<compile_context>
chip_gen: v5e
topology: v5e:2x2
jax: 0.10.0
libtpu: 0.0.40
codegen_flags: <defaults>
</compile_context>

<pallas_src>
import functools

import jax
import jax.numpy as jnp
from jax.experimental import pallas as pl
from jax.experimental.pallas import tpu as pltpu


# ------------- Pass 1: fused multi-dilation conv + BN statistics ----------- #
def _conv_stats_kernel(x_ref, w_ref, y_ref, stats_ref, *, dilations, dmax, th,
                       w, cin, cout):
    """x_ref: (Hp, Wp, Cin) padded image resident for the current batch elem.
    w_ref: (S, 9, Cin, Cout) stacked per-stage per-tap weights.
    y_ref: (TH, W, S*Cout) channel-concatenated conv output tile.
    stats_ref: (2, S*Cout) per-batch-element [sum, sumsq] accumulator."""
    t = pl.program_id(1)

    @pl.when(t == 0)
    def _():
        stats_ref[...] = jnp.zeros_like(stats_ref)

    parts, sums, sqs = [], [], []
    for s, d in enumerate(dilations):
        acc = jnp.zeros((th * w, cout), jnp.float32)
        # 9 dilated taps accumulated as matmuls (dilation d is a static int).
        for ki in range(3):
            hs = t * th + (dmax - d) + ki * d          # dynamic row start
            for kj in range(3):
                c0 = (dmax - d) + kj * d               # static column start
                xs = x_ref[pl.ds(hs, th), c0:c0 + w, :].reshape(th * w, cin)
                acc = acc + jnp.dot(xs, w_ref[s, 3 * ki + kj],
                                    preferred_element_type=jnp.float32)
        parts.append(acc)
        sums.append(jnp.sum(acc, axis=0, keepdims=True))       # (1, Cout)
        sqs.append(jnp.sum(acc * acc, axis=0, keepdims=True))  # (1, Cout)

    # Single full-width store of the channel-concatenated tile.
    y_full = jnp.concatenate(parts, axis=-1)                   # (TH*W, S*Cout)
    y_ref[...] = y_full.reshape(th, w, len(dilations) * cout).astype(y_ref.dtype)

    upd = jnp.concatenate([jnp.concatenate(sums, axis=-1),
                           jnp.concatenate(sqs, axis=-1)], axis=0)  # (2, S*Cout)
    stats_ref[...] += upd


def _conv_all_stages(x_pad, w_all, dilations, dmax, th):
    n, hp, wp, cin = x_pad.shape
    h, w = hp - 2 * dmax, wp - 2 * dmax
    s, _, _, cout = w_all.shape
    kernel = functools.partial(_conv_stats_kernel, dilations=tuple(dilations),
                               dmax=dmax, th=th, w=w, cin=cin, cout=cout)
    # NOTE: the full padded image per batch element must fit VMEM; for very
    # large feature maps a halo-tiled input BlockSpec would be used instead,
    # with TH sized against the per-generation VMEM budget (64 MiB on v7x).
    y, stats = pl.pallas_call(
        kernel,
        out_shape=(jax.ShapeDtypeStruct((n, h, w, s * cout), jnp.float32),
                   jax.ShapeDtypeStruct((n, 2, s * cout), jnp.float32)),
        grid=(n, h // th),
        in_specs=[
            pl.BlockSpec((None, hp, wp, cin), lambda ni, ti: (ni, 0, 0, 0)),
            pl.BlockSpec((s, 9, cin, cout), lambda ni, ti: (0, 0, 0, 0)),
        ],
        out_specs=(
            pl.BlockSpec((None, th, w, s * cout), lambda ni, ti: (ni, ti, 0, 0)),
            pl.BlockSpec((None, 2, s * cout), lambda ni, ti: (ni, 0, 0)),
        ),
        compiler_params=pltpu.CompilerParams(
            dimension_semantics=("parallel", "arbitrary")),
    )(x_pad, w_all)
    return y, stats


# --------------------------- Pass 2: BN affine + ReLU ---------------------- #
def _bn_relu_kernel(sb_ref, y_ref, o_ref):
    """sb_ref: (2, L) lane-tiled [scale; shift].  y_ref/o_ref: (TR, L)."""
    y = y_ref[...].astype(jnp.float32)
    scale = sb_ref[0:1, :]
    shift = sb_ref[1:2, :]
    o_ref[...] = jnp.maximum(y * scale + shift, 0.0).astype(o_ref.dtype)


def _bn_relu(y2d, sb_tiled, tr, out_dtype):
    rows, lanes = y2d.shape
    return pl.pallas_call(
        _bn_relu_kernel,
        out_shape=jax.ShapeDtypeStruct((rows, lanes), out_dtype),
        grid=(rows // tr,),
        in_specs=[pl.BlockSpec((2, lanes), lambda ri: (0, 0)),
                  pl.BlockSpec((tr, lanes), lambda ri: (ri, 0))],
        out_specs=pl.BlockSpec((tr, lanes), lambda ri: (ri, 0)),
        compiler_params=pltpu.CompilerParams(
            dimension_semantics=("parallel",)),
    )(sb_tiled, y2d)


# ------------------------------ JAX glue ----------------------------------- #
def _pick_tile_h(h, w, max_rows=512):
    th = max(1, min(h, max_rows // max(w, 1)))
    while h % th:
        th -= 1
    return th


def _pick_tile_rows(rows, target=512):
    if rows <= target:
        return rows
    for t in range(min(rows, target), 0, -1):
        if rows % t == 0 and t % 8 == 0:
            return t
    return rows


def _affine_from_stats(stats_n, gamma_all, beta_all, m, eps):
    stats = jnp.sum(stats_n, axis=0)                     # (2, S*Cout)
    mean = stats[0] / m
    var = jnp.maximum(stats[1] / m - mean * mean, 0.0)   # biased variance
    scale = gamma_all * jax.lax.rsqrt(var + eps)
    shift = beta_all - mean * scale
    return jnp.stack([scale, shift], axis=0)             # (2, S*Cout)


def aspp_forward(x_nchw, weights_hwio, gammas, betas, pyramids, *, eps=1e-5,
                 tile_h=None):
    """ASPPModule.forward: (N, Cin, H, W) -> (N, len(pyramids)*Cout, H, W)."""
    n, cin, h, w = x_nchw.shape
    s = len(pyramids)
    cout = weights_hwio[0].shape[-1]
    dmax = max(pyramids)

    x_nhwc = jnp.transpose(x_nchw, (0, 2, 3, 1))
    # Reflection-pad once with d_max; per-stage pad-d views are offsets into it.
    x_pad = jnp.pad(x_nhwc, ((0, 0), (dmax, dmax), (dmax, dmax), (0, 0)),
                    mode="reflect")
    th = tile_h if tile_h is not None else _pick_tile_h(h, w)
    m = n * h * w

    # Stack all stage weights tap-major: (S, 9, Cin, Cout) from HWIO.
    w_all = jnp.stack([wt.reshape(9, cin, cout) for wt in weights_hwio], axis=0)

    # Pass 1: fused conv (all dilations) + per-batch BN stats.
    y, stats = _conv_all_stages(x_pad, w_all, pyramids, dmax, th)

    # BN affine parameters from the accumulated stats (tiny XLA glue).
    gamma_all = jnp.concatenate([g.reshape(-1) for g in gammas], axis=0)
    beta_all = jnp.concatenate([b.reshape(-1) for b in betas], axis=0)
    scale_bias = _affine_from_stats(stats, gamma_all, beta_all, m, eps)

    # Pass 2 on the lane-dense flattened slab (N*H, W*S*Cout).
    lanes = w * s * cout
    y2d = y.reshape(n * h, lanes)                        # contiguous reshape
    sb_tiled = jnp.tile(scale_bias, (1, w))              # (2, W*S*Cout)
    tr = _pick_tile_rows(n * h)
    out2d = _bn_relu(y2d, sb_tiled, tr, x_nchw.dtype)

    out_nhwc = out2d.reshape(n, h, w, s * cout)
    # Final NCHW layout to match the PyTorch module (glue transpose only).
    return jnp.transpose(out_nhwc, (0, 3, 1, 2))


# ---------------------------- pure-JAX reference --------------------------- #
def aspp_reference(x_nchw, weights_hwio, gammas, betas, pyramids, eps=1e-5):
    outs = []
    for d, w_hwio, g, b in zip(pyramids, weights_hwio, gammas, betas):
        xp = jnp.pad(x_nchw, ((0, 0), (0, 0), (d, d), (d, d)), mode="reflect")
        y = jax.lax.conv_general_dilated(
            xp, w_hwio, window_strides=(1, 1), padding="VALID",
            rhs_dilation=(d, d),
            dimension_numbers=("NCHW", "HWIO", "NCHW"))
        mean = y.mean(axis=(0, 2, 3), keepdims=True)
        var = ((y - mean) ** 2).mean(axis=(0, 2, 3), keepdims=True)
        y = (y - mean) * jax.lax.rsqrt(var + eps)
        y = y * g.reshape(1, -1, 1, 1) + b.reshape(1, -1, 1, 1)
        outs.append(jnp.maximum(y, 0.0))
    return jnp.concatenate(outs, axis=1)


# ---------------------------------- main ----------------------------------- #
if __name__ == "__main__":
    N, CIN, H, W = 2, 4, 16, 16
    COUT = 8
    PYRAMIDS = (1, 2, 3)

    key = jax.random.PRNGKey(0)
    keys = jax.random.split(key, 1 + 3 * len(PYRAMIDS))
    x = jax.random.normal(keys[0], (N, CIN, H, W), dtype=jnp.float32)

    weights, gammas, betas = [], [], []
    for i, _ in enumerate(PYRAMIDS):
        kw, kg, kb = keys[1 + 3 * i], keys[2 + 3 * i], keys[3 + 3 * i]
        # Conv2d weight, bias=False. Stored HWIO: (3, 3, Cin, Cout).
        weights.append(0.1 * jax.random.normal(kw, (3, 3, CIN, COUT), jnp.float32))
        gammas.append(1.0 + 0.1 * jax.random.normal(kg, (1, COUT), jnp.float32))
        betas.append(0.1 * jax.random.normal(kb, (1, COUT), jnp.float32))
    # TODO(synk): BatchNorm running_mean/running_var buffer updates (training
    # side effect) are not replicated; only the forward output is produced.

    out = aspp_forward(x, weights, gammas, betas, PYRAMIDS)
    out = jax.block_until_ready(out)
    assert out.shape == (N, len(PYRAMIDS) * COUT, H, W), out.shape

    ref = jax.block_until_ready(
        aspp_reference(x, weights, gammas, betas, PYRAMIDS))
    assert jnp.allclose(out, ref, rtol=1e-3, atol=1e-3), (
        float(jnp.max(jnp.abs(out - ref))))

    print("KERNEL_OK")
</pallas_src>

<mosaic_0001>
module attributes {stable_mosaic.version = 11 : i64} {
  func.func @_conv_stats_kernel(%arg0: i32, %arg1: i32, %arg2: memref<1x22x22x4xf32, #tpu.memory_space<vmem>>, %arg3: memref<3x9x4x8xf32, #tpu.memory_space<vmem>>, %arg4: memref<1x16x16x24xf32, #tpu.memory_space<vmem>>, %arg5: memref<1x2x24xf32, #tpu.memory_space<vmem>>) attributes {dimension_semantics = [#tpu.dimension_semantics<parallel>, #tpu.dimension_semantics<arbitrary>], iteration_bounds = array<i64: 2, 1>, scalar_prefetch = 0 : i64, scratch_operands = 0 : i64, tpu.core_type = #tpu.core_type<tc>, window_params = [{transform_indices = @transform_0, window_bounds = array<i64: 1, 22, 22, 4>}, {pipeline_mode = #tpu.pipeline_mode<synchronous>, transform_indices = @transform_1, window_bounds = array<i64: 3, 9, 4, 8>}, {transform_indices = @transform_2, window_bounds = array<i64: 1, 16, 16, 24>}, {transform_indices = @transform_3, window_bounds = array<i64: 1, 2, 24>}]} {
    %c0_i32 = arith.constant 0 : i32
    %0 = arith.cmpi eq, %arg1, %c0_i32 : i32
    %1 = arith.extui %0 : i1 to i32
    %c0_i32_0 = arith.constant 0 : i32
    %2 = arith.cmpi ne, %1, %c0_i32_0 : i32
    scf.if %2 {
      %cst_247 = arith.constant 0.000000e+00 : f32
      %278 = vector.broadcast %cst_247 : f32 to vector<2x24xf32>
      %c0_248 = arith.constant 0 : index
      %c0_249 = arith.constant 0 : index
      %c0_250 = arith.constant 0 : index
      %279 = vector.load %arg5[%c0_248, %c0_249, %c0_250] : memref<1x2x24xf32, #tpu.memory_space<vmem>>, vector<1x2x24xf32>
      %280 = vector.shape_cast %279 : vector<1x2x24xf32> to vector<2x24xf32>
      %281 = vector.shape_cast %278 : vector<2x24xf32> to vector<1x2x24xf32>
      tpu.vector_store %arg5[%c0_248, %c0_249, %c0_250], %281 {strides = array<i32>} : memref<1x2x24xf32, #tpu.memory_space<vmem>>, vector<1x2x24xf32>,
    } else {
    }
    %cst = arith.constant 0.000000e+00 : f32
    %3 = vector.broadcast %cst : f32 to vector<256x8xf32>
    %c16_i32 = arith.constant 16 : i32
    %4 = arith.muli %arg1, %c16_i32 : i32
    %c2_i32 = arith.constant 2 : i32
    %5 = arith.addi %4, %c2_i32 : i32
    %c0_i32_1 = arith.constant 0 : i32
    %6 = arith.addi %5, %c0_i32_1 : i32
    %c0 = arith.constant 0 : index
    %7 = arith.index_cast %6 : i32 to index
    %c2 = arith.constant 2 : index
    %c0_2 = arith.constant 0 : index
    %8 = vector.load %arg2[%c0, %7, %c2, %c0_2] : memref<1x22x22x4xf32, #tpu.memory_space<vmem>>, vector<1x16x16x4xf32>
    %9 = vector.shape_cast %8 : vector<1x16x16x4xf32> to vector<16x16x4xf32>
    %10 = vector.shape_cast %9 : vector<16x16x4xf32> to vector<256x4xf32>
    %c0_3 = arith.constant 0 : index
    %c0_4 = arith.constant 0 : index
    %c0_5 = arith.constant 0 : index
    %c0_6 = arith.constant 0 : index
    %11 = vector.load %arg3[%c0_3, %c0_4, %c0_5, %c0_6] : memref<3x9x4x8xf32, #tpu.memory_space<vmem>>, vector<1x1x4x8xf32>
    %12 = vector.shape_cast %11 : vector<1x1x4x8xf32> to vector<4x8xf32>
    %cst_7 = arith.constant dense<0.000000e+00> : vector<256x8xf32>
    %13 = tpu.matmul %10, %12, %cst_7 {dimension_numbers = #tpu.dot_dimension_numbers<[1], [0], [0], [1], [0, 0, 1, 1], [], []>} : vector<256x4xf32>, vector<4x8xf32>, vector<256x8xf32> -> vector<256x8xf32>
    %14 = arith.addf %3, %13 : vector<256x8xf32>
    %c0_8 = arith.constant 0 : index
    %15 = arith.index_cast %6 : i32 to index
    %c3 = arith.constant 3 : index
    %c0_9 = arith.constant 0 : index
    %16 = vector.load %arg2[%c0_8, %15, %c3, %c0_9] : memref<1x22x22x4xf32, #tpu.memory_space<vmem>>, vector<1x16x16x4xf32>
    %17 = vector.shape_cast %16 : vector<1x16x16x4xf32> to vector<16x16x4xf32>
    %18 = vector.shape_cast %17 : vector<16x16x4xf32> to vector<256x4xf32>
    %c0_10 = arith.constant 0 : index
    %c1 = arith.constant 1 : index
    %c0_11 = arith.constant 0 : index
    %c0_12 = arith.constant 0 : index
    %19 = vector.load %arg3[%c0_10, %c1, %c0_11, %c0_12] : memref<3x9x4x8xf32, #tpu.memory_space<vmem>>, vector<1x1x4x8xf32>
    %20 = vector.shape_cast %19 : vector<1x1x4x8xf32> to vector<4x8xf32>
    %cst_13 = arith.constant dense<0.000000e+00> : vector<256x8xf32>
    %21 = tpu.matmul %18, %20, %cst_13 {dimension_numbers = #tpu.dot_dimension_numbers<[1], [0], [0], [1], [0, 0, 1, 1], [], []>} : vector<256x4xf32>, vector<4x8xf32>, vector<256x8xf32> -> vector<256x8xf32>
    %22 = arith.addf %14, %21 : vector<256x8xf32>
    %c0_14 = arith.constant 0 : index
    %23 = arith.index_cast %6 : i32 to index
    %c4 = arith.constant 4 : index
    %c0_15 = arith.constant 0 : index
    %24 = vector.load %arg2[%c0_14, %23, %c4, %c0_15] : memref<1x22x22x4xf32, #tpu.memory_space<vmem>>, vector<1x16x16x4xf32>
    %25 = vector.shape_cast %24 : vector<1x16x16x4xf32> to vector<16x16x4xf32>
    %26 = vector.shape_cast %25 : vector<16x16x4xf32> to vector<256x4xf32>
    %c0_16 = arith.constant 0 : index
    %c2_17 = arith.constant 2 : index
    %c0_18 = arith.constant 0 : index
    %c0_19 = arith.constant 0 : index
    %27 = vector.load %arg3[%c0_16, %c2_17, %c0_18, %c0_19] : memref<3x9x4x8xf32, #tpu.memory_space<vmem>>, vector<1x1x4x8xf32>
    %28 = vector.shape_cast %27 : vector<1x1x4x8xf32> to vector<4x8xf32>
    %cst_20 = arith.constant dense<0.000000e+00> : vector<256x8xf32>
    %29 = tpu.matmul %26, %28, %cst_20 {dimension_numbers = #tpu.dot_dimension_numbers<[1], [0], [0], [1], [0, 0, 1, 1], [], []>} : vector<256x4xf32>, vector<4x8xf32>, vector<256x8xf32> -> vector<256x8xf32>
    %30 = arith.addf %22, %29 : vector<256x8xf32>
    %c16_i32_21 = arith.constant 16 : i32
    %31 = arith.muli %arg1, %c16_i32_21 : i32
    %c2_i32_22 = arith.constant 2 : i32
    %32 = arith.addi %31, %c2_i32_22 : i32
    %c1_i32 = arith.constant 1 : i32
    %33 = arith.addi %32, %c1_i32 : i32
    %c0_23 = arith.constant 0 : index
    %34 = arith.index_cast %33 : i32 to index
    %c2_24 = arith.constant 2 : index
    %c0_25 = arith.constant 0 : index
    %35 = vector.load %arg2[%c0_23, %34, %c2_24, %c0_25] : memref<1x22x22x4xf32, #tpu.memory_space<vmem>>, vector<1x16x16x4xf32>
    %36 = vector.shape_cast %35 : vector<1x16x16x4xf32> to vector<16x16x4xf32>
    %37 = vector.shape_cast %36 : vector<16x16x4xf32> to vector<256x4xf32>
    %c0_26 = arith.constant 0 : index
    %c3_27 = arith.constant 3 : index
    %c0_28 = arith.constant 0 : index
    %c0_29 = arith.constant 0 : index
    %38 = vector.load %arg3[%c0_26, %c3_27, %c0_28, %c0_29] : memref<3x9x4x8xf32, #tpu.memory_space<vmem>>, vector<1x1x4x8xf32>
    %39 = vector.shape_cast %38 : vector<1x1x4x8xf32> to vector<4x8xf32>
    %cst_30 = arith.constant dense<0.000000e+00> : vector<256x8xf32>
    %40 = tpu.matmul %37, %39, %cst_30 {dimension_numbers = #tpu.dot_dimension_numbers<[1], [0], [0], [1], [0, 0, 1, 1], [], []>} : vector<256x4xf32>, vector<4x8xf32>, vector<256x8xf32> -> vector<256x8xf32>
    %41 = arith.addf %30, %40 : vector<256x8xf32>
    %c0_31 = arith.constant 0 : index
    %42 = arith.index_cast %33 : i32 to index
    %c3_32 = arith.constant 3 : index
    %c0_33 = arith.constant 0 : index
    %43 = vector.load %arg2[%c0_31, %42, %c3_32, %c0_33] : memref<1x22x22x4xf32, #tpu.memory_space<vmem>>, vector<1x16x16x4xf32>
    %44 = vector.shape_cast %43 : vector<1x16x16x4xf32> to vector<16x16x4xf32>
    %45 = vector.shape_cast %44 : vector<16x16x4xf32> to vector<256x4xf32>
    %c0_34 = arith.constant 0 : index
    %c4_35 = arith.constant 4 : index
    %c0_36 = arith.constant 0 : index
    %c0_37 = arith.constant 0 : index
    %46 = vector.load %arg3[%c0_34, %c4_35, %c0_36, %c0_37] : memref<3x9x4x8xf32, #tpu.memory_space<vmem>>, vector<1x1x4x8xf32>
    %47 = vector.shape_cast %46 : vector<1x1x4x8xf32> to vector<4x8xf32>
    %cst_38 = arith.constant dense<0.000000e+00> : vector<256x8xf32>
    %48 = tpu.matmul %45, %47, %cst_38 {dimension_numbers = #tpu.dot_dimension_numbers<[1], [0], [0], [1], [0, 0, 1, 1], [], []>} : vector<256x4xf32>, vector<4x8xf32>, vector<256x8xf32> -> vector<256x8xf32>
    %49 = arith.addf %41, %48 : vector<256x8xf32>
    %c0_39 = arith.constant 0 : index
    %50 = arith.index_cast %33 : i32 to index
    %c4_40 = arith.constant 4 : index
    %c0_41 = arith.constant 0 : index
    %51 = vector.load %arg2[%c0_39, %50, %c4_40, %c0_41] : memref<1x22x22x4xf32, #tpu.memory_space<vmem>>, vector<1x16x16x4xf32>
    %52 = vector.shape_cast %51 : vector<1x16x16x4xf32> to vector<16x16x4xf32>
    %53 = vector.shape_cast %52 : vector<16x16x4xf32> to vector<256x4xf32>
    %c0_42 = arith.constant 0 : index
    %c5 = arith.constant 5 : index
    %c0_43 = arith.constant 0 : index
    %c0_44 = arith.constant 0 : index
    %54 = vector.load %arg3[%c0_42, %c5, %c0_43, %c0_44] : memref<3x9x4x8xf32, #tpu.memory_space<vmem>>, vector<1x1x4x8xf32>
    %55 = vector.shape_cast %54 : vector<1x1x4x8xf32> to vector<4x8xf32>
    %cst_45 = arith.constant dense<0.000000e+00> : vector<256x8xf32>
    %56 = tpu.matmul %53, %55, %cst_45 {dimension_numbers = #tpu.dot_dimension_numbers<[1], [0], [0], [1], [0, 0, 1, 1], [], []>} : vector<256x4xf32>, vector<4x8xf32>, vector<256x8xf32> -> vector<256x8xf32>
    %57 = arith.addf %49, %56 : vector<256x8xf32>
    %c16_i32_46 = arith.constant 16 : i32
    %58 = arith.muli %arg1, %c16_i32_46 : i32
    %c2_i32_47 = arith.constant 2 : i32
    %59 = arith.addi %58, %c2_i32_47 : i32
    %c2_i32_48 = arith.constant 2 : i32
    %60 = arith.addi %59, %c2_i32_48 : i32
    %c0_49 = arith.constant 0 : index
    %61 = arith.index_cast %60 : i32 to index
    %c2_50 = arith.constant 2 : index
    %c0_51 = arith.constant 0 : index
    %62 = vector.load %arg2[%c0_49, %61, %c2_50, %c0_51] : memref<1x22x22x4xf32, #tpu.memory_space<vmem>>, vector<1x16x16x4xf32>
    %63 = vector.shape_cast %62 : vector<1x16x16x4xf32> to vector<16x16x4xf32>
    %64 = vector.shape_cast %63 : vector<16x16x4xf32> to vector<256x4xf32>
    %c0_52 = arith.constant 0 : index
    %c6 = arith.constant 6 : index
    %c0_53 = arith.constant 0 : index
    %c0_54 = arith.constant 0 : index
    %65 = vector.load %arg3[%c0_52, %c6, %c0_53, %c0_54] : memref<3x9x4x8xf32, #tpu.memory_space<vmem>>, vector<1x1x4x8xf32>
    %66 = vector.shape_cast %65 : vector<1x1x4x8xf32> to vector<4x8xf32>
    %cst_55 = arith.constant dense<0.000000e+00> : vector<256x8xf32>
    %67 = tpu.matmul %64, %66, %cst_55 {dimension_numbers = #tpu.dot_dimension_numbers<[1], [0], [0], [1], [0, 0, 1, 1], [], []>} : vector<256x4xf32>, vector<4x8xf32>, vector<256x8xf32> -> vector<256x8xf32>
    %68 = arith.addf %57, %67 : vector<256x8xf32>
    %c0_56 = arith.constant 0 : index
    %69 = arith.index_cast %60 : i32 to index
    %c3_57 = arith.constant 3 : index
    %c0_58 = arith.constant 0 : index
    %70 = vector.load %arg2[%c0_56, %69, %c3_57, %c0_58] : memref<1x22x22x4xf32, #tpu.memory_space<vmem>>, vector<1x16x16x4xf32>
    %71 = vector.shape_cast %70 : vector<1x16x16x4xf32> to vector<16x16x4xf32>
    %72 = vector.shape_cast %71 : vector<16x16x4xf32> to vector<256x4xf32>
    %c0_59 = arith.constant 0 : index
    %c7 = arith.constant 7 : index
    %c0_60 = arith.constant 0 : index
    %c0_61 = arith.constant 0 : index
    %73 = vector.load %arg3[%c0_59, %c7, %c0_60, %c0_61] : memref<3x9x4x8xf32, #tpu.memory_space<vmem>>, vector<1x1x4x8xf32>
    %74 = vector.shape_cast %73 : vector<1x1x4x8xf32> to vector<4x8xf32>
    %cst_62 = arith.constant dense<0.000000e+00> : vector<256x8xf32>
    %75 = tpu.matmul %72, %74, %cst_62 {dimension_numbers = #tpu.dot_dimension_numbers<[1], [0], [0], [1], [0, 0, 1, 1], [], []>} : vector<256x4xf32>, vector<4x8xf32>, vector<256x8xf32> -> vector<256x8xf32>
    %76 = arith.addf %68, %75 : vector<256x8xf32>
    %c0_63 = arith.constant 0 : index
    %77 = arith.index_cast %60 : i32 to index
    %c4_64 = arith.constant 4 : index
    %c0_65 = arith.constant 0 : index
    %78 = vector.load %arg2[%c0_63, %77, %c4_64, %c0_65] : memref<1x22x22x4xf32, #tpu.memory_space<vmem>>, vector<1x16x16x4xf32>
    %79 = vector.shape_cast %78 : vector<1x16x16x4xf32> to vector<16x16x4xf32>
    %80 = vector.shape_cast %79 : vector<16x16x4xf32> to vector<256x4xf32>
    %c0_66 = arith.constant 0 : index
    %c8 = arith.constant 8 : index
    %c0_67 = arith.constant 0 : index
    %c0_68 = arith.constant 0 : index
    %81 = vector.load %arg3[%c0_66, %c8, %c0_67, %c0_68] : memref<3x9x4x8xf32, #tpu.memory_space<vmem>>, vector<1x1x4x8xf32>
    %82 = vector.shape_cast %81 : vector<1x1x4x8xf32> to vector<4x8xf32>
    %cst_69 = arith.constant dense<0.000000e+00> : vector<256x8xf32>
    %83 = tpu.matmul %80, %82, %cst_69 {dimension_numbers = #tpu.dot_dimension_numbers<[1], [0], [0], [1], [0, 0, 1, 1], [], []>} : vector<256x4xf32>, vector<4x8xf32>, vector<256x8xf32> -> vector<256x8xf32>
    %84 = arith.addf %76, %83 : vector<256x8xf32>
    %cst_70 = arith.constant dense<0.000000e+00> : vector<8xf32>
    %85 = vector.multi_reduction <add>, %84, %cst_70 [0] : vector<256x8xf32> to vector<8xf32>
    %86 = vector.shape_cast %85 : vector<8xf32> to vector<1x8xf32>
    %87 = arith.mulf %84, %84 : vector<256x8xf32>
    %cst_71 = arith.constant dense<0.000000e+00> : vector<8xf32>
    %88 = vector.multi_reduction <add>, %87, %cst_71 [0] : vector<256x8xf32> to vector<8xf32>
    %89 = vector.shape_cast %88 : vector<8xf32> to vector<1x8xf32>
    %cst_72 = arith.constant 0.000000e+00 : f32
    %90 = vector.broadcast %cst_72 : f32 to vector<256x8xf32>
    %c16_i32_73 = arith.constant 16 : i32
    %91 = arith.muli %arg1, %c16_i32_73 : i32
    %c1_i32_74 = arith.constant 1 : i32
    %92 = arith.addi %91, %c1_i32_74 : i32
    %c0_i32_75 = arith.constant 0 : i32
    %93 = arith.addi %92, %c0_i32_75 : i32
    %c0_76 = arith.constant 0 : index
    %94 = arith.index_cast %93 : i32 to index
    %c1_77 = arith.constant 1 : index
    %c0_78 = arith.constant 0 : index
    %95 = vector.load %arg2[%c0_76, %94, %c1_77, %c0_78] : memref<1x22x22x4xf32, #tpu.memory_space<vmem>>, vector<1x16x16x4xf32>
    %96 = vector.shape_cast %95 : vector<1x16x16x4xf32> to vector<16x16x4xf32>
    %97 = vector.shape_cast %96 : vector<16x16x4xf32> to vector<256x4xf32>
    %c1_79 = arith.constant 1 : index
    %c0_80 = arith.constant 0 : index
    %c0_81 = arith.constant 0 : index
    %c0_82 = arith.constant 0 : index
    %98 = vector.load %arg3[%c1_79, %c0_80, %c0_81, %c0_82] : memref<3x9x4x8xf32, #tpu.memory_space<vmem>>, vector<1x1x4x8xf32>
    %99 = vector.shape_cast %98 : vector<1x1x4x8xf32> to vector<4x8xf32>
    %cst_83 = arith.constant dense<0.000000e+00> : vector<256x8xf32>
    %100 = tpu.matmul %97, %99, %cst_83 {dimension_numbers = #tpu.dot_dimension_numbers<[1], [0], [0], [1], [0, 0, 1, 1], [], []>} : vector<256x4xf32>, vector<4x8xf32>, vector<256x8xf32> -> vector<256x8xf32>
    %101 = arith.addf %90, %100 : vector<256x8xf32>
    %c0_84 = arith.constant 0 : index
    %102 = arith.index_cast %93 : i32 to index
    %c3_85 = arith.constant 3 : index
    %c0_86 = arith.constant 0 : index
    %103 = vector.load %arg2[%c0_84, %102, %c3_85, %c0_86] : memref<1x22x22x4xf32, #tpu.memory_space<vmem>>, vector<1x16x16x4xf32>
    %104 = vector.shape_cast %103 : vector<1x16x16x4xf32> to vector<16x16x4xf32>
    %105 = vector.shape_cast %104 : vector<16x16x4xf32> to vector<256x4xf32>
    %c1_87 = arith.constant 1 : index
    %c1_88 = arith.constant 1 : index
    %c0_89 = arith.constant 0 : index
    %c0_90 = arith.constant 0 : index
    %106 = vector.load %arg3[%c1_87, %c1_88, %c0_89, %c0_90] : memref<3x9x4x8xf32, #tpu.memory_space<vmem>>, vector<1x1x4x8xf32>
    %107 = vector.shape_cast %106 : vector<1x1x4x8xf32> to vector<4x8xf32>
    %cst_91 = arith.constant dense<0.000000e+00> : vector<256x8xf32>
    %108 = tpu.matmul %105, %107, %cst_91 {dimension_numbers = #tpu.dot_dimension_numbers<[1], [0], [0], [1], [0, 0, 1, 1], [], []>} : vector<256x4xf32>, vector<4x8xf32>, vector<256x8xf32> -> vector<256x8xf32>
    %109 = arith.addf %101, %108 : vector<256x8xf32>
    %c0_92 = arith.constant 0 : index
    %110 = arith.index_cast %93 : i32 to index
    %c5_93 = arith.constant 5 : index
    %c0_94 = arith.constant 0 : index
    %111 = vector.load %arg2[%c0_92, %110, %c5_93, %c0_94] : memref<1x22x22x4xf32, #tpu.memory_space<vmem>>, vector<1x16x16x4xf32>
    %112 = vector.shape_cast %111 : vector<1x16x16x4xf32> to vector<16x16x4xf32>
    %113 = vector.shape_cast %112 : vector<16x16x4xf32> to vector<256x4xf32>
    %c1_95 = arith.constant 1 : index
    %c2_96 = arith.constant 2 : index
    %c0_97 = arith.constant 0 : index
    %c0_98 = arith.constant 0 : index
    %114 = vector.load %arg3[%c1_95, %c2_96, %c0_97, %c0_98] : memref<3x9x4x8xf32, #tpu.memory_space<vmem>>, vector<1x1x4x8xf32>
    %115 = vector.shape_cast %114 : vector<1x1x4x8xf32> to vector<4x8xf32>
    %cst_99 = arith.constant dense<0.000000e+00> : vector<256x8xf32>
    %116 = tpu.matmul %113, %115, %cst_99 {dimension_numbers = #tpu.dot_dimension_numbers<[1], [0], [0], [1], [0, 0, 1, 1], [], []>} : vector<256x4xf32>, vector<4x8xf32>, vector<256x8xf32> -> vector<256x8xf32>
    %117 = arith.addf %109, %116 : vector<256x8xf32>
    %c16_i32_100 = arith.constant 16 : i32
    %118 = arith.muli %arg1, %c16_i32_100 : i32
    %c1_i32_101 = arith.constant 1 : i32
    %119 = arith.addi %118, %c1_i32_101 : i32
    %c2_i32_102 = arith.constant 2 : i32
    %120 = arith.addi %119, %c2_i32_102 : i32
    %c0_103 = arith.constant 0 : index
    %121 = arith.index_cast %120 : i32 to index
    %c1_104 = arith.constant 1 : index
    %c0_105 = arith.constant 0 : index
    %122 = vector.load %arg2[%c0_103, %121, %c1_104, %c0_105] : memref<1x22x22x4xf32, #tpu.memory_space<vmem>>, vector<1x16x16x4xf32>
    %123 = vector.shape_cast %122 : vector<1x16x16x4xf32> to vector<16x16x4xf32>
    %124 = vector.shape_cast %123 : vector<16x16x4xf32> to vector<256x4xf32>
    %c1_106 = arith.constant 1 : index
    %c3_107 = arith.constant 3 : index
    %c0_108 = arith.constant 0 : index
    %c0_109 = arith.constant 0 : index
    %125 = vector.load %arg3[%c1_106, %c3_107, %c0_108, %c0_109] : memref<3x9x4x8xf32, #tpu.memory_space<vmem>>, vector<1x1x4x8xf32>
    %126 = vector.shape_cast %125 : vector<1x1x4x8xf32> to vector<4x8xf32>
    %cst_110 = arith.constant dense<0.000000e+00> : vector<256x8xf32>
    %127 = tpu.matmul %124, %126, %cst_110 {dimension_numbers = #tpu.dot_dimension_numbers<[1], [0], [0], [1], [0, 0, 1, 1], [], []>} : vector<256x4xf32>, vector<4x8xf32>, vector<256x8xf32> -> vector<256x8xf32>
    %128 = arith.addf %117, %127 : vector<256x8xf32>
    %c0_111 = arith.constant 0 : index
    %129 = arith.index_cast %120 : i32 to index
    %c3_112 = arith.constant 3 : index
    %c0_113 = arith.constant 0 : index
    %130 = vector.load %arg2[%c0_111, %129, %c3_112, %c0_113] : memref<1x22x22x4xf32, #tpu.memory_space<vmem>>, vector<1x16x16x4xf32>
    %131 = vector.shape_cast %130 : vector<1x16x16x4xf32> to vector<16x16x4xf32>
    %132 = vector.shape_cast %131 : vector<16x16x4xf32> to vector<256x4xf32>
    %c1_114 = arith.constant 1 : index
    %c4_115 = arith.constant 4 : index
    %c0_116 = arith.constant 0 : index
    %c0_117 = arith.constant 0 : index
    %133 = vector.load %arg3[%c1_114, %c4_115, %c0_116, %c0_117] : memref<3x9x4x8xf32, #tpu.memory_space<vmem>>, vector<1x1x4x8xf32>
    %134 = vector.shape_cast %133 : vector<1x1x4x8xf32> to vector<4x8xf32>
    %cst_118 = arith.constant dense<0.000000e+00> : vector<256x8xf32>
    %135 = tpu.matmul %132, %134, %cst_118 {dimension_numbers = #tpu.dot_dimension_numbers<[1], [0], [0], [1], [0, 0, 1, 1], [], []>} : vector<256x4xf32>, vector<4x8xf32>, vector<256x8xf32> -> vector<256x8xf32>
    %136 = arith.addf %128, %135 : vector<256x8xf32>
    %c0_119 = arith.constant 0 : index
    %137 = arith.index_cast %120 : i32 to index
    %c5_120 = arith.constant 5 : index
    %c0_121 = arith.constant 0 : index
    %138 = vector.load %arg2[%c0_119, %137, %c5_120, %c0_121] : memref<1x22x22x4xf32, #tpu.memory_space<vmem>>, vector<1x16x16x4xf32>
    %139 = vector.shape_cast %138 : vector<1x16x16x4xf32> to vector<16x16x4xf32>
    %140 = vector.shape_cast %139 : vector<16x16x4xf32> to vector<256x4xf32>
    %c1_122 = arith.constant 1 : index
    %c5_123 = arith.constant 5 : index
    %c0_124 = arith.constant 0 : index
    %c0_125 = arith.constant 0 : index
    %141 = vector.load %arg3[%c1_122, %c5_123, %c0_124, %c0_125] : memref<3x9x4x8xf32, #tpu.memory_space<vmem>>, vector<1x1x4x8xf32>
    %142 = vector.shape_cast %141 : vector<1x1x4x8xf32> to vector<4x8xf32>
    %cst_126 = arith.constant dense<0.000000e+00> : vector<256x8xf32>
    %143 = tpu.matmul %140, %142, %cst_126 {dimension_numbers = #tpu.dot_dimension_numbers<[1], [0], [0], [1], [0, 0, 1, 1], [], []>} : vector<256x4xf32>, vector<4x8xf32>, vector<256x8xf32> -> vector<256x8xf32>
    %144 = arith.addf %136, %143 : vector<256x8xf32>
    %c16_i32_127 = arith.constant 16 : i32
    %145 = arith.muli %arg1, %c16_i32_127 : i32
    %c1_i32_128 = arith.constant 1 : i32
    %146 = arith.addi %145, %c1_i32_128 : i32
    %c4_i32 = arith.constant 4 : i32
    %147 = arith.addi %146, %c4_i32 : i32
    %c0_129 = arith.constant 0 : index
    %148 = arith.index_cast %147 : i32 to index
    %c1_130 = arith.constant 1 : index
    %c0_131 = arith.constant 0 : index
    %149 = vector.load %arg2[%c0_129, %148, %c1_130, %c0_131] : memref<1x22x22x4xf32, #tpu.memory_space<vmem>>, vector<1x16x16x4xf32>
    %150 = vector.shape_cast %149 : vector<1x16x16x4xf32> to vector<16x16x4xf32>
    %151 = vector.shape_cast %150 : vector<16x16x4xf32> to vector<256x4xf32>
    %c1_132 = arith.constant 1 : index
    %c6_133 = arith.constant 6 : index
    %c0_134 = arith.constant 0 : index
    %c0_135 = arith.constant 0 : index
    %152 = vector.load %arg3[%c1_132, %c6_133, %c0_134, %c0_135] : memref<3x9x4x8xf32, #tpu.memory_space<vmem>>, vector<1x1x4x8xf32>
    %153 = vector.shape_cast %152 : vector<1x1x4x8xf32> to vector<4x8xf32>
    %cst_136 = arith.constant dense<0.000000e+00> : vector<256x8xf32>
    %154 = tpu.matmul %151, %153, %cst_136 {dimension_numbers = #tpu.dot_dimension_numbers<[1], [0], [0], [1], [0, 0, 1, 1], [], []>} : vector<256x4xf32>, vector<4x8xf32>, vector<256x8xf32> -> vector<256x8xf32>
    %155 = arith.addf %144, %154 : vector<256x8xf32>
    %c0_137 = arith.constant 0 : index
    %156 = arith.index_cast %147 : i32 to index
    %c3_138 = arith.constant 3 : index
    %c0_139 = arith.constant 0 : index
    %157 = vector.load %arg2[%c0_137, %156, %c3_138, %c0_139] : memref<1x22x22x4xf32, #tpu.memory_space<vmem>>, vector<1x16x16x4xf32>
    %158 = vector.shape_cast %157 : vector<1x16x16x4xf32> to vector<16x16x4xf32>
    %159 = vector.shape_cast %158 : vector<16x16x4xf32> to vector<256x4xf32>
    %c1_140 = arith.constant 1 : index
    %c7_141 = arith.constant 7 : index
    %c0_142 = arith.constant 0 : index
    %c0_143 = arith.constant 0 : index
    %160 = vector.load %arg3[%c1_140, %c7_141, %c0_142, %c0_143] : memref<3x9x4x8xf32, #tpu.memory_space<vmem>>, vector<1x1x4x8xf32>
    %161 = vector.shape_cast %160 : vector<1x1x4x8xf32> to vector<4x8xf32>
    %cst_144 = arith.constant dense<0.000000e+00> : vector<256x8xf32>
    %162 = tpu.matmul %159, %161, %cst_144 {dimension_numbers = #tpu.dot_dimension_numbers<[1], [0], [0], [1], [0, 0, 1, 1], [], []>} : vector<256x4xf32>, vector<4x8xf32>, vector<256x8xf32> -> vector<256x8xf32>
    %163 = arith.addf %155, %162 : vector<256x8xf32>
    %c0_145 = arith.constant 0 : index
    %164 = arith.index_cast %147 : i32 to index
    %c5_146 = arith.constant 5 : index
    %c0_147 = arith.constant 0 : index
    %165 = vector.load %arg2[%c0_145, %164, %c5_146, %c0_147] : memref<1x22x22x4xf32, #tpu.memory_space<vmem>>, vector<1x16x16x4xf32>
    %166 = vector.shape_cast %165 : vector<1x16x16x4xf32> to vector<16x16x4xf32>
    %167 = vector.shape_cast %166 : vector<16x16x4xf32> to vector<256x4xf32>
    %c1_148 = arith.constant 1 : index
    %c8_149 = arith.constant 8 : index
    %c0_150 = arith.constant 0 : index
    %c0_151 = arith.constant 0 : index
    %168 = vector.load %arg3[%c1_148, %c8_149, %c0_150, %c0_151] : memref<3x9x4x8xf32, #tpu.memory_space<vmem>>, vector<1x1x4x8xf32>
    %169 = vector.shape_cast %168 : vector<1x1x4x8xf32> to vector<4x8xf32>
    %cst_152 = arith.constant dense<0.000000e+00> : vector<256x8xf32>
    %170 = tpu.matmul %167, %169, %cst_152 {dimension_numbers = #tpu.dot_dimension_numbers<[1], [0], [0], [1], [0, 0, 1, 1], [], []>} : vector<256x4xf32>, vector<4x8xf32>, vector<256x8xf32> -> vector<256x8xf32>
    %171 = arith.addf %163, %170 : vector<256x8xf32>
    %cst_153 = arith.constant dense<0.000000e+00> : vector<8xf32>
    %172 = vector.multi_reduction <add>, %171, %cst_153 [0] : vector<256x8xf32> to vector<8xf32>
    %173 = vector.shape_cast %172 : vector<8xf32> to vector<1x8xf32>
    %174 = arith.mulf %171, %171 : vector<256x8xf32>
    %cst_154 = arith.constant dense<0.000000e+00> : vector<8xf32>
    %175 = vector.multi_reduction <add>, %174, %cst_154 [0] : vector<256x8xf32> to vector<8xf32>
    %176 = vector.shape_cast %175 : vector<8xf32> to vector<1x8xf32>
    %cst_155 = arith.constant 0.000000e+00 : f32
    %177 = vector.broadcast %cst_155 : f32 to vector<256x8xf32>
    %c16_i32_156 = arith.constant 16 : i32
    %178 = arith.muli %arg1, %c16_i32_156 : i32
    %c0_i32_157 = arith.constant 0 : i32
    %179 = arith.addi %178, %c0_i32_157 : i32
    %c0_i32_158 = arith.constant 0 : i32
    %180 = arith.addi %179, %c0_i32_158 : i32
    %c0_159 = arith.constant 0 : index
    %181 = arith.index_cast %180 : i32 to index
    %c0_160 = arith.constant 0 : index
    %c0_161 = arith.constant 0 : index
    %182 = vector.load %arg2[%c0_159, %181, %c0_160, %c0_161] : memref<1x22x22x4xf32, #tpu.memory_space<vmem>>, vector<1x16x16x4xf32>
    %183 = vector.shape_cast %182 : vector<1x16x16x4xf32> to vector<16x16x4xf32>
    %184 = vector.shape_cast %183 : vector<16x16x4xf32> to vector<256x4xf32>
    %c2_162 = arith.constant 2 : index
    %c0_163 = arith.constant 0 : index
    %c0_164 = arith.constant 0 : index
    %c0_165 = arith.constant 0 : index
    %185 = vector.load %arg3[%c2_162, %c0_163, %c0_164, %c0_165] : memref<3x9x4x8xf32, #tpu.memory_space<vmem>>, vector<1x1x4x8xf32>
    %186 = vector.shape_cast %185 : vector<1x1x4x8xf32> to vector<4x8xf32>
    %cst_166 = arith.constant dense<0.000000e+00> : vector<256x8xf32>
    %187 = tpu.matmul %184, %186, %cst_166 {dimension_numbers = #tpu.dot_dimension_numbers<[1], [0], [0], [1], [0, 0, 1, 1], [], []>} : vector<256x4xf32>, vector<4x8xf32>, vector<256x8xf32> -> vector<256x8xf32>
    %188 = arith.addf %177, %187 : vector<256x8xf32>
    %c0_167 = arith.constant 0 : index
    %189 = arith.index_cast %180 : i32 to index
    %c3_168 = arith.constant 3 : index
    %c0_169 = arith.constant 0 : index
    %190 = vector.load %arg2[%c0_167, %189, %c3_168, %c0_169] : memref<1x22x22x4xf32, #tpu.memory_space<vmem>>, vector<1x16x16x4xf32>
    %191 = vector.shape_cast %190 : vector<1x16x16x4xf32> to vector<16x16x4xf32>
    %192 = vector.shape_cast %191 : vector<16x16x4xf32> to vector<256x4xf32>
    %c2_170 = arith.constant 2 : index
    %c1_171 = arith.constant 1 : index
    %c0_172 = arith.constant 0 : index
    %c0_173 = arith.constant 0 : index
    %193 = vector.load %arg3[%c2_170, %c1_171, %c0_172, %c0_173] : memref<3x9x4x8xf32, #tpu.memory_space<vmem>>, vector<1x1x4x8xf32>
    %194 = vector.shape_cast %193 : vector<1x1x4x8xf32> to vector<4x8xf32>
    %cst_174 = arith.constant dense<0.000000e+00> : vector<256x8xf32>
    %195 = tpu.matmul %192, %194, %cst_174 {dimension_numbers = #tpu.dot_dimension_numbers<[1], [0], [0], [1], [0, 0, 1, 1], [], []>} : vector<256x4xf32>, vector<4x8xf32>, vector<256x8xf32> -> vector<256x8xf32>
    %196 = arith.addf %188, %195 : vector<256x8xf32>
    %c0_175 = arith.constant 0 : index
    %197 = arith.index_cast %180 : i32 to index
    %c6_176 = arith.constant 6 : index
    %c0_177 = arith.constant 0 : index
    %198 = vector.load %arg2[%c0_175, %197, %c6_176, %c0_177] : memref<1x22x22x4xf32, #tpu.memory_space<vmem>>, vector<1x16x16x4xf32>
    %199 = vector.shape_cast %198 : vector<1x16x16x4xf32> to vector<16x16x4xf32>
    %200 = vector.shape_cast %199 : vector<16x16x4xf32> to vector<256x4xf32>
    %c2_178 = arith.constant 2 : index
    %c2_179 = arith.constant 2 : index
    %c0_180 = arith.constant 0 : index
    %c0_181 = arith.constant 0 : index
    %201 = vector.load %arg3[%c2_178, %c2_179, %c0_180, %c0_181] : memref<3x9x4x8xf32, #tpu.memory_space<vmem>>, vector<1x1x4x8xf32>
    %202 = vector.shape_cast %201 : vector<1x1x4x8xf32> to vector<4x8xf32>
    %cst_182 = arith.constant dense<0.000000e+00> : vector<256x8xf32>
    %203 = tpu.matmul %200, %202, %cst_182 {dimension_numbers = #tpu.dot_dimension_numbers<[1], [0], [0], [1], [0, 0, 1, 1], [], []>} : vector<256x4xf32>, vector<4x8xf32>, vector<256x8xf32> -> vector<256x8xf32>
    %204 = arith.addf %196, %203 : vector<256x8xf32>
    %c16_i32_183 = arith.constant 16 : i32
    %205 = arith.muli %arg1, %c16_i32_183 : i32
    %c0_i32_184 = arith.constant 0 : i32
    %206 = arith.addi %205, %c0_i32_184 : i32
    %c3_i32 = arith.constant 3 : i32
    %207 = arith.addi %206, %c3_i32 : i32
    %c0_185 = arith.constant 0 : index
    %208 = arith.index_cast %207 : i32 to index
    %c0_186 = arith.constant 0 : index
    %c0_187 = arith.constant 0 : index
    %209 = vector.load %arg2[%c0_185, %208, %c0_186, %c0_187] : memref<1x22x22x4xf32, #tpu.memory_space<vmem>>, vector<1x16x16x4xf32>
    %210 = vector.shape_cast %209 : vector<1x16x16x4xf32> to vector<16x16x4xf32>
    %211 = vector.shape_cast %210 : vector<16x16x4xf32> to vector<256x4xf32>
    %c2_188 = arith.constant 2 : index
    %c3_189 = arith.constant 3 : index
    %c0_190 = arith.constant 0 : index
    %c0_191 = arith.constant 0 : index
    %212 = vector.load %arg3[%c2_188, %c3_189, %c0_190, %c0_191] : memref<3x9x4x8xf32, #tpu.memory_space<vmem>>, vector<1x1x4x8xf32>
    %213 = vector.shape_cast %212 : vector<1x1x4x8xf32> to vector<4x8xf32>
    %cst_192 = arith.constant dense<0.000000e+00> : vector<256x8xf32>
    %214 = tpu.matmul %211, %213, %cst_192 {dimension_numbers = #tpu.dot_dimension_numbers<[1], [0], [0], [1], [0, 0, 1, 1], [], []>} : vector<256x4xf32>, vector<4x8xf32>, vector<256x8xf32> -> vector<256x8xf32>
    %215 = arith.addf %204, %214 : vector<256x8xf32>
    %c0_193 = arith.constant 0 : index
    %216 = arith.index_cast %207 : i32 to index
    %c3_194 = arith.constant 3 : index
    %c0_195 = arith.constant 0 : index
    %217 = vector.load %arg2[%c0_193, %216, %c3_194, %c0_195] : memref<1x22x22x4xf32, #tpu.memory_space<vmem>>, vector<1x16x16x4xf32>
    %218 = vector.shape_cast %217 : vector<1x16x16x4xf32> to vector<16x16x4xf32>
    %219 = vector.shape_cast %218 : vector<16x16x4xf32> to vector<256x4xf32>
    %c2_196 = arith.constant 2 : index
    %c4_197 = arith.constant 4 : index
    %c0_198 = arith.constant 0 : index
    %c0_199 = arith.constant 0 : index
    %220 = vector.load %arg3[%c2_196, %c4_197, %c0_198, %c0_199] : memref<3x9x4x8xf32, #tpu.memory_space<vmem>>, vector<1x1x4x8xf32>
    %221 = vector.shape_cast %220 : vector<1x1x4x8xf32> to vector<4x8xf32>
    %cst_200 = arith.constant dense<0.000000e+00> : vector<256x8xf32>
    %222 = tpu.matmul %219, %221, %cst_200 {dimension_numbers = #tpu.dot_dimension_numbers<[1], [0], [0], [1], [0, 0, 1, 1], [], []>} : vector<256x4xf32>, vector<4x8xf32>, vector<256x8xf32> -> vector<256x8xf32>
    %223 = arith.addf %215, %222 : vector<256x8xf32>
    %c0_201 = arith.constant 0 : index
    %224 = arith.index_cast %207 : i32 to index
    %c6_202 = arith.constant 6 : index
    %c0_203 = arith.constant 0 : index
    %225 = vector.load %arg2[%c0_201, %224, %c6_202, %c0_203] : memref<1x22x22x4xf32, #tpu.memory_space<vmem>>, vector<1x16x16x4xf32>
    %226 = vector.shape_cast %225 : vector<1x16x16x4xf32> to vector<16x16x4xf32>
    %227 = vector.shape_cast %226 : vector<16x16x4xf32> to vector<256x4xf32>
    %c2_204 = arith.constant 2 : index
    %c5_205 = arith.constant 5 : index
    %c0_206 = arith.constant 0 : index
    %c0_207 = arith.constant 0 : index
    %228 = vector.load %arg3[%c2_204, %c5_205, %c0_206, %c0_207] : memref<3x9x4x8xf32, #tpu.memory_space<vmem>>, vector<1x1x4x8xf32>
    %229 = vector.shape_cast %228 : vector<1x1x4x8xf32> to vector<4x8xf32>
    %cst_208 = arith.constant dense<0.000000e+00> : vector<256x8xf32>
    %230 = tpu.matmul %227, %229, %cst_208 {dimension_numbers = #tpu.dot_dimension_numbers<[1], [0], [0], [1], [0, 0, 1, 1], [], []>} : vector<256x4xf32>, vector<4x8xf32>, vector<256x8xf32> -> vector<256x8xf32>
    %231 = arith.addf %223, %230 : vector<256x8xf32>
    %c16_i32_209 = arith.constant 16 : i32
    %232 = arith.muli %arg1, %c16_i32_209 : i32
    %c0_i32_210 = arith.constant 0 : i32
    %233 = arith.addi %232, %c0_i32_210 : i32
    %c6_i32 = arith.constant 6 : i32
    %234 = arith.addi %233, %c6_i32 : i32
    %c0_211 = arith.constant 0 : index
    %235 = arith.index_cast %234 : i32 to index
    %c0_212 = arith.constant 0 : index
    %c0_213 = arith.constant 0 : index
    %236 = vector.load %arg2[%c0_211, %235, %c0_212, %c0_213] : memref<1x22x22x4xf32, #tpu.memory_space<vmem>>, vector<1x16x16x4xf32>
    %237 = vector.shape_cast %236 : vector<1x16x16x4xf32> to vector<16x16x4xf32>
    %238 = vector.shape_cast %237 : vector<16x16x4xf32> to vector<256x4xf32>
    %c2_214 = arith.constant 2 : index
    %c6_215 = arith.constant 6 : index
    %c0_216 = arith.constant 0 : index
    %c0_217 = arith.constant 0 : index
    %239 = vector.load %arg3[%c2_214, %c6_215, %c0_216, %c0_217] : memref<3x9x4x8xf32, #tpu.memory_space<vmem>>, vector<1x1x4x8xf32>
    %240 = vector.shape_cast %239 : vector<1x1x4x8xf32> to vector<4x8xf32>
    %cst_218 = arith.constant dense<0.000000e+00> : vector<256x8xf32>
    %241 = tpu.matmul %238, %240, %cst_218 {dimension_numbers = #tpu.dot_dimension_numbers<[1], [0], [0], [1], [0, 0, 1, 1], [], []>} : vector<256x4xf32>, vector<4x8xf32>, vector<256x8xf32> -> vector<256x8xf32>
    %242 = arith.addf %231, %241 : vector<256x8xf32>
    %c0_219 = arith.constant 0 : index
    %243 = arith.index_cast %234 : i32 to index
    %c3_220 = arith.constant 3 : index
    %c0_221 = arith.constant 0 : index
    %244 = vector.load %arg2[%c0_219, %243, %c3_220, %c0_221] : memref<1x22x22x4xf32, #tpu.memory_space<vmem>>, vector<1x16x16x4xf32>
    %245 = vector.shape_cast %244 : vector<1x16x16x4xf32> to vector<16x16x4xf32>
    %246 = vector.shape_cast %245 : vector<16x16x4xf32> to vector<256x4xf32>
    %c2_222 = arith.constant 2 : index
    %c7_223 = arith.constant 7 : index
    %c0_224 = arith.constant 0 : index
    %c0_225 = arith.constant 0 : index
    %247 = vector.load %arg3[%c2_222, %c7_223, %c0_224, %c0_225] : memref<3x9x4x8xf32, #tpu.memory_space<vmem>>, vector<1x1x4x8xf32>
    %248 = vector.shape_cast %247 : vector<1x1x4x8xf32> to vector<4x8xf32>
    %cst_226 = arith.constant dense<0.000000e+00> : vector<256x8xf32>
    %249 = tpu.matmul %246, %248, %cst_226 {dimension_numbers = #tpu.dot_dimension_numbers<[1], [0], [0], [1], [0, 0, 1, 1], [], []>} : vector<256x4xf32>, vector<4x8xf32>, vector<256x8xf32> -> vector<256x8xf32>
    %250 = arith.addf %242, %249 : vector<256x8xf32>
    %c0_227 = arith.constant 0 : index
    %251 = arith.index_cast %234 : i32 to index
    %c6_228 = arith.constant 6 : index
    %c0_229 = arith.constant 0 : index
    %252 = vector.load %arg2[%c0_227, %251, %c6_228, %c0_229] : memref<1x22x22x4xf32, #tpu.memory_space<vmem>>, vector<1x16x16x4xf32>
    %253 = vector.shape_cast %252 : vector<1x16x16x4xf32> to vector<16x16x4xf32>
    %254 = vector.shape_cast %253 : vector<16x16x4xf32> to vector<256x4xf32>
    %c2_230 = arith.constant 2 : index
    %c8_231 = arith.constant 8 : index
    %c0_232 = arith.constant 0 : index
    %c0_233 = arith.constant 0 : index
    %255 = vector.load %arg3[%c2_230, %c8_231, %c0_232, %c0_233] : memref<3x9x4x8xf32, #tpu.memory_space<vmem>>, vector<1x1x4x8xf32>
    %256 = vector.shape_cast %255 : vector<1x1x4x8xf32> to vector<4x8xf32>
    %cst_234 = arith.constant dense<0.000000e+00> : vector<256x8xf32>
    %257 = tpu.matmul %254, %256, %cst_234 {dimension_numbers = #tpu.dot_dimension_numbers<[1], [0], [0], [1], [0, 0, 1, 1], [], []>} : vector<256x4xf32>, vector<4x8xf32>, vector<256x8xf32> -> vector<256x8xf32>
    %258 = arith.addf %250, %257 : vector<256x8xf32>
    %cst_235 = arith.constant dense<0.000000e+00> : vector<8xf32>
    %259 = vector.multi_reduction <add>, %258, %cst_235 [0] : vector<256x8xf32> to vector<8xf32>
    %260 = vector.shape_cast %259 : vector<8xf32> to vector<1x8xf32>
    %261 = arith.mulf %258, %258 : vector<256x8xf32>
    %cst_236 = arith.constant dense<0.000000e+00> : vector<8xf32>
    %262 = vector.multi_reduction <add>, %261, %cst_236 [0] : vector<256x8xf32> to vector<8xf32>
    %263 = vector.shape_cast %262 : vector<8xf32> to vector<1x8xf32>
    %264 = tpu.concatenate %84, %171, %258 in 1 : vector<256x8xf32>, vector<256x8xf32>, vector<256x8xf32> -> vector<256x24xf32>
    %265 = vector.shape_cast %264 : vector<256x24xf32> to vector<16x16x24xf32>
    %c0_237 = arith.constant 0 : index
    %c0_238 = arith.constant 0 : index
    %c0_239 = arith.constant 0 : index
    %c0_240 = arith.constant 0 : index
    %266 = vector.load %arg4[%c0_237, %c0_238, %c0_239, %c0_240] : memref<1x16x16x24xf32, #tpu.memory_space<vmem>>, vector<1x16x16x24xf32>
    %267 = vector.shape_cast %266 : vector<1x16x16x24xf32> to vector<16x16x24xf32>
    %268 = vector.shape_cast %265 : vector<16x16x24xf32> to vector<1x16x16x24xf32>
    tpu.vector_store %arg4[%c0_237, %c0_238, %c0_239, %c0_240], %268 {strides = array<i32>} : memref<1x16x16x24xf32, #tpu.memory_space<vmem>>, vector<1x16x16x24xf32>,
    %269 = tpu.concatenate %86, %173, %260 in 1 : vector<1x8xf32>, vector<1x8xf32>, vector<1x8xf32> -> vector<1x24xf32>
    %270 = tpu.concatenate %89, %176, %263 in 1 : vector<1x8xf32>, vector<1x8xf32>, vector<1x8xf32> -> vector<1x24xf32>
    %271 = tpu.concatenate %269, %270 in 0 : vector<1x24xf32>, vector<1x24xf32> -> vector<2x24xf32>
    %c0_241 = arith.constant 0 : index
    %c0_242 = arith.constant 0 : index
    %c0_243 = arith.constant 0 : index
    %272 = vector.load %arg5[%c0_241, %c0_242, %c0_243] : memref<1x2x24xf32, #tpu.memory_space<vmem>>, vector<1x2x24xf32>
    %273 = vector.shape_cast %272 : vector<1x2x24xf32> to vector<2x24xf32>
    %274 = arith.addf %273, %271 : vector<2x24xf32>
    %c0_244 = arith.constant 0 : index
    %c0_245 = arith.constant 0 : index
    %c0_246 = arith.constant 0 : index
    %275 = vector.load %arg5[%c0_244, %c0_245, %c0_246] : memref<1x2x24xf32, #tpu.memory_space<vmem>>, vector<1x2x24xf32>
    %276 = vector.shape_cast %275 : vector<1x2x24xf32> to vector<2x24xf32>
    %277 = vector.shape_cast %274 : vector<2x24xf32> to vector<1x2x24xf32>
    tpu.vector_store %arg5[%c0_244, %c0_245, %c0_246], %277 {strides = array<i32>} : memref<1x2x24xf32, #tpu.memory_space<vmem>>, vector<1x2x24xf32>,
    return
  }
  func.func @transform_0(%arg0: i32, %arg1: i32) -> (i32, i32, i32, i32) {
    %c0_i32 = arith.constant 0 : i32
    %c0_i32_0 = arith.constant 0 : i32
    %c0_i32_1 = arith.constant 0 : i32
    %c0_i32_2 = arith.constant 0 : i32
    return %arg0, %c0_i32, %c0_i32_0, %c0_i32_1 : i32, i32, i32, i32
  }
  func.func @transform_1(%arg0: i32, %arg1: i32) -> (i32, i32, i32, i32) {
    %c0_i32 = arith.constant 0 : i32
    %c0_i32_0 = arith.constant 0 : i32
    %c0_i32_1 = arith.constant 0 : i32
    %c0_i32_2 = arith.constant 0 : i32
    %c0_i32_3 = arith.constant 0 : i32
    return %c0_i32, %c0_i32_0, %c0_i32_1, %c0_i32_2 : i32, i32, i32, i32
  }
  func.func @transform_2(%arg0: i32, %arg1: i32) -> (i32, i32, i32, i32) {
    %c0_i32 = arith.constant 0 : i32
    %c0_i32_0 = arith.constant 0 : i32
    %c0_i32_1 = arith.constant 0 : i32
    return %arg0, %arg1, %c0_i32, %c0_i32_0 : i32, i32, i32, i32
  }
  func.func @transform_3(%arg0: i32, %arg1: i32) -> (i32, i32, i32) {
    %c0_i32 = arith.constant 0 : i32
    %c0_i32_0 = arith.constant 0 : i32
    %c0_i32_1 = arith.constant 0 : i32
    return %arg0, %c0_i32, %c0_i32_0 : i32, i32, i32
  }
}

</mosaic_0001>

<bundles_post_ra>
// kernel: tpu_custom_call.1
= control target key start
LH: loop header
LB: loop body
LE: loop exit
PB: predicated region body
PF: predicated region fallthrough
CT: control target
= control target key end

     0   :  { %9 = vsyncpa [#allocation3], 0  ;;  %s14424_s0 = inlined_call_operand.vmem [shape: f32[2,22,22,4], index: 0, kind: input, shape index: {}]   ;;  %s14425_s1 = inlined_call_operand.vmem [shape: f32[3,9,4,8], index: 1, kind: input, shape index: {}]   ;;  %s14426_s2 = inlined_call_operand.hbm [shape: f32[2,16,16,24], index: 2, kind: output, shape index: {0}]   ;;  %s14427_s3 = inlined_call_operand.hbm [shape: f32[2,2,24], index: 3, kind: output, shape index: {1}]  }
   0x1   :  { %11 = vsyncpa [#allocation3 + $0x1], 0 }
   0x2   :  { %12 = vsyncpa [#allocation5], 0 }
   0x3   :  { %14 = vsyncpa [#allocation5 + $0x1], 0  ;;  %s10251_s12 = smov 0   ;;  %s10253_s13 = smov 0  }
   0x4   :  { %s10255_s14 = smov 0   ;;  %s10257_s15 = smov 0  }
   0x5   :  { %s10259_s16 = smov 0   ;;  %s10261_s17 = smov 0  }
   0x6 LB: > { %s8345_s18 = sadd.s32 4294967295, %s10225_s17   ;;  %s8346_s19 = sadd.s32 4294967294, %s10225_s17   ;;  %s10225_s17 = sphi %s10261_s17, %s20_s17   ;;  %s10221_s16 = sphi %s10259_s16, %s14939_s16   ;;  %s10217_s15 = sphi %s10257_s15, %s14938_s15   ;;  %s10213_s14 = sphi %s10255_s14, %s14937_s14   ;;  %s10209_s13 = sphi %s10253_s13, %s14936_s13   ;;  %s10205_s12 = sphi %s10251_s12, %s14935_s12  }
   0x7   : > { %s32_s20 = sadd.s32 1, %s10221_s16  ;;  %s88_s21 = sadd.s32 1, %s10213_s14 }
   0x8   : > { %p34_p0 = scmp.ge.s32.totalorder %s32_s20, 2  ;;  %p98_p1 = scmp.ne.s32.totalorder %s10213_s14, %s10209_s13 }
   0x9   : > { %p99_p2 = scmp.eq.s32.totalorder %s8345_s18, 1  ;;  %p104_p3 = scmp.ne.s32.totalorder %s10209_s13, %s10205_s12 }
   0xa   : > { %s14941_s20 = smov (%p34_p0, %s32_s20), 0  ;;  %p105_p5 = scmp.eq.s32.totalorder %s8346_s19, 1 }
   0xb   : > { %p10291_p4 = por %p99_p2, %p98_p1  ;;  %s83_s23 = ssub.s32 %s10221_s16, %s14941_s20 }
   0xc   : > { %p8349_p6 = scmp.ge.s32.totalorder %s10225_s17, 1  ;;  %p86_p7 = scmp.eq.s32.totalorder %s83_s23, 0 }
   0xd   : > { %p10298_p8 = por %p105_p5, %p104_p3  ;;  %p160_p9 = scmp.lt.s32.totalorder %s10225_s17, 3 }
   0xe   : > { %s10304_s25 = scalar_select %p86_p7, %s10213_s14, %s88_s21  }
   0xf   : > { %p161_p10 = pnand %p8349_p6, %p160_p9 }
  0x11   : > { %164 = sbr.rel (%p161_p10) target bundleno = 2045 (0x7fd), region = 28 }
  0x16   : > { %v8417_v0 = vld [vmem:[%s14425_s1 + $0x4] sm:$0xf]  ;;  %vm369_vm0 = vcmask 1043456   ;;  %p189_p11 = scmp.lt.s32.totalorder %s10217_s15, 1  ;;  %v237_v1 = vld [vmem:[%s14425_s1] sm:$0xf] }
  0x17   : > { %9982 = vmatpush.msk.msra.mxu3 %vm369_vm0, %v8417_v0  ;;  %v8516_v2 = vld [vmem:[%s14425_s1 + $0x8] sm:$0xf]  ;;  %v8780_v3 = vld [vmem:[%s14425_s1 + $0x18] sm:$0xf]  ;;  %8418 = vmatpush.msk.msra.mxu0 %vm369_vm0, %v8417_v0  ;;  %v8648_v4 = vld [vmem:[%s14425_s1 + $0x10] sm:$0xf] }
  0x18   : > { %s190_s7 = scalar_select %p189_p11, %s10217_s15, 1  ;;  %8517 = vmatpush.msk.msra.mxu2 %vm369_vm0, %v8516_v2  ;;  %v8714_v5 = vld [vmem:[%s14425_s1 + $0x14] sm:$0xf]  ;;  %8451 = vmatpush.msk.msra.mxu1 %vm369_vm0, %v237_v1  ;;  %vm272_vm1 = vcmask 31744   ;;  %v8582_v58 = vld [vmem:[%s14425_s1 + $0xc] sm:$0xf] }
  0x19   : > { %9983 = vmatpush.msk.msrb.mxu3 %vm369_vm0, %v237_v1  ;;  %8649 = vmatpush.msk.msrb.mxu0 %vm369_vm0, %v8648_v4  ;;  %vm2650_vm2 = vcmask 64512   ;;  %s10227_s28 = smov 8   ;;  %s10228_s10 = smov 16   ;;  %vm8080_vm3 = vcmask 130048   ;;  %vm8113_vm4 = vcmask 195584   ;;  %vm199_vm5 = vcmask 189440  }
  0x1a   : > { %8781 = vmatpush.msk.msrb.mxu2 %vm369_vm0, %v8780_v3  ;;  %s9985_s18 = smul.u32 528, %s190_s7  ;;  %8715 = vmatpush.msk.msrb.mxu1 %vm369_vm0, %v8714_v5  ;;  %s14046_s11 = sand.u32 1, %s10209_s13   ;;  %vm8169_vm6 = vcmask 1040384  }
  0x1b   : > { %s9978_s26 = sshll.u32 %s10217_s15, 1  ;;  %s9981_s27 = sshll.u32 %s10217_s15, 8 }
  0x1c   : > { %s10337_s23 = scalar_lea.vmem %s14424_s0, %s9985_s18  ;;  %s8350_s18 = sshll.u32 %s14046_s11, 8 }
  0x1d   : > { %v8409_v6 = vld [vmem:[%s10337_s23 + $0x153] sm:$0xff]  ;;  %v8410_v10 = vld [vmem:[%s10337_s23 + $0x15b] sm:$0xff]  ;;  %v8411_v14 = vld [vmem:[%s10337_s23 + $0x16b] sm:$0xff]  ;;  %s14066_s19 = scalar_lea.vmem [#allocation2], %s8350_s18  ;;  %s8211_s4 = scalar_lea.hbm %s14427_s3, %s9978_s26 }
  0x1e   : > { %v8484_v7 = vld [vmem:[%s10337_s23 + $0x34] sm:$0xff]  ;;  %8443 = vmatmul.msk.f32.vlgmr.msra.gmra.mxu3 %vm272_vm1, %v8409_v6  ;;  %v8485_v11 = vld [vmem:[%s10337_s23 + $0x3c] sm:$0xff]  ;;  %v10358_v15 = vld [vmem:[%s10337_s23 + $0x4c] sm:$0xff]  ;;  %s8195_s7 = scalar_lea.hbm %s14426_s2, %s9981_s27  ;;  %s8215_s8 = sshll.u32 %s8211_s4, 4  ;;  %s8216_s8 = int_to_ptr.hbm [resolvable:$true] %s8215_s8 }
  0x1f   : > { %v8385_v8 = vld [vmem:[%s10337_s23 + $0x33] sm:$0xff]  ;;  %8518 = vmatmul.msk.f32.vlgmr.msra.gmra.mxu2 %vm272_vm1, %v8484_v7  ;;  %9984 = vmatpush.msk.msra.mxu3 %vm369_vm0, %v8516_v2  ;;  %v8386_v12 = vld [vmem:[%s10337_s23 + $0x3b] sm:$0xff]  ;;  %v10361_v16 = vld [vmem:[%s10337_s23 + $0x4b] sm:$0xff]  ;;  %s8196_s9 = sshll.u32 %s14066_s19, 4  ;;  %s8181_s18 = scalar_lea.sflag [#allocation5], %s14046_s11  ;;  %s14364_s9 = int_to_ptr.vmem [resolvable:$true] %s8196_s9 }
  0x20   : > { %v8353_v9 = vld [vmem:[%s10337_s23 + $0x32] sm:$0xff]  ;;  %8419 = vmatmul.msk.f32.vlgmr.msra.gmra.mxu0 %vm272_vm1, %v8385_v8  ;;  %v8354_v13 = vld [vmem:[%s10337_s23 + $0x3a] sm:$0xff]  ;;  %v10364_v17 = vld [vmem:[%s10337_s23 + $0x4a] sm:$0xff]  ;;  %s10135_s30 = scalar_lea.hbm %s14427_s3, 4 }
  0x21   : > { %8452 = vmatmul.msk.f32.vlgmr.msra.gmra.mxu1 %vm272_vm1, %v8353_v9  ;;  %v8412_v18 = vld [vmem:[%s10337_s23 + $0x173] sm:$0xff]  ;;  %v8413_v22 = vld [vmem:[%s10337_s23 + $0x183] sm:$0xff]  ;;  %v8414_v26 = vld [vmem:[%s10337_s23 + $0x18b] sm:$0xff] }
  0x22   : > { %v10375_v19 = vld [vmem:[%s10337_s23 + $0x54] sm:$0xff]  ;;  %v10392_v23 = vld [vmem:[%s10337_s23 + $0x64] sm:$0xff]  ;;  %v10409_v27 = vld [vmem:[%s10337_s23 + $0x6c] sm:$0xff] }
  0x23   : > { %v10378_v20 = vld [vmem:[%s10337_s23 + $0x53] sm:$0xff]  ;;  %v10395_v24 = vld [vmem:[%s10337_s23 + $0x63] sm:$0xff]  ;;  %v10412_v28 = vld [vmem:[%s10337_s23 + $0x6b] sm:$0xff] }
  0x24   : > { %v10381_v21 = vld [vmem:[%s10337_s23 + $0x52] sm:$0xff]  ;;  %v10398_v25 = vld [vmem:[%s10337_s23 + $0x62] sm:$0xff]  ;;  %v10415_v29 = vld [vmem:[%s10337_s23 + $0x6a] sm:$0xff] }
  0x25   : > { %v8415_v30 = vld [vmem:[%s10337_s23 + $0x19b] sm:$0xff]  ;;  %v8416_v34 = vld [vmem:[%s10337_s23 + $0x1a3] sm:$0xff]  ;;  %v10459_v38 = vld [vmem:[%s10337_s23 + $0x152] sm:$0xff] }
  0x26   : > { %8444 = vmatmul.msk.f32.gmra.mxu3 %vm272_vm1, %v8410_v10  ;;  %v10426_v31 = vld [vmem:[%s10337_s23 + $0x7c] sm:$0xff]  ;;  %v10443_v35 = vld [vmem:[%s10337_s23 + $0x84] sm:$0xff]  ;;  %14517 = vst [vmem:[#allocation8_spill] sm:$0xff] %v10459_v38  ;;  %v10462_v39 = vld [vmem:[%s10337_s23 + $0x94] sm:$0xff] }
  0x27   : > { %8519 = vmatmul.msk.f32.gmra.mxu2 %vm272_vm1, %v8485_v11  ;;  %v10429_v32 = vld [vmem:[%s10337_s23 + $0x7b] sm:$0xff]  ;;  %v10446_v36 = vld [vmem:[%s10337_s23 + $0x83] sm:$0xff]  ;;  %v10465_v40 = vld [vmem:[%s10337_s23 + $0x93] sm:$0xff] }
  0x28   : > { %8420 = vmatmul.msk.f32.gmra.mxu0 %vm272_vm1, %v8386_v12  ;;  %v10432_v33 = vld [vmem:[%s10337_s23 + $0x7a] sm:$0xff]  ;;  %v10449_v37 = vld [vmem:[%s10337_s23 + $0x82] sm:$0xff]  ;;  %v10468_v41 = vld [vmem:[%s10337_s23 + $0x92] sm:$0xff] }
  0x29   : > { %8453 = vmatmul.msk.f32.gmra.mxu1 %vm272_vm1, %v8354_v13  ;;  %v10479_v42 = vld [vmem:[%s10337_s23 + $0x15a] sm:$0xff]  ;;  %v10499_v46 = vld [vmem:[%s10337_s23 + $0x16a] sm:$0xff]  ;;  %v8380_v50 = vld [vmem:[%s10337_s23 + $0x172] sm:$0xff] }
  0x2a   : > { %14518 = vst [vmem:[#allocation9_spill] sm:$0xff] %v10479_v42  ;;  %v10482_v43 = vld [vmem:[%s10337_s23 + $0x9c] sm:$0xff]  ;;  %v10502_v47 = vld [vmem:[%s10337_s23 + $0xac] sm:$0xff]  ;;  %v10520_v51 = vld [vmem:[%s10337_s23 + $0xb4] sm:$0xff] }
  0x2b   : > { %v10485_v44 = vld [vmem:[%s10337_s23 + $0x9b] sm:$0xff]  ;;  %14519 = vst [vmem:[#allocation10_spill] sm:$0xff] %v10499_v46  ;;  %v10505_v48 = vld [vmem:[%s10337_s23 + $0xab] sm:$0xff]  ;;  %v10523_v52 = vld [vmem:[%s10337_s23 + $0xb3] sm:$0xff] }
  0x2c   : > { %v10488_v45 = vld [vmem:[%s10337_s23 + $0x9a] sm:$0xff]  ;;  %v10508_v49 = vld [vmem:[%s10337_s23 + $0xaa] sm:$0xff]  ;;  %v10526_v53 = vld [vmem:[%s10337_s23 + $0xb2] sm:$0xff] }
  0x2d   : > { %v8381_v54 = vld [vmem:[%s10337_s23 + $0x182] sm:$0xff]  ;;  %v8382_v59 = vld [vmem:[%s10337_s23 + $0x18a] sm:$0xff]  ;;  %v8383_v63 = vld [vmem:[%s10337_s23 + $0x19a] sm:$0xff] }
  0x2e   : > { %8445 = vmatmul.msk.f32.gmra.mxu3 %vm272_vm1, %v8411_v14  ;;  %v10537_v55 = vld [vmem:[%s10337_s23 + $0xc4] sm:$0xff]  ;;  %v10558_v60 = vld [vmem:[%s10337_s23 + $0xcc] sm:$0xff]  ;;  %v10575_v0 = vld [vmem:[%s10337_s23 + $0xdc] sm:$0xff] }
  0x2f   : > { %8520 = vmatmul.msk.f32.gmra.mxu2 %vm272_vm1, %v10358_v15  ;;  %v10540_v56 = vld [vmem:[%s10337_s23 + $0xc3] sm:$0xff]  ;;  %v10561_v61 = vld [vmem:[%s10337_s23 + $0xcb] sm:$0xff]  ;;  %v10578_v1 = vld [vmem:[%s10337_s23 + $0xdb] sm:$0xff] }
  0x30   : > { %8421 = vmatmul.msk.f32.gmra.mxu0 %vm272_vm1, %v10361_v16  ;;  %v10543_v57 = vld [vmem:[%s10337_s23 + $0xc2] sm:$0xff]  ;;  %v10564_v62 = vld [vmem:[%s10337_s23 + $0xca] sm:$0xff]  ;;  %v10581_v2 = vld [vmem:[%s10337_s23 + $0xda] sm:$0xff] }
  0x31   : > { %8454 = vmatmul.msk.f32.gmra.mxu1 %vm272_vm1, %v10364_v17  ;;  %v8384_v3 = vld [vmem:[%s10337_s23 + $0x1a2] sm:$0xff]  ;;  %v10608_v7 = vld [vmem:[%s10337_s23 + $0x154] sm:$0xff] }
  0x32   : > { %v10592_v4 = vld [vmem:[%s10337_s23 + $0xe4] sm:$0xff]  ;;  %14520 = vst [vmem:[#allocation11_spill] sm:$0xff] %v10608_v7  ;;  %v10611_v8 = vld [vmem:[%s10337_s23 + $0xf4] sm:$0xff] }
  0x33   : > { %v10595_v5 = vld [vmem:[%s10337_s23 + $0xe3] sm:$0xff]  ;;  %v10618_v11 = vld [vmem:[%s10337_s23 + $0xf3] sm:$0xff] }
  0x34   : > { %v10598_v6 = vld [vmem:[%s10337_s23 + $0xe2] sm:$0xff]  ;;  %v10621_v12 = vld [vmem:[%s10337_s23 + $0xf2] sm:$0xff] }
  0x36   : > { %8446 = vmatmul.msk.f32.gmra.mxu3 %vm272_vm1, %v8412_v18  ;;  %v10636_v18 = vld [vmem:[%s10337_s23 + $0x15c] sm:$0xff] }
  0x37   : > { %8521 = vmatmul.msk.f32.gmra.mxu2 %vm272_vm1, %v10375_v19  ;;  %14524 = vst [vmem:[#allocation15_spill] sm:$0xff] %v10636_v18 }
  0x38   : > { %8422 = vmatmul.msk.f32.gmra.mxu0 %vm272_vm1, %v10378_v20 }
  0x39   : > { %8455 = vmatmul.msk.f32.gmra.mxu1 %vm272_vm1, %v10381_v21 }
  0x3e   : > { %8447 = vmatmul.msk.f32.gmra.mxu3 %vm272_vm1, %v8413_v22  ;;  %v10639_v22 = vld [vmem:[%s10337_s23 + $0xfc] sm:$0xff] }
  0x3f   : > { %8522 = vmatmul.msk.f32.gmra.mxu2 %vm272_vm1, %v10392_v23  ;;  %14525 = vst [vmem:[#allocation16_spill] sm:$0xff] %v10639_v22 }
  0x40   : > { %8423 = vmatmul.msk.f32.gmra.mxu0 %vm272_vm1, %v10395_v24 }
  0x41   : > { %8456 = vmatmul.msk.f32.gmra.mxu1 %vm272_vm1, %v10398_v25 }
  0x46   : > { %8448 = vmatmul.msk.f32.gmra.mxu3 %vm272_vm1, %v8414_v26 }
  0x47   : > { %8523 = vmatmul.msk.f32.gmra.mxu2 %vm272_vm1, %v10409_v27 }
  0x48   : > { %8424 = vmatmul.msk.f32.gmra.mxu0 %vm272_vm1, %v10412_v28 }
  0x49   : > { %8457 = vmatmul.msk.f32.gmra.mxu1 %vm272_vm1, %v10415_v29 }
  0x4e   : > { %8449 = vmatmul.msk.f32.gmra.mxu3 %vm272_vm1, %v8415_v30 }
  0x4f   : > { %8524 = vmatmul.msk.f32.gmra.mxu2 %vm272_vm1, %v10426_v31 }
  0x50   : > { %8425 = vmatmul.msk.f32.gmra.mxu0 %vm272_vm1, %v10429_v32 }
  0x51   : > { %8458 = vmatmul.msk.f32.gmra.mxu1 %vm272_vm1, %v10432_v33 }
  0x56   : > { %8450 = vmatmul.msk.f32.gmra.mxu3 %vm272_vm1, %v8416_v34  ;;  %v10646_v34 = vld [vmem:[%s10337_s23 + $0xfb] sm:$0xff] }
  0x57   : > { %8525 = vmatmul.msk.f32.gmra.mxu2 %vm272_vm1, %v10443_v35  ;;  %14528 = vst [vmem:[#allocation19_spill] sm:$0xff] %v10646_v34 }
  0x58   : > { %8426 = vmatmul.msk.f32.gmra.mxu0 %vm272_vm1, %v10446_v36 }
  0x59   : > { %8459 = vmatmul.msk.f32.gmra.mxu1 %vm272_vm1, %v10449_v37 }
  0x5e   : > { %8476 = vmatmul.msk.f32.vlgmr.msrb.gmra.mxu3 %vm272_vm1, %v10459_v38 }
  0x5f   : > { %8526 = vmatmul.msk.f32.gmra.mxu2 %vm272_vm1, %v10462_v39  ;;  %8583 = vmatpush.msk.msrb.mxu3 %vm369_vm0, %v8582_v58 }
  0x60   : > { %8427 = vmatmul.msk.f32.gmra.mxu0 %vm272_vm1, %v10465_v40 }
  0x61   : > { %8460 = vmatmul.msk.f32.gmra.mxu1 %vm272_vm1, %v10468_v41 }
  0x66   : > { %8477 = vmatmul.msk.f32.gmra.mxu3 %vm272_vm1, %v10479_v42 }
  0x67   : > { %8527 = vmatmul.msk.f32.gmra.mxu2 %vm272_vm1, %v10482_v43 }
  0x68   : > { %8428 = vmatmul.msk.f32.gmra.mxu0 %vm272_vm1, %v10485_v44 }
  0x69   : > { %8461 = vmatmul.msk.f32.gmra.mxu1 %vm272_vm1, %v10488_v45 }
  0x6e   : > { %8478 = vmatmul.msk.f32.gmra.mxu3 %vm272_vm1, %v10499_v46  ;;  %v10677_v46 = vld [vmem:[%s10337_s23 + $0x10a] sm:$0xff] }
  0x6f   : > { %8528 = vmatmul.msk.f32.gmra.mxu2 %vm272_vm1, %v10502_v47 }
  0x70   : > { %8429 = vmatmul.msk.f32.gmra.mxu0 %vm272_vm1, %v10505_v48 }
  0x71   : > { %8462 = vmatmul.msk.f32.gmra.mxu1 %vm272_vm1, %v10508_v49 }
  0x76   : > { %8479 = vmatmul.msk.f32.gmra.mxu3 %vm272_vm1, %v8380_v50  ;;  %v10649_v50 = vld [vmem:[%s10337_s23 + $0xfa] sm:$0xff] }
  0x77   : > { %8529 = vmatmul.msk.f32.gmra.mxu2 %vm272_vm1, %v10520_v51 }
  0x78   : > { %8430 = vmatmul.msk.f32.gmra.mxu0 %vm272_vm1, %v10523_v52 }
  0x79   : > { %8463 = vmatmul.msk.f32.gmra.mxu1 %vm272_vm1, %v10526_v53 }
  0x7e   : > { %8480 = vmatmul.msk.f32.gmra.mxu3 %vm272_vm1, %v8381_v54 }
  0x7f   : > { %8530 = vmatmul.msk.f32.gmra.mxu2 %vm272_vm1, %v10537_v55 }
  0x80   : > { %8431 = vmatmul.msk.f32.gmra.mxu0 %vm272_vm1, %v10540_v56 }
  0x81   : > { %8464 = vmatmul.msk.f32.gmra.mxu1 %vm272_vm1, %v10543_v57 }
  0x86   : > { %8481 = vmatmul.msk.f32.gmra.mxu3 %vm272_vm1, %v8382_v59  ;;  %v10664_v59 = vld [vmem:[%s10337_s23 + $0x16c] sm:$0xff] }
  0x87   : > { %8531 = vmatmul.msk.f32.gmra.mxu2 %vm272_vm1, %v10558_v60  ;;  %14530 = vst [vmem:[#allocation21_spill] sm:$0xff] %v10664_v59 }
  0x88   : > { %8432 = vmatmul.msk.f32.gmra.mxu0 %vm272_vm1, %v10561_v61 }
  0x89   : > { %8465 = vmatmul.msk.f32.gmra.mxu1 %vm272_vm1, %v10564_v62 }
  0x8e   : > { %8482 = vmatmul.msk.f32.gmra.mxu3 %vm272_vm1, %v8383_v63  ;;  %v10667_v63 = vld [vmem:[%s10337_s23 + $0x10c] sm:$0xff] }
  0x8f   : > { %8532 = vmatmul.msk.f32.gmra.mxu2 %vm272_vm1, %v10575_v0  ;;  %14531 = vst [vmem:[#allocation22_spill] sm:$0xff] %v10667_v63 }
  0x90   : > { %8433 = vmatmul.msk.f32.gmra.mxu0 %vm272_vm1, %v10578_v1 }
  0x91   : > { %8466 = vmatmul.msk.f32.gmra.mxu1 %vm272_vm1, %v10581_v2 }
  0x96   : > { %8483 = vmatmul.msk.f32.gmra.mxu3 %vm272_vm1, %v8384_v3 }
  0x97   : > { %8533 = vmatmul.msk.f32.gmra.mxu2 %vm272_vm1, %v10592_v4 }
  0x98   : > { %8434 = vmatmul.msk.f32.gmra.mxu0 %vm272_vm1, %v10595_v5 }
  0x99   : > { %8467 = vmatmul.msk.f32.gmra.mxu1 %vm272_vm1, %v10598_v6 }
  0x9d   : > { %v10613_v9 = vpop.f32.mrf.mxu0 }
  0x9e   : > { %14521 = vst [vmem:[#allocation12_spill] sm:$0xff] %v10613_v9  ;;  %v10615_v10 = vpop.f32.mrf.mxu1  ;;  %8542 = vmatmul.msk.f32.vlgmr.msra.gmra.mxu3 %vm272_vm1, %v10608_v7  ;;  %v10674_v7 = vld [vmem:[%s10337_s23 + $0x10b] sm:$0xff] }
  0x9f   : > { %14522 = vst [vmem:[#allocation13_spill] sm:$0xff] %v10615_v10  ;;  %8534 = vmatmul.msk.f32.gmra.mxu2 %vm272_vm1, %v10611_v8  ;;  %v10795_v10 = vld [vmem:[%s10337_s23 + $0x13c] sm:$0xff] }
  0xa0   : > { %8435 = vmatmul.msk.f32.gmra.mxu0 %vm272_vm1, %v10618_v11  ;;  %14534 = vst [vmem:[#allocation25_spill] sm:$0xff] %v10674_v7 }
  0xa1   : > { %8468 = vmatmul.msk.f32.gmra.mxu1 %vm272_vm1, %v10621_v12  ;;  %v10631_v13 = vpop.f32.mrf.mxu3  ;;  %14557 = vst [vmem:[#allocation48_spill] sm:$0xff] %v10795_v10 }
  0xa2   : > { %v10633_v14 = vpop.f32.mrf.mxu2 }
  0xa3   : > { %14523 = vst [vmem:[#allocation14_spill] sm:$0xff] %v10633_v14  ;;  %v10723_v14 = vld [vmem:[%s10337_s23 + $0x124] sm:$0xff] }
  0xa4   : > { %14543 = vst [vmem:[#allocation34_spill] sm:$0xff] %v10723_v14 }
  0xa5   : > { %v10641_v26 = vpop.f32.mrf.mxu0 }
  0xa6   : > { %14526 = vst [vmem:[#allocation17_spill] sm:$0xff] %v10641_v26  ;;  %v10643_v30 = vpop.f32.mrf.mxu1  ;;  %8543 = vmatmul.msk.f32.gmra.mxu3 %vm272_vm1, %v10636_v18  ;;  %v10705_v26 = vld [vmem:[%s10337_s23 + $0x112] sm:$0xff] }
  0xa7   : > { %14527 = vst [vmem:[#allocation18_spill] sm:$0xff] %v10643_v30  ;;  %8535 = vmatmul.msk.f32.gmra.mxu2 %vm272_vm1, %v10639_v22  ;;  %v10702_v30 = vld [vmem:[%s10337_s23 + $0x113] sm:$0xff] }
  0xa8   : > { %8436 = vmatmul.msk.f32.gmra.mxu0 %vm272_vm1, %v10646_v34  ;;  %14540 = vst [vmem:[#allocation31_spill] sm:$0xff] %v10702_v30  ;;  %v10830_v34 = vld [vmem:[%s10337_s23 + $0x143] sm:$0xff] }
  0xa9   : > { %8469 = vmatmul.msk.f32.gmra.mxu1 %vm272_vm1, %v10649_v50  ;;  %v10659_v54 = vpop.f32.mrf.mxu3 }
  0xaa   : > { %v10661_v58 = vpop.f32.mrf.mxu2 }
  0xab   : > { %14529 = vst [vmem:[#allocation20_spill] sm:$0xff] %v10661_v58 }
  0xad   : > { %v10669_v3 = vpop.f32.mrf.mxu0 }
  0xae   : > { %14532 = vst [vmem:[#allocation23_spill] sm:$0xff] %v10669_v3  ;;  %v10671_v18 = vpop.f32.mrf.mxu1  ;;  %8544 = vmatmul.msk.f32.gmra.mxu3 %vm272_vm1, %v10664_v59  ;;  %v10695_v3 = vld [vmem:[%s10337_s23 + $0x114] sm:$0xff] }
  0xaf   : > { %14533 = vst [vmem:[#allocation24_spill] sm:$0xff] %v10671_v18  ;;  %8536 = vmatmul.msk.f32.gmra.mxu2 %vm272_vm1, %v10667_v63  ;;  %v10692_v18 = vld [vmem:[%s10337_s23 + $0x174] sm:$0xff] }
  0xb0   : > { %8437 = vmatmul.msk.f32.gmra.mxu0 %vm272_vm1, %v10674_v7  ;;  %14536 = vst [vmem:[#allocation27_spill] sm:$0xff] %v10692_v18  ;;  %v10758_v7 = vld [vmem:[%s10337_s23 + $0x12c] sm:$0xff] }
  0xb1   : > { %8470 = vmatmul.msk.f32.gmra.mxu1 %vm272_vm1, %v10677_v46  ;;  %v10687_v42 = vpop.f32.mrf.mxu3  ;;  %14537 = vst [vmem:[#allocation28_spill] sm:$0xff] %v10695_v3 }
  0xb2   : > { %v10689_v38 = vpop.f32.mrf.mxu2  ;;  %14550 = vst [vmem:[#allocation41_spill] sm:$0xff] %v10758_v7 }
  0xb3   : > { %14535 = vst [vmem:[#allocation26_spill] sm:$0xff] %v10689_v38 }
  0xb5   : > { %v10697_v59 = vpop.f32.mrf.mxu0 }
  0xb6   : > { %14538 = vst [vmem:[#allocation29_spill] sm:$0xff] %v10697_v59  ;;  %v10699_v58 = vpop.f32.mrf.mxu1  ;;  %8545 = vmatmul.msk.f32.gmra.mxu3 %vm272_vm1, %v10692_v18 }
  0xb7   : > { %14539 = vst [vmem:[#allocation30_spill] sm:$0xff] %v10699_v58  ;;  %8537 = vmatmul.msk.f32.gmra.mxu2 %vm272_vm1, %v10695_v3  ;;  %v10720_v58 = vld [vmem:[%s10337_s23 + $0x184] sm:$0xff] }
  0xb8   : > { %8438 = vmatmul.msk.f32.gmra.mxu0 %vm272_vm1, %v10702_v30  ;;  %14542 = vst [vmem:[#allocation33_spill] sm:$0xff] %v10720_v58  ;;  %v10730_v3 = vld [vmem:[%s10337_s23 + $0x123] sm:$0xff] }
  0xb9   : > { %8471 = vmatmul.msk.f32.gmra.mxu1 %vm272_vm1, %v10705_v26  ;;  %v10715_v38 = vpop.f32.mrf.mxu3  ;;  %14546 = vst [vmem:[#allocation37_spill] sm:$0xff] %v10730_v3  ;;  %v10733_v30 = vld [vmem:[%s10337_s23 + $0x122] sm:$0xff] }
  0xba   : > { %v10717_v59 = vpop.f32.mrf.mxu2  ;;  %14547 = vst [vmem:[#allocation38_spill] sm:$0xff] %v10733_v30 }
  0xbb   : > { %14541 = vst [vmem:[#allocation32_spill] sm:$0xff] %v10717_v59  ;;  %v8846_v59 = vld [vmem:[%s14425_s1 + $0x1c] sm:$0xf] }
  0xbc   : > { %8847 = vmatpush.msk.msra.mxu3 %vm369_vm0, %v8846_v59  ;;  %v10766_v59 = vld [vmem:[%s10337_s23 + $0x12b] sm:$0xff] }
  0xbd   : > { %v10725_v18 = vpop.f32.mrf.mxu0  ;;  %14553 = vst [vmem:[#allocation44_spill] sm:$0xff] %v10766_v59 }
  0xbe   : > { %14544 = vst [vmem:[#allocation35_spill] sm:$0xff] %v10725_v18  ;;  %v10727_v63 = vpop.f32.mrf.mxu1  ;;  %8546 = vmatmul.msk.f32.gmra.mxu3 %vm272_vm1, %v10720_v58  ;;  %v8978_v58 = vld [vmem:[%s14425_s1 + $0x24] sm:$0xf] }
  0xbf   : > { %14545 = vst [vmem:[#allocation36_spill] sm:$0xff] %v10727_v63  ;;  %8538 = vmatmul.msk.f32.gmra.mxu2 %vm272_vm1, %v10723_v14  ;;  %v10755_v14 = vld [vmem:[%s10337_s23 + $0x18c] sm:$0xff] }
  0xc0   : > { %8439 = vmatmul.msk.f32.gmra.mxu0 %vm272_vm1, %v10730_v3  ;;  %14549 = vst [vmem:[#allocation40_spill] sm:$0xff] %v10755_v14  ;;  %9045 = vmatpush.msk.msra.mxu2 %vm369_vm0, %v8978_v58  ;;  %v8912_v58 = vld [vmem:[%s14425_s1 + $0x20] sm:$0xf] }
  0xc1   : > { %8472 = vmatmul.msk.f32.gmra.mxu1 %vm272_vm1, %v10733_v30  ;;  %v10747_v63 = vpop.f32.mrf.mxu3  ;;  %8913 = vmatpush.msk.msra.mxu0 %vm369_vm0, %v8912_v58  ;;  %v10805_v58 = vld [vmem:[%s10337_s23 + $0x13a] sm:$0xff] }
  0xc2   : > { %v10749_v18 = vpop.f32.mrf.mxu2 }
  0xc3   : > { %14548 = vst [vmem:[#allocation39_spill] sm:$0xff] %v10749_v18  ;;  %v10769_v18 = vld [vmem:[%s10337_s23 + $0x12a] sm:$0xff] }
  0xc4   : > { %14554 = vst [vmem:[#allocation45_spill] sm:$0xff] %v10769_v18 }
  0xc5   : > { %v10761_v3 = vpop.f32.mrf.mxu0 }
  0xc6   : > { %14551 = vst [vmem:[#allocation42_spill] sm:$0xff] %v10761_v3  ;;  %v10763_v30 = vpop.f32.mrf.mxu1  ;;  %8547 = vmatmul.msk.f32.gmra.mxu3 %vm272_vm1, %v10755_v14 }
  0xc7   : > { %14552 = vst [vmem:[#allocation43_spill] sm:$0xff] %v10763_v30  ;;  %8539 = vmatmul.msk.f32.gmra.mxu2 %vm272_vm1, %v10758_v7  ;;  %v9011_v30 = vld [vmem:[%s14425_s1 + $0x28] sm:$0xf]  ;;  %v10792_v7 = vld [vmem:[%s10337_s23 + $0x19c] sm:$0xff] }
  0xc8   : > { %8440 = vmatmul.msk.f32.gmra.mxu0 %vm272_vm1, %v10766_v59  ;;  %9012 = vmatpush.msk.msra.mxu1 %vm369_vm0, %v9011_v30  ;;  %14556 = vst [vmem:[#allocation47_spill] sm:$0xff] %v10792_v7 }
  0xc9   : > { %8473 = vmatmul.msk.f32.gmra.mxu1 %vm272_vm1, %v10769_v18  ;;  %v10787_v14 = vpop.f32.mrf.mxu3  ;;  %v10802_v18 = vld [vmem:[%s10337_s23 + $0x13b] sm:$0xff] }
  0xca   : > { %v10789_v3 = vpop.f32.mrf.mxu2  ;;  %14560 = vst [vmem:[#allocation51_spill] sm:$0xff] %v10802_v18 }
  0xcb   : > { %14555 = vst [vmem:[#allocation46_spill] sm:$0xff] %v10789_v3  ;;  %v10823_v3 = vld [vmem:[%s10337_s23 + $0x144] sm:$0xff] }
  0xcc   : > { %14563 = vst [vmem:[#allocation54_spill] sm:$0xff] %v10823_v3 }
  0xcd   : > { %v10797_v59 = vpop.f32.mrf.mxu0 }
  0xce   : > { %14558 = vst [vmem:[#allocation49_spill] sm:$0xff] %v10797_v59  ;;  %v10799_v9 = vpop.f32.mrf.mxu1  ;;  %8548 = vmatmul.msk.f32.gmra.mxu3 %vm272_vm1, %v10792_v7 }
  0xcf   : > { %14559 = vst [vmem:[#allocation50_spill] sm:$0xff] %v10799_v9  ;;  %8540 = vmatmul.msk.f32.gmra.mxu2 %vm272_vm1, %v10795_v10  ;;  %v10820_v9 = vld [vmem:[%s10337_s23 + $0x1a4] sm:$0xff] }
  0xd0   : > { %8441 = vmatmul.msk.f32.gmra.mxu0 %vm272_vm1, %v10802_v18  ;;  %14562 = vst [vmem:[#allocation53_spill] sm:$0xff] %v10820_v9  ;;  %v10833_v10 = vld [vmem:[%s10337_s23 + $0x142] sm:$0xff] }
  0xd1   : > { %8474 = vmatmul.msk.f32.gmra.mxu1 %vm272_vm1, %v10805_v58  ;;  %v10815_v30 = vpop.f32.mrf.mxu3 }
  0xd2   : > { %v10817_v59 = vpop.f32.mrf.mxu2 }
  0xd3   : > { %14561 = vst [vmem:[#allocation52_spill] sm:$0xff] %v10817_v59 }
  0xd5   : > { %v10825_v22 = vpop.f32.mrf.mxu0 }
  0xd6   : > { %14564 = vst [vmem:[#allocation55_spill] sm:$0xff] %v10825_v22  ;;  %v10827_v7 = vpop.f32.mrf.mxu1  ;;  %8549 = vmatmul.msk.f32.gmra.mxu3 %vm272_vm1, %v10820_v9 }
  0xd7   : > { %14565 = vst [vmem:[#allocation56_spill] sm:$0xff] %v10827_v7  ;;  %8541 = vmatmul.msk.f32.gmra.mxu2 %vm272_vm1, %v10823_v3 }
  0xd8   : > { %8442 = vmatmul.msk.f32.gmra.mxu0 %vm272_vm1, %v10830_v34 }
  0xd9   : > { %8475 = vmatmul.msk.f32.gmra.mxu1 %vm272_vm1, %v10833_v10  ;;  %v10843_v59 = vpop.f32.mrf.mxu3 }
  0xda   : > { %v10845_v22 = vpop.f32.mrf.mxu2 }
  0xdb   : > { %14566 = vst [vmem:[#allocation57_spill] sm:$0xff] %v10845_v22 }
  0xdd   : > { %v10847_v7 = vpop.f32.mrf.mxu0 }
  0xde   : > { %14567 = vst [vmem:[#allocation58_spill] sm:$0xff] %v10847_v7  ;;  %v10849_v18 = vpop.f32.mrf.mxu1  ;;  %8584 = vmatmul.msk.f32.vlgmr.msrb.gmra.mxu3 %vm272_vm1, %v10364_v17 }
  0xdf   : > { %14568 = vst [vmem:[#allocation59_spill] sm:$0xff] %v10849_v18  ;;  %8782 = vmatmul.msk.f32.vlgmr.msrb.gmra.mxu2 %vm272_vm1, %v10398_v25 }
  0xe0   : > { %8650 = vmatmul.msk.f32.vlgmr.msrb.gmra.mxu0 %vm272_vm1, %v10361_v16 }
  0xe1   : > { %8716 = vmatmul.msk.f32.vlgmr.msrb.gmra.mxu1 %vm272_vm1, %v10358_v15  ;;  %v674_v9 = vpop.f32.mrf.mxu3 }
  0xe2   : > { %v10859_v3 = vpop.f32.mrf.mxu2  ;;  %v10862_v22 = vadd.f32 %v674_v9, %v10631_v13 }
  0xe5   : > { %v10864_v7 = vpop.f32.mrf.mxu0 }
  0xe6   : > { %v10866_v18 = vpop.f32.mrf.mxu1  ;;  %8585 = vmatmul.msk.f32.gmra.mxu3 %vm272_vm1, %v10381_v21 }
  0xe7   : > { %8783 = vmatmul.msk.f32.gmra.mxu2 %vm272_vm1, %v10415_v29 }
  0xe8   : > { %8651 = vmatmul.msk.f32.gmra.mxu0 %vm272_vm1, %v10378_v20 }
  0xe9   : > { %8717 = vmatmul.msk.f32.gmra.mxu1 %vm272_vm1, %v10375_v19  ;;  %v677_v15 = vpop.f32.mrf.mxu3 }
  0xea   : > { %v10876_v16 = vpop.f32.mrf.mxu2  ;;  %v10879_v17 = vadd.f32 %v677_v15, %v10659_v54 }
  0xed   : > { %v10881_v9 = vpop.f32.mrf.mxu0 }
  0xee   : > { %v10883_v13 = vpop.f32.mrf.mxu1  ;;  %8586 = vmatmul.msk.f32.gmra.mxu3 %vm272_vm1, %v10398_v25 }
  0xef   : > { %8784 = vmatmul.msk.f32.gmra.mxu2 %vm272_vm1, %v10432_v33 }
  0xf0   : > { %8652 = vmatmul.msk.f32.gmra.mxu0 %vm272_vm1, %v10395_v24 }
  0xf1   : > { %8718 = vmatmul.msk.f32.gmra.mxu1 %vm272_vm1, %v10392_v23  ;;  %v680_v19 = vpop.f32.mrf.mxu3 }
  0xf2   : > { %v10893_v20 = vpop.f32.mrf.mxu2  ;;  %v10896_v21 = vadd.f32 %v680_v19, %v10687_v42 }
  0xf5   : > { %v10898_v54 = vpop.f32.mrf.mxu0 }
  0xf6   : > { %v10900_v15 = vpop.f32.mrf.mxu1  ;;  %8587 = vmatmul.msk.f32.gmra.mxu3 %vm272_vm1, %v10415_v29 }
  0xf7   : > { %8785 = vmatmul.msk.f32.gmra.mxu2 %vm272_vm1, %v10449_v37 }
  0xf8   : > { %8653 = vmatmul.msk.f32.gmra.mxu0 %vm272_vm1, %v10412_v28 }
  0xf9   : > { %8719 = vmatmul.msk.f32.gmra.mxu1 %vm272_vm1, %v10409_v27  ;;  %v683_v23 = vpop.f32.mrf.mxu3 }
  0xfa   : > { %v10910_v24 = vpop.f32.mrf.mxu2  ;;  %v10913_v25 = vadd.f32 %v683_v23, %v10715_v38 }
  0xfd   : > { %v10915_v42 = vpop.f32.mrf.mxu0 }
  0xfe   : > { %v10917_v19 = vpop.f32.mrf.mxu1  ;;  %8588 = vmatmul.msk.f32.gmra.mxu3 %vm272_vm1, %v10432_v33 }
  0xff   : > { %8786 = vmatmul.msk.f32.gmra.mxu2 %vm272_vm1, %v10468_v41 }
 0x100   : > { %8654 = vmatmul.msk.f32.gmra.mxu0 %vm272_vm1, %v10429_v32 }
 0x101   : > { %8720 = vmatmul.msk.f32.gmra.mxu1 %vm272_vm1, %v10426_v31  ;;  %v686_v27 = vpop.f32.mrf.mxu3 }
 0x102   : > { %v10927_v28 = vpop.f32.mrf.mxu2  ;;  %v10930_v29 = vadd.f32 %v686_v27, %v10747_v63 }
 0x105   : > { %v10932_v38 = vpop.f32.mrf.mxu0 }
 0x106   : > { %v10934_v23 = vpop.f32.mrf.mxu1  ;;  %8589 = vmatmul.msk.f32.gmra.mxu3 %vm272_vm1, %v10449_v37 }
 0x107   : > { %8787 = vmatmul.msk.f32.gmra.mxu2 %vm272_vm1, %v10488_v45 }
 0x108   : > { %8655 = vmatmul.msk.f32.gmra.mxu0 %vm272_vm1, %v10446_v36 }
 0x109   : > { %8721 = vmatmul.msk.f32.gmra.mxu1 %vm272_vm1, %v10443_v35  ;;  %v689_v31 = vpop.f32.mrf.mxu3 }
 0x10a   : > { %v10944_v32 = vpop.f32.mrf.mxu2  ;;  %v10947_v33 = vadd.f32 %v689_v31, %v10787_v14 }
 0x10d   : > { %v10949_v63 = vpop.f32.mrf.mxu0 }
 0x10e   : > { %v10951_v27 = vpop.f32.mrf.mxu1  ;;  %8590 = vmatmul.msk.f32.gmra.mxu3 %vm272_vm1, %v10468_v41 }
 0x10f   : > { %8788 = vmatmul.msk.f32.gmra.mxu2 %vm272_vm1, %v10508_v49 }
 0x110   : > { %8656 = vmatmul.msk.f32.gmra.mxu0 %vm272_vm1, %v10465_v40 }
 0x111   : > { %8722 = vmatmul.msk.f32.gmra.mxu1 %vm272_vm1, %v10462_v39  ;;  %v692_v35 = vpop.f32.mrf.mxu3 }
 0x112   : > { %v10961_v36 = vpop.f32.mrf.mxu2  ;;  %v10964_v37 = vadd.f32 %v692_v35, %v10815_v30 }
 0x115   : > { %v10966_v14 = vpop.f32.mrf.mxu0 }
 0x116   : > { %v10968_v31 = vpop.f32.mrf.mxu1  ;;  %8591 = vmatmul.msk.f32.gmra.mxu3 %vm272_vm1, %v10488_v45 }
 0x117   : > { %8789 = vmatmul.msk.f32.gmra.mxu2 %vm272_vm1, %v10526_v53 }
 0x118   : > { %8657 = vmatmul.msk.f32.gmra.mxu0 %vm272_vm1, %v10485_v44 }
 0x119   : > { %8723 = vmatmul.msk.f32.gmra.mxu1 %vm272_vm1, %v10482_v43  ;;  %v695_v39 = vpop.f32.mrf.mxu3 }
 0x11a   : > { %v10978_v40 = vpop.f32.mrf.mxu2  ;;  %v10981_v41 = vadd.f32 %v695_v39, %v10843_v59 }
 0x11d   : > { %v10983_v30 = vpop.f32.mrf.mxu0 }
 0x11e   : > { %v10985_v35 = vpop.f32.mrf.mxu1  ;;  %8592 = vmatmul.msk.f32.gmra.mxu3 %vm272_vm1, %v10508_v49 }
 0x11f   : > { %8790 = vmatmul.msk.f32.gmra.mxu2 %vm272_vm1, %v10543_v57 }
 0x120   : > { %8658 = vmatmul.msk.f32.gmra.mxu0 %vm272_vm1, %v10505_v48 }
 0x121   : > { %8724 = vmatmul.msk.f32.gmra.mxu1 %vm272_vm1, %v10502_v47  ;;  %v920_v43 = vpop.f32.mrf.mxu3 }
 0x122   : > { %v10995_v44 = vpop.f32.mrf.mxu2  ;;  %v10998_v45 = vadd.f32 %v920_v43, %v10862_v22 }
 0x124   : > { %14569 = vst [vmem:[#allocation60_spill] sm:$0xff] %v10998_v45 }
 0x125   : > { %v11000_v59 = vpop.f32.mrf.mxu0 }
 0x126   : > { %v11002_v39 = vpop.f32.mrf.mxu1  ;;  %8593 = vmatmul.msk.f32.gmra.mxu3 %vm272_vm1, %v10526_v53 }
 0x127   : > { %8791 = vmatmul.msk.f32.gmra.mxu2 %vm272_vm1, %v10564_v62 }
 0x128   : > { %8659 = vmatmul.msk.f32.gmra.mxu0 %vm272_vm1, %v10523_v52 }
 0x129   : > { %8725 = vmatmul.msk.f32.gmra.mxu1 %vm272_vm1, %v10520_v51  ;;  %v923_v47 = vpop.f32.mrf.mxu3 }
 0x12a   : > { %v11012_v48 = vpop.f32.mrf.mxu2  ;;  %v11015_v49 = vadd.f32 %v923_v47, %v10879_v17 }
 0x12c   : > { %14570 = vst [vmem:[#allocation61_spill] sm:$0xff] %v11015_v49  ;;  %v14591_v49 = vld [vmem:[#allocation14_spill] sm:$0xff] }
 0x12d   : > { %v11017_v22 = vpop.f32.mrf.mxu0 }
 0x12e   : > { %v11019_v43 = vpop.f32.mrf.mxu1  ;;  %8594 = vmatmul.msk.f32.gmra.mxu3 %vm272_vm1, %v10543_v57 }
 0x12f   : > { %8792 = vmatmul.msk.f32.gmra.mxu2 %vm272_vm1, %v10581_v2 }
 0x130   : > { %8660 = vmatmul.msk.f32.gmra.mxu0 %vm272_vm1, %v10540_v56 }
 0x131   : > { %8726 = vmatmul.msk.f32.gmra.mxu1 %vm272_vm1, %v10537_v55  ;;  %v926_v51 = vpop.f32.mrf.mxu3 }
 0x132   : > { %v11029_v52 = vpop.f32.mrf.mxu2  ;;  %v11032_v53 = vadd.f32 %v926_v51, %v10896_v21 }
 0x134   : > { %14571 = vst [vmem:[#allocation62_spill] sm:$0xff] %v11032_v53  ;;  %v14588_v53 = vld [vmem:[#allocation38_spill] sm:$0xff] }
 0x135   : > { %v11034_v17 = vpop.f32.mrf.mxu0 }
 0x136   : > { %v11036_v47 = vpop.f32.mrf.mxu1  ;;  %8595 = vmatmul.msk.f32.gmra.mxu3 %vm272_vm1, %v10564_v62 }
 0x137   : > { %8793 = vmatmul.msk.f32.gmra.mxu2 %vm272_vm1, %v10598_v6 }
 0x138   : > { %8661 = vmatmul.msk.f32.gmra.mxu0 %vm272_vm1, %v10561_v61 }
 0x139   : > { %8727 = vmatmul.msk.f32.gmra.mxu1 %vm272_vm1, %v10558_v60  ;;  %v929_v55 = vpop.f32.mrf.mxu3 }
 0x13a   : > { %v11046_v56 = vpop.f32.mrf.mxu2  ;;  %v11049_v57 = vadd.f32 %v929_v55, %v10913_v25 }
 0x13c   : > { %14572 = vst [vmem:[#allocation63_spill] sm:$0xff] %v11049_v57 }
 0x13d   : > { %v11051_v21 = vpop.f32.mrf.mxu0 }
 0x13e   : > { %v11053_v51 = vpop.f32.mrf.mxu1  ;;  %8596 = vmatmul.msk.f32.gmra.mxu3 %vm272_vm1, %v10581_v2 }
 0x13f   : > { %8794 = vmatmul.msk.f32.gmra.mxu2 %vm272_vm1, %v10621_v12 }
 0x140   : > { %8662 = vmatmul.msk.f32.gmra.mxu0 %vm272_vm1, %v10578_v1 }
 0x141   : > { %8728 = vmatmul.msk.f32.gmra.mxu1 %vm272_vm1, %v10575_v0  ;;  %v932_v60 = vpop.f32.mrf.mxu3 }
 0x142   : > { %v11063_v61 = vpop.f32.mrf.mxu2  ;;  %v11066_v62 = vadd.f32 %v932_v60, %v10930_v29 }
 0x144   : > { %14573 = vst [vmem:[#allocation64_spill] sm:$0xff] %v11066_v62 }
 0x145   : > { %v11068_v25 = vpop.f32.mrf.mxu0 }
 0x146   : > { %v11070_v55 = vpop.f32.mrf.mxu1  ;;  %8597 = vmatmul.msk.f32.gmra.mxu3 %vm272_vm1, %v10598_v6 }
 0x147   : > { %8795 = vmatmul.msk.f32.gmra.mxu2 %vm272_vm1, %v10649_v50 }
 0x148   : > { %8663 = vmatmul.msk.f32.gmra.mxu0 %vm272_vm1, %v10595_v5 }
 0x149   : > { %8729 = vmatmul.msk.f32.gmra.mxu1 %vm272_vm1, %v10592_v4  ;;  %v935_v0 = vpop.f32.mrf.mxu3 }
 0x14a   : > { %v11080_v1 = vpop.f32.mrf.mxu2  ;;  %v11083_v2 = vadd.f32 %v935_v0, %v10947_v33 }
 0x14b   : > { %14574 = vst [vmem:[#allocation65_spill] sm:$0xff] %v11080_v1 }
 0x14c   : > { %14575 = vst [vmem:[#allocation66_spill] sm:$0xff] %v11083_v2 }
 0x14d   : > { %v11085_v29 = vpop.f32.mrf.mxu0 }
 0x14e   : > { %14576 = vst [vmem:[#allocation67_spill] sm:$0xff] %v11085_v29  ;;  %v11087_v60 = vpop.f32.mrf.mxu1  ;;  %8598 = vmatmul.msk.f32.gmra.mxu3 %vm272_vm1, %v10621_v12 }
 0x14f   : > { %14577 = vst [vmem:[#allocation68_spill] sm:$0xff] %v11087_v60  ;;  %8796 = vmatmul.msk.f32.gmra.mxu2 %vm272_vm1, %v10677_v46  ;;  %v14594_v60 = vld [vmem:[#allocation45_spill] sm:$0xff] }
 0x150   : > { %8664 = vmatmul.msk.f32.gmra.mxu0 %vm272_vm1, %v10618_v11  ;;  %v14582_v11 = vld [vmem:[#allocation19_spill] sm:$0xff] }
 0x151   : > { %8730 = vmatmul.msk.f32.gmra.mxu1 %vm272_vm1, %v10611_v8  ;;  %v938_v4 = vpop.f32.mrf.mxu3  ;;  %v14583_v8 = vld [vmem:[#allocation16_spill] sm:$0xff] }
 0x152   : > { %v11097_v5 = vpop.f32.mrf.mxu2  ;;  %v11100_v6 = vadd.f32 %v938_v4, %v10964_v37  ;;  %v14586_v4 = vld [vmem:[#allocation12_spill] sm:$0xff] }
 0x153   : > { %14578 = vst [vmem:[#allocation69_spill] sm:$0xff] %v11097_v5 }
 0x154   : > { %14579 = vst [vmem:[#allocation70_spill] sm:$0xff] %v11100_v6  ;;  %v14587_v6 = vld [vmem:[#allocation13_spill] sm:$0xff] }
 0x155   : > { %v11102_v33 = vpop.f32.mrf.mxu0  ;;  %v603_v62 = vadd.f32 %v14587_v6, %v14586_v4  ;;  %v14592_v6 = vld [vmem:[#allocation17_spill] sm:$0xff]  ;;  %v14593_v4 = vld [vmem:[#allocation18_spill] sm:$0xff] }
 0x156   : > { %14580 = vst [vmem:[#allocation71_spill] sm:$0xff] %v11102_v33  ;;  %v11104_v0 = vpop.f32.mrf.mxu1  ;;  %8599 = vmatmul.msk.f32.gmra.mxu3 %vm272_vm1, %v10649_v50 }
 0x157   : > { %14581 = vst [vmem:[#allocation72_spill] sm:$0xff] %v11104_v0  ;;  %8797 = vmatmul.msk.f32.gmra.mxu2 %vm272_vm1, %v10705_v26 }
 0x158   : > { %8665 = vmatmul.msk.f32.gmra.mxu0 %vm272_vm1, %v14582_v11  ;;  %v14589_v11 = vld [vmem:[#allocation25_spill] sm:$0xff] }
 0x159   : > { %8731 = vmatmul.msk.f32.gmra.mxu1 %vm272_vm1, %v14583_v8  ;;  %v941_v12 = vpop.f32.mrf.mxu3  ;;  %v14590_v8 = vld [vmem:[#allocation22_spill] sm:$0xff] }
 0x15a   : > { %v11114_v2 = vpop.f32.mrf.mxu2  ;;  %v11117_v37 = vadd.f32 %v941_v12, %v10981_v41  ;;  %v944_v41 = vadd.f32 %v14591_v49, %v603_v62  ;;  %v14596_v49 = vld [vmem:[#allocation28_spill] sm:$0xff] }
 0x15b   : > { %14584 = vst [vmem:[#allocation19_spill] sm:$0xff] %v11114_v2  ;;  %v606_v2 = vadd.f32 %v14593_v4, %v14592_v6  ;;  %v14597_v62 = vld [vmem:[#allocation20_spill] sm:$0xff] }
 0x15c   : > { %14585 = vst [vmem:[#allocation16_spill] sm:$0xff] %v11117_v37 }
 0x15d   : > { %v1407_v57 = vpop.f32.mrf.mxu0 }
 0x15e   : > { %v1685_v50 = vpop.f32.mrf.mxu1  ;;  %8600 = vmatmul.msk.f32.gmra.mxu3 %vm272_vm1, %v10677_v46 }
 0x15f   : > { %8798 = vmatmul.msk.f32.gmra.mxu2 %vm272_vm1, %v14588_v53 }
 0x160   : > { %8666 = vmatmul.msk.f32.gmra.mxu0 %vm272_vm1, %v14589_v11  ;;  %v14595_v11 = vld [vmem:[#allocation31_spill] sm:$0xff] }
 0x161   : > { %8732 = vmatmul.msk.f32.gmra.mxu1 %vm272_vm1, %v14590_v8  ;;  %v1129_v12 = vpop.f32.mrf.mxu3  ;;  %v945_v8 = vadd.f32 %v14597_v62, %v606_v2  ;;  %v14601_v2 = vld [vmem:[#allocation34_spill] sm:$0xff] }
 0x162   : > { %v1966_v37 = vpop.f32.mrf.mxu2  ;;  %v1225_v45 = vadd.f32 %v1129_v12, %v944_v41 }
 0x164   : > { %v1503_v0 = vadd.f32 %v1407_v57, %v1225_v45 }
 0x165   : > { %v1410_v33 = vpop.f32.mrf.mxu0 }
 0x166   : > { %v1688_v46 = vpop.f32.mrf.mxu1  ;;  %v1781_v5 = vadd.f32 %v1685_v50, %v1503_v0  ;;  %8601 = vmatmul.msk.f32.gmra.mxu3 %vm272_vm1, %v10705_v26  ;;  %v14598_v0 = vld [vmem:[#allocation23_spill] sm:$0xff]  ;;  %v14599_v50 = vld [vmem:[#allocation24_spill] sm:$0xff] }
 0x167   : > { %8799 = vmatmul.msk.f32.gmra.mxu2 %vm272_vm1, %v14594_v60  ;;  %v609_v6 = vadd.f32 %v14599_v50, %v14598_v0 }
 0x168   : > { %8667 = vmatmul.msk.f32.gmra.mxu0 %vm272_vm1, %v14595_v11  ;;  %v11141_v41 = vadd.f32 %v1966_v37, %v1781_v5  ;;  %v14600_v11 = vld [vmem:[#allocation37_spill] sm:$0xff]  ;;  %v14602_v5 = vld [vmem:[#allocation26_spill] sm:$0xff] }
 0x169   : > { %8733 = vmatmul.msk.f32.gmra.mxu1 %vm272_vm1, %v14596_v49  ;;  %v1132_v45 = vpop.f32.mrf.mxu3  ;;  %v946_v37 = vadd.f32 %v14602_v5, %v609_v6 }
 0x16a   : > { %v1969_v57 = vpop.f32.mrf.mxu2  ;;  %v1226_v12 = vadd.f32 %v1132_v45, %v945_v8  ;;  %v14604_v45 = vld [vmem:[#allocation30_spill] sm:$0xff] }
 0x16c   : > { %v1504_v26 = vadd.f32 %v1410_v33, %v1226_v12 }
 0x16d   : > { %v1413_v4 = vpop.f32.mrf.mxu0 }
 0x16e   : > { %v1691_v29 = vpop.f32.mrf.mxu1  ;;  %v1782_v1 = vadd.f32 %v1688_v46, %v1504_v26  ;;  %8602 = vmatmul.msk.f32.gmra.mxu3 %vm272_vm1, %v14588_v53  ;;  %v14603_v46 = vld [vmem:[#allocation29_spill] sm:$0xff] }
 0x16f   : > { %8800 = vmatmul.msk.f32.gmra.mxu2 %vm272_vm1, %v10805_v58  ;;  %v612_v12 = vadd.f32 %v14604_v45, %v14603_v46 }
 0x170   : > { %8668 = vmatmul.msk.f32.gmra.mxu0 %vm272_vm1, %v14600_v11  ;;  %v11154_v49 = vadd.f32 %v1969_v57, %v1782_v1  ;;  %v14605_v11 = vld [vmem:[#allocation44_spill] sm:$0xff]  ;;  %v14606_v1 = vld [vmem:[#allocation41_spill] sm:$0xff] }
 0x171   : > { %8734 = vmatmul.msk.f32.gmra.mxu1 %vm272_vm1, %v14601_v2  ;;  %v1135_v33 = vpop.f32.mrf.mxu3  ;;  %v14607_v57 = vld [vmem:[#allocation32_spill] sm:$0xff] }
 0x172   : > { %v1972_v62 = vpop.f32.mrf.mxu2  ;;  %v1227_v8 = vadd.f32 %v1135_v33, %v946_v37  ;;  %v947_v6 = vadd.f32 %v14607_v57, %v612_v12  ;;  %v14609_v33 = vld [vmem:[#allocation36_spill] sm:$0xff]  ;;  %v14613_v12 = vld [vmem:[#allocation39_spill] sm:$0xff] }
 0x174   : > { %v1505_v53 = vadd.f32 %v1413_v4, %v1227_v8 }
 0x175   : > { %v1416_v0 = vpop.f32.mrf.mxu0 }
 0x176   : > { %v1694_v50 = vpop.f32.mrf.mxu1  ;;  %v1783_v26 = vadd.f32 %v1691_v29, %v1505_v53  ;;  %8603 = vmatmul.msk.f32.gmra.mxu3 %vm272_vm1, %v14594_v60  ;;  %v14608_v29 = vld [vmem:[#allocation35_spill] sm:$0xff] }
 0x177   : > { %8801 = vmatmul.msk.f32.gmra.mxu2 %vm272_vm1, %v10833_v10  ;;  %v615_v8 = vadd.f32 %v14609_v33, %v14608_v29 }
 0x178   : > { %8669 = vmatmul.msk.f32.gmra.mxu0 %vm272_vm1, %v14605_v11  ;;  %v11167_v2 = vadd.f32 %v1972_v62, %v1783_v26  ;;  %v14610_v11 = vld [vmem:[#allocation8_spill] sm:$0xff] }
 0x179   : > { %8735 = vmatmul.msk.f32.gmra.mxu1 %vm272_vm1, %v14606_v1  ;;  %v1138_v4 = vpop.f32.mrf.mxu3  ;;  %v14611_v1 = vld [vmem:[#allocation51_spill] sm:$0xff]  ;;  %v14612_v62 = vld [vmem:[#allocation48_spill] sm:$0xff]  ;;  %v948_v26 = vadd.f32 %v14613_v12, %v615_v8  ;;  %v14619_v8 = vld [vmem:[#allocation46_spill] sm:$0xff] }
 0x17a   : > { %v1975_v5 = vpop.f32.mrf.mxu2  ;;  %v1228_v37 = vadd.f32 %v1138_v4, %v947_v6  ;;  %v14615_v4 = vld [vmem:[#allocation42_spill] sm:$0xff] }
 0x17c   : > { %v1506_v60 = vadd.f32 %v1416_v0, %v1228_v37  ;;  %v14616_v37 = vld [vmem:[#allocation43_spill] sm:$0xff] }
 0x17d   : > { %v1419_v46 = vpop.f32.mrf.mxu0 }
 0x17e   : > { %v1697_v45 = vpop.f32.mrf.mxu1  ;;  %v1784_v53 = vadd.f32 %v1694_v50, %v1506_v60  ;;  %8604 = vmatmul.msk.f32.gmra.mxu3 %vm272_vm1, %v10805_v58  ;;  %v618_v58 = vadd.f32 %v14616_v37, %v14615_v4 }
 0x17f   : > { %8802 = vmatmul.msk.f32.gmra.mxu2 %vm272_vm1, %v14610_v11 }
 0x180   : > { %8670 = vmatmul.msk.f32.gmra.mxu0 %vm272_vm1, %v14611_v1  ;;  %v11180_v57 = vadd.f32 %v1975_v5, %v1784_v53  ;;  %v14617_v1 = vld [vmem:[#allocation9_spill] sm:$0xff]  ;;  %v14618_v5 = vld [vmem:[#allocation54_spill] sm:$0xff]  ;;  %v949_v53 = vadd.f32 %v14619_v8, %v618_v58  ;;  %v14625_v58 = vld [vmem:[#allocation11_spill] sm:$0xff] }
 0x181   : > { %8736 = vmatmul.msk.f32.gmra.mxu1 %vm272_vm1, %v14612_v62  ;;  %v1141_v0 = vpop.f32.mrf.mxu3 }
 0x182   : > { %14614 = vst [vmem:[#allocation12_spill] sm:$0xff] %v11180_v57  ;;  %v1978_v6 = vpop.f32.mrf.mxu2  ;;  %v1229_v50 = vadd.f32 %v1141_v0, %v948_v26  ;;  %v14621_v0 = vld [vmem:[#allocation49_spill] sm:$0xff] }
 0x184   : > { %v1507_v29 = vadd.f32 %v1419_v46, %v1229_v50  ;;  %v14622_v50 = vld [vmem:[#allocation50_spill] sm:$0xff] }
 0x185   : > { %v1422_v33 = vpop.f32.mrf.mxu0 }
 0x186   : > { %v1700_v60 = vpop.f32.mrf.mxu1  ;;  %v1785_v11 = vadd.f32 %v1697_v45, %v1507_v29  ;;  %8605 = vmatmul.msk.f32.gmra.mxu3 %vm272_vm1, %v10833_v10  ;;  %v8572_v45 = vld [vmem:[%s10337_s23 + $0x152] sm:$0xff]  ;;  %v621_v10 = vadd.f32 %v14622_v50, %v14621_v0  ;;  %v14628_v0 = vld [vmem:[#allocation55_spill] sm:$0xff] }
 0x187   : > { %8803 = vmatmul.msk.f32.gmra.mxu2 %vm272_vm1, %v14617_v1 }
 0x188   : > { %8671 = vmatmul.msk.f32.gmra.mxu0 %vm272_vm1, %v10830_v34  ;;  %v11193_v62 = vadd.f32 %v1978_v6, %v1785_v11  ;;  %v11199_v34 = vld [vmem:[%s10337_s23 + $0x153] sm:$0xff]  ;;  %v14626_v11 = vld [vmem:[#allocation52_spill] sm:$0xff] }
 0x189   : > { %8737 = vmatmul.msk.f32.gmra.mxu1 %vm272_vm1, %v14618_v5  ;;  %v1144_v46 = vpop.f32.mrf.mxu3  ;;  %14623 = vst [vmem:[#allocation38_spill] sm:$0xff] %v11199_v34  ;;  %v14624_v6 = vld [vmem:[#allocation10_spill] sm:$0xff]  ;;  %v950_v5 = vadd.f32 %v14626_v11, %v621_v10  ;;  %v14632_v10 = vld [vmem:[#allocation57_spill] sm:$0xff] }
 0x18a   : > { %14620 = vst [vmem:[#allocation13_spill] sm:$0xff] %v11193_v62  ;;  %v1981_v12 = vpop.f32.mrf.mxu2  ;;  %v1230_v26 = vadd.f32 %v1144_v46, %v949_v53 }
 0x18c   : > { %v1508_v4 = vadd.f32 %v1422_v33, %v1230_v26  ;;  %v8771_v26 = vld [vmem:[%s10337_s23 + $0x172] sm:$0xff] }
 0x18d   : > { %v1425_v37 = vpop.f32.mrf.mxu0 }
 0x18e   : > { %v1703_v29 = vpop.f32.mrf.mxu1  ;;  %v1786_v1 = vadd.f32 %v1700_v60, %v1508_v4  ;;  %8606 = vmatmul.msk.f32.gmra.mxu3 %vm272_vm1, %v8572_v45  ;;  %v8573_v60 = vld [vmem:[%s10337_s23 + $0x15a] sm:$0xff]  ;;  %v14629_v45 = vld [vmem:[#allocation56_spill] sm:$0xff] }
 0x18f   : > { %8804 = vmatmul.msk.f32.gmra.mxu2 %vm272_vm1, %v14624_v6  ;;  %v624_v50 = vadd.f32 %v14629_v45, %v14628_v0  ;;  %v14633_v0 = vld [vmem:[#allocation58_spill] sm:$0xff]  ;;  %v14634_v45 = vld [vmem:[#allocation59_spill] sm:$0xff] }
 0x190   : > { %8672 = vmatmul.msk.f32.gmra.mxu0 %vm272_vm1, %v11199_v34  ;;  %v11209_v33 = vadd.f32 %v1981_v12, %v1786_v1  ;;  %v11216_v34 = vld [vmem:[%s10337_s23 + $0x15b] sm:$0xff] }
 0x191   : > { %8738 = vmatmul.msk.f32.gmra.mxu1 %vm272_vm1, %v14625_v58  ;;  %v1147_v8 = vpop.f32.mrf.mxu3  ;;  %14630 = vst [vmem:[#allocation22_spill] sm:$0xff] %v11216_v34  ;;  %v14631_v12 = vld [vmem:[#allocation15_spill] sm:$0xff]  ;;  %v951_v1 = vadd.f32 %v14632_v10, %v624_v50 }
 0x192   : > { %14627 = vst [vmem:[#allocation25_spill] sm:$0xff] %v11209_v33  ;;  %v1984_v53 = vpop.f32.mrf.mxu2  ;;  %v1231_v46 = vadd.f32 %v1147_v8, %v950_v5 }
 0x194   : > { %v1509_v4 = vadd.f32 %v1425_v37, %v1231_v46  ;;  %v8574_v46 = vld [vmem:[%s10337_s23 + $0x16a] sm:$0xff] }
 0x195   : > { %v1428_v6 = vpop.f32.mrf.mxu0 }
 0x196   : > { %v1706_v62 = vpop.f32.mrf.mxu1  ;;  %v1787_v58 = vadd.f32 %v1703_v29, %v1509_v4  ;;  %8607 = vmatmul.msk.f32.gmra.mxu3 %vm272_vm1, %v8573_v60  ;;  %v8772_v29 = vld [vmem:[%s10337_s23 + $0x182] sm:$0xff]  ;;  %v627_v60 = vadd.f32 %v14634_v45, %v14633_v0  ;;  %v11247_v45 = vld [vmem:[%s10337_s23 + $0x173] sm:$0xff] }
 0x197   : > { %8805 = vmatmul.msk.f32.gmra.mxu2 %vm272_vm1, %v8771_v26 }
 0x198   : > { %8673 = vmatmul.msk.f32.gmra.mxu0 %vm272_vm1, %v11216_v34  ;;  %v11225_v11 = vadd.f32 %v1984_v53, %v1787_v58  ;;  %v11232_v34 = vld [vmem:[%s10337_s23 + $0x16b] sm:$0xff]  ;;  %v952_v50 = vadd.f32 %v10859_v3, %v627_v60  ;;  %v14636_v3 = vld [vmem:[#allocation27_spill] sm:$0xff] }
 0x199   : > { %8739 = vmatmul.msk.f32.gmra.mxu1 %vm272_vm1, %v14631_v12  ;;  %v1150_v37 = vpop.f32.mrf.mxu3  ;;  %v14635_v53 = vld [vmem:[#allocation21_spill] sm:$0xff] }
 0x19a   : > { %v1987_v5 = vpop.f32.mrf.mxu2  ;;  %v1232_v8 = vadd.f32 %v1150_v37, %v951_v1  ;;  %v8773_v37 = vld [vmem:[%s10337_s23 + $0x18a] sm:$0xff] }
 0x19c   : > { %v1510_v4 = vadd.f32 %v1428_v6, %v1232_v8 }
 0x19d   : > { %v1431_v33 = vpop.f32.mrf.mxu0 }
 0x19e   : > { %v1709_v57 = vpop.f32.mrf.mxu1  ;;  %v1788_v12 = vadd.f32 %v1706_v62, %v1510_v4  ;;  %8608 = vmatmul.msk.f32.gmra.mxu3 %vm272_vm1, %v8574_v46  ;;  %v630_v62 = vadd.f32 %v10866_v18, %v10864_v7 }
 0x19f   : > { %8806 = vmatmul.msk.f32.gmra.mxu2 %vm272_vm1, %v8772_v29 }
 0x1a0   : > { %8674 = vmatmul.msk.f32.gmra.mxu0 %vm272_vm1, %v11232_v34  ;;  %v11241_v58 = vadd.f32 %v1987_v5, %v1788_v12  ;;  %v953_v5 = vadd.f32 %v10876_v16, %v630_v62  ;;  %v8774_v12 = vld [vmem:[%s10337_s23 + $0x19a] sm:$0xff]  ;;  %v14637_v16 = vld [vmem:[#allocation33_spill] sm:$0xff] }
 0x1a1   : > { %8740 = vmatmul.msk.f32.gmra.mxu1 %vm272_vm1, %v14635_v53  ;;  %v1153_v6 = vpop.f32.mrf.mxu3 }
 0x1a2   : > { %v1990_v10 = vpop.f32.mrf.mxu2  ;;  %v1233_v1 = vadd.f32 %v1153_v6, %v952_v50  ;;  %v11262_v6 = vld [vmem:[%s10337_s23 + $0x183] sm:$0xff] }
 0x1a4   : > { %v1511_v8 = vadd.f32 %v1431_v33, %v1233_v1 }
 0x1a5   : > { %v1434_v46 = vpop.f32.mrf.mxu0 }
 0x1a6   : > { %v1712_v0 = vpop.f32.mrf.mxu1  ;;  %v1789_v4 = vadd.f32 %v1709_v57, %v1511_v8  ;;  %8609 = vmatmul.msk.f32.gmra.mxu3 %vm272_vm1, %v8771_v26  ;;  %v633_v57 = vadd.f32 %v10883_v13, %v10881_v9 }
 0x1a7   : > { %8807 = vmatmul.msk.f32.gmra.mxu2 %vm272_vm1, %v8773_v37 }
 0x1a8   : > { %8675 = vmatmul.msk.f32.gmra.mxu0 %vm272_vm1, %v11247_v45  ;;  %v11256_v7 = vadd.f32 %v1990_v10, %v1789_v4  ;;  %v954_v10 = vadd.f32 %v10893_v20, %v633_v57  ;;  %v14638_v20 = vld [vmem:[#allocation40_spill] sm:$0xff] }
 0x1a9   : > { %8741 = vmatmul.msk.f32.gmra.mxu1 %vm272_vm1, %v14636_v3  ;;  %v1156_v18 = vpop.f32.mrf.mxu3 }
 0x1aa   : > { %v1993_v33 = vpop.f32.mrf.mxu2  ;;  %v1234_v60 = vadd.f32 %v1156_v18, %v953_v5  ;;  %v11277_v5 = vld [vmem:[%s10337_s23 + $0x18b] sm:$0xff] }
 0x1ac   : > { %v1512_v26 = vadd.f32 %v1434_v46, %v1234_v60  ;;  %v8775_v46 = vld [vmem:[%s10337_s23 + $0x1a2] sm:$0xff] }
 0x1ad   : > { %v1437_v53 = vpop.f32.mrf.mxu0 }
 0x1ae   : > { %v1715_v50 = vpop.f32.mrf.mxu1  ;;  %v1790_v1 = vadd.f32 %v1712_v0, %v1512_v26  ;;  %8610 = vmatmul.msk.f32.gmra.mxu3 %vm272_vm1, %v8772_v29  ;;  %v636_v29 = vadd.f32 %v10900_v15, %v10898_v54  ;;  %v8776_v26 = vld [vmem:[%s10337_s23 + $0x1b2] sm:$0xff] }
 0x1af   : > { %8808 = vmatmul.msk.f32.gmra.mxu2 %vm272_vm1, %v8774_v12 }
 0x1b0   : > { %8676 = vmatmul.msk.f32.gmra.mxu0 %vm272_vm1, %v11262_v6  ;;  %v11271_v9 = vadd.f32 %v1993_v33, %v1790_v1  ;;  %v955_v33 = vadd.f32 %v10910_v24, %v636_v29  ;;  %v14639_v24 = vld [vmem:[#allocation47_spill] sm:$0xff] }
 0x1b1   : > { %8742 = vmatmul.msk.f32.gmra.mxu1 %vm272_vm1, %v14637_v16  ;;  %v1159_v13 = vpop.f32.mrf.mxu3  ;;  %v11292_v16 = vld [vmem:[%s10337_s23 + $0x19b] sm:$0xff] }
 0x1b2   : > { %v1996_v62 = vpop.f32.mrf.mxu2  ;;  %v1235_v8 = vadd.f32 %v1159_v13, %v954_v10  ;;  %v9110_v13 = vld [vmem:[%s14425_s1 + $0x2c] sm:$0xf]  ;;  %v8777_v29 = vld [vmem:[%s10337_s23 + $0x1ba] sm:$0xff] }
 0x1b3   : > { %9111 = vmatpush.msk.msrb.mxu3 %vm369_vm0, %v9110_v13  ;;  %v8712_v13 = vld [vmem:[%s10337_s23 + $0x1b4] sm:$0xff] }
 0x1b4   : > { %v1513_v0 = vadd.f32 %v1437_v53, %v1235_v8  ;;  %v639_v53 = vadd.f32 %v10917_v19, %v10915_v42 }
 0x1b5   : > { %v1440_v4 = vpop.f32.mrf.mxu0 }
 0x1b6   : > { %v1718_v3 = vpop.f32.mrf.mxu1  ;;  %v1791_v18 = vadd.f32 %v1715_v50, %v1513_v0  ;;  %8611 = vmatmul.msk.f32.gmra.mxu3 %vm272_vm1, %v8773_v37  ;;  %v956_v42 = vadd.f32 %v10927_v28, %v639_v53  ;;  %v642_v0 = vadd.f32 %v10934_v23, %v10932_v38  ;;  %v9276_v28 = vld [vmem:[%s14425_s1 + $0x38] sm:$0xf] }
 0x1b7   : > { %8809 = vmatmul.msk.f32.gmra.mxu2 %vm272_vm1, %v8775_v46 }
 0x1b8   : > { %8677 = vmatmul.msk.f32.gmra.mxu0 %vm272_vm1, %v11277_v5  ;;  %v11286_v54 = vadd.f32 %v1996_v62, %v1791_v18  ;;  %9277 = vmatpush.msk.msrb.mxu2 %vm369_vm0, %v9276_v28  ;;  %v957_v38 = vadd.f32 %v10944_v32, %v642_v0  ;;  %v645_v32 = vadd.f32 %v10951_v27, %v10949_v63  ;;  %v8647_v28 = vld [vmem:[%s10337_s23 + $0x1bb] sm:$0xff] }
 0x1b9   : > { %8743 = vmatmul.msk.f32.gmra.mxu1 %vm272_vm1, %v14638_v20  ;;  %v1162_v15 = vpop.f32.mrf.mxu3  ;;  %v8645_v20 = vld [vmem:[%s10337_s23 + $0x1a3] sm:$0xff] }
 0x1ba   : > { %v1999_v60 = vpop.f32.mrf.mxu2  ;;  %v1236_v57 = vadd.f32 %v1162_v15, %v955_v33  ;;  %v14640_v15 = vld [vmem:[#allocation53_spill] sm:$0xff] }
 0x1bc   : > { %v1514_v37 = vadd.f32 %v1440_v4, %v1236_v57 }
 0x1bd   : > { %v1443_v50 = vpop.f32.mrf.mxu0 }
 0x1be   : > { %v1721_v1 = vpop.f32.mrf.mxu1  ;;  %v1792_v10 = vadd.f32 %v1718_v3, %v1514_v37  ;;  %8612 = vmatmul.msk.f32.gmra.mxu3 %vm272_vm1, %v8774_v12 }
 0x1bf   : > { %8810 = vmatmul.msk.f32.gmra.mxu2 %vm272_vm1, %v8776_v26 }
 0x1c0   : > { %8678 = vmatmul.msk.f32.gmra.mxu0 %vm272_vm1, %v11292_v16  ;;  %v11301_v19 = vadd.f32 %v1999_v60, %v1792_v10  ;;  %v9176_v60 = vld [vmem:[%s14425_s1 + $0x30] sm:$0xf] }
 0x1c1   : > { %8744 = vmatmul.msk.f32.gmra.mxu1 %vm272_vm1, %v14639_v24  ;;  %v1165_v62 = vpop.f32.mrf.mxu3  ;;  %9177 = vmatpush.msk.msrb.mxu0 %vm369_vm0, %v9176_v60 }
 0x1c2   : > { %v2002_v8 = vpop.f32.mrf.mxu2  ;;  %v1237_v12 = vadd.f32 %v1165_v62, %v956_v42  ;;  %v8646_v42 = vld [vmem:[%s10337_s23 + $0x1b3] sm:$0xff] }
 0x1c4   : > { %v1515_v4 = vadd.f32 %v1443_v50, %v1237_v12  ;;  %v8778_v50 = vld [vmem:[%s10337_s23 + $0x1ca] sm:$0xff] }
 0x1c5   : > { %v1446_v3 = vpop.f32.mrf.mxu0 }
 0x1c6   : > { %v1724_v18 = vpop.f32.mrf.mxu1  ;;  %v1793_v33 = vadd.f32 %v1721_v1, %v1515_v4  ;;  %8613 = vmatmul.msk.f32.gmra.mxu3 %vm272_vm1, %v8775_v46  ;;  %v9210_v46 = vld [vmem:[%s14425_s1 + $0x34] sm:$0xf] }
 0x1c7   : > { %8811 = vmatmul.msk.f32.gmra.mxu2 %vm272_vm1, %v8777_v29  ;;  %9211 = vmatpush.msk.msrb.mxu1 %vm369_vm0, %v9210_v46  ;;  %v8779_v4 = vld [vmem:[%s10337_s23 + $0x1d2] sm:$0xff]  ;;  %v11356_v46 = vld [vmem:[%s10337_s23 + $0x63] sm:$0xff] }
 0x1c8   : > { %8679 = vmatmul.msk.f32.gmra.mxu0 %vm272_vm1, %v8645_v20  ;;  %v11321_v23 = vadd.f32 %v2002_v8, %v1793_v33  ;;  %v958_v8 = vadd.f32 %v10961_v36, %v645_v32  ;;  %v8713_v33 = vld [vmem:[%s10337_s23 + $0x1bc] sm:$0xff]  ;;  %v8880_v32 = vld [vmem:[%s10337_s23 + $0x64] sm:$0xff] }
 0x1c9   : > { %8745 = vmatmul.msk.f32.gmra.mxu1 %vm272_vm1, %v14640_v15  ;;  %v1168_v57 = vpop.f32.mrf.mxu3 }
 0x1ca   : > { %v2005_v53 = vpop.f32.mrf.mxu2  ;;  %v1238_v37 = vadd.f32 %v1168_v57, %v957_v38  ;;  %v8946_v57 = vld [vmem:[%s10337_s23 + $0x19] sm:$0xff] }
 0x1cc   : > { %v1516_v1 = vadd.f32 %v1446_v3, %v1238_v37  ;;  %v648_v3 = vadd.f32 %v10968_v31, %v10966_v14 }
 0x1cd   : > { %v1449_v10 = vpop.f32.mrf.mxu0 }
 0x1ce   : > { %v1727_v24 = vpop.f32.mrf.mxu1  ;;  %v1794_v62 = vadd.f32 %v1724_v18, %v1516_v1  ;;  %8614 = vmatmul.msk.f32.gmra.mxu3 %vm272_vm1, %v8776_v26  ;;  %v959_v36 = vadd.f32 %v10978_v40, %v648_v3  ;;  %v8979_v1 = vld [vmem:[%s10337_s23 + $0x1b] sm:$0xff]  ;;  %v8980_v3 = vld [vmem:[%s10337_s23 + $0x23] sm:$0xff] }
 0x1cf   : > { %8812 = vmatmul.msk.f32.gmra.mxu2 %vm272_vm1, %v8778_v50 }
 0x1d0   : > { %8680 = vmatmul.msk.f32.gmra.mxu0 %vm272_vm1, %v8646_v42  ;;  %v11341_v63 = vadd.f32 %v2005_v53, %v1794_v62  ;;  %v8947_v62 = vld [vmem:[%s10337_s23 + $0x21] sm:$0xff] }
 0x1d1   : > { %8746 = vmatmul.msk.f32.gmra.mxu1 %vm272_vm1, %v8712_v13  ;;  %v1171_v27 = vpop.f32.mrf.mxu3  ;;  %v11372_v13 = vld [vmem:[%s10337_s23 + $0x6b] sm:$0xff] }
 0x1d2   : > { %v2008_v12 = vpop.f32.mrf.mxu2  ;;  %v1239_v0 = vadd.f32 %v1171_v27, %v958_v8  ;;  %v654_v8 = vadd.f32 %v11002_v39, %v11000_v59 }
 0x1d4   : > { %v1517_v18 = vadd.f32 %v1449_v10, %v1239_v0 }
 0x1d5   : > { %v1452_v26 = vpop.f32.mrf.mxu0 }
 0x1d6   : > { %v1730_v20 = vpop.f32.mrf.mxu1  ;;  %v1795_v15 = vadd.f32 %v1727_v24, %v1517_v18  ;;  %8615 = vmatmul.msk.f32.gmra.mxu3 %vm272_vm1, %v8777_v29  ;;  %v651_v29 = vadd.f32 %v10985_v35, %v10983_v30 }
 0x1d7   : > { %8813 = vmatmul.msk.f32.gmra.mxu2 %vm272_vm1, %v8779_v4  ;;  %v8881_v4 = vld [vmem:[%s10337_s23 + $0x6c] sm:$0xff] }
 0x1d8   : > { %8681 = vmatmul.msk.f32.gmra.mxu0 %vm272_vm1, %v8647_v28  ;;  %v11353_v14 = vadd.f32 %v2008_v12, %v1795_v15  ;;  %v960_v40 = vadd.f32 %v10995_v44, %v651_v29  ;;  %v961_v44 = vadd.f32 %v11012_v48, %v654_v8  ;;  %v11388_v28 = vld [vmem:[%s10337_s23 + $0x7b] sm:$0xff]  ;;  %v657_v15 = vadd.f32 %v11019_v43, %v11017_v22 }
 0x1d9   : > { %8747 = vmatmul.msk.f32.gmra.mxu1 %vm272_vm1, %v8713_v33  ;;  %v1174_v31 = vpop.f32.mrf.mxu3  ;;  %v8948_v33 = vld [vmem:[%s10337_s23 + $0x31] sm:$0xff] }
 0x1da   : > { %v2011_v38 = vpop.f32.mrf.mxu2  ;;  %v1240_v60 = vadd.f32 %v1174_v31, %v959_v36  ;;  %v962_v48 = vadd.f32 %v11029_v52, %v657_v15 }
 0x1dc   : > { %v1518_v53 = vadd.f32 %v1452_v26, %v1240_v60  ;;  %v8882_v60 = vld [vmem:[%s10337_s23 + $0x7c] sm:$0xff] }
 0x1dd   : > { %v1455_v37 = vpop.f32.mrf.mxu0 }
 0x1de   : > { %v1733_v50 = vpop.f32.mrf.mxu1  ;;  %v1796_v10 = vadd.f32 %v1730_v20, %v1518_v53  ;;  %8848 = vmatmul.msk.f32.vlgmr.msra.gmra.mxu3 %vm272_vm1, %v11356_v46 }
 0x1df   : > { %9046 = vmatmul.msk.f32.vlgmr.msra.gmra.mxu2 %vm272_vm1, %v8946_v57  ;;  %v8981_v57 = vld [vmem:[%s10337_s23 + $0x33] sm:$0xff] }
 0x1e0   : > { %8914 = vmatmul.msk.f32.vlgmr.msra.gmra.mxu0 %vm272_vm1, %v8880_v32  ;;  %v11369_v30 = vadd.f32 %v2011_v38, %v1796_v10  ;;  %v8949_v32 = vld [vmem:[%s10337_s23 + $0x39] sm:$0xff] }
 0x1e1   : > { %9013 = vmatmul.msk.f32.vlgmr.msra.gmra.mxu1 %vm272_vm1, %v8979_v1  ;;  %v1177_v35 = vpop.f32.mrf.mxu3  ;;  %v660_v1 = vadd.f32 %v11036_v47, %v11034_v17 }
 0x1e2   : > { %v2014_v24 = vpop.f32.mrf.mxu2  ;;  %v1241_v42 = vadd.f32 %v1177_v35, %v960_v40 }
 0x1e3   : > { %v963_v52 = vadd.f32 %v11046_v56, %v660_v1 }
 0x1e4   : > { %v1519_v27 = vadd.f32 %v1455_v37, %v1241_v42  ;;  %v8982_v42 = vld [vmem:[%s10337_s23 + $0x3b] sm:$0xff] }
 0x1e5   : > { %v1458_v12 = vpop.f32.mrf.mxu0 }
 0x1e6   : > { %v1736_v0 = vpop.f32.mrf.mxu1  ;;  %v1797_v18 = vadd.f32 %v1733_v50, %v1519_v27  ;;  %8849 = vmatmul.msk.f32.gmra.mxu3 %vm272_vm1, %v11372_v13  ;;  %v11404_v50 = vld [vmem:[%s10337_s23 + $0x83] sm:$0xff] }
 0x1e7   : > { %9047 = vmatmul.msk.f32.gmra.mxu2 %vm272_vm1, %v8947_v62 }
 0x1e8   : > { %8915 = vmatmul.msk.f32.gmra.mxu0 %vm272_vm1, %v8881_v4  ;;  %v11385_v59 = vadd.f32 %v2014_v24, %v1797_v18  ;;  %v8883_v24 = vld [vmem:[%s10337_s23 + $0x84] sm:$0xff]  ;;  %v663_v4 = vadd.f32 %v11053_v51, %v11051_v21 }
 0x1e9   : > { %9014 = vmatmul.msk.f32.gmra.mxu1 %vm272_vm1, %v8980_v3  ;;  %v1180_v39 = vpop.f32.mrf.mxu3 }
 0x1ea   : > { %v2017_v26 = vpop.f32.mrf.mxu2  ;;  %v1242_v20 = vadd.f32 %v1180_v39, %v961_v44  ;;  %v8884_v39 = vld [vmem:[%s10337_s23 + $0x94] sm:$0xff]  ;;  %v964_v56 = vadd.f32 %v11063_v61, %v663_v4  ;;  %v14641_v61 = vld [vmem:[#allocation65_spill] sm:$0xff] }
 0x1ec   : > { %v1520_v36 = vadd.f32 %v1458_v12, %v1242_v20  ;;  %v11420_v12 = vld [vmem:[%s10337_s23 + $0x93] sm:$0xff] }
 0x1ed   : > { %v1461_v31 = vpop.f32.mrf.mxu0 }
 0x1ee   : > { %v1739_v38 = vpop.f32.mrf.mxu1  ;;  %v1798_v29 = vadd.f32 %v1736_v0, %v1520_v36  ;;  %8850 = vmatmul.msk.f32.gmra.mxu3 %vm272_vm1, %v11388_v28  ;;  %v8950_v0 = vld [vmem:[%s10337_s23 + $0x49] sm:$0xff]  ;;  %v11436_v36 = vld [vmem:[%s10337_s23 + $0x9b] sm:$0xff] }
 0x1ef   : > { %9048 = vmatmul.msk.f32.gmra.mxu2 %vm272_vm1, %v8948_v33 }
 0x1f0   : > { %8916 = vmatmul.msk.f32.gmra.mxu0 %vm272_vm1, %v8882_v60  ;;  %v11401_v22 = vadd.f32 %v2017_v26, %v1798_v29  ;;  %v8983_v26 = vld [vmem:[%s10337_s23 + $0x4b] sm:$0xff] }
 0x1f1   : > { %9015 = vmatmul.msk.f32.gmra.mxu1 %vm272_vm1, %v8981_v57  ;;  %v1183_v43 = vpop.f32.mrf.mxu3 }
 0x1f2   : > { %v2020_v53 = vpop.f32.mrf.mxu2  ;;  %v1243_v37 = vadd.f32 %v1183_v43, %v962_v48  ;;  %v8885_v48 = vld [vmem:[%s10337_s23 + $0x9c] sm:$0xff]  ;;  %v8984_v43 = vld [vmem:[%s10337_s23 + $0x53] sm:$0xff] }
 0x1f4   : > { %v1521_v10 = vadd.f32 %v1461_v31, %v1243_v37  ;;  %v8951_v31 = vld [vmem:[%s10337_s23 + $0x51] sm:$0xff] }
 0x1f5   : > { %v1464_v40 = vpop.f32.mrf.mxu0 }
 0x1f6   : > { %v1742_v35 = vpop.f32.mrf.mxu1  ;;  %v1799_v62 = vadd.f32 %v1739_v38, %v1521_v10  ;;  %8851 = vmatmul.msk.f32.gmra.mxu3 %vm272_vm1, %v11404_v50  ;;  %v666_v38 = vadd.f32 %v11070_v55, %v11068_v25  ;;  %v11452_v10 = vld [vmem:[%s10337_s23 + $0xab] sm:$0xff] }
 0x1f7   : > { %9049 = vmatmul.msk.f32.gmra.mxu2 %vm272_vm1, %v8949_v32 }
 0x1f8   : > { %8917 = vmatmul.msk.f32.gmra.mxu0 %vm272_vm1, %v8883_v24  ;;  %v11417_v17 = vadd.f32 %v2020_v53, %v1799_v62  ;;  %v965_v25 = vadd.f32 %v14641_v61, %v666_v38  ;;  %v14643_v24 = vld [vmem:[#allocation68_spill] sm:$0xff] }
 0x1f9   : > { %9016 = vmatmul.msk.f32.gmra.mxu1 %vm272_vm1, %v8982_v42  ;;  %v1186_v47 = vpop.f32.mrf.mxu3 }
 0x1fa   : > { %v2023_v8 = vpop.f32.mrf.mxu2  ;;  %v1244_v27 = vadd.f32 %v1186_v47, %v963_v52 }
 0x1fc   : > { %v1522_v3 = vadd.f32 %v1464_v40, %v1244_v27  ;;  %v8952_v40 = vld [vmem:[%s10337_s23 + $0x61] sm:$0xff] }
 0x1fd   : > { %v1467_v18 = vpop.f32.mrf.mxu0 }
 0x1fe   : > { %v1745_v44 = vpop.f32.mrf.mxu1  ;;  %v1800_v20 = vadd.f32 %v1742_v35, %v1522_v3  ;;  %8852 = vmatmul.msk.f32.gmra.mxu3 %vm272_vm1, %v11420_v12  ;;  %v14642_v35 = vld [vmem:[#allocation67_spill] sm:$0xff] }
 0x1ff   : > { %9050 = vmatmul.msk.f32.gmra.mxu2 %vm272_vm1, %v8950_v0  ;;  %v669_v42 = vadd.f32 %v14643_v24, %v14642_v35  ;;  %v14644_v0 = vld [vmem:[#allocation69_spill] sm:$0xff]  ;;  %v8888_v35 = vld [vmem:[%s10337_s23 + $0xc4] sm:$0xff] }
 0x200   : > { %8918 = vmatmul.msk.f32.gmra.mxu0 %vm272_vm1, %v8884_v39  ;;  %v11433_v21 = vadd.f32 %v2023_v8, %v1800_v20  ;;  %v8886_v8 = vld [vmem:[%s10337_s23 + $0xac] sm:$0xff] }
 0x201   : > { %9017 = vmatmul.msk.f32.gmra.mxu1 %vm272_vm1, %v8983_v26  ;;  %v1189_v51 = vpop.f32.mrf.mxu3  ;;  %v966_v4 = vadd.f32 %v14644_v0, %v669_v42  ;;  %v11468_v26 = vld [vmem:[%s10337_s23 + $0xb3] sm:$0xff]  ;;  %v8953_v20 = vld [vmem:[%s10337_s23 + $0x69] sm:$0xff] }
 0x202   : > { %v2026_v33 = vpop.f32.mrf.mxu2  ;;  %v1245_v15 = vadd.f32 %v1189_v51, %v964_v56  ;;  %v14645_v56 = vld [vmem:[#allocation71_spill] sm:$0xff]  ;;  %v14646_v51 = vld [vmem:[#allocation72_spill] sm:$0xff] }
 0x204   : > { %v1523_v60 = vadd.f32 %v1467_v18, %v1245_v15 }
 0x205   : > { %v1470_v57 = vpop.f32.mrf.mxu0 }
 0x206   : > { %v1748_v29 = vpop.f32.mrf.mxu1  ;;  %v1801_v53 = vadd.f32 %v1745_v44, %v1523_v60  ;;  %8853 = vmatmul.msk.f32.gmra.mxu3 %vm272_vm1, %v11436_v36  ;;  %v8887_v60 = vld [vmem:[%s10337_s23 + $0xb4] sm:$0xff] }
 0x207   : > { %9051 = vmatmul.msk.f32.gmra.mxu2 %vm272_vm1, %v8951_v31 }
 0x208   : > { %8919 = vmatmul.msk.f32.gmra.mxu0 %vm272_vm1, %v8885_v48  ;;  %v11449_v55 = vadd.f32 %v2026_v33, %v1801_v53  ;;  %v672_v33 = vadd.f32 %v14646_v51, %v14645_v56  ;;  %v14649_v51 = vld [vmem:[#allocation61_spill] sm:$0xff] }
 0x209   : > { %9018 = vmatmul.msk.f32.gmra.mxu1 %vm272_vm1, %v8984_v43  ;;  %v1192_v37 = vpop.f32.mrf.mxu3 }
 0x20a   : > { %v2029_v32 = vpop.f32.mrf.mxu2  ;;  %v1246_v1 = vadd.f32 %v1192_v37, %v965_v25  ;;  %v11484_v25 = vld [vmem:[%s10337_s23 + $0xc3] sm:$0xff]  ;;  %v8954_v37 = vld [vmem:[%s10337_s23 + $0x79] sm:$0xff] }
 0x20c   : > { %v1524_v62 = vadd.f32 %v1470_v57, %v1246_v1  ;;  %v14647_v57 = vld [vmem:[#allocation19_spill] sm:$0xff] }
 0x20d   : > { %v1473_v52 = vpop.f32.mrf.mxu0 }
 0x20e   : > { %v1751_v47 = vpop.f32.mrf.mxu1  ;;  %v1802_v27 = vadd.f32 %v1748_v29, %v1524_v62  ;;  %8854 = vmatmul.msk.f32.gmra.mxu3 %vm272_vm1, %v11452_v10  ;;  %v967_v29 = vadd.f32 %v14647_v57, %v672_v33  ;;  %v8890_v57 = vld [vmem:[%s10337_s23 + $0xdc] sm:$0xff] }
 0x20f   : > { %9052 = vmatmul.msk.f32.gmra.mxu2 %vm272_vm1, %v8952_v40 }
 0x210   : > { %8920 = vmatmul.msk.f32.gmra.mxu0 %vm272_vm1, %v8886_v8  ;;  %v11465_v3 = vadd.f32 %v2029_v32, %v1802_v27  ;;  %v11498_v8 = vld [vmem:[%s10337_s23 + $0xcb] sm:$0xff]  ;;  %v8955_v27 = vld [vmem:[%s10337_s23 + $0x81] sm:$0xff] }
 0x211   : > { %9019 = vmatmul.msk.f32.gmra.mxu1 %vm272_vm1, %v11356_v46  ;;  %v1195_v18 = vpop.f32.mrf.mxu3 }
 0x212   : > { %v2032_v44 = vpop.f32.mrf.mxu2  ;;  %v1247_v39 = vadd.f32 %v1195_v18, %v966_v4 }
 0x214   : > { %v1525_v15 = vadd.f32 %v1473_v52, %v1247_v39  ;;  %v14648_v52 = vld [vmem:[#allocation60_spill] sm:$0xff] }
 0x215   : > { %v1476_v31 = vpop.f32.mrf.mxu0 }
 0x216   : > { %v1754_v38 = vpop.f32.mrf.mxu1  ;;  %v1803_v46 = vadd.f32 %v1751_v47, %v1525_v15  ;;  %8855 = vmatmul.msk.f32.gmra.mxu3 %vm272_vm1, %v11468_v26  ;;  %v11512_v15 = vld [vmem:[%s10337_s23 + $0xdb] sm:$0xff] }
 0x217   : > { %9053 = vmatmul.msk.f32.gmra.mxu2 %vm272_vm1, %v8953_v20 }
 0x218   : > { %8921 = vmatmul.msk.f32.gmra.mxu0 %vm272_vm1, %v8887_v60  ;;  %v11481_v48 = vadd.f32 %v2032_v44, %v1803_v46  ;;  %v8889_v44 = vld [vmem:[%s10337_s23 + $0xcc] sm:$0xff] }
 0x219   : > { %9020 = vmatmul.msk.f32.gmra.mxu1 %vm272_vm1, %v11372_v13  ;;  %v1198_v43 = vpop.f32.mrf.mxu3 }
 0x21a   : > { %v2035_v53 = vpop.f32.mrf.mxu2  ;;  %v1248_v61 = vadd.f32 %v1198_v43, %v967_v29 }
 0x21c   : > { %v1526_v32 = vadd.f32 %v1476_v31, %v1248_v61  ;;  %v8956_v31 = vld [vmem:[%s10337_s23 + $0x91] sm:$0xff] }
 0x21d   : > { %v1479_v1 = vpop.f32.mrf.mxu0  ;;  %v14650_v61 = vld [vmem:[#allocation62_spill] sm:$0xff] }
 0x21e   : > { %v1757_v40 = vpop.f32.mrf.mxu1  ;;  %v1804_v24 = vadd.f32 %v1754_v38, %v1526_v32  ;;  %8856 = vmatmul.msk.f32.gmra.mxu3 %vm272_vm1, %v11484_v25  ;;  %v11526_v32 = vld [vmem:[%s10337_s23 + $0xe3] sm:$0xff] }
 0x21f   : > { %9054 = vmatmul.msk.f32.gmra.mxu2 %vm272_vm1, %v8954_v37 }
 0x220   : > { %8922 = vmatmul.msk.f32.gmra.mxu0 %vm272_vm1, %v8888_v35  ;;  %v11494_v13 = vadd.f32 %v2035_v53, %v1804_v24 }
 0x221   : > { %9021 = vmatmul.msk.f32.gmra.mxu1 %vm272_vm1, %v11388_v28  ;;  %v1201_v42 = vpop.f32.mrf.mxu3 }
 0x222   : > { %v2038_v62 = vpop.f32.mrf.mxu2  ;;  %v1249_v47 = vadd.f32 %v1201_v42, %v14648_v52  ;;  %v8891_v42 = vld [vmem:[%s10337_s23 + $0xe4] sm:$0xff] }
 0x224   : > { %v1527_v0 = vadd.f32 %v1479_v1, %v1249_v47  ;;  %v8957_v1 = vld [vmem:[%s10337_s23 + $0x99] sm:$0xff] }
 0x225   : > { %v1482_v4 = vpop.f32.mrf.mxu0 }
 0x226   : > { %v1760_v18 = vpop.f32.mrf.mxu1  ;;  %v1805_v39 = vadd.f32 %v1757_v40, %v1527_v0  ;;  %8857 = vmatmul.msk.f32.gmra.mxu3 %vm272_vm1, %v11498_v8 }
 0x227   : > { %9055 = vmatmul.msk.f32.gmra.mxu2 %vm272_vm1, %v8955_v27  ;;  %v14651_v27 = vld [vmem:[#allocation63_spill] sm:$0xff] }
 0x228   : > { %8923 = vmatmul.msk.f32.gmra.mxu0 %vm272_vm1, %v8889_v44  ;;  %v11508_v28 = vadd.f32 %v2038_v62, %v1805_v39 }
 0x229   : > { %9022 = vmatmul.msk.f32.gmra.mxu1 %vm272_vm1, %v11404_v50  ;;  %v1204_v20 = vpop.f32.mrf.mxu3 }
 0x22a   : > { %v2041_v56 = vpop.f32.mrf.mxu2  ;;  %v1250_v33 = vadd.f32 %v1204_v20, %v14649_v51 }
 0x22c   : > { %v1528_v38 = vadd.f32 %v1482_v4, %v1250_v33  ;;  %v11540_v4 = vld [vmem:[%s10337_s23 + $0xf3] sm:$0xff] }
 0x22d   : > { %v1485_v60 = vpop.f32.mrf.mxu0 }
 0x22e   : > { %v1763_v46 = vpop.f32.mrf.mxu1  ;;  %v1806_v29 = vadd.f32 %v1760_v18, %v1528_v38  ;;  %8858 = vmatmul.msk.f32.gmra.mxu3 %vm272_vm1, %v11512_v15  ;;  %v8958_v18 = vld [vmem:[%s10337_s23 + $0xa9] sm:$0xff] }
 0x22f   : > { %9056 = vmatmul.msk.f32.gmra.mxu2 %vm272_vm1, %v8956_v31  ;;  %v14652_v38 = vld [vmem:[#allocation64_spill] sm:$0xff] }
 0x230   : > { %8924 = vmatmul.msk.f32.gmra.mxu0 %vm272_vm1, %v8890_v57  ;;  %v11522_v50 = vadd.f32 %v2041_v56, %v1806_v29  ;;  %v8892_v56 = vld [vmem:[%s10337_s23 + $0xf4] sm:$0xff] }
 0x231   : > { %9023 = vmatmul.msk.f32.gmra.mxu1 %vm272_vm1, %v11420_v12  ;;  %v1207_v43 = vpop.f32.mrf.mxu3  ;;  %v8959_v57 = vld [vmem:[%s10337_s23 + $0xb1] sm:$0xff] }
 0x232   : > { %v2044_v53 = vpop.f32.mrf.mxu2  ;;  %v1251_v37 = vadd.f32 %v1207_v43, %v14650_v61  ;;  %v8893_v61 = vld [vmem:[%s10337_s23 + $0xfc] sm:$0xff] }
 0x234   : > { %v1529_v40 = vadd.f32 %v1485_v60, %v1251_v37 }
 0x235   : > { %v1488_v35 = vpop.f32.mrf.mxu0 }
 0x236   : > { %v1766_v24 = vpop.f32.mrf.mxu1  ;;  %v1807_v62 = vadd.f32 %v1763_v46, %v1529_v40  ;;  %8859 = vmatmul.msk.f32.gmra.mxu3 %vm272_vm1, %v11526_v32  ;;  %v11554_v46 = vld [vmem:[%s10337_s23 + $0xfb] sm:$0xff] }
 0x237   : > { %9057 = vmatmul.msk.f32.gmra.mxu2 %vm272_vm1, %v8957_v1 }
 0x238   : > { %8925 = vmatmul.msk.f32.gmra.mxu0 %vm272_vm1, %v8891_v42  ;;  %v11536_v12 = vadd.f32 %v2044_v53, %v1807_v62  ;;  %v11568_v42 = vld [vmem:[%s10337_s23 + $0x10b] sm:$0xff]  ;;  %v8960_v62 = vld [vmem:[%s10337_s23 + $0xc1] sm:$0xff] }
 0x239   : > { %9024 = vmatmul.msk.f32.gmra.mxu1 %vm272_vm1, %v11436_v36  ;;  %v1210_v52 = vpop.f32.mrf.mxu3 }
 0x23a   : > { %v2047_v47 = vpop.f32.mrf.mxu2  ;;  %v1252_v0 = vadd.f32 %v1210_v52, %v14651_v27 }
 0x23c   : > { %v1530_v44 = vadd.f32 %v1488_v35, %v1252_v0  ;;  %v14653_v35 = vld [vmem:[#allocation66_spill] sm:$0xff]  ;;  %v8894_v0 = vld [vmem:[%s10337_s23 + $0x10c] sm:$0xff] }
 0x23d   : > { %v1491_v39 = vpop.f32.mrf.mxu0 }
 0x23e   : > { %v1769_v20 = vpop.f32.mrf.mxu1  ;;  %v1808_v51 = vadd.f32 %v1766_v24, %v1530_v44  ;;  %8860 = vmatmul.msk.f32.gmra.mxu3 %vm272_vm1, %v11540_v4 }
 0x23f   : > { %9058 = vmatmul.msk.f32.gmra.mxu2 %vm272_vm1, %v8958_v18 }
 0x240   : > { %8926 = vmatmul.msk.f32.gmra.mxu0 %vm272_vm1, %v8892_v56  ;;  %v11550_v36 = vadd.f32 %v2047_v47, %v1808_v51  ;;  %v11582_v51 = vld [vmem:[%s10337_s23 + $0x113] sm:$0xff] }
 0x241   : > { %9025 = vmatmul.msk.f32.gmra.mxu1 %vm272_vm1, %v11452_v10  ;;  %v1213_v33 = vpop.f32.mrf.mxu3 }
 0x242   : > { %v2050_v31 = vpop.f32.mrf.mxu2  ;;  %v1253_v60 = vadd.f32 %v1213_v33, %v14652_v38  ;;  %v8961_v33 = vld [vmem:[%s10337_s23 + $0xc9] sm:$0xff] }
 0x244   : > { %v1531_v29 = vadd.f32 %v1491_v39, %v1253_v60 }
 0x245   : > { %v1494_v43 = vpop.f32.mrf.mxu0 }
 0x246   : > { %v1772_v53 = vpop.f32.mrf.mxu1  ;;  %v1809_v37 = vadd.f32 %v1769_v20, %v1531_v29  ;;  %8861 = vmatmul.msk.f32.gmra.mxu3 %vm272_vm1, %v11554_v46  ;;  %v14654_v20 = vld [vmem:[#allocation70_spill] sm:$0xff] }
 0x247   : > { %9059 = vmatmul.msk.f32.gmra.mxu2 %vm272_vm1, %v8959_v57  ;;  %v8895_v57 = vld [vmem:[%s10337_s23 + $0x114] sm:$0xff] }
 0x248   : > { %8927 = vmatmul.msk.f32.gmra.mxu0 %vm272_vm1, %v8893_v61  ;;  %v11564_v10 = vadd.f32 %v2050_v31, %v1809_v37  ;;  %v14655_v61 = vld [vmem:[#allocation16_spill] sm:$0xff] }
 0x249   : > { %9026 = vmatmul.msk.f32.gmra.mxu1 %vm272_vm1, %v11468_v26  ;;  %v1216_v1 = vpop.f32.mrf.mxu3 }
 0x24a   : > { %v2053_v40 = vpop.f32.mrf.mxu2  ;;  %v1254_v24 = vadd.f32 %v1216_v1, %v14653_v35  ;;  %v11596_v1 = vld [vmem:[%s10337_s23 + $0x123] sm:$0xff] }
 0x24c   : > { %v1532_v52 = vadd.f32 %v1494_v43, %v1254_v24 }
 0x24d   : > { %v1497_v47 = vpop.f32.mrf.mxu0 }
 0x24e   : > { %v1775_v27 = vpop.f32.mrf.mxu1  ;;  %v1810_v18 = vadd.f32 %v1772_v53, %v1532_v52  ;;  %8862 = vmatmul.msk.f32.gmra.mxu3 %vm272_vm1, %v11568_v42  ;;  %v8896_v52 = vld [vmem:[%s10337_s23 + $0x124] sm:$0xff] }
 0x24f   : > { %9060 = vmatmul.msk.f32.gmra.mxu2 %vm272_vm1, %v8960_v62 }
 0x250   : > { %8928 = vmatmul.msk.f32.gmra.mxu0 %vm272_vm1, %v8894_v0  ;;  %v11578_v26 = vadd.f32 %v2053_v40, %v1810_v18  ;;  %v8962_v40 = vld [vmem:[%s10337_s23 + $0xd9] sm:$0xff] }
 0x251   : > { %9027 = vmatmul.msk.f32.gmra.mxu1 %vm272_vm1, %v11484_v25  ;;  %v1219_v44 = vpop.f32.mrf.mxu3 }
 0x252   : > { %v2056_v39 = vpop.f32.mrf.mxu2  ;;  %v1255_v56 = vadd.f32 %v1219_v44, %v14654_v20  ;;  %v8963_v20 = vld [vmem:[%s10337_s23 + $0xe1] sm:$0xff] }
 0x254   : > { %v1533_v31 = vadd.f32 %v1497_v47, %v1255_v56 }
 0x255   : > { %v1500_v38 = vpop.f32.mrf.mxu0 }
 0x256   : > { %v1778_v60 = vpop.f32.mrf.mxu1  ;;  %v1811_v29 = vadd.f32 %v1775_v27, %v1533_v31  ;;  %8863 = vmatmul.msk.f32.gmra.mxu3 %vm272_vm1, %v11582_v51 }
 0x257   : > { %9061 = vmatmul.msk.f32.gmra.mxu2 %vm272_vm1, %v8961_v33 }
 0x258   : > { %8929 = vmatmul.msk.f32.gmra.mxu0 %vm272_vm1, %v8895_v57  ;;  %v11592_v25 = vadd.f32 %v2056_v39, %v1811_v29  ;;  %v11612_v39 = vld [vmem:[%s10337_s23 + $0x12b] sm:$0xff]  ;;  %v11628_v29 = vld [vmem:[%s10337_s23 + $0x13b] sm:$0xff] }
 0x259   : > { %9028 = vmatmul.msk.f32.gmra.mxu1 %vm272_vm1, %v11498_v8  ;;  %v1222_v43 = vpop.f32.mrf.mxu3 }
 0x25a   : > { %v2059_v53 = vpop.f32.mrf.mxu2  ;;  %v1256_v37 = vadd.f32 %v1222_v43, %v14655_v61  ;;  %v8964_v43 = vld [vmem:[%s10337_s23 + $0xf1] sm:$0xff] }
 0x25c   : > { %v1534_v35 = vadd.f32 %v1500_v38, %v1256_v37  ;;  %v8897_v38 = vld [vmem:[%s10337_s23 + $0x12c] sm:$0xff] }
 0x25d   : > { %v2522_v24 = vpop.f32.mrf.mxu0 }
 0x25e   : > { %v3008_v62 = vpop.f32.mrf.mxu1  ;;  %v1812_v47 = vadd.f32 %v1778_v60, %v1534_v35  ;;  %8864 = vmatmul.msk.f32.gmra.mxu3 %vm272_vm1, %v11596_v1 }
 0x25f   : > { %9062 = vmatmul.msk.f32.gmra.mxu2 %vm272_vm1, %v8962_v40  ;;  %v8898_v40 = vld [vmem:[%s10337_s23 + $0x13c] sm:$0xff] }
 0x260   : > { %8930 = vmatmul.msk.f32.gmra.mxu0 %vm272_vm1, %v8896_v52  ;;  %v11606_v8 = vadd.f32 %v2059_v53, %v1812_v47  ;;  %v8965_v52 = vld [vmem:[%s10337_s23 + $0xf9] sm:$0xff] }
 0x261   : > { %9029 = vmatmul.msk.f32.gmra.mxu1 %vm272_vm1, %v11512_v15  ;;  %v2244_v27 = vpop.f32.mrf.mxu3 }
 0x262   : > { %v3220_v0 = vpop.f32.mrf.mxu2  ;;  %v2340_v18 = vadd.f32 %v2244_v27, %v11141_v41 }
 0x263   : > { %v11609_v44 = vadd.f32 %v3220_v0, %v3008_v62  ;;  %v11644_v62 = vld [vmem:[%s10337_s23 + $0x143] sm:$0xff] }
 0x264   : > { %v11615_v56 = vadd.f32 %v2522_v24, %v2340_v18  ;;  %v8899_v18 = vld [vmem:[%s10337_s23 + $0x144] sm:$0xff] }
 0x265   : > { %v2525_v33 = vpop.f32.mrf.mxu0 }
 0x266   : > { %14656 = vst [vmem:[#allocation14_spill] sm:$0xff] %v11615_v56  ;;  %v3011_v31 = vpop.f32.mrf.mxu1  ;;  %8865 = vmatmul.msk.f32.gmra.mxu3 %vm272_vm1, %v11612_v39 }
 0x267   : > { %9063 = vmatmul.msk.f32.gmra.mxu2 %vm272_vm1, %v8963_v20  ;;  %v14659_v20 = vld [vmem:[#allocation12_spill] sm:$0xff] }
 0x268   : > { %8931 = vmatmul.msk.f32.gmra.mxu0 %vm272_vm1, %v8897_v38  ;;  %v8966_v38 = vld [vmem:[%s10337_s23 + $0x109] sm:$0xff] }
 0x269   : > { %9030 = vmatmul.msk.f32.gmra.mxu1 %vm272_vm1, %v11526_v32  ;;  %v2247_v41 = vpop.f32.mrf.mxu3 }
 0x26a   : > { %v3223_v15 = vpop.f32.mrf.mxu2  ;;  %v2341_v60 = vadd.f32 %v2247_v41, %v11154_v49 }
 0x26b   : > { %v11625_v57 = vadd.f32 %v3223_v15, %v3011_v31 }
 0x26c   : > { %v11631_v53 = vadd.f32 %v2525_v33, %v2341_v60 }
 0x26d   : > { %v2528_v61 = vpop.f32.mrf.mxu0 }
 0x26e   : > { %14657 = vst [vmem:[#allocation17_spill] sm:$0xff] %v11631_v53  ;;  %v3014_v37 = vpop.f32.mrf.mxu1  ;;  %8866 = vmatmul.msk.f32.gmra.mxu3 %vm272_vm1, %v11628_v29 }
 0x26f   : > { %9064 = vmatmul.msk.f32.gmra.mxu2 %vm272_vm1, %v8964_v43  ;;  %v8900_v43 = vld [vmem:[%s10337_s23 + $0x154] sm:$0xff] }
 0x270   : > { %8932 = vmatmul.msk.f32.gmra.mxu0 %vm272_vm1, %v8898_v40  ;;  %v14662_v40 = vld [vmem:[#allocation13_spill] sm:$0xff] }
 0x271   : > { %9031 = vmatmul.msk.f32.gmra.mxu1 %vm272_vm1, %v11540_v4  ;;  %v2250_v49 = vpop.f32.mrf.mxu3 }
 0x272   : > { %v3226_v32 = vpop.f32.mrf.mxu2  ;;  %v2342_v35 = vadd.f32 %v2250_v49, %v11167_v2 }
 0x273   : > { %v11641_v24 = vadd.f32 %v3226_v32, %v3014_v37 }
 0x274   : > { %v11647_v47 = vadd.f32 %v2528_v61, %v2342_v35  ;;  %v14661_v61 = vld [vmem:[#allocation38_spill] sm:$0xff] }
 0x275   : > { %v2531_v27 = vpop.f32.mrf.mxu0  ;;  %v8967_v35 = vld [vmem:[%s10337_s23 + $0x111] sm:$0xff] }
 0x276   : > { %14658 = vst [vmem:[#allocation18_spill] sm:$0xff] %v11647_v47  ;;  %v3017_v0 = vpop.f32.mrf.mxu1  ;;  %8867 = vmatmul.msk.f32.gmra.mxu3 %vm272_vm1, %v11644_v62 }
 0x277   : > { %9065 = vmatmul.msk.f32.gmra.mxu2 %vm272_vm1, %v8965_v52 }
 0x278   : > { %8933 = vmatmul.msk.f32.gmra.mxu0 %vm272_vm1, %v8899_v18  ;;  %v8901_v18 = vld [vmem:[%s10337_s23 + $0x15c] sm:$0xff] }
 0x279   : > { %9032 = vmatmul.msk.f32.gmra.mxu1 %vm272_vm1, %v11554_v46  ;;  %v2253_v2 = vpop.f32.mrf.mxu3 }
 0x27a   : > { %v3229_v4 = vpop.f32.mrf.mxu2  ;;  %v2343_v33 = vadd.f32 %v2253_v2, %v14659_v20  ;;  %v14664_v2 = vld [vmem:[#allocation22_spill] sm:$0xff]  ;;  %v14665_v20 = vld [vmem:[#allocation25_spill] sm:$0xff] }
 0x27b   : > { %v11657_v31 = vadd.f32 %v3229_v4, %v3017_v0 }
 0x27c   : > { %v11660_v41 = vadd.f32 %v2531_v27, %v2343_v33 }
 0x27d   : > { %v2534_v15 = vpop.f32.mrf.mxu0 }
 0x27e   : > { %14660 = vst [vmem:[#allocation45_spill] sm:$0xff] %v11660_v41  ;;  %v3020_v60 = vpop.f32.mrf.mxu1  ;;  %8868 = vmatmul.msk.f32.gmra.mxu3 %vm272_vm1, %v14661_v61 }
 0x27f   : > { %9066 = vmatmul.msk.f32.gmra.mxu2 %vm272_vm1, %v8966_v38 }
 0x280   : > { %8934 = vmatmul.msk.f32.gmra.mxu0 %vm272_vm1, %v8900_v43 }
 0x281   : > { %9033 = vmatmul.msk.f32.gmra.mxu1 %vm272_vm1, %v11568_v42  ;;  %v2256_v46 = vpop.f32.mrf.mxu3 }
 0x282   : > { %v3232_v37 = vpop.f32.mrf.mxu2  ;;  %v2344_v49 = vadd.f32 %v2256_v46, %v14662_v40  ;;  %v8902_v46 = vld [vmem:[%s10337_s23 + $0x16c] sm:$0xff] }
 0x283   : > { %v11670_v32 = vadd.f32 %v3232_v37, %v3020_v60 }
 0x284   : > { %v11673_v52 = vadd.f32 %v2534_v15, %v2344_v49  ;;  %v8968_v15 = vld [vmem:[%s10337_s23 + $0x121] sm:$0xff] }
 0x285   : > { %v2537_v27 = vpop.f32.mrf.mxu0 }
 0x286   : > { %14663 = vst [vmem:[#allocation31_spill] sm:$0xff] %v11673_v52  ;;  %v3023_v0 = vpop.f32.mrf.mxu1  ;;  %8869 = vmatmul.msk.f32.gmra.mxu3 %vm272_vm1, %v14664_v2 }
 0x287   : > { %9067 = vmatmul.msk.f32.gmra.mxu2 %vm272_vm1, %v8967_v35  ;;  %v8969_v35 = vld [vmem:[%s10337_s23 + $0x129] sm:$0xff] }
 0x288   : > { %8935 = vmatmul.msk.f32.gmra.mxu0 %vm272_vm1, %v8901_v18  ;;  %v8903_v18 = vld [vmem:[%s10337_s23 + $0x174] sm:$0xff] }
 0x289   : > { %9034 = vmatmul.msk.f32.gmra.mxu1 %vm272_vm1, %v11582_v51  ;;  %v2259_v42 = vpop.f32.mrf.mxu3 }
 0x28a   : > { %v3235_v4 = vpop.f32.mrf.mxu2  ;;  %v2345_v33 = vadd.f32 %v2259_v42, %v14665_v20 }
 0x28b   : > { %v11683_v38 = vadd.f32 %v3235_v4, %v3023_v0  ;;  %v8970_v4 = vld [vmem:[%s10337_s23 + $0x139] sm:$0xff] }
 0x28c   : > { %v11686_v60 = vadd.f32 %v2537_v27, %v2345_v33 }
 0x28d   : > { %v2540_v43 = vpop.f32.mrf.mxu0 }
 0x28e   : > { %14666 = vst [vmem:[#allocation28_spill] sm:$0xff] %v11686_v60  ;;  %v3026_v61 = vpop.f32.mrf.mxu1  ;;  %8870 = vmatmul.msk.f32.gmra.mxu3 %vm272_vm1, %v11232_v34 }
 0x28f   : > { %9068 = vmatmul.msk.f32.gmra.mxu2 %vm272_vm1, %v8968_v15  ;;  %v8904_v15 = vld [vmem:[%s10337_s23 + $0x184] sm:$0xff] }
 0x290   : > { %8936 = vmatmul.msk.f32.gmra.mxu0 %vm272_vm1, %v8902_v46  ;;  %v8971_v46 = vld [vmem:[%s10337_s23 + $0x141] sm:$0xff] }
 0x291   : > { %9035 = vmatmul.msk.f32.gmra.mxu1 %vm272_vm1, %v11596_v1  ;;  %v2262_v51 = vpop.f32.mrf.mxu3 }
 0x292   : > { %v3238_v37 = vpop.f32.mrf.mxu2  ;;  %v2346_v40 = vadd.f32 %v2262_v51, %v11225_v11 }
 0x293   : > { %v11696_v49 = vadd.f32 %v3238_v37, %v3026_v61 }
 0x294   : > { %v11699_v27 = vadd.f32 %v2540_v43, %v2346_v40  ;;  %v8905_v40 = vld [vmem:[%s10337_s23 + $0x18c] sm:$0xff] }
 0x295   : > { %v2543_v0 = vpop.f32.mrf.mxu0 }
 0x296   : > { %14667 = vst [vmem:[#allocation20_spill] sm:$0xff] %v11699_v27  ;;  %v3029_v34 = vpop.f32.mrf.mxu1  ;;  %8871 = vmatmul.msk.f32.gmra.mxu3 %vm272_vm1, %v11247_v45 }
 0x297   : > { %9069 = vmatmul.msk.f32.gmra.mxu2 %vm272_vm1, %v8969_v35 }
 0x298   : > { %8937 = vmatmul.msk.f32.gmra.mxu0 %vm272_vm1, %v8903_v18 }
 0x299   : > { %9036 = vmatmul.msk.f32.gmra.mxu1 %vm272_vm1, %v11612_v39  ;;  %v2265_v11 = vpop.f32.mrf.mxu3 }
 0x29a   : > { %v3241_v1 = vpop.f32.mrf.mxu2  ;;  %v2347_v2 = vadd.f32 %v2265_v11, %v11241_v58 }
 0x29b   : > { %v11709_v42 = vadd.f32 %v3241_v1, %v3029_v34  ;;  %v8972_v34 = vld [vmem:[%s10337_s23 + $0x151] sm:$0xff]  ;;  %v8906_v1 = vld [vmem:[%s10337_s23 + $0x19c] sm:$0xff] }
 0x29c   : > { %v11712_v20 = vadd.f32 %v2543_v0, %v2347_v2  ;;  %v9005_v2 = vld [vmem:[%s10337_s23 + $0x153] sm:$0xff] }
 0x29d   : > { %v2546_v33 = vpop.f32.mrf.mxu0 }
 0x29e   : > { %14668 = vst [vmem:[#allocation23_spill] sm:$0xff] %v11712_v20  ;;  %v3032_v45 = vpop.f32.mrf.mxu1  ;;  %8872 = vmatmul.msk.f32.gmra.mxu3 %vm272_vm1, %v11262_v6 }
 0x29f   : > { %9070 = vmatmul.msk.f32.gmra.mxu2 %vm272_vm1, %v8970_v4 }
 0x2a0   : > { %8938 = vmatmul.msk.f32.gmra.mxu0 %vm272_vm1, %v8904_v15  ;;  %v8973_v15 = vld [vmem:[%s10337_s23 + $0x159] sm:$0xff] }
 0x2a1   : > { %9037 = vmatmul.msk.f32.gmra.mxu1 %vm272_vm1, %v11628_v29  ;;  %v2268_v58 = vpop.f32.mrf.mxu3 }
 0x2a2   : > { %v3244_v39 = vpop.f32.mrf.mxu2  ;;  %v2348_v43 = vadd.f32 %v2268_v58, %v11256_v7 }
 0x2a3   : > { %v11722_v61 = vadd.f32 %v3244_v39, %v3032_v45  ;;  %v8841_v45 = vld [vmem:[%s10337_s23 + $0x1a3] sm:$0xff] }
 0x2a4   : > { %v11725_v51 = vadd.f32 %v2546_v33, %v2348_v43  ;;  %v8907_v43 = vld [vmem:[%s10337_s23 + $0x1a4] sm:$0xff] }
 0x2a5   : > { %v2549_v37 = vpop.f32.mrf.mxu0 }
 0x2a6   : > { %14669 = vst [vmem:[#allocation24_spill] sm:$0xff] %v11725_v51  ;;  %v3035_v6 = vpop.f32.mrf.mxu1  ;;  %8873 = vmatmul.msk.f32.gmra.mxu3 %vm272_vm1, %v11277_v5 }
 0x2a7   : > { %9071 = vmatmul.msk.f32.gmra.mxu2 %vm272_vm1, %v8971_v46  ;;  %v9006_v46 = vld [vmem:[%s10337_s23 + $0x15b] sm:$0xff] }
 0x2a8   : > { %8939 = vmatmul.msk.f32.gmra.mxu0 %vm272_vm1, %v8905_v40 }
 0x2a9   : > { %9038 = vmatmul.msk.f32.gmra.mxu1 %vm272_vm1, %v11644_v62  ;;  %v2271_v7 = vpop.f32.mrf.mxu3 }
 0x2aa   : > { %v3247_v29 = vpop.f32.mrf.mxu2  ;;  %v2349_v35 = vadd.f32 %v2271_v7, %v11271_v9  ;;  %v8842_v7 = vld [vmem:[%s10337_s23 + $0x1b3] sm:$0xff] }
 0x2ab   : > { %v11735_v0 = vadd.f32 %v3247_v29, %v3035_v6  ;;  %v8974_v29 = vld [vmem:[%s10337_s23 + $0x169] sm:$0xff] }
 0x2ac   : > { %v11738_v18 = vadd.f32 %v2549_v37, %v2349_v35 }
 0x2ad   : > { %v2552_v11 = vpop.f32.mrf.mxu0 }
 0x2ae   : > { %14670 = vst [vmem:[#allocation37_spill] sm:$0xff] %v11738_v18  ;;  %v3038_v5 = vpop.f32.mrf.mxu1  ;;  %8874 = vmatmul.msk.f32.gmra.mxu3 %vm272_vm1, %v11292_v16 }
 0x2af   : > { %9072 = vmatmul.msk.f32.gmra.mxu2 %vm272_vm1, %v8972_v34 }
 0x2b0   : > { %8940 = vmatmul.msk.f32.gmra.mxu0 %vm272_vm1, %v8906_v1  ;;  %v9007_v1 = vld [vmem:[%s10337_s23 + $0x16b] sm:$0xff] }
 0x2b1   : > { %9039 = vmatmul.msk.f32.gmra.mxu1 %vm272_vm1, %v9005_v2  ;;  %v2274_v9 = vpop.f32.mrf.mxu3 }
 0x2b2   : > { %v3250_v62 = vpop.f32.mrf.mxu2  ;;  %v2350_v4 = vadd.f32 %v2274_v9, %v11286_v54  ;;  %v9342_v9 = vld [vmem:[%s14425_s1 + $0x3c] sm:$0xf] }
 0x2b3   : > { %v11748_v33 = vadd.f32 %v3250_v62, %v3038_v5  ;;  %v8908_v5 = vld [vmem:[%s10337_s23 + $0x1b4] sm:$0xff]  ;;  %9343 = vmatpush.msk.msra.mxu3 %vm369_vm0, %v9342_v9 }
 0x2b4   : > { %v11752_v58 = vadd.f32 %v2552_v11, %v2350_v4 }
 0x2b5   : > { %v2555_v39 = vpop.f32.mrf.mxu0 }
 0x2b6   : > { %14671 = vst [vmem:[#allocation34_spill] sm:$0xff] %v11752_v58  ;;  %v3041_v16 = vpop.f32.mrf.mxu1  ;;  %8875 = vmatmul.msk.f32.gmra.mxu3 %vm272_vm1, %v8841_v45  ;;  %v8843_v45 = vld [vmem:[%s10337_s23 + $0x1bb] sm:$0xff] }
 0x2b7   : > { %9073 = vmatmul.msk.f32.gmra.mxu2 %vm272_vm1, %v8973_v15  ;;  %v8975_v15 = vld [vmem:[%s10337_s23 + $0x171] sm:$0xff] }
 0x2b8   : > { %8941 = vmatmul.msk.f32.gmra.mxu0 %vm272_vm1, %v8907_v43 }
 0x2b9   : > { %9040 = vmatmul.msk.f32.gmra.mxu1 %vm272_vm1, %v9006_v46  ;;  %v2277_v54 = vpop.f32.mrf.mxu3  ;;  %v8909_v46 = vld [vmem:[%s10337_s23 + $0x1bc] sm:$0xff] }
 0x2ba   : > { %v3253_v37 = vpop.f32.mrf.mxu2  ;;  %v2351_v6 = vadd.f32 %v2277_v54, %v11301_v19  ;;  %v9008_v54 = vld [vmem:[%s10337_s23 + $0x173] sm:$0xff] }
 0x2bb   : > { %v11761_v40 = vadd.f32 %v3253_v37, %v3041_v16 }
 0x2bc   : > { %v11765_v35 = vadd.f32 %v2555_v39, %v2351_v6  ;;  %v9509_v6 = vld [vmem:[%s14425_s1 + $0x4c] sm:$0xf] }
 0x2bd   : > { %v2558_v34 = vpop.f32.mrf.mxu0  ;;  %9510 = vmatpush.msk.msra.mxu2 %vm369_vm0, %v9509_v6 }
 0x2be   : > { %14672 = vst [vmem:[#allocation26_spill] sm:$0xff] %v11765_v35  ;;  %v3044_v11 = vpop.f32.mrf.mxu1  ;;  %8876 = vmatmul.msk.f32.gmra.mxu3 %vm272_vm1, %v8842_v7  ;;  %v9408_v7 = vld [vmem:[%s14425_s1 + $0x40] sm:$0xf] }
 0x2bf   : > { %9074 = vmatmul.msk.f32.gmra.mxu2 %vm272_vm1, %v8974_v29  ;;  %v9474_v29 = vld [vmem:[%s14425_s1 + $0x44] sm:$0xf]  ;;  %9409 = vmatpush.msk.msra.mxu0 %vm369_vm0, %v9408_v7  ;;  %v8911_v7 = vld [vmem:[%s10337_s23 + $0x1d4] sm:$0xff] }
 0x2c0   : > { %8942 = vmatmul.msk.f32.gmra.mxu0 %vm272_vm1, %v8908_v5  ;;  %v8844_v5 = vld [vmem:[%s10337_s23 + $0x1cb] sm:$0xff]  ;;  %9475 = vmatpush.msk.msra.mxu1 %vm369_vm0, %v9474_v29 }
 0x2c1   : > { %9041 = vmatmul.msk.f32.gmra.mxu1 %vm272_vm1, %v9007_v1  ;;  %v2280_v19 = vpop.f32.mrf.mxu3  ;;  %v8976_v1 = vld [vmem:[%s10337_s23 + $0x181] sm:$0xff]  ;;  %v9010_v29 = vld [vmem:[%s10337_s23 + $0x18b] sm:$0xff] }
 0x2c2   : > { %v3256_v2 = vpop.f32.mrf.mxu2  ;;  %v2352_v62 = vadd.f32 %v2280_v19, %v11321_v23 }
 0x2c3   : > { %v11777_v4 = vadd.f32 %v3256_v2, %v3044_v11 }
 0x2c4   : > { %v11782_v39 = vadd.f32 %v2558_v34, %v2352_v62  ;;  %v8910_v62 = vld [vmem:[%s10337_s23 + $0x1cc] sm:$0xff] }
 0x2c5   : > { %14673 = vst [vmem:[#allocation29_spill] sm:$0xff] %v11777_v4  ;;  %v2561_v16 = vpop.f32.mrf.mxu0  ;;  %v9081_v4 = vld [vmem:[%s10337_s23 + $0x3d] sm:$0xff] }
 0x2c6   : > { %14674 = vst [vmem:[#allocation30_spill] sm:$0xff] %v11782_v39  ;;  %v3047_v43 = vpop.f32.mrf.mxu1  ;;  %8877 = vmatmul.msk.f32.gmra.mxu3 %vm272_vm1, %v8843_v45 }
 0x2c7   : > { %9075 = vmatmul.msk.f32.gmra.mxu2 %vm272_vm1, %v8975_v15 }
 0x2c8   : > { %8943 = vmatmul.msk.f32.gmra.mxu0 %vm272_vm1, %v8909_v46  ;;  %v8845_v46 = vld [vmem:[%s10337_s23 + $0x1d3] sm:$0xff] }
 0x2c9   : > { %9042 = vmatmul.msk.f32.gmra.mxu1 %vm272_vm1, %v9008_v54  ;;  %v2283_v23 = vpop.f32.mrf.mxu3  ;;  %v8977_v54 = vld [vmem:[%s10337_s23 + $0x189] sm:$0xff] }
 0x2ca   : > { %v3259_v37 = vpop.f32.mrf.mxu2  ;;  %v2353_v34 = vadd.f32 %v2283_v23, %v11341_v63  ;;  %v9009_v63 = vld [vmem:[%s10337_s23 + $0x183] sm:$0xff] }
 0x2cb   : > { %v11800_v11 = vadd.f32 %v3259_v37, %v3047_v43 }
 0x2cc   : > { %v11807_v19 = vadd.f32 %v2561_v16, %v2353_v34 }
 0x2cd   : > { %14675 = vst [vmem:[#allocation44_spill] sm:$0xff] %v11800_v11  ;;  %v2564_v2 = vpop.f32.mrf.mxu0 }
 0x2ce   : > { %14676 = vst [vmem:[#allocation41_spill] sm:$0xff] %v11807_v19  ;;  %v3050_v9 = vpop.f32.mrf.mxu1  ;;  %8878 = vmatmul.msk.f32.gmra.mxu3 %vm272_vm1, %v8844_v5 }
 0x2cf   : > { %9076 = vmatmul.msk.f32.gmra.mxu2 %vm272_vm1, %v8976_v1 }
 0x2d0   : > { %8944 = vmatmul.msk.f32.gmra.mxu0 %vm272_vm1, %v8910_v62 }
 0x2d1   : > { %9043 = vmatmul.msk.f32.gmra.mxu1 %vm272_vm1, %v9009_v63  ;;  %v2286_v45 = vpop.f32.mrf.mxu3 }
 0x2d2   : > { %v3262_v15 = vpop.f32.mrf.mxu2  ;;  %v2354_v43 = vadd.f32 %v2286_v45, %v11353_v14 }
 0x2d3   : > { %v11816_v16 = vadd.f32 %v3262_v15, %v3050_v9  ;;  %v11833_v9 = vld [vmem:[%s10337_s23 + $0x4d] sm:$0xff] }
 0x2d4   : > { %v11820_v23 = vadd.f32 %v2564_v2, %v2354_v43  ;;  %v9078_v2 = vld [vmem:[%s10337_s23 + $0x1d] sm:$0xff]  ;;  %v9144_v15 = vld [vmem:[%s10337_s23 + $0x49] sm:$0xff] }
 0x2d5   : > { %14677 = vst [vmem:[#allocation32_spill] sm:$0xff] %v11816_v16  ;;  %v2567_v37 = vpop.f32.mrf.mxu0 }
 0x2d6   : > { %14678 = vst [vmem:[#allocation35_spill] sm:$0xff] %v11820_v23  ;;  %v3053_v6 = vpop.f32.mrf.mxu1  ;;  %8879 = vmatmul.msk.f32.gmra.mxu3 %vm272_vm1, %v8845_v46 }
 0x2d7   : > { %9077 = vmatmul.msk.f32.gmra.mxu2 %vm272_vm1, %v8977_v54 }
 0x2d8   : > { %8945 = vmatmul.msk.f32.gmra.mxu0 %vm272_vm1, %v8911_v7  ;;  %v11849_v7 = vld [vmem:[%s10337_s23 + $0x55] sm:$0xff] }
 0x2d9   : > { %9044 = vmatmul.msk.f32.gmra.mxu1 %vm272_vm1, %v9010_v29  ;;  %v2289_v14 = vpop.f32.mrf.mxu3 }
 0x2da   : > { %v3265_v34 = vpop.f32.mrf.mxu2  ;;  %v2355_v5 = vadd.f32 %v2289_v14, %v11369_v30  ;;  %v10050_v30 = vld [vmem:[%s10337_s23 + $0x4b] sm:$0xff] }
 0x2db   : > { %v11829_v1 = vadd.f32 %v3265_v34, %v3053_v6  ;;  %v9079_v6 = vld [vmem:[%s10337_s23 + $0x25] sm:$0xff] }
 0x2dc   : > { %v11835_v62 = vadd.f32 %v2567_v37, %v2355_v5  ;;  %v9145_v5 = vld [vmem:[%s10337_s23 + $0x51] sm:$0xff] }
 0x2dd   : > { %14679 = vst [vmem:[#allocation36_spill] sm:$0xff] %v11829_v1  ;;  %v2570_v63 = vpop.f32.mrf.mxu0  ;;  %v2654_v1 = vsel %vm2650_vm2, %v11647_v47, 0.0 }
 0x2de   : > { %14680 = vst [vmem:[#allocation8_spill] sm:$0xff] %v11835_v62  ;;  %v3056_v45 = vpop.f32.mrf.mxu1  ;;  %9112 = vmatmul.msk.f32.vlgmr.msrb.gmra.mxu3 %vm272_vm1, %v9078_v2  ;;  %v2721_v2 = vmul.f32 %v11631_v53, %v11631_v53 }
 0x2df   : > { %9278 = vmatmul.msk.f32.vlgmr.msrb.gmra.mxu2 %vm272_vm1, %v11833_v9 }
 0x2e0   : > { %9178 = vmatmul.msk.f32.vlgmr.msrb.gmra.mxu0 %vm272_vm1, %v9144_v15 }
 0x2e1   : > { %9212 = vmatmul.msk.f32.vlgmr.msrb.gmra.mxu1 %vm272_vm1, %v10050_v30  ;;  %v2292_v43 = vpop.f32.mrf.mxu3  ;;  %v2652_v30 = vsel %vm2650_vm2, %v11631_v53, 0.0  ;;  %v2723_v53 = vmul.f32 %v11660_v41, %v11660_v41 }
 0x2e2   : > { %v3268_v46 = vpop.f32.mrf.mxu2  ;;  %v2356_v54 = vadd.f32 %v2292_v43, %v11385_v59  ;;  %v10051_v59 = vld [vmem:[%s10337_s23 + $0x53] sm:$0xff]  ;;  %v2722_v43 = vmul.f32 %v11647_v47, %v11647_v47  ;;  %v2656_v47 = vsel %vm2650_vm2, %v11660_v41, 0.0 }
 0x2e3   : > { %v11845_v37 = vadd.f32 %v3268_v46, %v3056_v45 }
 0x2e4   : > { %v11851_v29 = vadd.f32 %v2570_v63, %v2356_v54  ;;  %v2720_v63 = vmul.f32 %v11615_v56, %v11615_v56 }
 0x2e5   : > { %14681 = vst [vmem:[#allocation51_spill] sm:$0xff] %v11845_v37  ;;  %v2573_v14 = vpop.f32.mrf.mxu0  ;;  %v2753_v37 = vsel %vm2650_vm2, %v2721_v2, 0.0  ;;  %v2755_v2 = vsel %vm2650_vm2, %v2722_v43, 0.0  ;;  %v2658_v43 = vsel %vm2650_vm2, %v11673_v52, 0.0 }
 0x2e6   : > { %14682 = vst [vmem:[#allocation48_spill] sm:$0xff] %v11851_v29  ;;  %v3059_v34 = vpop.f32.mrf.mxu1  ;;  %9113 = vmatmul.msk.f32.gmra.mxu3 %vm272_vm1, %v9079_v6  ;;  %v2651_v6 = vsel %vm2650_vm2, %v11615_v56, 0.0  ;;  %v2724_v56 = vmul.f32 %v11673_v52, %v11673_v52 }
 0x2e7   : > { %9279 = vmatmul.msk.f32.gmra.mxu2 %vm272_vm1, %v11849_v7 }
 0x2e8   : > { %9179 = vmatmul.msk.f32.gmra.mxu0 %vm272_vm1, %v9145_v5  ;;  %v9080_v5 = vld [vmem:[%s10337_s23 + $0x35] sm:$0xff] }
 0x2e9   : > { %9213 = vmatmul.msk.f32.gmra.mxu1 %vm272_vm1, %v10051_v59  ;;  %v2295_v45 = vpop.f32.mrf.mxu3  ;;  %v11875_v59 = vld [vmem:[%s10337_s23 + $0x65] sm:$0xff] }
 0x2ea   : > { %v3271_v15 = vpop.f32.mrf.mxu2  ;;  %v2357_v46 = vadd.f32 %v2295_v45, %v11401_v22  ;;  %v9146_v45 = vld [vmem:[%s10337_s23 + $0x61] sm:$0xff] }
 0x2eb   : > { %v11869_v54 = vadd.f32 %v3271_v15, %v3059_v34  ;;  %v2653_v15 = vadd.f32 %v2652_v30, %v2651_v6  ;;  %v10052_v30 = vld [vmem:[%s10337_s23 + $0x63] sm:$0xff]  ;;  %v2725_v6 = vmul.f32 %v11686_v60, %v11686_v60 }
 0x2ec   : > { %v11882_v16 = vadd.f32 %v2573_v14, %v2357_v46 }
 0x2ed   : > { %14683 = vst [vmem:[#allocation39_spill] sm:$0xff] %v11869_v54  ;;  %v2576_v22 = vpop.f32.mrf.mxu0  ;;  %v2752_v54 = vsel %vm2650_vm2, %v2720_v63, 0.0  ;;  %v2655_v46 = vadd.f32 %v2654_v1, %v2653_v15  ;;  %v2757_v63 = vsel %vm2650_vm2, %v2723_v53, 0.0  ;;  %v2726_v15 = vmul.f32 %v11699_v27, %v11699_v27 }
 0x2ee   : > { %14684 = vst [vmem:[#allocation42_spill] sm:$0xff] %v11882_v16  ;;  %v3062_v34 = vpop.f32.mrf.mxu1  ;;  %9114 = vmatmul.msk.f32.gmra.mxu3 %vm272_vm1, %v9080_v5  ;;  %v2754_v14 = vadd.f32 %v2753_v37, %v2752_v54  ;;  %v2759_v37 = vsel %vm2650_vm2, %v2724_v56, 0.0  ;;  %v2761_v56 = vsel %vm2650_vm2, %v2725_v6, 0.0  ;;  %v2664_v6 = vsel %vm2650_vm2, %v11712_v20, 0.0 }
 0x2ef   : > { %9280 = vmatmul.msk.f32.gmra.mxu2 %vm272_vm1, %v11875_v59  ;;  %v2657_v41 = vadd.f32 %v2656_v47, %v2655_v46  ;;  %v2662_v47 = vsel %vm2650_vm2, %v11699_v27, 0.0  ;;  %v12188_v27 = vld [vmem:[%s10337_s23 + $0xd9] sm:$0xff] }
 0x2f0   : > { %9180 = vmatmul.msk.f32.gmra.mxu0 %vm272_vm1, %v9146_v45  ;;  %v2756_v5 = vadd.f32 %v2755_v2, %v2754_v14  ;;  %v2660_v45 = vsel %vm2650_vm2, %v11686_v60, 0.0  ;;  %v11912_v2 = vld [vmem:[%s10337_s23 + $0x6d] sm:$0xff]  ;;  %v2727_v14 = vmul.f32 %v11712_v20, %v11712_v20 }
 0x2f1   : > { %9214 = vmatmul.msk.f32.gmra.mxu1 %vm272_vm1, %v10052_v30  ;;  %v2298_v1 = vpop.f32.mrf.mxu3  ;;  %v2659_v11 = vadd.f32 %v2658_v43, %v2657_v41  ;;  %v2728_v41 = vmul.f32 %v11725_v51, %v11725_v51  ;;  %v2763_v43 = vsel %vm2650_vm2, %v2726_v15, 0.0 }
 0x2f2   : > { %v3274_v54 = vpop.f32.mrf.mxu2  ;;  %v2358_v53 = vadd.f32 %v2298_v1, %v11417_v17  ;;  %v2758_v52 = vadd.f32 %v2757_v63, %v2756_v5 }
 0x2f3   : > { %v11908_v30 = vadd.f32 %v3274_v54, %v3062_v34  ;;  %v9147_v34 = vld [vmem:[%s10337_s23 + $0x69] sm:$0xff]  ;;  %v2661_v63 = vadd.f32 %v2660_v45, %v2659_v11  ;;  %v2666_v11 = vsel %vm2650_vm2, %v11725_v51, 0.0  ;;  %v2767_v15 = vsel %vm2650_vm2, %v2728_v41, 0.0  ;;  %v11947_v51 = vld [vmem:[%s10337_s23 + $0x7d] sm:$0xff] }
 0x2f4   : > { %v11919_v46 = vadd.f32 %v2576_v22, %v2358_v53  ;;  %v2760_v1 = vadd.f32 %v2759_v37, %v2758_v52  ;;  %v10053_v54 = vld [vmem:[%s10337_s23 + $0x6b] sm:$0xff]  ;;  %v2765_v52 = vsel %vm2650_vm2, %v2727_v14, 0.0  ;;  %v2729_v37 = vmul.f32 %v11738_v18, %v11738_v18 }
 0x2f5   : > { %v2579_v60 = vpop.f32.mrf.mxu0  ;;  %v2663_v5 = vadd.f32 %v2662_v47, %v2661_v63  ;;  %v2668_v47 = vsel %vm2650_vm2, %v11738_v18, 0.0  ;;  %v2670_v41 = vsel %vm2650_vm2, %v11752_v58, 0.0 }
 0x2f6   : > { %14685 = vst [vmem:[#allocation43_spill] sm:$0xff] %v11919_v46  ;;  %v3065_v17 = vpop.f32.mrf.mxu1  ;;  %9115 = vmatmul.msk.f32.gmra.mxu3 %vm272_vm1, %v9081_v4  ;;  %v2762_v22 = vadd.f32 %v2761_v56, %v2760_v1 }
 0x2f7   : > { %9281 = vmatmul.msk.f32.gmra.mxu2 %vm272_vm1, %v11912_v2  ;;  %v2665_v45 = vadd.f32 %v2664_v6, %v2663_v5  ;;  %v2731_v6 = vmul.f32 %v11765_v35, %v11765_v35 }
 0x2f8   : > { %9181 = vmatmul.msk.f32.gmra.mxu0 %vm272_vm1, %v9147_v34  ;;  %v2764_v4 = vadd.f32 %v2763_v43, %v2762_v22  ;;  %v2730_v34 = vmul.f32 %v11752_v58, %v11752_v58  ;;  %v2769_v43 = vsel %vm2650_vm2, %v2729_v37, 0.0  ;;  %v12164_v58 = vld [vmem:[%s10337_s23 + $0xc9] sm:$0xff] }
 0x2f9   : > { %9215 = vmatmul.msk.f32.gmra.mxu1 %vm272_vm1, %v10053_v54  ;;  %v2301_v53 = vpop.f32.mrf.mxu3  ;;  %v2667_v54 = vadd.f32 %v2666_v11, %v2665_v45  ;;  %v2732_v11 = vmul.f32 %v11782_v39, %v11782_v39 }
 0x2fa   : > { %v3277_v56 = vpop.f32.mrf.mxu2  ;;  %v2359_v14 = vadd.f32 %v2301_v53, %v11433_v21  ;;  %v2766_v63 = vadd.f32 %v2765_v52, %v2764_v4  ;;  %v11957_v21 = vld [vmem:[%s10337_s23 + $0x79] sm:$0xff]  ;;  %v2771_v37 = vsel %vm2650_vm2, %v2730_v34, 0.0  ;;  %v2672_v4 = vsel %vm2650_vm2, %v11765_v35, 0.0  ;;  %v11986_v35 = vld [vmem:[%s10337_s23 + $0x85] sm:$0xff] }
 0x2fb   : > { %v11944_v1 = vadd.f32 %v3277_v56, %v3065_v17  ;;  %v2669_v52 = vadd.f32 %v2668_v47, %v2667_v54  ;;  %v2773_v53 = vsel %vm2650_vm2, %v2731_v6, 0.0  ;;  %v2674_v56 = vsel %vm2650_vm2, %v11782_v39, 0.0  ;;  %v12183_v39 = vld [vmem:[%s10337_s23 + $0xdd] sm:$0xff] }
 0x2fc   : > { %v11954_v22 = vadd.f32 %v2579_v60, %v2359_v14  ;;  %v2768_v17 = vadd.f32 %v2767_v15, %v2766_v63  ;;  %v10054_v15 = vld [vmem:[%s10337_s23 + $0x7b] sm:$0xff]  ;;  %v2775_v14 = vsel %vm2650_vm2, %v2732_v11, 0.0  ;;  %v2678_v11 = vsel %vm2650_vm2, %v11820_v23, 0.0 }
 0x2fd   : > { %v2582_v5 = vpop.f32.mrf.mxu0  ;;  %v2671_v45 = vadd.f32 %v2670_v41, %v2669_v52  ;;  %v2734_v41 = vmul.f32 %v11820_v23, %v11820_v23  ;;  %v12159_v23 = vld [vmem:[%s10337_s23 + $0xcd] sm:$0xff] }
 0x2fe   : > { %14686 = vst [vmem:[#allocation9_spill] sm:$0xff] %v11954_v22  ;;  %v3068_v20 = vpop.f32.mrf.mxu1  ;;  %9116 = vmatmul.msk.f32.gmra.mxu3 %vm272_vm1, %v11833_v9  ;;  %v2770_v60 = vadd.f32 %v2769_v43, %v2768_v17  ;;  %v2733_v9 = vmul.f32 %v11807_v19, %v11807_v19  ;;  %v2676_v43 = vsel %vm2650_vm2, %v11807_v19, 0.0 }
 0x2ff   : > { %9282 = vmatmul.msk.f32.gmra.mxu2 %vm272_vm1, %v11947_v51  ;;  %v2673_v34 = vadd.f32 %v2672_v4, %v2671_v45  ;;  %v2735_v4 = vmul.f32 %v11835_v62, %v11835_v62 }
 0x300   : > { %9182 = vmatmul.msk.f32.gmra.mxu0 %vm272_vm1, %v11957_v21  ;;  %v2772_v47 = vadd.f32 %v2771_v37, %v2770_v60  ;;  %v2777_v37 = vsel %vm2650_vm2, %v2733_v9, 0.0  ;;  %v2779_v9 = vsel %vm2650_vm2, %v2734_v41, 0.0 }
 0x301   : > { %9216 = vmatmul.msk.f32.gmra.mxu1 %vm272_vm1, %v10054_v15  ;;  %v2304_v63 = vpop.f32.mrf.mxu3  ;;  %v2675_v15 = vadd.f32 %v2674_v56, %v2673_v34  ;;  %v2736_v56 = vmul.f32 %v11851_v29, %v11851_v29 }
 0x302   : > { %v3280_v54 = vpop.f32.mrf.mxu2  ;;  %v2360_v6 = vadd.f32 %v2304_v63, %v11449_v55  ;;  %v2774_v52 = vadd.f32 %v2773_v53, %v2772_v47  ;;  %v11996_v55 = vld [vmem:[%s10337_s23 + $0x81] sm:$0xff]  ;;  %v2680_v47 = vsel %vm2650_vm2, %v11835_v62, 0.0  ;;  %v2781_v63 = vsel %vm2650_vm2, %v2735_v4, 0.0 }
 0x303   : > { %v11983_v17 = vadd.f32 %v3280_v54, %v3068_v20  ;;  %v2677_v53 = vadd.f32 %v2676_v43, %v2675_v15  ;;  %v2682_v54 = vsel %vm2650_vm2, %v11851_v29, 0.0  ;;  %v12025_v29 = vld [vmem:[%s10337_s23 + $0x95] sm:$0xff] }
 0x304   : > { %v11993_v60 = vadd.f32 %v2582_v5, %v2360_v6  ;;  %v2776_v20 = vadd.f32 %v2775_v14, %v2774_v52  ;;  %v10055_v14 = vld [vmem:[%s10337_s23 + $0x83] sm:$0xff]  ;;  %v2783_v6 = vsel %vm2650_vm2, %v2736_v56, 0.0  ;;  %v2686_v56 = vsel %vm2650_vm2, %v11919_v46, 0.0 }
 0x305   : > { %v2585_v45 = vpop.f32.mrf.mxu0  ;;  %v2679_v34 = vadd.f32 %v2678_v11, %v2677_v53  ;;  %v2738_v11 = vmul.f32 %v11919_v46, %v11919_v46  ;;  %v12135_v46 = vld [vmem:[%s10337_s23 + $0xc5] sm:$0xff] }
 0x306   : > { %14687 = vst [vmem:[#allocation54_spill] sm:$0xff] %v11993_v60  ;;  %v3071_v19 = vpop.f32.mrf.mxu1  ;;  %9117 = vmatmul.msk.f32.gmra.mxu3 %vm272_vm1, %v11849_v7  ;;  %v2778_v5 = vadd.f32 %v2777_v37, %v2776_v20  ;;  %v2737_v7 = vmul.f32 %v11882_v16, %v11882_v16  ;;  %v2684_v37 = vsel %vm2650_vm2, %v11882_v16, 0.0 }
 0x307   : > { %9283 = vmatmul.msk.f32.gmra.mxu2 %vm272_vm1, %v11986_v35  ;;  %v2681_v41 = vadd.f32 %v2680_v47, %v2679_v34  ;;  %v2739_v47 = vmul.f32 %v11954_v22, %v11954_v22 }
 0x308   : > { %9183 = vmatmul.msk.f32.gmra.mxu0 %vm272_vm1, %v11996_v55  ;;  %v2780_v43 = vadd.f32 %v2779_v9, %v2778_v5  ;;  %v2785_v9 = vsel %vm2650_vm2, %v2737_v7, 0.0  ;;  %v2688_v7 = vsel %vm2650_vm2, %v11954_v22, 0.0 }
 0x309   : > { %9217 = vmatmul.msk.f32.gmra.mxu1 %vm272_vm1, %v10055_v14  ;;  %v2307_v52 = vpop.f32.mrf.mxu3  ;;  %v2683_v14 = vadd.f32 %v2682_v54, %v2681_v41  ;;  %v2787_v54 = vsel %vm2650_vm2, %v2738_v11, 0.0 }
 0x30a   : > { %v3283_v15 = vpop.f32.mrf.mxu2  ;;  %v2361_v4 = vadd.f32 %v2307_v52, %v11465_v3  ;;  %v2782_v53 = vadd.f32 %v2781_v63, %v2780_v43  ;;  %v12035_v3 = vld [vmem:[%s10337_s23 + $0x91] sm:$0xff]  ;;  %v2740_v43 = vmul.f32 %v11993_v60, %v11993_v60  ;;  %v2789_v52 = vsel %vm2650_vm2, %v2739_v47, 0.0 }
 0x30b   : > { %v12022_v20 = vadd.f32 %v3283_v15, %v3071_v19  ;;  %v2685_v63 = vadd.f32 %v2684_v37, %v2683_v14  ;;  %v2690_v15 = vsel %vm2650_vm2, %v11993_v60, 0.0 }
 0x30c   : > { %v12032_v5 = vadd.f32 %v2585_v45, %v2361_v4  ;;  %v2784_v19 = vadd.f32 %v2783_v6, %v2782_v53  ;;  %v10056_v6 = vld [vmem:[%s10337_s23 + $0x93] sm:$0xff]  ;;  %v2791_v14 = vsel %vm2650_vm2, %v2740_v43, 0.0 }
 0x30d   : > { %v2588_v34 = vpop.f32.mrf.mxu0  ;;  %v2687_v41 = vadd.f32 %v2686_v56, %v2685_v63 }
 0x30e   : > { %14688 = vst [vmem:[#allocation46_spill] sm:$0xff] %v12032_v5  ;;  %v3074_v16 = vpop.f32.mrf.mxu1  ;;  %9118 = vmatmul.msk.f32.gmra.mxu3 %vm272_vm1, %v11875_v59  ;;  %v2786_v45 = vadd.f32 %v2785_v9, %v2784_v19  ;;  %v2741_v59 = vmul.f32 %v12032_v5, %v12032_v5  ;;  %v2692_v9 = vsel %vm2650_vm2, %v12032_v5, 0.0 }
 0x30f   : > { %9284 = vmatmul.msk.f32.gmra.mxu2 %vm272_vm1, %v12025_v29  ;;  %v2689_v11 = vadd.f32 %v2688_v7, %v2687_v41  ;;  %v12068_v41 = vld [vmem:[%s10337_s23 + $0x99] sm:$0xff] }
 0x310   : > { %9184 = vmatmul.msk.f32.gmra.mxu0 %vm272_vm1, %v12035_v3  ;;  %v2788_v37 = vadd.f32 %v2787_v54, %v2786_v45  ;;  %v2793_v60 = vsel %vm2650_vm2, %v2741_v59, 0.0 }
 0x311   : > { %9218 = vmatmul.msk.f32.gmra.mxu1 %vm272_vm1, %v10056_v6  ;;  %v2310_v4 = vpop.f32.mrf.mxu3  ;;  %v2691_v63 = vadd.f32 %v2690_v15, %v2689_v11  ;;  %v12062_v6 = vld [vmem:[%s10337_s23 + $0x9d] sm:$0xff] }
 0x312   : > { %v3286_v53 = vpop.f32.mrf.mxu2  ;;  %v2362_v56 = vadd.f32 %v2310_v4, %v11481_v48  ;;  %v2790_v47 = vadd.f32 %v2789_v52, %v2788_v37  ;;  %v10057_v15 = vld [vmem:[%s10337_s23 + $0x9b] sm:$0xff] }
 0x313   : > { %v12059_v19 = vadd.f32 %v3286_v53, %v3074_v16  ;;  %v2693_v22 = vadd.f32 %v2692_v9, %v2691_v63 }
 0x314   : > { %v12065_v54 = vadd.f32 %v2588_v34, %v2362_v56  ;;  %v2792_v43 = vadd.f32 %v2791_v14, %v2790_v47  ;;  %v12087_v14 = vld [vmem:[%s10337_s23 + $0xad] sm:$0xff] }
 0x315   : > { %v2591_v7 = vpop.f32.mrf.mxu0  ;;  %v12092_v56 = vld [vmem:[%s10337_s23 + $0xa9] sm:$0xff] }
 0x316   : > { %14689 = vst [vmem:[#allocation49_spill] sm:$0xff] %v12065_v54  ;;  %v3077_v45 = vpop.f32.mrf.mxu1  ;;  %v2694_v48 = vsel %vm2650_vm2, %v12065_v54, 0.0  ;;  %v2742_v16 = vmul.f32 %v12065_v54, %v12065_v54  ;;  %9119 = vmatmul.msk.f32.gmra.mxu3 %vm272_vm1, %v11912_v2  ;;  %v2794_v34 = vadd.f32 %v2793_v60, %v2792_v43  ;;  %v12236_v54 = vld [vmem:[%s10337_s23 + $0xf1] sm:$0xff] }
 0x317   : > { %9285 = vmatmul.msk.f32.gmra.mxu2 %vm272_vm1, %v12062_v6  ;;  %v2695_v52 = vadd.f32 %v2694_v48, %v2693_v22 }
 0x318   : > { %9185 = vmatmul.msk.f32.gmra.mxu0 %vm272_vm1, %v12068_v41  ;;  %v2795_v59 = vsel %vm2650_vm2, %v2742_v16, 0.0  ;;  %v12110_v16 = vld [vmem:[%s10337_s23 + $0xb5] sm:$0xff] }
 0x319   : > { %9219 = vmatmul.msk.f32.gmra.mxu1 %vm272_vm1, %v10057_v15  ;;  %v2796_v37 = vadd.f32 %v2795_v59, %v2794_v34  ;;  %v2313_v11 = vpop.f32.mrf.mxu3 }
 0x31a   : > { %v3289_v4 = vpop.f32.mrf.mxu2  ;;  %v2363_v2 = vadd.f32 %v2313_v11, %v11494_v13  ;;  %v10058_v13 = vld [vmem:[%s10337_s23 + $0xab] sm:$0xff] }
 0x31b   : > { %v12084_v53 = vadd.f32 %v3289_v4, %v3077_v45  ;;  %v12116_v4 = vld [vmem:[%s10337_s23 + $0xb1] sm:$0xff] }
 0x31c   : > { %v12089_v22 = vadd.f32 %v2591_v7, %v2363_v2 }
 0x31d   : > { %v2594_v60 = vpop.f32.mrf.mxu0 }
 0x31e   : > { %14690 = vst [vmem:[#allocation50_spill] sm:$0xff] %v12089_v22  ;;  %v3080_v9 = vpop.f32.mrf.mxu1  ;;  %9120 = vmatmul.msk.f32.gmra.mxu3 %vm272_vm1, %v11947_v51  ;;  %v2743_v47 = vmul.f32 %v12089_v22, %v12089_v22  ;;  %v2696_v45 = vsel %vm2650_vm2, %v12089_v22, 0.0 }
 0x31f   : > { %9286 = vmatmul.msk.f32.gmra.mxu2 %vm272_vm1, %v12087_v14  ;;  %v2697_v2 = vadd.f32 %v2696_v45, %v2695_v52  ;;  %v10059_v52 = vld [vmem:[%s10337_s23 + $0xb3] sm:$0xff] }
 0x320   : > { %9186 = vmatmul.msk.f32.gmra.mxu0 %vm272_vm1, %v12092_v56  ;;  %v2797_v34 = vsel %vm2650_vm2, %v2743_v47, 0.0 }
 0x321   : > { %9220 = vmatmul.msk.f32.gmra.mxu1 %vm272_vm1, %v10058_v13  ;;  %v2316_v63 = vpop.f32.mrf.mxu3 }
 0x322   : > { %v3292_v7 = vpop.f32.mrf.mxu2  ;;  %v2364_v43 = vadd.f32 %v2316_v63, %v11508_v28 }
 0x323   : > { %v12107_v48 = vadd.f32 %v3292_v7, %v3080_v9 }
 0x324   : > { %v12113_v15 = vadd.f32 %v2594_v60, %v2364_v43  ;;  %v2798_v60 = vadd.f32 %v2797_v34, %v2796_v37 }
 0x325   : > { %v2597_v59 = vpop.f32.mrf.mxu0 }
 0x326   : > { %14691 = vst [vmem:[#allocation10_spill] sm:$0xff] %v12113_v15  ;;  %v3083_v11 = vpop.f32.mrf.mxu1  ;;  %v2698_v13 = vsel %vm2650_vm2, %v12113_v15, 0.0  ;;  %v2744_v28 = vmul.f32 %v12113_v15, %v12113_v15  ;;  %9121 = vmatmul.msk.f32.gmra.mxu3 %vm272_vm1, %v11986_v35  ;;  %v12212_v15 = vld [vmem:[%s10337_s23 + $0xe1] sm:$0xff] }
 0x327   : > { %9287 = vmatmul.msk.f32.gmra.mxu2 %vm272_vm1, %v12110_v16  ;;  %v2699_v9 = vadd.f32 %v2698_v13, %v2697_v2  ;;  %v12140_v13 = vld [vmem:[%s10337_s23 + $0xc1] sm:$0xff] }
 0x328   : > { %9187 = vmatmul.msk.f32.gmra.mxu0 %vm272_vm1, %v12116_v4  ;;  %v2799_v47 = vsel %vm2650_vm2, %v2744_v28, 0.0 }
 0x329   : > { %9221 = vmatmul.msk.f32.gmra.mxu1 %vm272_vm1, %v10059_v52  ;;  %v2800_v63 = vadd.f32 %v2799_v47, %v2798_v60  ;;  %v2319_v7 = vpop.f32.mrf.mxu3 }
 0x32a   : > { %v3295_v45 = vpop.f32.mrf.mxu2  ;;  %v2365_v43 = vadd.f32 %v2319_v7, %v11522_v50 }
 0x32b   : > { %v12132_v22 = vadd.f32 %v3295_v45, %v3083_v11 }
 0x32c   : > { %v12137_v37 = vadd.f32 %v2597_v59, %v2365_v43  ;;  %v10060_v59 = vld [vmem:[%s10337_s23 + $0xc3] sm:$0xff] }
 0x32d   : > { %v2600_v34 = vpop.f32.mrf.mxu0 }
 0x32e   : > { %14692 = vst [vmem:[#allocation11_spill] sm:$0xff] %v12137_v37  ;;  %v3086_v2 = vpop.f32.mrf.mxu1  ;;  %v2700_v28 = vsel %vm2650_vm2, %v12137_v37, 0.0  ;;  %v2745_v60 = vmul.f32 %v12137_v37, %v12137_v37  ;;  %9122 = vmatmul.msk.f32.gmra.mxu3 %vm272_vm1, %v12025_v29 }
 0x32f   : > { %9288 = vmatmul.msk.f32.gmra.mxu2 %vm272_vm1, %v12135_v46  ;;  %v2701_v50 = vadd.f32 %v2700_v28, %v2699_v9 }
 0x330   : > { %9188 = vmatmul.msk.f32.gmra.mxu0 %vm272_vm1, %v12140_v13  ;;  %v2801_v11 = vsel %vm2650_vm2, %v2745_v60, 0.0 }
 0x331   : > { %9222 = vmatmul.msk.f32.gmra.mxu1 %vm272_vm1, %v10060_v59  ;;  %v2802_v52 = vadd.f32 %v2801_v11, %v2800_v63  ;;  %v2322_v47 = vpop.f32.mrf.mxu3 }
 0x332   : > { %v3298_v7 = vpop.f32.mrf.mxu2  ;;  %v2366_v45 = vadd.f32 %v2322_v47, %v11536_v12 }
 0x333   : > { %v12156_v43 = vadd.f32 %v3298_v7, %v3086_v2 }
 0x334   : > { %v12161_v62 = vadd.f32 %v2600_v34, %v2366_v45  ;;  %v10061_v34 = vld [vmem:[%s10337_s23 + $0xcb] sm:$0xff] }
 0x335   : > { %v2603_v9 = vpop.f32.mrf.mxu0 }
 0x336   : > { %14693 = vst [vmem:[#allocation52_spill] sm:$0xff] %v12161_v62  ;;  %v3089_v28 = vpop.f32.mrf.mxu1  ;;  %v2702_v60 = vsel %vm2650_vm2, %v12161_v62, 0.0  ;;  %v2746_v63 = vmul.f32 %v12161_v62, %v12161_v62  ;;  %9123 = vmatmul.msk.f32.gmra.mxu3 %vm272_vm1, %v12062_v6 }
 0x337   : > { %9289 = vmatmul.msk.f32.gmra.mxu2 %vm272_vm1, %v12159_v23  ;;  %v2703_v12 = vadd.f32 %v2702_v60, %v2701_v50 }
 0x338   : > { %9189 = vmatmul.msk.f32.gmra.mxu0 %vm272_vm1, %v12164_v58  ;;  %v2803_v2 = vsel %vm2650_vm2, %v2746_v63, 0.0 }
 0x339   : > { %9223 = vmatmul.msk.f32.gmra.mxu1 %vm272_vm1, %v10061_v34  ;;  %v2804_v59 = vadd.f32 %v2803_v2, %v2802_v52  ;;  %v2325_v11 = vpop.f32.mrf.mxu3 }
 0x33a   : > { %v3301_v47 = vpop.f32.mrf.mxu2  ;;  %v2367_v7 = vadd.f32 %v2325_v11, %v11550_v36 }
 0x33b   : > { %v12180_v45 = vadd.f32 %v3301_v47, %v3089_v28 }
 0x33c   : > { %v12185_v18 = vadd.f32 %v2603_v9, %v2367_v7  ;;  %v10062_v9 = vld [vmem:[%s10337_s23 + $0xdb] sm:$0xff] }
 0x33d   : > { %v2606_v50 = vpop.f32.mrf.mxu0 }
 0x33e   : > { %14694 = vst [vmem:[#allocation55_spill] sm:$0xff] %v12185_v18  ;;  %v3092_v60 = vpop.f32.mrf.mxu1  ;;  %v2704_v63 = vsel %vm2650_vm2, %v12185_v18, 0.0  ;;  %v2747_v52 = vmul.f32 %v12185_v18, %v12185_v18  ;;  %9124 = vmatmul.msk.f32.gmra.mxu3 %vm272_vm1, %v12087_v14  ;;  %v12207_v18 = vld [vmem:[%s10337_s23 + $0xe5] sm:$0xff] }
 0x33f   : > { %9290 = vmatmul.msk.f32.gmra.mxu2 %vm272_vm1, %v12183_v39  ;;  %v2705_v36 = vadd.f32 %v2704_v63, %v2703_v12 }
 0x340   : > { %9190 = vmatmul.msk.f32.gmra.mxu0 %vm272_vm1, %v12188_v27  ;;  %v2805_v28 = vsel %vm2650_vm2, %v2747_v52, 0.0 }
 0x341   : > { %9224 = vmatmul.msk.f32.gmra.mxu1 %vm272_vm1, %v10062_v9  ;;  %v2806_v34 = vadd.f32 %v2805_v28, %v2804_v59  ;;  %v2328_v2 = vpop.f32.mrf.mxu3 }
 0x342   : > { %v3304_v11 = vpop.f32.mrf.mxu2  ;;  %v2368_v47 = vadd.f32 %v2328_v2, %v11564_v10 }
 0x343   : > { %v12204_v7 = vadd.f32 %v3304_v11, %v3092_v60 }
 0x344   : > { %v12209_v37 = vadd.f32 %v2606_v50, %v2368_v47  ;;  %v10063_v50 = vld [vmem:[%s10337_s23 + $0xe3] sm:$0xff] }
 0x345   : > { %14695 = vst [vmem:[#allocation56_spill] sm:$0xff] %v12204_v7  ;;  %v2609_v12 = vpop.f32.mrf.mxu0  ;;  %v12284_v7 = vld [vmem:[%s10337_s23 + $0x109] sm:$0xff] }
 0x346   : > { %14696 = vst [vmem:[#allocation15_spill] sm:$0xff] %v12209_v37  ;;  %v3095_v63 = vpop.f32.mrf.mxu1  ;;  %v2706_v52 = vsel %vm2650_vm2, %v12209_v37, 0.0  ;;  %v2748_v59 = vmul.f32 %v12209_v37, %v12209_v37  ;;  %9125 = vmatmul.msk.f32.gmra.mxu3 %vm272_vm1, %v12110_v16  ;;  %v12231_v37 = vld [vmem:[%s10337_s23 + $0xf5] sm:$0xff] }
 0x347   : > { %9291 = vmatmul.msk.f32.gmra.mxu2 %vm272_vm1, %v12207_v18  ;;  %v2707_v10 = vadd.f32 %v2706_v52, %v2705_v36 }
 0x348   : > { %9191 = vmatmul.msk.f32.gmra.mxu0 %vm272_vm1, %v12212_v15  ;;  %v2807_v60 = vsel %vm2650_vm2, %v2748_v59, 0.0 }
 0x349   : > { %9225 = vmatmul.msk.f32.gmra.mxu1 %vm272_vm1, %v10063_v50  ;;  %v2808_v9 = vadd.f32 %v2807_v60, %v2806_v34  ;;  %v2331_v28 = vpop.f32.mrf.mxu3 }
 0x34a   : > { %v3307_v2 = vpop.f32.mrf.mxu2  ;;  %v2369_v11 = vadd.f32 %v2331_v28, %v11578_v26 }
 0x34b   : > { %v12228_v47 = vadd.f32 %v3307_v2, %v3095_v63 }
 0x34c   : > { %v12233_v62 = vadd.f32 %v2609_v12, %v2369_v11  ;;  %v10064_v12 = vld [vmem:[%s10337_s23 + $0xf3] sm:$0xff] }
 0x34d   : > { %14697 = vst [vmem:[#allocation57_spill] sm:$0xff] %v12228_v47  ;;  %v2612_v36 = vpop.f32.mrf.mxu0  ;;  %v12260_v47 = vld [vmem:[%s10337_s23 + $0xf9] sm:$0xff] }
 0x34e   : > { %14698 = vst [vmem:[#allocation58_spill] sm:$0xff] %v12233_v62  ;;  %v3098_v52 = vpop.f32.mrf.mxu1  ;;  %v2708_v59 = vsel %vm2650_vm2, %v12233_v62, 0.0  ;;  %v2749_v34 = vmul.f32 %v12233_v62, %v12233_v62  ;;  %9126 = vmatmul.msk.f32.gmra.mxu3 %vm272_vm1, %v12135_v46  ;;  %v12255_v62 = vld [vmem:[%s10337_s23 + $0xfd] sm:$0xff] }
 0x34f   : > { %9292 = vmatmul.msk.f32.gmra.mxu2 %vm272_vm1, %v12231_v37  ;;  %v2709_v26 = vadd.f32 %v2708_v59, %v2707_v10 }
 0x350   : > { %9192 = vmatmul.msk.f32.gmra.mxu0 %vm272_vm1, %v12236_v54  ;;  %v2809_v63 = vsel %vm2650_vm2, %v2749_v34, 0.0 }
 0x351   : > { %9226 = vmatmul.msk.f32.gmra.mxu1 %vm272_vm1, %v10064_v12  ;;  %v2810_v50 = vadd.f32 %v2809_v63, %v2808_v9  ;;  %v2334_v60 = vpop.f32.mrf.mxu3 }
 0x352   : > { %v3310_v28 = vpop.f32.mrf.mxu2  ;;  %v2370_v2 = vadd.f32 %v2334_v60, %v11592_v25 }
 0x353   : > { %v12252_v11 = vadd.f32 %v3310_v28, %v3098_v52 }
 0x354   : > { %v12257_v5 = vadd.f32 %v2612_v36, %v2370_v2  ;;  %v10065_v36 = vld [vmem:[%s10337_s23 + $0xfb] sm:$0xff] }
 0x355   : > { %14699 = vst [vmem:[#allocation59_spill] sm:$0xff] %v12252_v11  ;;  %v2615_v10 = vpop.f32.mrf.mxu0 }
 0x356   : > { %14700 = vst [vmem:[#allocation21_spill] sm:$0xff] %v12257_v5  ;;  %v3101_v59 = vpop.f32.mrf.mxu1  ;;  %v2710_v34 = vsel %vm2650_vm2, %v12257_v5, 0.0  ;;  %v2750_v9 = vmul.f32 %v12257_v5, %v12257_v5  ;;  %9127 = vmatmul.msk.f32.gmra.mxu3 %vm272_vm1, %v12159_v23  ;;  %v12279_v5 = vld [vmem:[%s10337_s23 + $0x10d] sm:$0xff] }
 0x357   : > { %9293 = vmatmul.msk.f32.gmra.mxu2 %vm272_vm1, %v12255_v62  ;;  %v2711_v25 = vadd.f32 %v2710_v34, %v2709_v26 }
 0x358   : > { %9193 = vmatmul.msk.f32.gmra.mxu0 %vm272_vm1, %v12260_v47  ;;  %v2811_v52 = vsel %vm2650_vm2, %v2750_v9, 0.0 }
 0x359   : > { %9227 = vmatmul.msk.f32.gmra.mxu1 %vm272_vm1, %v10065_v36  ;;  %v2812_v12 = vadd.f32 %v2811_v52, %v2810_v50  ;;  %v2337_v63 = vpop.f32.mrf.mxu3 }
 0x35a   : > { %v3313_v60 = vpop.f32.mrf.mxu2  ;;  %v2371_v28 = vadd.f32 %v2337_v63, %v11606_v8 }
 0x35b   : > { %v12276_v2 = vadd.f32 %v3313_v60, %v3101_v59 }
 0x35c   : > { %v12281_v11 = vadd.f32 %v2615_v10, %v2371_v28  ;;  %v10066_v10 = vld [vmem:[%s10337_s23 + $0x10b] sm:$0xff]  ;;  %v12305_v28 = vld [vmem:[%s10337_s23 + $0x115] sm:$0xff] }
 0x35d   : > { %14701 = vst [vmem:[#allocation27_spill] sm:$0xff] %v12276_v2  ;;  %v3744_v26 = vpop.f32.mrf.mxu0 }
 0x35e   : > { %14702 = vst [vmem:[#allocation33_spill] sm:$0xff] %v12281_v11  ;;  %v3894_v34 = vpop.f32.mrf.mxu1  ;;  %v2712_v9 = vsel %vm2650_vm2, %v12281_v11, 0.0  ;;  %v2751_v50 = vmul.f32 %v12281_v11, %v12281_v11  ;;  %9128 = vmatmul.msk.f32.gmra.mxu3 %vm272_vm1, %v12183_v39  ;;  %v12308_v11 = vld [vmem:[%s10337_s23 + $0x111] sm:$0xff] }
 0x35f   : > { %9294 = vmatmul.msk.f32.gmra.mxu2 %vm272_vm1, %v12279_v5  ;;  %v12294_v8 = vadd.f32 %v2712_v9, %v2711_v25 }
 0x360   : > { %9194 = vmatmul.msk.f32.gmra.mxu0 %vm272_vm1, %v12284_v7  ;;  %v2813_v59 = vsel %vm2650_vm2, %v2751_v50, 0.0 }
 0x361   : > { %14703 = vst [vmem:[#allocation40_spill] sm:$0xff] %v12294_v8  ;;  %9228 = vmatmul.msk.f32.gmra.mxu1 %vm272_vm1, %v10066_v10  ;;  %v12301_v36 = vadd.f32 %v2813_v59, %v2812_v12  ;;  %v3466_v52 = vpop.f32.mrf.mxu3 }
 0x362   : > { %v4172_v63 = vpop.f32.mrf.mxu2  ;;  %v3562_v60 = vadd.f32 %v3466_v52, %v11609_v44  ;;  %v10067_v44 = vld [vmem:[%s10337_s23 + $0x113] sm:$0xff] }
 0x363   : > { %14704 = vst [vmem:[#allocation47_spill] sm:$0xff] %v12301_v36 }
 0x364   : > { %v3840_v25 = vadd.f32 %v3744_v26, %v3562_v60 }
 0x365   : > { %v3747_v9 = vpop.f32.mrf.mxu0 }
 0x366   : > { %v3897_v8 = vpop.f32.mrf.mxu1  ;;  %v3990_v2 = vadd.f32 %v3894_v34, %v3840_v25  ;;  %9129 = vmatmul.msk.f32.gmra.mxu3 %vm272_vm1, %v12207_v18  ;;  %v12322_v34 = vld [vmem:[%s10337_s23 + $0x125] sm:$0xff] }
 0x367   : > { %9295 = vmatmul.msk.f32.gmra.mxu2 %vm272_vm1, %v12305_v28  ;;  %v12325_v25 = vld [vmem:[%s10337_s23 + $0x121] sm:$0xff] }
 0x368   : > { %9195 = vmatmul.msk.f32.gmra.mxu0 %vm272_vm1, %v12308_v11  ;;  %v12318_v12 = vadd.f32 %v4172_v63, %v3990_v2  ;;  %14706 = vst [vmem:[#allocation65_spill] sm:$0xff] %v12325_v25 }
 0x369   : > { %9229 = vmatmul.msk.f32.gmra.mxu1 %vm272_vm1, %v10067_v44  ;;  %v3469_v26 = vpop.f32.mrf.mxu3 }
 0x36a   : > { %14705 = vst [vmem:[#allocation53_spill] sm:$0xff] %v12318_v12  ;;  %v4175_v50 = vpop.f32.mrf.mxu2  ;;  %v3563_v10 = vadd.f32 %v3469_v26, %v11625_v57  ;;  %v10068_v57 = vld [vmem:[%s10337_s23 + $0x123] sm:$0xff] }
 0x36b   : > { %v12342_v12 = vld [vmem:[%s10337_s23 + $0x129] sm:$0xff] }
 0x36c   : > { %v3841_v59 = vadd.f32 %v3747_v9, %v3563_v10  ;;  %14708 = vst [vmem:[#allocation68_spill] sm:$0xff] %v12342_v12 }
 0x36d   : > { %v3750_v52 = vpop.f32.mrf.mxu0 }
 0x36e   : > { %v3900_v60 = vpop.f32.mrf.mxu1  ;;  %v3991_v36 = vadd.f32 %v3897_v8, %v3841_v59  ;;  %9130 = vmatmul.msk.f32.gmra.mxu3 %vm272_vm1, %v12231_v37  ;;  %v12339_v8 = vld [vmem:[%s10337_s23 + $0x12d] sm:$0xff] }
 0x36f   : > { %9296 = vmatmul.msk.f32.gmra.mxu2 %vm272_vm1, %v12322_v34 }
 0x370   : > { %9196 = vmatmul.msk.f32.gmra.mxu0 %vm272_vm1, %v12325_v25  ;;  %v12335_v2 = vadd.f32 %v4175_v50, %v3991_v36 }
 0x371   : > { %9230 = vmatmul.msk.f32.gmra.mxu1 %vm272_vm1, %v10068_v57  ;;  %v3472_v63 = vpop.f32.mrf.mxu3 }
 0x372   : > { %14707 = vst [vmem:[#allocation67_spill] sm:$0xff] %v12335_v2  ;;  %v4178_v9 = vpop.f32.mrf.mxu2  ;;  %v3564_v44 = vadd.f32 %v3472_v63, %v11641_v24  ;;  %v10069_v24 = vld [vmem:[%s10337_s23 + $0x12b] sm:$0xff]  ;;  %v12359_v2 = vld [vmem:[%s10337_s23 + $0x139] sm:$0xff] }
 0x373   : > { %14710 = vst [vmem:[#allocation71_spill] sm:$0xff] %v12359_v2 }
 0x374   : > { %v3842_v26 = vadd.f32 %v3750_v52, %v3564_v44 }
 0x375   : > { %v3753_v10 = vpop.f32.mrf.mxu0 }
 0x376   : > { %v3903_v59 = vpop.f32.mrf.mxu1  ;;  %v3992_v25 = vadd.f32 %v3900_v60, %v3842_v26  ;;  %9131 = vmatmul.msk.f32.gmra.mxu3 %vm272_vm1, %v12255_v62  ;;  %v12356_v60 = vld [vmem:[%s10337_s23 + $0x13d] sm:$0xff] }
 0x377   : > { %9297 = vmatmul.msk.f32.gmra.mxu2 %vm272_vm1, %v12339_v8 }
 0x378   : > { %9197 = vmatmul.msk.f32.gmra.mxu0 %vm272_vm1, %v12342_v12  ;;  %v12352_v36 = vadd.f32 %v4178_v9, %v3992_v25 }
 0x379   : > { %9231 = vmatmul.msk.f32.gmra.mxu1 %vm272_vm1, %v10069_v24  ;;  %v3475_v50 = vpop.f32.mrf.mxu3 }
 0x37a   : > { %14709 = vst [vmem:[#allocation69_spill] sm:$0xff] %v12352_v36  ;;  %v4181_v52 = vpop.f32.mrf.mxu2  ;;  %v3565_v57 = vadd.f32 %v3475_v50, %v11657_v31  ;;  %v10070_v31 = vld [vmem:[%s10337_s23 + $0x13b] sm:$0xff] }
 0x37b   : > { %v12376_v36 = vld [vmem:[%s10337_s23 + $0x141] sm:$0xff] }
 0x37c   : > { %v3843_v63 = vadd.f32 %v3753_v10, %v3565_v57  ;;  %14713 = vst [vmem:[#allocation60_spill] sm:$0xff] %v12376_v36 }
 0x37d   : > { %v3756_v44 = vpop.f32.mrf.mxu0 }
 0x37e   : > { %v3906_v26 = vpop.f32.mrf.mxu1  ;;  %v3993_v12 = vadd.f32 %v3903_v59, %v3843_v63  ;;  %9132 = vmatmul.msk.f32.gmra.mxu3 %vm272_vm1, %v12279_v5  ;;  %v12373_v59 = vld [vmem:[%s10337_s23 + $0x145] sm:$0xff] }
 0x37f   : > { %9298 = vmatmul.msk.f32.gmra.mxu2 %vm272_vm1, %v12356_v60  ;;  %14712 = vst [vmem:[#allocation19_spill] sm:$0xff] %v12373_v59 }
 0x380   : > { %9198 = vmatmul.msk.f32.gmra.mxu0 %vm272_vm1, %v12359_v2  ;;  %v12369_v25 = vadd.f32 %v4181_v52, %v3993_v12 }
 0x381   : > { %9232 = vmatmul.msk.f32.gmra.mxu1 %vm272_vm1, %v10070_v31  ;;  %v3478_v9 = vpop.f32.mrf.mxu3 }
 0x382   : > { %14711 = vst [vmem:[#allocation72_spill] sm:$0xff] %v12369_v25  ;;  %v4184_v10 = vpop.f32.mrf.mxu2  ;;  %v3566_v24 = vadd.f32 %v3478_v9, %v11670_v32  ;;  %v10071_v32 = vld [vmem:[%s10337_s23 + $0x143] sm:$0xff]  ;;  %v12393_v25 = vld [vmem:[%s10337_s23 + $0x151] sm:$0xff] }
 0x383   : > { %14715 = vst [vmem:[#allocation62_spill] sm:$0xff] %v12393_v25 }
 0x384   : > { %v3844_v50 = vadd.f32 %v3756_v44, %v3566_v24 }
 0x385   : > { %v3759_v57 = vpop.f32.mrf.mxu0 }
 0x386   : > { %v3909_v63 = vpop.f32.mrf.mxu1  ;;  %v3994_v2 = vadd.f32 %v3906_v26, %v3844_v50  ;;  %9133 = vmatmul.msk.f32.gmra.mxu3 %vm272_vm1, %v12305_v28  ;;  %v12390_v26 = vld [vmem:[%s10337_s23 + $0x155] sm:$0xff] }
 0x387   : > { %9299 = vmatmul.msk.f32.gmra.mxu2 %vm272_vm1, %v12373_v59 }
 0x388   : > { %9199 = vmatmul.msk.f32.gmra.mxu0 %vm272_vm1, %v12376_v36  ;;  %v12386_v12 = vadd.f32 %v4184_v10, %v3994_v2 }
 0x389   : > { %9233 = vmatmul.msk.f32.gmra.mxu1 %vm272_vm1, %v10071_v32  ;;  %v3481_v52 = vpop.f32.mrf.mxu3 }
 0x38a   : > { %14714 = vst [vmem:[#allocation61_spill] sm:$0xff] %v12386_v12  ;;  %v4187_v44 = vpop.f32.mrf.mxu2  ;;  %v3567_v31 = vadd.f32 %v3481_v52, %v11683_v38  ;;  %v10072_v38 = vld [vmem:[%s10337_s23 + $0x153] sm:$0xff] }
 0x38b   : > { %v12410_v12 = vld [vmem:[%s10337_s23 + $0x159] sm:$0xff] }
 0x38c   : > { %v3845_v9 = vadd.f32 %v3759_v57, %v3567_v31  ;;  %14717 = vst [vmem:[#allocation64_spill] sm:$0xff] %v12410_v12 }
 0x38d   : > { %v3762_v24 = vpop.f32.mrf.mxu0 }
 0x38e   : > { %v3912_v50 = vpop.f32.mrf.mxu1  ;;  %v3995_v36 = vadd.f32 %v3909_v63, %v3845_v9  ;;  %9134 = vmatmul.msk.f32.gmra.mxu3 %vm272_vm1, %v12322_v34  ;;  %v12407_v63 = vld [vmem:[%s10337_s23 + $0x15d] sm:$0xff] }
 0x38f   : > { %9300 = vmatmul.msk.f32.gmra.mxu2 %vm272_vm1, %v12390_v26 }
 0x390   : > { %9200 = vmatmul.msk.f32.gmra.mxu0 %vm272_vm1, %v12393_v25  ;;  %v12403_v2 = vadd.f32 %v4187_v44, %v3995_v36 }
 0x391   : > { %9234 = vmatmul.msk.f32.gmra.mxu1 %vm272_vm1, %v10072_v38  ;;  %v3484_v10 = vpop.f32.mrf.mxu3 }
 0x392   : > { %14716 = vst [vmem:[#allocation63_spill] sm:$0xff] %v12403_v2  ;;  %v4190_v57 = vpop.f32.mrf.mxu2  ;;  %v3568_v32 = vadd.f32 %v3484_v10, %v11696_v49  ;;  %v10073_v49 = vld [vmem:[%s10337_s23 + $0x15b] sm:$0xff]  ;;  %v12427_v2 = vld [vmem:[%s10337_s23 + $0x169] sm:$0xff] }
 0x393   : > { %14719 = vst [vmem:[#allocation70_spill] sm:$0xff] %v12427_v2 }
 0x394   : > { %v3846_v52 = vadd.f32 %v3762_v24, %v3568_v32 }
 0x395   : > { %v3765_v31 = vpop.f32.mrf.mxu0 }
 0x396   : > { %v3915_v9 = vpop.f32.mrf.mxu1  ;;  %v3996_v25 = vadd.f32 %v3912_v50, %v3846_v52  ;;  %9135 = vmatmul.msk.f32.gmra.mxu3 %vm272_vm1, %v12339_v8  ;;  %v12424_v50 = vld [vmem:[%s10337_s23 + $0x16d] sm:$0xff] }
 0x397   : > { %9301 = vmatmul.msk.f32.gmra.mxu2 %vm272_vm1, %v12407_v63 }
 0x398   : > { %9201 = vmatmul.msk.f32.gmra.mxu0 %vm272_vm1, %v12410_v12  ;;  %v12420_v36 = vadd.f32 %v4190_v57, %v3996_v25 }
 0x399   : > { %9235 = vmatmul.msk.f32.gmra.mxu1 %vm272_vm1, %v10073_v49  ;;  %v3487_v44 = vpop.f32.mrf.mxu3 }
 0x39a   : > { %14718 = vst [vmem:[#allocation66_spill] sm:$0xff] %v12420_v36  ;;  %v4193_v24 = vpop.f32.mrf.mxu2  ;;  %v3569_v38 = vadd.f32 %v3487_v44, %v11709_v42  ;;  %v10074_v42 = vld [vmem:[%s10337_s23 + $0x16b] sm:$0xff] }
 0x39b   : > { %v12444_v36 = vld [vmem:[%s10337_s23 + $0x171] sm:$0xff] }
 0x39c   : > { %v3847_v10 = vadd.f32 %v3765_v31, %v3569_v38  ;;  %14721 = vst [vmem:[#allocation12_spill] sm:$0xff] %v12444_v36 }
 0x39d   : > { %v3768_v32 = vpop.f32.mrf.mxu0 }
 0x39e   : > { %v3918_v52 = vpop.f32.mrf.mxu1  ;;  %v3997_v12 = vadd.f32 %v3915_v9, %v3847_v10  ;;  %9136 = vmatmul.msk.f32.gmra.mxu3 %vm272_vm1, %v12356_v60  ;;  %v12441_v9 = vld [vmem:[%s10337_s23 + $0x175] sm:$0xff] }
 0x39f   : > { %9302 = vmatmul.msk.f32.gmra.mxu2 %vm272_vm1, %v12424_v50 }
 0x3a0   : > { %9202 = vmatmul.msk.f32.gmra.mxu0 %vm272_vm1, %v12427_v2  ;;  %v12437_v25 = vadd.f32 %v4193_v24, %v3997_v12 }
 0x3a1   : > { %9236 = vmatmul.msk.f32.gmra.mxu1 %vm272_vm1, %v10074_v42  ;;  %v3490_v57 = vpop.f32.mrf.mxu3 }
 0x3a2   : > { %14720 = vst [vmem:[#allocation16_spill] sm:$0xff] %v12437_v25  ;;  %v4196_v31 = vpop.f32.mrf.mxu2  ;;  %v3570_v49 = vadd.f32 %v3490_v57, %v11722_v61  ;;  %v10075_v61 = vld [vmem:[%s10337_s23 + $0x173] sm:$0xff]  ;;  %v12461_v25 = vld [vmem:[%s10337_s23 + $0x181] sm:$0xff] }
 0x3a3   : > { %14723 = vst [vmem:[#allocation13_spill] sm:$0xff] %v12461_v25 }
 0x3a4   : > { %v3848_v44 = vadd.f32 %v3768_v32, %v3570_v49 }
 0x3a5   : > { %v3771_v38 = vpop.f32.mrf.mxu0 }
 0x3a6   : > { %v3921_v10 = vpop.f32.mrf.mxu1  ;;  %v3998_v2 = vadd.f32 %v3918_v52, %v3848_v44  ;;  %9137 = vmatmul.msk.f32.gmra.mxu3 %vm272_vm1, %v12373_v59  ;;  %v12458_v52 = vld [vmem:[%s10337_s23 + $0x185] sm:$0xff] }
 0x3a7   : > { %9303 = vmatmul.msk.f32.gmra.mxu2 %vm272_vm1, %v12441_v9 }
 0x3a8   : > { %9203 = vmatmul.msk.f32.gmra.mxu0 %vm272_vm1, %v12444_v36  ;;  %v12454_v12 = vadd.f32 %v4196_v31, %v3998_v2 }
 0x3a9   : > { %9237 = vmatmul.msk.f32.gmra.mxu1 %vm272_vm1, %v10075_v61  ;;  %v3493_v24 = vpop.f32.mrf.mxu3  ;;  %v12475_v61 = vld [vmem:[%s10337_s23 + $0x18d] sm:$0xff] }
 0x3aa   : > { %14722 = vst [vmem:[#allocation38_spill] sm:$0xff] %v12454_v12  ;;  %v4199_v32 = vpop.f32.mrf.mxu2  ;;  %v3571_v42 = vadd.f32 %v3493_v24, %v11735_v0  ;;  %v10076_v0 = vld [vmem:[%s10337_s23 + $0x183] sm:$0xff] }
 0x3ac   : > { %v3849_v57 = vadd.f32 %v3771_v38, %v3571_v42 }
 0x3ad   : > { %v3774_v49 = vpop.f32.mrf.mxu0 }
 0x3ae   : > { %v3924_v44 = vpop.f32.mrf.mxu1  ;;  %v3999_v59 = vadd.f32 %v3921_v10, %v3849_v57  ;;  %9138 = vmatmul.msk.f32.gmra.mxu3 %vm272_vm1, %v12390_v26 }
 0x3af   : > { %9304 = vmatmul.msk.f32.gmra.mxu2 %vm272_vm1, %v12458_v52 }
 0x3b0   : > { %9204 = vmatmul.msk.f32.gmra.mxu0 %vm272_vm1, %v12461_v25  ;;  %v12471_v2 = vadd.f32 %v4199_v32, %v3999_v59  ;;  %v10077_v59 = vld [vmem:[%s10337_s23 + $0x189] sm:$0xff]  ;;  %v12492_v25 = vld [vmem:[%s10337_s23 + $0x199] sm:$0xff] }
 0x3b1   : > { %9238 = vmatmul.msk.f32.gmra.mxu1 %vm272_vm1, %v10076_v0  ;;  %v3496_v31 = vpop.f32.mrf.mxu3  ;;  %v10078_v32 = vld [vmem:[%s10337_s23 + $0x18b] sm:$0xff]  ;;  %14727 = vst [vmem:[#allocation74_spill] sm:$0xff] %v12492_v25 }
 0x3b2   : > { %14724 = vst [vmem:[#allocation22_spill] sm:$0xff] %v12471_v2  ;;  %v4202_v38 = vpop.f32.mrf.mxu2  ;;  %v3572_v10 = vadd.f32 %v3496_v31, %v11748_v33 }
 0x3b4   : > { %v3850_v24 = vadd.f32 %v3774_v49, %v3572_v10 }
 0x3b5   : > { %v3777_v42 = vpop.f32.mrf.mxu0 }
 0x3b6   : > { %v3927_v57 = vpop.f32.mrf.mxu1  ;;  %v4000_v12 = vadd.f32 %v3924_v44, %v3850_v24  ;;  %9139 = vmatmul.msk.f32.gmra.mxu3 %vm272_vm1, %v12407_v63  ;;  %v12489_v44 = vld [vmem:[%s10337_s23 + $0x19d] sm:$0xff] }
 0x3b7   : > { %9305 = vmatmul.msk.f32.gmra.mxu2 %vm272_vm1, %v12475_v61  ;;  %14726 = vst [vmem:[#allocation73_spill] sm:$0xff] %v12489_v44 }
 0x3b8   : > { %9205 = vmatmul.msk.f32.gmra.mxu0 %vm272_vm1, %v10077_v59  ;;  %v12485_v33 = vadd.f32 %v4202_v38, %v4000_v12  ;;  %v10079_v12 = vld [vmem:[%s10337_s23 + $0x19b] sm:$0xff]  ;;  %v14729_v59 = vld [vmem:[#allocation29_spill] sm:$0xff] }
 0x3b9   : > { %9239 = vmatmul.msk.f32.gmra.mxu1 %vm272_vm1, %v10078_v32  ;;  %v3499_v49 = vpop.f32.mrf.mxu3 }
 0x3ba   : > { %14725 = vst [vmem:[#allocation25_spill] sm:$0xff] %v12485_v33  ;;  %v4205_v0 = vpop.f32.mrf.mxu2  ;;  %v3573_v31 = vadd.f32 %v3499_v49, %v11761_v40  ;;  %v9508_v40 = vld [vmem:[%s14425_s1 + $0x48] sm:$0xf] }
 0x3bb   : > { %9543 = vmatpush.msk.msrb.mxu3 %vm369_vm0, %v9508_v40  ;;  %v12510_v49 = vld [vmem:[%s10337_s23 + $0x1a5] sm:$0xff] }
 0x3bc   : > { %v3851_v10 = vadd.f32 %v3777_v42, %v3573_v31  ;;  %14730 = vst [vmem:[#allocation29_spill] sm:$0xff] %v12510_v49 }
 0x3bd   : > { %v3780_v24 = vpop.f32.mrf.mxu0 }
 0x3be   : > { %v3930_v2 = vpop.f32.mrf.mxu1  ;;  %v4001_v36 = vadd.f32 %v3927_v57, %v3851_v10  ;;  %9140 = vmatmul.msk.f32.gmra.mxu3 %vm272_vm1, %v12424_v50 }
 0x3bf   : > { %9306 = vmatmul.msk.f32.gmra.mxu2 %vm272_vm1, %v12489_v44  ;;  %v12513_v44 = vld [vmem:[%s10337_s23 + $0x1a1] sm:$0xff] }
 0x3c0   : > { %9206 = vmatmul.msk.f32.gmra.mxu0 %vm272_vm1, %v12492_v25  ;;  %v12505_v38 = vadd.f32 %v4205_v0, %v4001_v36  ;;  %14731 = vst [vmem:[#allocation76_spill] sm:$0xff] %v12513_v44  ;;  %v9576_v0 = vld [vmem:[%s14425_s1 + $0x50] sm:$0xf] }
 0x3c1   : > { %9240 = vmatmul.msk.f32.gmra.mxu1 %vm272_vm1, %v10079_v12  ;;  %v3502_v42 = vpop.f32.mrf.mxu3  ;;  %v9676_v12 = vld [vmem:[%s14425_s1 + $0x58] sm:$0xf]  ;;  %9577 = vmatpush.msk.msrb.mxu0 %vm369_vm0, %v9576_v0 }
 0x3c2   : > { %14728 = vst [vmem:[#allocation75_spill] sm:$0xff] %v12505_v38  ;;  %v4208_v57 = vpop.f32.mrf.mxu2  ;;  %v3574_v32 = vadd.f32 %v3502_v42, %v14729_v59  ;;  %9677 = vmatpush.msk.msrb.mxu2 %vm369_vm0, %v9676_v12  ;;  %v9274_v12 = vld [vmem:[%s10337_s23 + $0x1b5] sm:$0xff] }
 0x3c3   : > { %v10081_v0 = vld [vmem:[%s10337_s23 + $0x1b3] sm:$0xff] }
 0x3c4   : > { %v3852_v31 = vadd.f32 %v3780_v24, %v3574_v32  ;;  %v10080_v24 = vld [vmem:[%s10337_s23 + $0x1a3] sm:$0xff] }
 0x3c5   : > { %v3783_v10 = vpop.f32.mrf.mxu0  ;;  %v14733_v32 = vld [vmem:[#allocation44_spill] sm:$0xff] }
 0x3c6   : > { %v3933_v33 = vpop.f32.mrf.mxu1  ;;  %v4002_v36 = vadd.f32 %v3930_v2, %v3852_v31  ;;  %9141 = vmatmul.msk.f32.gmra.mxu3 %vm272_vm1, %v12441_v9  ;;  %v9642_v2 = vld [vmem:[%s14425_s1 + $0x54] sm:$0xf] }
 0x3c7   : > { %9307 = vmatmul.msk.f32.gmra.mxu2 %vm272_vm1, %v12510_v49  ;;  %9643 = vmatpush.msk.msrb.mxu1 %vm369_vm0, %v9642_v2 }
 0x3c8   : > { %9207 = vmatmul.msk.f32.gmra.mxu0 %vm272_vm1, %v12513_v44  ;;  %v12530_v40 = vadd.f32 %v4208_v57, %v4002_v36  ;;  %v12540_v57 = vld [vmem:[%s10337_s23 + $0x1b1] sm:$0xff] }
 0x3c9   : > { %9241 = vmatmul.msk.f32.gmra.mxu1 %vm272_vm1, %v10080_v24  ;;  %v3505_v42 = vpop.f32.mrf.mxu3  ;;  %14734 = vst [vmem:[#allocation44_spill] sm:$0xff] %v12540_v57 }
 0x3ca   : > { %14732 = vst [vmem:[#allocation77_spill] sm:$0xff] %v12530_v40  ;;  %v4211_v59 = vpop.f32.mrf.mxu2  ;;  %v3575_v31 = vadd.f32 %v3505_v42, %v14733_v32  ;;  %v14736_v32 = vld [vmem:[#allocation32_spill] sm:$0xff] }
 0x3cc   : > { %v3853_v38 = vadd.f32 %v3783_v10, %v3575_v31 }
 0x3cd   : > { %v3786_v49 = vpop.f32.mrf.mxu0 }
 0x3ce   : > { %v3936_v24 = vpop.f32.mrf.mxu1  ;;  %v4003_v36 = vadd.f32 %v3933_v33, %v3853_v38  ;;  %9142 = vmatmul.msk.f32.gmra.mxu3 %vm272_vm1, %v12458_v52  ;;  %v9275_v33 = vld [vmem:[%s10337_s23 + $0x1bd] sm:$0xff] }
 0x3cf   : > { %9308 = vmatmul.msk.f32.gmra.mxu2 %vm272_vm1, %v9274_v12  ;;  %v12554_v12 = vld [vmem:[%s10337_s23 + $0x1b9] sm:$0xff] }
 0x3d0   : > { %9208 = vmatmul.msk.f32.gmra.mxu0 %vm272_vm1, %v12540_v57  ;;  %v12549_v2 = vadd.f32 %v4211_v59, %v4003_v36  ;;  %v10082_v59 = vld [vmem:[%s10337_s23 + $0x1bb] sm:$0xff] }
 0x3d1   : > { %9242 = vmatmul.msk.f32.gmra.mxu1 %vm272_vm1, %v10081_v0  ;;  %v3508_v10 = vpop.f32.mrf.mxu3  ;;  %v12568_v57 = vld [vmem:[%s10337_s23 + $0x7b] sm:$0xff] }
 0x3d2   : > { %14735 = vst [vmem:[#allocation78_spill] sm:$0xff] %v12549_v2  ;;  %v4214_v42 = vpop.f32.mrf.mxu2  ;;  %v3576_v31 = vadd.f32 %v3508_v10, %v14736_v32  ;;  %v14737_v10 = vld [vmem:[#allocation36_spill] sm:$0xff] }
 0x3d4   : > { %v3854_v38 = vadd.f32 %v3786_v49, %v3576_v31  ;;  %v5343_v31 = vld [vmem:[%s10337_s23 + $0x3] sm:$0xff] }
 0x3d5   : > { %v3789_v40 = vpop.f32.mrf.mxu0 }
 0x3d6   : > { %v3939_v44 = vpop.f32.mrf.mxu1  ;;  %v4004_v25 = vadd.f32 %v3936_v24, %v3854_v38  ;;  %9143 = vmatmul.msk.f32.gmra.mxu3 %vm272_vm1, %v12475_v61 }
 0x3d7   : > { %9309 = vmatmul.msk.f32.gmra.mxu2 %vm272_vm1, %v9275_v33 }
 0x3d8   : > { %9209 = vmatmul.msk.f32.gmra.mxu0 %vm272_vm1, %v12554_v12  ;;  %v12563_v36 = vadd.f32 %v4214_v42, %v4004_v25 }
 0x3d9   : > { %9243 = vmatmul.msk.f32.gmra.mxu1 %vm272_vm1, %v10082_v59  ;;  %v3511_v49 = vpop.f32.mrf.mxu3  ;;  %v14738_v59 = vld [vmem:[#allocation51_spill] sm:$0xff] }
 0x3da   : > { %v4217_v0 = vpop.f32.mrf.mxu2  ;;  %v3577_v32 = vadd.f32 %v3511_v49, %v14737_v10  ;;  %v5344_v10 = vld [vmem:[%s10337_s23 + $0xb] sm:$0xff] }
 0x3dc   : > { %v3855_v24 = vadd.f32 %v3789_v40, %v3577_v32 }
 0x3dd   : > { %v3792_v38 = vpop.f32.mrf.mxu0 }
 0x3de   : > { %v3942_v2 = vpop.f32.mrf.mxu1  ;;  %v4005_v33 = vadd.f32 %v3939_v44, %v3855_v24  ;;  %9344 = vmatmul.msk.f32.vlgmr.msra.gmra.mxu3 %vm272_vm1, %v11957_v21  ;;  %v12582_v24 = vld [vmem:[%s10337_s23 + $0x83] sm:$0xff] }
 0x3df   : > { %9511 = vmatmul.msk.f32.vlgmr.msra.gmra.mxu2 %vm272_vm1, %v5343_v31 }
 0x3e0   : > { %9410 = vmatmul.msk.f32.vlgmr.msra.gmra.mxu0 %vm272_vm1, %v12568_v57  ;;  %v12577_v25 = vadd.f32 %v4217_v0, %v4005_v33  ;;  %v14739_v33 = vld [vmem:[#allocation39_spill] sm:$0xff] }
 0x3e1   : > { %9476 = vmatmul.msk.f32.vlgmr.msra.gmra.mxu1 %vm272_vm1, %v11947_v51  ;;  %v3514_v40 = vpop.f32.mrf.mxu3 }
 0x3e2   : > { %v4220_v42 = vpop.f32.mrf.mxu2  ;;  %v3578_v49 = vadd.f32 %v3514_v40, %v14738_v59  ;;  %v5345_v59 = vld [vmem:[%s10337_s23 + $0x1b] sm:$0xff] }
 0x3e4   : > { %v3856_v44 = vadd.f32 %v3792_v38, %v3578_v49 }
 0x3e5   : > { %v3795_v32 = vpop.f32.mrf.mxu0 }
 0x3e6   : > { %v3945_v21 = vpop.f32.mrf.mxu1  ;;  %v4006_v31 = vadd.f32 %v3942_v2, %v3856_v44  ;;  %9345 = vmatmul.msk.f32.gmra.mxu3 %vm272_vm1, %v11996_v55  ;;  %v12596_v44 = vld [vmem:[%s10337_s23 + $0x93] sm:$0xff] }
 0x3e7   : > { %9512 = vmatmul.msk.f32.gmra.mxu2 %vm272_vm1, %v5344_v10 }
 0x3e8   : > { %9411 = vmatmul.msk.f32.gmra.mxu0 %vm272_vm1, %v12582_v24  ;;  %v12591_v51 = vadd.f32 %v4220_v42, %v4006_v31 }
 0x3e9   : > { %9477 = vmatmul.msk.f32.gmra.mxu1 %vm272_vm1, %v11986_v35  ;;  %v3517_v0 = vpop.f32.mrf.mxu3 }
 0x3ea   : > { %v4223_v38 = vpop.f32.mrf.mxu2  ;;  %v3579_v40 = vadd.f32 %v3517_v0, %v14739_v33  ;;  %v5346_v0 = vld [vmem:[%s10337_s23 + $0x23] sm:$0xff] }
 0x3ec   : > { %v3857_v2 = vadd.f32 %v3795_v32, %v3579_v40  ;;  %v12610_v40 = vld [vmem:[%s10337_s23 + $0x9b] sm:$0xff] }
 0x3ed   : > { %v3798_v49 = vpop.f32.mrf.mxu0 }
 0x3ee   : > { %v3948_v55 = vpop.f32.mrf.mxu1  ;;  %v4007_v10 = vadd.f32 %v3945_v21, %v3857_v2  ;;  %9346 = vmatmul.msk.f32.gmra.mxu3 %vm272_vm1, %v12035_v3 }
 0x3ef   : > { %9513 = vmatmul.msk.f32.gmra.mxu2 %vm272_vm1, %v5345_v59 }
 0x3f0   : > { %9412 = vmatmul.msk.f32.gmra.mxu0 %vm272_vm1, %v12596_v44  ;;  %v12605_v35 = vadd.f32 %v4223_v38, %v4007_v10 }
 0x3f1   : > { %9478 = vmatmul.msk.f32.gmra.mxu1 %vm272_vm1, %v12025_v29  ;;  %v3520_v42 = vpop.f32.mrf.mxu3 }
 0x3f2   : > { %v4226_v32 = vpop.f32.mrf.mxu2  ;;  %v3580_v31 = vadd.f32 %v3520_v42, %v11908_v30  ;;  %v12624_v42 = vld [vmem:[%s10337_s23 + $0xab] sm:$0xff] }
 0x3f4   : > { %v3858_v21 = vadd.f32 %v3798_v49, %v3580_v31  ;;  %v5347_v49 = vld [vmem:[%s10337_s23 + $0x33] sm:$0xff] }
 0x3f5   : > { %v3801_v33 = vpop.f32.mrf.mxu0 }
 0x3f6   : > { %v3951_v3 = vpop.f32.mrf.mxu1  ;;  %v4008_v59 = vadd.f32 %v3948_v55, %v3858_v21  ;;  %9347 = vmatmul.msk.f32.gmra.mxu3 %vm272_vm1, %v12068_v41  ;;  %v5348_v21 = vld [vmem:[%s10337_s23 + $0x3b] sm:$0xff] }
 0x3f7   : > { %9514 = vmatmul.msk.f32.gmra.mxu2 %vm272_vm1, %v5346_v0 }
 0x3f8   : > { %9413 = vmatmul.msk.f32.gmra.mxu0 %vm272_vm1, %v12610_v40  ;;  %v12619_v29 = vadd.f32 %v4226_v32, %v4008_v59  ;;  %v12638_v59 = vld [vmem:[%s10337_s23 + $0xb3] sm:$0xff] }
 0x3f9   : > { %9479 = vmatmul.msk.f32.gmra.mxu1 %vm272_vm1, %v12062_v6  ;;  %v3523_v30 = vpop.f32.mrf.mxu3 }
 0x3fa   : > { %v4229_v38 = vpop.f32.mrf.mxu2  ;;  %v3581_v2 = vadd.f32 %v3523_v30, %v11944_v1 }
 0x3fc   : > { %v3859_v55 = vadd.f32 %v3801_v33, %v3581_v2 }
 0x3fd   : > { %v3804_v10 = vpop.f32.mrf.mxu0 }
 0x3fe   : > { %v3954_v41 = vpop.f32.mrf.mxu1  ;;  %v4009_v31 = vadd.f32 %v3951_v3, %v3859_v55  ;;  %9348 = vmatmul.msk.f32.gmra.mxu3 %vm272_vm1, %v12092_v56 }
 0x3ff   : > { %9515 = vmatmul.msk.f32.gmra.mxu2 %vm272_vm1, %v5347_v49  ;;  %v5349_v49 = vld [vmem:[%s10337_s23 + $0x4b] sm:$0xff] }
 0x400   : > { %9414 = vmatmul.msk.f32.gmra.mxu0 %vm272_vm1, %v12624_v42  ;;  %v12633_v1 = vadd.f32 %v4229_v38, %v4009_v31 }
 0x401   : > { %9480 = vmatmul.msk.f32.gmra.mxu1 %vm272_vm1, %v12087_v14  ;;  %v3526_v6 = vpop.f32.mrf.mxu3 }
 0x402   : > { %v4232_v32 = vpop.f32.mrf.mxu2  ;;  %v3582_v0 = vadd.f32 %v3526_v6, %v11983_v17 }
 0x404   : > { %v3860_v33 = vadd.f32 %v3804_v10, %v3582_v0  ;;  %v5350_v0 = vld [vmem:[%s10337_s23 + $0x53] sm:$0xff] }
 0x405   : > { %v3807_v3 = vpop.f32.mrf.mxu0 }
 0x406   : > { %v3957_v56 = vpop.f32.mrf.mxu1  ;;  %v4010_v30 = vadd.f32 %v3954_v41, %v3860_v33  ;;  %9349 = vmatmul.msk.f32.gmra.mxu3 %vm272_vm1, %v12116_v4  ;;  %v12652_v41 = vld [vmem:[%s10337_s23 + $0xc3] sm:$0xff] }
 0x407   : > { %9516 = vmatmul.msk.f32.gmra.mxu2 %vm272_vm1, %v5348_v21 }
 0x408   : > { %9415 = vmatmul.msk.f32.gmra.mxu0 %vm272_vm1, %v12638_v59  ;;  %v12647_v17 = vadd.f32 %v4232_v32, %v4010_v30 }
 0x409   : > { %9481 = vmatmul.msk.f32.gmra.mxu1 %vm272_vm1, %v12110_v16  ;;  %v3529_v14 = vpop.f32.mrf.mxu3 }
 0x40a   : > { %v4235_v38 = vpop.f32.mrf.mxu2  ;;  %v3583_v2 = vadd.f32 %v3529_v14, %v12022_v20 }
 0x40c   : > { %v3861_v55 = vadd.f32 %v3807_v3, %v3583_v2  ;;  %v12666_v3 = vld [vmem:[%s10337_s23 + $0xcb] sm:$0xff] }
 0x40d   : > { %v3810_v10 = vpop.f32.mrf.mxu0 }
 0x40e   : > { %v3960_v4 = vpop.f32.mrf.mxu1  ;;  %v4011_v31 = vadd.f32 %v3957_v56, %v3861_v55  ;;  %9350 = vmatmul.msk.f32.gmra.mxu3 %vm272_vm1, %v12140_v13  ;;  %v12680_v55 = vld [vmem:[%s10337_s23 + $0xdb] sm:$0xff] }
 0x40f   : > { %9517 = vmatmul.msk.f32.gmra.mxu2 %vm272_vm1, %v5349_v49 }
 0x410   : > { %9416 = vmatmul.msk.f32.gmra.mxu0 %vm272_vm1, %v12652_v41  ;;  %v12661_v20 = vadd.f32 %v4235_v38, %v4011_v31  ;;  %v5351_v38 = vld [vmem:[%s10337_s23 + $0x63] sm:$0xff] }
 0x411   : > { %9482 = vmatmul.msk.f32.gmra.mxu1 %vm272_vm1, %v12135_v46  ;;  %v3532_v16 = vpop.f32.mrf.mxu3 }
 0x412   : > { %v4238_v6 = vpop.f32.mrf.mxu2  ;;  %v3584_v32 = vadd.f32 %v3532_v16, %v12059_v19  ;;  %v5352_v16 = vld [vmem:[%s10337_s23 + $0x6b] sm:$0xff] }
 0x414   : > { %v3862_v21 = vadd.f32 %v3810_v10, %v3584_v32 }
 0x415   : > { %v3813_v33 = vpop.f32.mrf.mxu0 }
 0x416   : > { %v3963_v13 = vpop.f32.mrf.mxu1  ;;  %v4012_v56 = vadd.f32 %v3960_v4, %v3862_v21  ;;  %9351 = vmatmul.msk.f32.gmra.mxu3 %vm272_vm1, %v12164_v58 }
 0x417   : > { %9518 = vmatmul.msk.f32.gmra.mxu2 %vm272_vm1, %v5350_v0 }
 0x418   : > { %9417 = vmatmul.msk.f32.gmra.mxu0 %vm272_vm1, %v12666_v3  ;;  %v12675_v46 = vadd.f32 %v4238_v6, %v4012_v56 }
 0x419   : > { %9483 = vmatmul.msk.f32.gmra.mxu1 %vm272_vm1, %v12159_v23  ;;  %v3535_v19 = vpop.f32.mrf.mxu3 }
 0x41a   : > { %v4241_v30 = vpop.f32.mrf.mxu2  ;;  %v3585_v14 = vadd.f32 %v3535_v19, %v12084_v53 }
 0x41c   : > { %v3863_v2 = vadd.f32 %v3813_v33, %v3585_v14  ;;  %v12707_v14 = vld [vmem:[%s10337_s23 + $0xf3] sm:$0xff] }
 0x41d   : > { %v3816_v49 = vpop.f32.mrf.mxu0 }
 0x41e   : > { %v3966_v58 = vpop.f32.mrf.mxu1  ;;  %v4013_v10 = vadd.f32 %v3963_v13, %v3863_v2  ;;  %9352 = vmatmul.msk.f32.gmra.mxu3 %vm272_vm1, %v12188_v27  ;;  %v12694_v27 = vld [vmem:[%s10337_s23 + $0xe3] sm:$0xff] }
 0x41f   : > { %9519 = vmatmul.msk.f32.gmra.mxu2 %vm272_vm1, %v5351_v38 }
 0x420   : > { %9418 = vmatmul.msk.f32.gmra.mxu0 %vm272_vm1, %v12680_v55  ;;  %v12689_v23 = vadd.f32 %v4241_v30, %v4013_v10 }
 0x421   : > { %9484 = vmatmul.msk.f32.gmra.mxu1 %vm272_vm1, %v12183_v39  ;;  %v3538_v53 = vpop.f32.mrf.mxu3 }
 0x422   : > { %v4244_v4 = vpop.f32.mrf.mxu2  ;;  %v3586_v31 = vadd.f32 %v3538_v53, %v12107_v48 }
 0x424   : > { %v3864_v6 = vadd.f32 %v3816_v49, %v3586_v31 }
 0x425   : > { %v3819_v32 = vpop.f32.mrf.mxu0 }
 0x426   : > { %v3969_v0 = vpop.f32.mrf.mxu1  ;;  %v4014_v21 = vadd.f32 %v3966_v58, %v3864_v6  ;;  %9353 = vmatmul.msk.f32.gmra.mxu3 %vm272_vm1, %v12212_v15 }
 0x427   : > { %9520 = vmatmul.msk.f32.gmra.mxu2 %vm272_vm1, %v5352_v16 }
 0x428   : > { %9419 = vmatmul.msk.f32.gmra.mxu0 %vm272_vm1, %v12694_v27  ;;  %v12703_v39 = vadd.f32 %v4244_v4, %v4014_v21 }
 0x429   : > { %9485 = vmatmul.msk.f32.gmra.mxu1 %vm272_vm1, %v12207_v18  ;;  %v3541_v48 = vpop.f32.mrf.mxu3 }
 0x42a   : > { %v4247_v33 = vpop.f32.mrf.mxu2  ;;  %v3587_v13 = vadd.f32 %v3541_v48, %v12132_v22 }
 0x42c   : > { %v3865_v56 = vadd.f32 %v3819_v32, %v3587_v13 }
 0x42d   : > { %v3822_v19 = vpop.f32.mrf.mxu0 }
 0x42e   : > { %v3972_v30 = vpop.f32.mrf.mxu1  ;;  %v4015_v15 = vadd.f32 %v3969_v0, %v3865_v56  ;;  %9354 = vmatmul.msk.f32.gmra.mxu3 %vm272_vm1, %v12236_v54  ;;  %v12721_v54 = vld [vmem:[%s10337_s23 + $0xfb] sm:$0xff]  ;;  %v14740_v0 = vld [vmem:[#allocation56_spill] sm:$0xff] }
 0x42f   : > { %9521 = vmatmul.msk.f32.gmra.mxu2 %vm272_vm1, %v12568_v57 }
 0x430   : > { %9420 = vmatmul.msk.f32.gmra.mxu0 %vm272_vm1, %v12707_v14  ;;  %v12717_v18 = vadd.f32 %v4247_v33, %v4015_v15 }
 0x431   : > { %9486 = vmatmul.msk.f32.gmra.mxu1 %vm272_vm1, %v12231_v37  ;;  %v3544_v22 = vpop.f32.mrf.mxu3 }
 0x432   : > { %v4250_v38 = vpop.f32.mrf.mxu2  ;;  %v3588_v2 = vadd.f32 %v3544_v22, %v12156_v43 }
 0x434   : > { %v3866_v49 = vadd.f32 %v3822_v19, %v3588_v2 }
 0x435   : > { %v3825_v58 = vpop.f32.mrf.mxu0 }
 0x436   : > { %v3975_v10 = vpop.f32.mrf.mxu1  ;;  %v4016_v53 = vadd.f32 %v3972_v30, %v3866_v49  ;;  %9355 = vmatmul.msk.f32.gmra.mxu3 %vm272_vm1, %v12260_v47  ;;  %v12735_v47 = vld [vmem:[%s10337_s23 + $0x10b] sm:$0xff] }
 0x437   : > { %9522 = vmatmul.msk.f32.gmra.mxu2 %vm272_vm1, %v12582_v24  ;;  %v14741_v30 = vld [vmem:[#allocation57_spill] sm:$0xff] }
 0x438   : > { %9421 = vmatmul.msk.f32.gmra.mxu0 %vm272_vm1, %v12721_v54  ;;  %v12731_v37 = vadd.f32 %v4250_v38, %v4016_v53  ;;  %v14743_v53 = vld [vmem:[#allocation59_spill] sm:$0xff] }
 0x439   : > { %9487 = vmatmul.msk.f32.gmra.mxu1 %vm272_vm1, %v12255_v62  ;;  %v3547_v43 = vpop.f32.mrf.mxu3 }
 0x43a   : > { %v4253_v57 = vpop.f32.mrf.mxu2  ;;  %v3589_v4 = vadd.f32 %v3547_v43, %v12180_v45 }
 0x43c   : > { %v3867_v31 = vadd.f32 %v3825_v58, %v3589_v4 }
 0x43d   : > { %v3828_v16 = vpop.f32.mrf.mxu0 }
 0x43e   : > { %v3978_v6 = vpop.f32.mrf.mxu1  ;;  %v4017_v32 = vadd.f32 %v3975_v10, %v3867_v31  ;;  %9356 = vmatmul.msk.f32.gmra.mxu3 %vm272_vm1, %v12284_v7  ;;  %v12749_v7 = vld [vmem:[%s10337_s23 + $0x113] sm:$0xff] }
 0x43f   : > { %9523 = vmatmul.msk.f32.gmra.mxu2 %vm272_vm1, %v12596_v44 }
 0x440   : > { %9422 = vmatmul.msk.f32.gmra.mxu0 %vm272_vm1, %v12735_v47  ;;  %v12745_v62 = vadd.f32 %v4253_v57, %v4017_v32 }
 0x441   : > { %9488 = vmatmul.msk.f32.gmra.mxu1 %vm272_vm1, %v12279_v5  ;;  %v3550_v45 = vpop.f32.mrf.mxu3 }
 0x442   : > { %v4256_v24 = vpop.f32.mrf.mxu2  ;;  %v3590_v21 = vadd.f32 %v3550_v45, %v14740_v0 }
 0x444   : > { %v3868_v48 = vadd.f32 %v3828_v16, %v3590_v21  ;;  %v12777_v16 = vld [vmem:[%s10337_s23 + $0x12b] sm:$0xff] }
 0x445   : > { %v3831_v33 = vpop.f32.mrf.mxu0 }
 0x446   : > { %v3981_v13 = vpop.f32.mrf.mxu1  ;;  %v4018_v56 = vadd.f32 %v3978_v6, %v3868_v48  ;;  %9357 = vmatmul.msk.f32.gmra.mxu3 %vm272_vm1, %v12308_v11  ;;  %v12763_v11 = vld [vmem:[%s10337_s23 + $0x123] sm:$0xff] }
 0x447   : > { %9524 = vmatmul.msk.f32.gmra.mxu2 %vm272_vm1, %v12610_v40  ;;  %v14742_v40 = vld [vmem:[#allocation65_spill] sm:$0xff] }
 0x448   : > { %9423 = vmatmul.msk.f32.gmra.mxu0 %vm272_vm1, %v12749_v7  ;;  %v12759_v5 = vadd.f32 %v4256_v24, %v4018_v56  ;;  %v14745_v24 = vld [vmem:[#allocation27_spill] sm:$0xff] }
 0x449   : > { %9489 = vmatmul.msk.f32.gmra.mxu1 %vm272_vm1, %v12305_v28  ;;  %v3553_v44 = vpop.f32.mrf.mxu3 }
 0x44a   : > { %v4259_v19 = vpop.f32.mrf.mxu2  ;;  %v3591_v15 = vadd.f32 %v3553_v44, %v14741_v30  ;;  %v14747_v30 = vld [vmem:[#allocation53_spill] sm:$0xff] }
 0x44c   : > { %v3869_v22 = vadd.f32 %v3831_v33, %v3591_v15 }
 0x44d   : > { %v3834_v38 = vpop.f32.mrf.mxu0 }
 0x44e   : > { %v3984_v2 = vpop.f32.mrf.mxu1  ;;  %v4019_v49 = vadd.f32 %v3981_v13, %v3869_v22  ;;  %9358 = vmatmul.msk.f32.gmra.mxu3 %vm272_vm1, %v14742_v40  ;;  %v12791_v13 = vld [vmem:[%s10337_s23 + $0x13b] sm:$0xff]  ;;  %v14748_v40 = vld [vmem:[#allocation60_spill] sm:$0xff] }
 0x44f   : > { %9525 = vmatmul.msk.f32.gmra.mxu2 %vm272_vm1, %v12624_v42  ;;  %v14744_v42 = vld [vmem:[#allocation68_spill] sm:$0xff] }
 0x450   : > { %9424 = vmatmul.msk.f32.gmra.mxu0 %vm272_vm1, %v12763_v11  ;;  %v12773_v28 = vadd.f32 %v4259_v19, %v4019_v49  ;;  %v12807_v49 = vld [vmem:[%s10337_s23 + $0x143] sm:$0xff] }
 0x451   : > { %9490 = vmatmul.msk.f32.gmra.mxu1 %vm272_vm1, %v12322_v34  ;;  %v3556_v58 = vpop.f32.mrf.mxu3 }
 0x452   : > { %v4262_v10 = vpop.f32.mrf.mxu2  ;;  %v3592_v43 = vadd.f32 %v3556_v58, %v14743_v53  ;;  %v14750_v53 = vld [vmem:[#allocation67_spill] sm:$0xff] }
 0x454   : > { %v3870_v57 = vadd.f32 %v3834_v38, %v3592_v43 }
 0x455   : > { %v3837_v4 = vpop.f32.mrf.mxu0 }
 0x456   : > { %v3987_v31 = vpop.f32.mrf.mxu1  ;;  %v4020_v6 = vadd.f32 %v3984_v2, %v3870_v57  ;;  %9359 = vmatmul.msk.f32.gmra.mxu3 %vm272_vm1, %v14744_v42 }
 0x457   : > { %9526 = vmatmul.msk.f32.gmra.mxu2 %vm272_vm1, %v12638_v59  ;;  %v14746_v59 = vld [vmem:[#allocation71_spill] sm:$0xff] }
 0x458   : > { %9425 = vmatmul.msk.f32.gmra.mxu0 %vm272_vm1, %v12777_v16  ;;  %v12787_v34 = vadd.f32 %v4262_v10, %v4020_v6  ;;  %v12822_v6 = vld [vmem:[%s10337_s23 + $0x153] sm:$0xff] }
 0x459   : > { %9491 = vmatmul.msk.f32.gmra.mxu1 %vm272_vm1, %v12339_v8  ;;  %v3559_v32 = vpop.f32.mrf.mxu3 }
 0x45a   : > { %v4265_v45 = vpop.f32.mrf.mxu2  ;;  %v3593_v0 = vadd.f32 %v3559_v32, %v14745_v24  ;;  %v14751_v32 = vld [vmem:[#allocation62_spill] sm:$0xff] }
 0x45c   : > { %v3871_v21 = vadd.f32 %v3837_v4, %v3593_v0 }
 0x45d   : > { %v4731_v48 = vpop.f32.mrf.mxu0 }
 0x45e   : > { %v5009_v33 = vpop.f32.mrf.mxu1  ;;  %v4021_v56 = vadd.f32 %v3987_v31, %v3871_v21  ;;  %9360 = vmatmul.msk.f32.gmra.mxu3 %vm272_vm1, %v14746_v59  ;;  %v14752_v59 = vld [vmem:[#allocation69_spill] sm:$0xff] }
 0x45f   : > { %9527 = vmatmul.msk.f32.gmra.mxu2 %vm272_vm1, %v12652_v41 }
 0x460   : > { %9426 = vmatmul.msk.f32.gmra.mxu0 %vm272_vm1, %v12791_v13  ;;  %v12801_v8 = vadd.f32 %v4265_v45, %v4021_v56 }
 0x461   : > { %9492 = vmatmul.msk.f32.gmra.mxu1 %vm272_vm1, %v12356_v60  ;;  %v4453_v44 = vpop.f32.mrf.mxu3  ;;  %v14749_v60 = vld [vmem:[#allocation19_spill] sm:$0xff] }
 0x462   : > { %v12803_v19 = vpop.f32.mrf.mxu2  ;;  %v4549_v15 = vadd.f32 %v4453_v44, %v14747_v30 }
 0x464   : > { %v4827_v22 = vadd.f32 %v4731_v48, %v4549_v15 }
 0x465   : > { %v4734_v38 = vpop.f32.mrf.mxu0 }
 0x466   : > { %v5012_v2 = vpop.f32.mrf.mxu1  ;;  %v5105_v41 = vadd.f32 %v5009_v33, %v4827_v22  ;;  %9361 = vmatmul.msk.f32.gmra.mxu3 %vm272_vm1, %v14748_v40 }
 0x467   : > { %9528 = vmatmul.msk.f32.gmra.mxu2 %vm272_vm1, %v12666_v3 }
 0x468   : > { %9427 = vmatmul.msk.f32.gmra.mxu0 %vm272_vm1, %v12807_v49  ;;  %7824 = vrot.lane.b32.xlu0 %v5105_v41, %s10227_s28  ;;  %v5206_v3 = vmul.f32 %v5105_v41, %v5105_v41  ;;  %v5137_v45 = vsel %vm2650_vm2, %v5105_v41, 0.0  ;;  %v14753_v41 = vld [vmem:[#allocation64_spill] sm:$0xff] }
 0x469   : > { %9493 = vmatmul.msk.f32.gmra.mxu1 %vm272_vm1, %v14749_v60  ;;  %v4456_v58 = vpop.f32.mrf.mxu3 }
 0x46a   : > { %v12818_v10 = vpop.f32.mrf.mxu2  ;;  %v4550_v43 = vadd.f32 %v4456_v58, %v14750_v53 }
 0x46c   : > { %v4828_v57 = vadd.f32 %v4734_v38, %v4550_v43  ;;  %v12841_v38 = vld [vmem:[%s10337_s23 + $0x15b] sm:$0xff] }
 0x46d   : > { %v4737_v4 = vpop.f32.mrf.mxu0 }
 0x46e   : > { %v5015_v31 = vpop.f32.mrf.mxu1  ;;  %v5106_v42 = vadd.f32 %v5012_v2, %v4828_v57  ;;  %9362 = vmatmul.msk.f32.gmra.mxu3 %vm272_vm1, %v14751_v32 }
 0x46f   : > { %9529 = vmatmul.msk.f32.gmra.mxu2 %vm272_vm1, %v12680_v55  ;;  %v5238_v55 = vsel %vm2650_vm2, %v5206_v3, 0.0 }
 0x470   : > { %9428 = vmatmul.msk.f32.gmra.mxu0 %vm272_vm1, %v12822_v6  ;;  %v5138_v24 = vsel %vm2650_vm2, %v5106_v42, 0.0  ;;  %v5207_v0 = vmul.f32 %v5106_v42, %v5106_v42  ;;  %7826 = vrot.lane.b32.xlu0 %v5106_v42, %s10227_s28 }
 0x471   : > { %9494 = vmatmul.msk.f32.gmra.mxu1 %vm272_vm1, %v12390_v26  ;;  %v5139_v21 = vadd.f32 %v5138_v24, %v5137_v45  ;;  %v4459_v48 = vpop.f32.mrf.mxu3  ;;  %v12858_v45 = vld [vmem:[%s10337_s23 + $0x16b] sm:$0xff]  ;;  %v14755_v24 = vld [vmem:[#allocation70_spill] sm:$0xff] }
 0x472   : > { %v12835_v33 = vpop.f32.mrf.mxu2  ;;  %v5239_v56 = vsel %vm2650_vm2, %v5207_v0, 0.0  ;;  %v4551_v44 = vadd.f32 %v4459_v48, %v14752_v59 }
 0x473   : > { %v5240_v30 = vadd.f32 %v5239_v56, %v5238_v55 }
 0x474   : > { %v4829_v15 = vadd.f32 %v4737_v4, %v4551_v44  ;;  %v14754_v4 = vld [vmem:[#allocation72_spill] sm:$0xff]  ;;  %v14756_v44 = vld [vmem:[#allocation61_spill] sm:$0xff] }
 0x475   : > { %v4740_v26 = vpop.f32.mrf.mxu0 }
 0x476   : > { %v5018_v22 = vpop.f32.mrf.mxu1  ;;  %v5107_v2 = vadd.f32 %v5015_v31, %v4829_v15  ;;  %9363 = vmatmul.msk.f32.gmra.mxu3 %vm272_vm1, %v14753_v41  ;;  %v14757_v41 = vld [vmem:[#allocation12_spill] sm:$0xff] }
 0x477   : > { %9530 = vmatmul.msk.f32.gmra.mxu2 %vm272_vm1, %v12694_v27 }
 0x478   : > { %9429 = vmatmul.msk.f32.gmra.mxu0 %vm272_vm1, %v12841_v38  ;;  %v5140_v40 = vsel %vm2650_vm2, %v5107_v2, 0.0  ;;  %v5208_v60 = vmul.f32 %v5107_v2, %v5107_v2  ;;  %7828 = vrot.lane.b32.xlu1 %v5107_v2, %s10227_s28  ;;  %v12875_v2 = vld [vmem:[%s10337_s23 + $0x173] sm:$0xff] }
 0x479   : > { %9495 = vmatmul.msk.f32.gmra.mxu1 %vm272_vm1, %v12407_v63  ;;  %v5141_v58 = vadd.f32 %v5140_v40, %v5139_v21  ;;  %v4462_v53 = vpop.f32.mrf.mxu3 }
 0x47a   : > { %v12853_v43 = vpop.f32.mrf.mxu2  ;;  %v5241_v57 = vsel %vm2650_vm2, %v5208_v60, 0.0  ;;  %v4552_v31 = vadd.f32 %v4462_v53, %v14754_v4 }
 0x47b   : > { %v5242_v27 = vadd.f32 %v5241_v57, %v5240_v30 }
 0x47c   : > { %v4830_v3 = vadd.f32 %v4740_v26, %v4552_v31  ;;  %v14758_v31 = vld [vmem:[#allocation63_spill] sm:$0xff] }
 0x47d   : > { %v4743_v42 = vpop.f32.mrf.mxu0 }
 0x47e   : > { %v5021_v32 = vpop.f32.mrf.mxu1  ;;  %v5108_v63 = vadd.f32 %v5018_v22, %v4830_v3  ;;  %9364 = vmatmul.msk.f32.gmra.mxu3 %vm272_vm1, %v14755_v24  ;;  %v14759_v24 = vld [vmem:[#allocation13_spill] sm:$0xff] }
 0x47f   : > { %9531 = vmatmul.msk.f32.gmra.mxu2 %vm272_vm1, %v12707_v14 }
 0x480   : > { %9430 = vmatmul.msk.f32.gmra.mxu0 %vm272_vm1, %v12858_v45  ;;  %v5142_v0 = vsel %vm2650_vm2, %v5108_v63, 0.0  ;;  %v5209_v21 = vmul.f32 %v5108_v63, %v5108_v63  ;;  %7830 = vrot.lane.b32.xlu1 %v5108_v63, %s10227_s28  ;;  %v9398_v63 = vld [vmem:[%s10337_s23 + $0x183] sm:$0xff] }
 0x481   : > { %9496 = vmatmul.msk.f32.gmra.mxu1 %vm272_vm1, %v12424_v50  ;;  %v5143_v48 = vadd.f32 %v5142_v0, %v5141_v58  ;;  %v4465_v55 = vpop.f32.mrf.mxu3 }
 0x482   : > { %v12870_v56 = vpop.f32.mrf.mxu2  ;;  %v5243_v59 = vsel %vm2650_vm2, %v5209_v21, 0.0  ;;  %v4553_v30 = vadd.f32 %v4465_v55, %v14756_v44 }
 0x483   : > { %v5244_v14 = vadd.f32 %v5243_v59, %v5242_v27 }
 0x484   : > { %v4831_v15 = vadd.f32 %v4743_v42, %v4553_v30  ;;  %v14760_v30 = vld [vmem:[#allocation66_spill] sm:$0xff] }
 0x485   : > { %v4746_v26 = vpop.f32.mrf.mxu0 }
 0x486   : > { %v5024_v22 = vpop.f32.mrf.mxu1  ;;  %v5109_v50 = vadd.f32 %v5021_v32, %v4831_v15  ;;  %9365 = vmatmul.msk.f32.gmra.mxu3 %vm272_vm1, %v14757_v41  ;;  %v9333_v15 = vld [vmem:[%s10337_s23 + $0x189] sm:$0xff] }
 0x487   : > { %9532 = vmatmul.msk.f32.gmra.mxu2 %vm272_vm1, %v12721_v54  ;;  %v9399_v41 = vld [vmem:[%s10337_s23 + $0x18b] sm:$0xff] }
 0x488   : > { %9431 = vmatmul.msk.f32.gmra.mxu0 %vm272_vm1, %v12875_v2  ;;  %v5144_v40 = vsel %vm2650_vm2, %v5109_v50, 0.0  ;;  %v5210_v60 = vmul.f32 %v5109_v50, %v5109_v50  ;;  %7832 = vrot.lane.b32.xlu2 %v5109_v50, %s10227_s28 }
 0x489   : > { %9497 = vmatmul.msk.f32.gmra.mxu1 %vm272_vm1, %v12441_v9  ;;  %v5145_v58 = vadd.f32 %v5144_v40, %v5143_v48  ;;  %v4468_v53 = vpop.f32.mrf.mxu3 }
 0x48a   : > { %v12887_v57 = vpop.f32.mrf.mxu2  ;;  %v5245_v4 = vsel %vm2650_vm2, %v5210_v60, 0.0  ;;  %v4554_v27 = vadd.f32 %v4468_v53, %v14758_v31 }
 0x48b   : > { %v5246_v54 = vadd.f32 %v5245_v4, %v5244_v14 }
 0x48c   : > { %v4832_v3 = vadd.f32 %v4746_v26, %v4554_v27  ;;  %v14761_v27 = vld [vmem:[#allocation16_spill] sm:$0xff] }
 0x48d   : > { %v4749_v42 = vpop.f32.mrf.mxu0 }
 0x48e   : > { %v5027_v32 = vpop.f32.mrf.mxu1  ;;  %v5110_v9 = vadd.f32 %v5024_v22, %v4832_v3  ;;  %9366 = vmatmul.msk.f32.gmra.mxu3 %vm272_vm1, %v14759_v24  ;;  %v14763_v24 = vld [vmem:[#allocation73_spill] sm:$0xff] }
 0x48f   : > { %9533 = vmatmul.msk.f32.gmra.mxu2 %vm272_vm1, %v12735_v47 }
 0x490   : > { %9432 = vmatmul.msk.f32.gmra.mxu0 %vm272_vm1, %v9398_v63  ;;  %v5146_v0 = vsel %vm2650_vm2, %v5110_v9, 0.0  ;;  %v5211_v21 = vmul.f32 %v5110_v9, %v5110_v9  ;;  %7834 = vrot.lane.b32.xlu2 %v5110_v9, %s10227_s28  ;;  %v9400_v63 = vld [vmem:[%s10337_s23 + $0x19b] sm:$0xff] }
 0x491   : > { %9498 = vmatmul.msk.f32.gmra.mxu1 %vm272_vm1, %v12458_v52  ;;  %v5147_v48 = vadd.f32 %v5146_v0, %v5145_v58  ;;  %v4471_v55 = vpop.f32.mrf.mxu3 }
 0x492   : > { %v12901_v59 = vpop.f32.mrf.mxu2  ;;  %v5247_v44 = vsel %vm2650_vm2, %v5211_v21, 0.0  ;;  %v4555_v14 = vadd.f32 %v4471_v55, %v14760_v30 }
 0x493   : > { %v5248_v47 = vadd.f32 %v5247_v44, %v5246_v54 }
 0x494   : > { %v4833_v26 = vadd.f32 %v4749_v42, %v4555_v14  ;;  %v14764_v14 = vld [vmem:[#allocation38_spill] sm:$0xff] }
 0x495   : > { %v4752_v22 = vpop.f32.mrf.mxu0 }
 0x496   : > { %v5030_v50 = vpop.f32.mrf.mxu1  ;;  %v5111_v52 = vadd.f32 %v5027_v32, %v4833_v26  ;;  %9367 = vmatmul.msk.f32.gmra.mxu3 %vm272_vm1, %v9333_v15 }
 0x497   : > { %9534 = vmatmul.msk.f32.gmra.mxu2 %vm272_vm1, %v12749_v7 }
 0x498   : > { %9433 = vmatmul.msk.f32.gmra.mxu0 %vm272_vm1, %v9399_v41  ;;  %v5148_v40 = vsel %vm2650_vm2, %v5111_v52, 0.0  ;;  %v5212_v60 = vmul.f32 %v5111_v52, %v5111_v52  ;;  %7836 = vrot.lane.b32.xlu0 %v5111_v52, %s10227_s28  ;;  %v14765_v52 = vld [vmem:[#allocation76_spill] sm:$0xff] }
 0x499   : > { %9499 = vmatmul.msk.f32.gmra.mxu1 %vm272_vm1, %v12475_v61  ;;  %v5149_v58 = vadd.f32 %v5148_v40, %v5147_v48  ;;  %v4474_v53 = vpop.f32.mrf.mxu3  ;;  %v14762_v61 = vld [vmem:[#allocation74_spill] sm:$0xff]  ;;  %v14766_v40 = vld [vmem:[#allocation29_spill] sm:$0xff] }
 0x49a   : > { %v12915_v4 = vpop.f32.mrf.mxu2  ;;  %v5249_v31 = vsel %vm2650_vm2, %v5212_v60, 0.0  ;;  %v4556_v54 = vadd.f32 %v4474_v53, %v14761_v27 }
 0x49b   : > { %v5250_v3 = vadd.f32 %v5249_v31, %v5248_v47 }
 0x49c   : > { %v4834_v7 = vadd.f32 %v4752_v22, %v4556_v54 }
 0x49d   : > { %v4755_v42 = vpop.f32.mrf.mxu0 }
 0x49e   : > { %v5033_v32 = vpop.f32.mrf.mxu1  ;;  %v5112_v9 = vadd.f32 %v5030_v50, %v4834_v7  ;;  %9368 = vmatmul.msk.f32.gmra.mxu3 %vm272_vm1, %v14762_v61  ;;  %v9401_v50 = vld [vmem:[%s10337_s23 + $0x1a3] sm:$0xff]  ;;  %v9468_v61 = vld [vmem:[%s10337_s23 + $0x1b5] sm:$0xff] }
 0x49f   : > { %9535 = vmatmul.msk.f32.gmra.mxu2 %vm272_vm1, %v12763_v11 }
 0x4a0   : > { %9434 = vmatmul.msk.f32.gmra.mxu0 %vm272_vm1, %v9400_v63  ;;  %v5150_v0 = vsel %vm2650_vm2, %v5112_v9, 0.0  ;;  %v5213_v21 = vmul.f32 %v5112_v9, %v5112_v9  ;;  %7838 = vrot.lane.b32.xlu1 %v5112_v9, %s10227_s28  ;;  %v9402_v9 = vld [vmem:[%s10337_s23 + $0x1b3] sm:$0xff] }
 0x4a1   : > { %9500 = vmatmul.msk.f32.gmra.mxu1 %vm272_vm1, %v14763_v24  ;;  %v5151_v48 = vadd.f32 %v5150_v0, %v5149_v58  ;;  %v4477_v55 = vpop.f32.mrf.mxu3  ;;  %v14768_v0 = vld [vmem:[#allocation44_spill] sm:$0xff] }
 0x4a2   : > { %v12929_v44 = vpop.f32.mrf.mxu2  ;;  %v5251_v30 = vsel %vm2650_vm2, %v5213_v21, 0.0  ;;  %v4557_v47 = vadd.f32 %v4477_v55, %v14764_v14 }
 0x4a3   : > { %v5252_v15 = vadd.f32 %v5251_v30, %v5250_v3  ;;  %v14767_v3 = vld [vmem:[#allocation22_spill] sm:$0xff] }
 0x4a4   : > { %v4835_v11 = vadd.f32 %v4755_v42, %v4557_v47 }
 0x4a5   : > { %v4758_v26 = vpop.f32.mrf.mxu0 }
 0x4a6   : > { %v5036_v22 = vpop.f32.mrf.mxu1  ;;  %v5113_v41 = vadd.f32 %v5033_v32, %v4835_v11  ;;  %9369 = vmatmul.msk.f32.gmra.mxu3 %vm272_vm1, %v14765_v52  ;;  %v9469_v52 = vld [vmem:[%s10337_s23 + $0x1bd] sm:$0xff] }
 0x4a7   : > { %9536 = vmatmul.msk.f32.gmra.mxu2 %vm272_vm1, %v12777_v16 }
 0x4a8   : > { %9435 = vmatmul.msk.f32.gmra.mxu0 %vm272_vm1, %v9401_v50  ;;  %v5152_v60 = vsel %vm2650_vm2, %v5113_v41, 0.0  ;;  %v5214_v58 = vmul.f32 %v5113_v41, %v5113_v41  ;;  %7840 = vrot.lane.b32.xlu2 %v5113_v41, %s10227_s28  ;;  %v9403_v41 = vld [vmem:[%s10337_s23 + $0x1bb] sm:$0xff] }
 0x4a9   : > { %9501 = vmatmul.msk.f32.gmra.mxu1 %vm272_vm1, %v14766_v40  ;;  %v5153_v53 = vadd.f32 %v5152_v60, %v5151_v48  ;;  %v4480_v31 = vpop.f32.mrf.mxu3 }
 0x4aa   : > { %v12943_v27 = vpop.f32.mrf.mxu2  ;;  %v5253_v54 = vsel %vm2650_vm2, %v5214_v58, 0.0  ;;  %v4558_v7 = vadd.f32 %v4480_v31, %v14767_v3  ;;  %v14770_v3 = vld [vmem:[#allocation75_spill] sm:$0xff] }
 0x4ab   : > { %v5254_v16 = vadd.f32 %v5253_v54, %v5252_v15  ;;  %v14769_v15 = vld [vmem:[#allocation25_spill] sm:$0xff] }
 0x4ac   : > { %v4836_v42 = vadd.f32 %v4758_v26, %v4558_v7 }
 0x4ad   : > { %v4761_v32 = vpop.f32.mrf.mxu0 }
 0x4ae   : > { %v5039_v63 = vpop.f32.mrf.mxu1  ;;  %v5114_v24 = vadd.f32 %v5036_v22, %v4836_v42  ;;  %9370 = vmatmul.msk.f32.gmra.mxu3 %vm272_vm1, %v14768_v0 }
 0x4af   : > { %9537 = vmatmul.msk.f32.gmra.mxu2 %vm272_vm1, %v12791_v13 }
 0x4b0   : > { %9436 = vmatmul.msk.f32.gmra.mxu0 %vm272_vm1, %v9402_v9  ;;  %v5154_v21 = vsel %vm2650_vm2, %v5114_v24, 0.0  ;;  %v5215_v48 = vmul.f32 %v5114_v24, %v5114_v24  ;;  %7842 = vrot.lane.b32.xlu0 %v5114_v24, %s10227_s28  ;;  %v9404_v9 = vld [vmem:[%s10337_s23 + $0x1cb] sm:$0xff] }
 0x4b1   : > { %9502 = vmatmul.msk.f32.gmra.mxu1 %vm272_vm1, %v9468_v61  ;;  %v5155_v55 = vadd.f32 %v5154_v21, %v5153_v53  ;;  %v4483_v30 = vpop.f32.mrf.mxu3  ;;  %v9470_v61 = vld [vmem:[%s10337_s23 + $0x1cd] sm:$0xff] }
 0x4b2   : > { %v12957_v14 = vpop.f32.mrf.mxu2  ;;  %v5255_v47 = vsel %vm2650_vm2, %v5215_v48, 0.0  ;;  %v4559_v11 = vadd.f32 %v4483_v30, %v14769_v15  ;;  %v14771_v15 = vld [vmem:[#allocation77_spill] sm:$0xff] }
 0x4b3   : > { %v5256_v26 = vadd.f32 %v5255_v47, %v5254_v16  ;;  %v9338_v16 = vld [vmem:[%s10337_s23 + $0x1c9] sm:$0xff] }
 0x4b4   : > { %v4837_v13 = vadd.f32 %v4761_v32, %v4559_v11 }
 0x4b5   : > { %v4764_v22 = vpop.f32.mrf.mxu0 }
 0x4b6   : > { %v5042_v50 = vpop.f32.mrf.mxu1  ;;  %v5115_v40 = vadd.f32 %v5039_v63, %v4837_v13  ;;  %9371 = vmatmul.msk.f32.gmra.mxu3 %vm272_vm1, %v12554_v12  ;;  %v9742_v13 = vld [vmem:[%s14425_s1 + $0x5c] sm:$0xf] }
 0x4b7   : > { %9538 = vmatmul.msk.f32.gmra.mxu2 %vm272_vm1, %v12807_v49  ;;  %9743 = vmatpush.msk.msra.mxu3 %vm369_vm0, %v9742_v13 }
 0x4b8   : > { %9437 = vmatmul.msk.f32.gmra.mxu0 %vm272_vm1, %v9403_v41  ;;  %v5156_v60 = vsel %vm2650_vm2, %v5115_v40, 0.0  ;;  %v5216_v58 = vmul.f32 %v5115_v40, %v5115_v40  ;;  %7844 = vrot.lane.b32.xlu1 %v5115_v40, %s10227_s28  ;;  %v9471_v40 = vld [vmem:[%s10337_s23 + $0x1d5] sm:$0xff] }
 0x4b9   : > { %9503 = vmatmul.msk.f32.gmra.mxu1 %vm272_vm1, %v9469_v52  ;;  %v5157_v53 = vadd.f32 %v5156_v60, %v5155_v55  ;;  %v4486_v31 = vpop.f32.mrf.mxu3  ;;  %v9405_v52 = vld [vmem:[%s10337_s23 + $0x1d3] sm:$0xff]  ;;  %v9940_v60 = vld [vmem:[%s14425_s1 + $0x68] sm:$0xf] }
 0x4ba   : > { %v12971_v54 = vpop.f32.mrf.mxu2  ;;  %v5257_v12 = vsel %vm2650_vm2, %v5216_v58, 0.0  ;;  %v4560_v7 = vadd.f32 %v4486_v31, %v14770_v3  ;;  %9941 = vmatpush.msk.msra.mxu2 %vm369_vm0, %v9940_v60  ;;  %v9407_v60 = vld [vmem:[%s10337_s23 + $0x1eb] sm:$0xff] }
 0x4bb   : > { %v5258_v49 = vadd.f32 %v5257_v12, %v5256_v26  ;;  %v9339_v26 = vld [vmem:[%s10337_s23 + $0x1d1] sm:$0xff] }
 0x4bc   : > { %v4838_v42 = vadd.f32 %v4764_v22, %v4560_v7 }
 0x4bd   : > { %v4767_v32 = vpop.f32.mrf.mxu0 }
 0x4be   : > { %v5045_v63 = vpop.f32.mrf.mxu1  ;;  %v5116_v24 = vadd.f32 %v5042_v50, %v4838_v42  ;;  %9372 = vmatmul.msk.f32.gmra.mxu3 %vm272_vm1, %v9338_v16  ;;  %v14772_v16 = vld [vmem:[#allocation78_spill] sm:$0xff] }
 0x4bf   : > { %9539 = vmatmul.msk.f32.gmra.mxu2 %vm272_vm1, %v12822_v6 }
 0x4c0   : > { %9438 = vmatmul.msk.f32.gmra.mxu0 %vm272_vm1, %v9404_v9  ;;  %v5158_v0 = vsel %vm2650_vm2, %v5116_v24, 0.0  ;;  %v5217_v21 = vmul.f32 %v5116_v24, %v5116_v24  ;;  %7846 = vrot.lane.b32.xlu2 %v5116_v24, %s10227_s28  ;;  %v9874_v9 = vld [vmem:[%s14425_s1 + $0x64] sm:$0xf] }
 0x4c1   : > { %9504 = vmatmul.msk.f32.gmra.mxu1 %vm272_vm1, %v9470_v61  ;;  %v5159_v48 = vadd.f32 %v5158_v0, %v5157_v53  ;;  %v4489_v55 = vpop.f32.mrf.mxu3 }
 0x4c2   : > { %v12985_v30 = vpop.f32.mrf.mxu2  ;;  %v5259_v47 = vsel %vm2650_vm2, %v5217_v21, 0.0  ;;  %v4561_v11 = vadd.f32 %v4489_v55, %v14771_v15  ;;  %v9406_v21 = vld [vmem:[%s10337_s23 + $0x1e3] sm:$0xff]  ;;  %9875 = vmatpush.msk.msra.mxu1 %vm369_vm0, %v9874_v9 }
 0x4c3   : > { %v5260_v6 = vadd.f32 %v5259_v47, %v5258_v49 }
 0x4c4   : > { %v4839_v22 = vadd.f32 %v4767_v32, %v4561_v11  ;;  %v9340_v32 = vld [vmem:[%s10337_s23 + $0x1e1] sm:$0xff] }
 0x4c5   : > { %v4770_v50 = vpop.f32.mrf.mxu0 }
 0x4c6   : > { %v5048_v41 = vpop.f32.mrf.mxu1  ;;  %v5117_v58 = vadd.f32 %v5045_v63, %v4839_v22  ;;  %9373 = vmatmul.msk.f32.gmra.mxu3 %vm272_vm1, %v9339_v26  ;;  %v9808_v63 = vld [vmem:[%s14425_s1 + $0x60] sm:$0xf] }
 0x4c7   : > { %9540 = vmatmul.msk.f32.gmra.mxu2 %vm272_vm1, %v12841_v38  ;;  %9809 = vmatpush.msk.msra.mxu0 %vm369_vm0, %v9808_v63 }
 0x4c8   : > { %9439 = vmatmul.msk.f32.gmra.mxu0 %vm272_vm1, %v9405_v52  ;;  %v5160_v53 = vsel %vm2650_vm2, %v5117_v58, 0.0  ;;  %v5218_v31 = vmul.f32 %v5117_v58, %v5117_v58  ;;  %7848 = vrot.lane.b32.xlu0 %v5117_v58, %s10227_s28  ;;  %v9473_v58 = vld [vmem:[%s10337_s23 + $0x1ed] sm:$0xff] }
 0x4c9   : > { %9505 = vmatmul.msk.f32.gmra.mxu1 %vm272_vm1, %v9471_v40  ;;  %v5161_v12 = vadd.f32 %v5160_v53, %v5159_v48  ;;  %v4492_v3 = vpop.f32.mrf.mxu3  ;;  %v9472_v48 = vld [vmem:[%s10337_s23 + $0x1e5] sm:$0xff] }
 0x4ca   : > { %v13007_v7 = vpop.f32.mrf.mxu2  ;;  %v5261_v49 = vsel %vm2650_vm2, %v5218_v31, 0.0  ;;  %v4562_v42 = vadd.f32 %v4492_v3, %v14772_v16 }
 0x4cb   : > { %v5262_v38 = vadd.f32 %v5261_v49, %v5260_v6 }
 0x4cc   : > { %v4840_v61 = vadd.f32 %v4770_v50, %v4562_v42  ;;  %v9341_v50 = vld [vmem:[%s10337_s23 + $0x1e9] sm:$0xff] }
 0x4cd   : > { %v4773_v24 = vpop.f32.mrf.mxu0 }
 0x4ce   : > { %v5051_v0 = vpop.f32.mrf.mxu1  ;;  %v5118_v55 = vadd.f32 %v5048_v41, %v4840_v61  ;;  %9374 = vmatmul.msk.f32.gmra.mxu3 %vm272_vm1, %v9340_v32  ;;  %v5801_v61 = vld [vmem:[%s10337_s23 + $0x6] sm:$0xff] }
 0x4cf   : > { %9541 = vmatmul.msk.f32.gmra.mxu2 %vm272_vm1, %v12858_v45 }
 0x4d0   : > { %9440 = vmatmul.msk.f32.gmra.mxu0 %vm272_vm1, %v9406_v21  ;;  %v5162_v47 = vsel %vm2650_vm2, %v5118_v55, 0.0  ;;  %v5219_v15 = vmul.f32 %v5118_v55, %v5118_v55  ;;  %7850 = vrot.lane.b32.xlu1 %v5118_v55, %s10227_s28  ;;  %v10083_v21 = vld [vmem:[%s10337_s23 + $0x4b] sm:$0xff] }
 0x4d1   : > { %9506 = vmatmul.msk.f32.gmra.mxu1 %vm272_vm1, %v9472_v48  ;;  %v5163_v11 = vadd.f32 %v5162_v47, %v5161_v12  ;;  %v4495_v6 = vpop.f32.mrf.mxu3 }
 0x4d2   : > { %v13029_v26 = vpop.f32.mrf.mxu2  ;;  %v5263_v13 = vsel %vm2650_vm2, %v5219_v15, 0.0  ;;  %v4563_v22 = vadd.f32 %v4495_v6, %v12563_v36 }
 0x4d3   : > { %v5264_v45 = vadd.f32 %v5263_v13, %v5262_v38  ;;  %v5309_v38 = vld [vmem:[%s10337_s23] sm:$0xff] }
 0x4d4   : > { %v4841_v41 = vadd.f32 %v4773_v24, %v4563_v22  ;;  %v13050_v24 = vld [vmem:[%s10337_s23 + $0x48] sm:$0xff] }
 0x4d5   : > { %v4776_v52 = vpop.f32.mrf.mxu0  ;;  %v5310_v22 = vld [vmem:[%s10337_s23 + $0x8] sm:$0xff] }
 0x4d6   : > { %v5054_v40 = vpop.f32.mrf.mxu1  ;;  %v5119_v53 = vadd.f32 %v5051_v0, %v4841_v41  ;;  %9375 = vmatmul.msk.f32.gmra.mxu3 %vm272_vm1, %v9341_v50 }
 0x4d7   : > { %9542 = vmatmul.msk.f32.gmra.mxu2 %vm272_vm1, %v12875_v2 }
 0x4d8   : > { %9441 = vmatmul.msk.f32.gmra.mxu0 %vm272_vm1, %v9407_v60  ;;  %v5164_v36 = vsel %vm2650_vm2, %v5119_v53, 0.0  ;;  %v5220_v31 = vmul.f32 %v5119_v53, %v5119_v53  ;;  %7852 = vrot.lane.b32.xlu2 %v5119_v53, %s10227_s28 }
 0x4d9   : > { %9507 = vmatmul.msk.f32.gmra.mxu1 %vm272_vm1, %v9473_v58  ;;  %v5165_v12 = vadd.f32 %v5164_v36, %v5163_v11  ;;  %v4498_v3 = vpop.f32.mrf.mxu3  ;;  %v10084_v58 = vld [vmem:[%s10337_s23 + $0x53] sm:$0xff] }
 0x4da   : > { %v13043_v49 = vpop.f32.mrf.mxu2  ;;  %v5265_v16 = vsel %vm2650_vm2, %v5220_v31, 0.0  ;;  %v4564_v2 = vadd.f32 %v4498_v3, %v12577_v25 }
 0x4db   : > { %v5266_v42 = vadd.f32 %v5265_v16, %v5264_v45 }
 0x4dc   : > { %v4842_v32 = vadd.f32 %v4776_v52, %v4564_v2  ;;  %v5802_v52 = vld [vmem:[%s10337_s23 + $0xe] sm:$0xff] }
 0x4dd   : > { %v4779_v63 = vpop.f32.mrf.mxu0 }
 0x4de   : > { %v5057_v9 = vpop.f32.mrf.mxu1  ;;  %v5120_v0 = vadd.f32 %v5054_v40, %v4842_v32  ;;  %9544 = vmatmul.msk.f32.vlgmr.msrb.gmra.mxu3 %vm272_vm1, %v5309_v38  ;;  %v13067_v40 = vld [vmem:[%s10337_s23 + $0x50] sm:$0xff] }
 0x4df   : > { %9678 = vmatmul.msk.f32.vlgmr.msrb.gmra.mxu2 %vm272_vm1, %v10083_v21  ;;  %v10085_v21 = vld [vmem:[%s10337_s23 + $0x63] sm:$0xff] }
 0x4e0   : > { %9578 = vmatmul.msk.f32.vlgmr.msrb.gmra.mxu0 %vm272_vm1, %v5801_v61  ;;  %v5166_v25 = vsel %vm2650_vm2, %v5120_v0, 0.0  ;;  %v5221_v48 = vmul.f32 %v5120_v0, %v5120_v0  ;;  %7854 = vrot.lane.b32.xlu0 %v5120_v0, %s10227_s28  ;;  %v13084_v61 = vld [vmem:[%s10337_s23 + $0x60] sm:$0xff] }
 0x4e1   : > { %9644 = vmatmul.msk.f32.vlgmr.msrb.gmra.mxu1 %vm272_vm1, %v13050_v24  ;;  %v5167_v55 = vadd.f32 %v5166_v25, %v5165_v12  ;;  %v4501_v47 = vpop.f32.mrf.mxu3 }
 0x4e2   : > { %v13060_v15 = vpop.f32.mrf.mxu2  ;;  %v5267_v11 = vsel %vm2650_vm2, %v5221_v48, 0.0  ;;  %v4565_v6 = vadd.f32 %v4501_v47, %v12591_v51 }
 0x4e3   : > { %v5268_v13 = vadd.f32 %v5267_v11, %v5266_v42  ;;  %v5311_v42 = vld [vmem:[%s10337_s23 + $0x18] sm:$0xff] }
 0x4e4   : > { %v4843_v45 = vadd.f32 %v4779_v63, %v4565_v6 }
 0x4e5   : > { %v4782_v50 = vpop.f32.mrf.mxu0 }
 0x4e6   : > { %v5060_v41 = vpop.f32.mrf.mxu1  ;;  %v5121_v60 = vadd.f32 %v5057_v9, %v4843_v45  ;;  %9545 = vmatmul.msk.f32.gmra.mxu3 %vm272_vm1, %v5310_v22  ;;  %v5803_v9 = vld [vmem:[%s10337_s23 + $0x1e] sm:$0xff] }
 0x4e7   : > { %9679 = vmatmul.msk.f32.gmra.mxu2 %vm272_vm1, %v10084_v58  ;;  %v5312_v22 = vld [vmem:[%s10337_s23 + $0x20] sm:$0xff] }
 0x4e8   : > { %9579 = vmatmul.msk.f32.gmra.mxu0 %vm272_vm1, %v5802_v52  ;;  %v5168_v51 = vsel %vm2650_vm2, %v5121_v60, 0.0  ;;  %v5222_v53 = vmul.f32 %v5121_v60, %v5121_v60  ;;  %7856 = vrot.lane.b32.xlu1 %v5121_v60, %s10227_s28  ;;  %v5804_v52 = vld [vmem:[%s10337_s23 + $0x26] sm:$0xff] }
 0x4e9   : > { %9645 = vmatmul.msk.f32.gmra.mxu1 %vm272_vm1, %v13067_v40  ;;  %v5169_v36 = vadd.f32 %v5168_v51, %v5167_v55  ;;  %v4504_v31 = vpop.f32.mrf.mxu3  ;;  %v13101_v60 = vld [vmem:[%s10337_s23 + $0x68] sm:$0xff] }
 0x4ea   : > { %v13077_v12 = vpop.f32.mrf.mxu2  ;;  %v5269_v3 = vsel %vm2650_vm2, %v5222_v53, 0.0  ;;  %v4566_v16 = vadd.f32 %v4504_v31, %v12605_v35  ;;  %v10086_v51 = vld [vmem:[%s10337_s23 + $0x6b] sm:$0xff] }
 0x4eb   : > { %v5270_v2 = vadd.f32 %v5269_v3, %v5268_v13 }
 0x4ec   : > { %v4844_v38 = vadd.f32 %v4782_v50, %v4566_v16 }
 0x4ed   : > { %v4785_v32 = vpop.f32.mrf.mxu0 }
 0x4ee   : > { %v5063_v63 = vpop.f32.mrf.mxu1  ;;  %v5122_v0 = vadd.f32 %v5060_v41, %v4844_v38  ;;  %9546 = vmatmul.msk.f32.gmra.mxu3 %vm272_vm1, %v5311_v42  ;;  %v5313_v38 = vld [vmem:[%s10337_s23 + $0x30] sm:$0xff] }
 0x4ef   : > { %9680 = vmatmul.msk.f32.gmra.mxu2 %vm272_vm1, %v10085_v21  ;;  %v13118_v21 = vld [vmem:[%s10337_s23 + $0x78] sm:$0xff] }
 0x4f0   : > { %9580 = vmatmul.msk.f32.gmra.mxu0 %vm272_vm1, %v5803_v9  ;;  %v5170_v35 = vsel %vm2650_vm2, %v5122_v0, 0.0  ;;  %v5223_v25 = vmul.f32 %v5122_v0, %v5122_v0  ;;  %7858 = vrot.lane.b32.xlu2 %v5122_v0, %s10227_s28  ;;  %v5805_v0 = vld [vmem:[%s10337_s23 + $0x36] sm:$0xff] }
 0x4f1   : > { %9646 = vmatmul.msk.f32.gmra.mxu1 %vm272_vm1, %v13084_v61  ;;  %v5171_v48 = vadd.f32 %v5170_v35, %v5169_v36  ;;  %v4507_v55 = vpop.f32.mrf.mxu3 }
 0x4f2   : > { %v13094_v47 = vpop.f32.mrf.mxu2  ;;  %v5271_v11 = vsel %vm2650_vm2, %v5223_v25, 0.0  ;;  %v4567_v6 = vadd.f32 %v4507_v55, %v12619_v29  ;;  %v10087_v25 = vld [vmem:[%s10337_s23 + $0x7b] sm:$0xff] }
 0x4f3   : > { %v5272_v13 = vadd.f32 %v5271_v11, %v5270_v2 }
 0x4f4   : > { %v4845_v45 = vadd.f32 %v4785_v32, %v4567_v6 }
 0x4f5   : > { %v4788_v50 = vpop.f32.mrf.mxu0 }
 0x4f6   : > { %v5066_v41 = vpop.f32.mrf.mxu1  ;;  %v5123_v58 = vadd.f32 %v5063_v63, %v4845_v45  ;;  %9547 = vmatmul.msk.f32.gmra.mxu3 %vm272_vm1, %v5312_v22 }
 0x4f7   : > { %9681 = vmatmul.msk.f32.gmra.mxu2 %vm272_vm1, %v10086_v51  ;;  %v5806_v51 = vld [vmem:[%s10337_s23 + $0x3e] sm:$0xff] }
 0x4f8   : > { %9581 = vmatmul.msk.f32.gmra.mxu0 %vm272_vm1, %v5804_v52  ;;  %v5172_v29 = vsel %vm2650_vm2, %v5123_v58, 0.0  ;;  %v5224_v53 = vmul.f32 %v5123_v58, %v5123_v58  ;;  %7860 = vrot.lane.b32.xlu0 %v5123_v58, %s10227_s28 }
 0x4f9   : > { %9647 = vmatmul.msk.f32.gmra.mxu1 %vm272_vm1, %v13101_v60  ;;  %v5173_v36 = vadd.f32 %v5172_v29, %v5171_v48  ;;  %v4510_v31 = vpop.f32.mrf.mxu3  ;;  %v13135_v29 = vld [vmem:[%s10337_s23 + $0x80] sm:$0xff] }
 0x4fa   : > { %v13111_v3 = vpop.f32.mrf.mxu2  ;;  %v5273_v16 = vsel %vm2650_vm2, %v5224_v53, 0.0  ;;  %v4568_v2 = vadd.f32 %v4510_v31, %v12633_v1  ;;  %v10088_v31 = vld [vmem:[%s10337_s23 + $0x83] sm:$0xff] }
 0x4fb   : > { %v5274_v42 = vadd.f32 %v5273_v16, %v5272_v13 }
 0x4fc   : > { %v4846_v32 = vadd.f32 %v4788_v50, %v4568_v2  ;;  %v5314_v50 = vld [vmem:[%s10337_s23 + $0x38] sm:$0xff] }
 0x4fd   : > { %v4791_v63 = vpop.f32.mrf.mxu0 }
 0x4fe   : > { %v5069_v9 = vpop.f32.mrf.mxu1  ;;  %v5124_v35 = vadd.f32 %v5066_v41, %v4846_v32  ;;  %9548 = vmatmul.msk.f32.gmra.mxu3 %vm272_vm1, %v5313_v38 }
 0x4ff   : > { %9682 = vmatmul.msk.f32.gmra.mxu2 %vm272_vm1, %v10087_v25  ;;  %v13150_v25 = vld [vmem:[%s10337_s23 + $0x4e] sm:$0xff] }
 0x500   : > { %9582 = vmatmul.msk.f32.gmra.mxu0 %vm272_vm1, %v5805_v0  ;;  %v5174_v1 = vsel %vm2650_vm2, %v5124_v35, 0.0  ;;  %v5225_v48 = vmul.f32 %v5124_v35, %v5124_v35  ;;  %7862 = vrot.lane.b32.xlu1 %v5124_v35, %s10227_s28 }
 0x501   : > { %9648 = vmatmul.msk.f32.gmra.mxu1 %vm272_vm1, %v13118_v21  ;;  %v5175_v55 = vadd.f32 %v5174_v1, %v5173_v36  ;;  %v4513_v11 = vpop.f32.mrf.mxu3  ;;  %v13153_v1 = vld [vmem:[%s10337_s23 + $0x90] sm:$0xff] }
 0x502   : > { %v13128_v6 = vpop.f32.mrf.mxu2  ;;  %v5275_v13 = vsel %vm2650_vm2, %v5225_v48, 0.0  ;;  %v4569_v22 = vadd.f32 %v4513_v11, %v12647_v17 }
 0x503   : > { %v5276_v45 = vadd.f32 %v5275_v13, %v5274_v42 }
 0x504   : > { %v4847_v41 = vadd.f32 %v4791_v63, %v4569_v22 }
 0x505   : > { %v4794_v52 = vpop.f32.mrf.mxu0 }
 0x506   : > { %v5072_v58 = vpop.f32.mrf.mxu1  ;;  %v5125_v53 = vadd.f32 %v5069_v9, %v4847_v41  ;;  %9549 = vmatmul.msk.f32.gmra.mxu3 %vm272_vm1, %v5314_v50 }
 0x507   : > { %9683 = vmatmul.msk.f32.gmra.mxu2 %vm272_vm1, %v10088_v31  ;;  %v13173_v31 = vld [vmem:[%s10337_s23 + $0x98] sm:$0xff] }
 0x508   : > { %9583 = vmatmul.msk.f32.gmra.mxu0 %vm272_vm1, %v5806_v51  ;;  %v5176_v17 = vsel %vm2650_vm2, %v5125_v53, 0.0  ;;  %v5226_v36 = vmul.f32 %v5125_v53, %v5125_v53  ;;  %7864 = vrot.lane.b32.xlu2 %v5125_v53, %s10227_s28  ;;  %v13170_v53 = vld [vmem:[%s10337_s23 + $0x56] sm:$0xff] }
 0x509   : > { %9649 = vmatmul.msk.f32.gmra.mxu1 %vm272_vm1, %v13135_v29  ;;  %v5177_v16 = vadd.f32 %v5176_v17, %v5175_v55  ;;  %v4516_v2 = vpop.f32.mrf.mxu3  ;;  %v10089_v55 = vld [vmem:[%s10337_s23 + $0x93] sm:$0xff] }
 0x50a   : > { %v13145_v42 = vpop.f32.mrf.mxu2  ;;  %v5277_v38 = vsel %vm2650_vm2, %v5226_v36, 0.0  ;;  %v4570_v32 = vadd.f32 %v4516_v2, %v12661_v20  ;;  %v10090_v36 = vld [vmem:[%s10337_s23 + $0x9b] sm:$0xff] }
 0x50b   : > { %14773 = vst [vmem:[#allocation32_spill] sm:$0xff] %v13145_v42  ;;  %v5278_v63 = vadd.f32 %v5277_v38, %v5276_v45 }
 0x50c   : > { %v4848_v9 = vadd.f32 %v4794_v52, %v4570_v32 }
 0x50d   : > { %v4797_v0 = vpop.f32.mrf.mxu0 }
 0x50e   : > { %v5075_v35 = vpop.f32.mrf.mxu1  ;;  %v5126_v48 = vadd.f32 %v5072_v58, %v4848_v9  ;;  %9550 = vmatmul.msk.f32.gmra.mxu3 %vm272_vm1, %v13050_v24 }
 0x50f   : > { %9684 = vmatmul.msk.f32.gmra.mxu2 %vm272_vm1, %v10089_v55  ;;  %v13190_v55 = vld [vmem:[%s10337_s23 + $0x66] sm:$0xff] }
 0x510   : > { %9584 = vmatmul.msk.f32.gmra.mxu0 %vm272_vm1, %v13150_v25  ;;  %v5178_v20 = vsel %vm2650_vm2, %v5126_v48, 0.0  ;;  %v5227_v11 = vmul.f32 %v5126_v48, %v5126_v48  ;;  %7866 = vrot.lane.b32.xlu0 %v5126_v48, %s10227_s28 }
 0x511   : > { %9650 = vmatmul.msk.f32.gmra.mxu1 %vm272_vm1, %v13153_v1  ;;  %v5179_v13 = vadd.f32 %v5178_v20, %v5177_v16  ;;  %v4519_v22 = vpop.f32.mrf.mxu3  ;;  %v13193_v20 = vld [vmem:[%s10337_s23 + $0xa8] sm:$0xff] }
 0x512   : > { %v13165_v24 = vpop.f32.mrf.mxu2  ;;  %v5279_v45 = vsel %vm2650_vm2, %v5227_v11, 0.0  ;;  %v4571_v50 = vadd.f32 %v4519_v22, %v12675_v46 }
 0x513   : > { %14774 = vst [vmem:[#allocation36_spill] sm:$0xff] %v13165_v24  ;;  %v5280_v41 = vadd.f32 %v5279_v45, %v5278_v63  ;;  %v13388_v24 = vld [vmem:[%s10337_s23 + $0xce] sm:$0xff] }
 0x514   : > { %v4849_v52 = vadd.f32 %v4797_v0, %v4571_v50 }
 0x515   : > { %v4800_v58 = vpop.f32.mrf.mxu0 }
 0x516   : > { %v5078_v51 = vpop.f32.mrf.mxu1  ;;  %v5127_v17 = vadd.f32 %v5075_v35, %v4849_v52  ;;  %9551 = vmatmul.msk.f32.gmra.mxu3 %vm272_vm1, %v13067_v40 }
 0x517   : > { %9685 = vmatmul.msk.f32.gmra.mxu2 %vm272_vm1, %v10090_v36 }
 0x518   : > { %9585 = vmatmul.msk.f32.gmra.mxu0 %vm272_vm1, %v13170_v53  ;;  %v5180_v46 = vsel %vm2650_vm2, %v5127_v17, 0.0  ;;  %v5228_v16 = vmul.f32 %v5127_v17, %v5127_v17  ;;  %7868 = vrot.lane.b32.xlu1 %v5127_v17, %s10227_s28 }
 0x519   : > { %9651 = vmatmul.msk.f32.gmra.mxu1 %vm272_vm1, %v13173_v31  ;;  %v5181_v2 = vadd.f32 %v5180_v46, %v5179_v13  ;;  %v4522_v38 = vpop.f32.mrf.mxu3  ;;  %v10091_v13 = vld [vmem:[%s10337_s23 + $0xab] sm:$0xff] }
 0x51a   : > { %v13185_v40 = vpop.f32.mrf.mxu2  ;;  %v5281_v32 = vsel %vm2650_vm2, %v5228_v16, 0.0  ;;  %v4572_v63 = vadd.f32 %v4522_v38, %v12689_v23  ;;  %v13210_v46 = vld [vmem:[%s10337_s23 + $0x6e] sm:$0xff] }
 0x51b   : > { %14775 = vst [vmem:[#allocation51_spill] sm:$0xff] %v13185_v40  ;;  %v5282_v9 = vadd.f32 %v5281_v32, %v5280_v41  ;;  %v13213_v16 = vld [vmem:[%s10337_s23 + $0xb0] sm:$0xff] }
 0x51c   : > { %v4850_v0 = vadd.f32 %v4800_v58, %v4572_v63 }
 0x51d   : > { %v4803_v35 = vpop.f32.mrf.mxu0 }
 0x51e   : > { %v5081_v48 = vpop.f32.mrf.mxu1  ;;  %v5128_v11 = vadd.f32 %v5078_v51, %v4850_v0  ;;  %9552 = vmatmul.msk.f32.gmra.mxu3 %vm272_vm1, %v13084_v61 }
 0x51f   : > { %9686 = vmatmul.msk.f32.gmra.mxu2 %vm272_vm1, %v10091_v13 }
 0x520   : > { %9586 = vmatmul.msk.f32.gmra.mxu0 %vm272_vm1, %v13190_v55  ;;  %v5182_v23 = vsel %vm2650_vm2, %v5128_v11, 0.0  ;;  %v5229_v22 = vmul.f32 %v5128_v11, %v5128_v11  ;;  %7870 = vrot.lane.b32.xlu2 %v5128_v11, %s10227_s28 }
 0x521   : > { %9652 = vmatmul.msk.f32.gmra.mxu1 %vm272_vm1, %v13193_v20  ;;  %v5183_v45 = vadd.f32 %v5182_v23, %v5181_v2  ;;  %v4525_v50 = vpop.f32.mrf.mxu3  ;;  %v10092_v2 = vld [vmem:[%s10337_s23 + $0xb3] sm:$0xff] }
 0x522   : > { %v13205_v61 = vpop.f32.mrf.mxu2  ;;  %v5283_v41 = vsel %vm2650_vm2, %v5229_v22, 0.0  ;;  %v4573_v52 = vadd.f32 %v4525_v50, %v12703_v39  ;;  %v13230_v22 = vld [vmem:[%s10337_s23 + $0x7e] sm:$0xff] }
 0x523   : > { %14776 = vst [vmem:[#allocation39_spill] sm:$0xff] %v13205_v61  ;;  %v5284_v58 = vadd.f32 %v5283_v41, %v5282_v9  ;;  %v13233_v50 = vld [vmem:[%s10337_s23 + $0xc0] sm:$0xff] }
 0x524   : > { %v4851_v51 = vadd.f32 %v4803_v35, %v4573_v52 }
 0x525   : > { %v4806_v17 = vpop.f32.mrf.mxu0 }
 0x526   : > { %v5084_v36 = vpop.f32.mrf.mxu1  ;;  %v5129_v38 = vadd.f32 %v5081_v48, %v4851_v51  ;;  %9553 = vmatmul.msk.f32.gmra.mxu3 %vm272_vm1, %v13101_v60 }
 0x527   : > { %9687 = vmatmul.msk.f32.gmra.mxu2 %vm272_vm1, %v10092_v2 }
 0x528   : > { %9587 = vmatmul.msk.f32.gmra.mxu0 %vm272_vm1, %v13210_v46  ;;  %v5184_v39 = vsel %vm2650_vm2, %v5129_v38, 0.0  ;;  %v5230_v32 = vmul.f32 %v5129_v38, %v5129_v38  ;;  %7872 = vrot.lane.b32.xlu0 %v5129_v38, %s10227_s28 }
 0x529   : > { %9653 = vmatmul.msk.f32.gmra.mxu1 %vm272_vm1, %v13213_v16  ;;  %v5185_v63 = vadd.f32 %v5184_v39, %v5183_v45  ;;  %v4528_v9 = vpop.f32.mrf.mxu3  ;;  %v10093_v45 = vld [vmem:[%s10337_s23 + $0xc3] sm:$0xff] }
 0x52a   : > { %v13225_v60 = vpop.f32.mrf.mxu2  ;;  %v5285_v0 = vsel %vm2650_vm2, %v5230_v32, 0.0  ;;  %v4574_v35 = vadd.f32 %v4528_v9, %v12717_v18  ;;  %v13250_v9 = vld [vmem:[%s10337_s23 + $0x86] sm:$0xff] }
 0x52b   : > { %14777 = vst [vmem:[#allocation56_spill] sm:$0xff] %v13225_v60  ;;  %v5286_v48 = vadd.f32 %v5285_v0, %v5284_v58  ;;  %v13253_v0 = vld [vmem:[%s10337_s23 + $0xc8] sm:$0xff] }
 0x52c   : > { %v4852_v11 = vadd.f32 %v4806_v17, %v4574_v35  ;;  %14779 = vst [vmem:[#allocation65_spill] sm:$0xff] %v13253_v0 }
 0x52d   : > { %v4809_v13 = vpop.f32.mrf.mxu0 }
 0x52e   : > { %v5087_v23 = vpop.f32.mrf.mxu1  ;;  %v5130_v41 = vadd.f32 %v5084_v36, %v4852_v11  ;;  %9554 = vmatmul.msk.f32.gmra.mxu3 %vm272_vm1, %v13118_v21 }
 0x52f   : > { %9688 = vmatmul.msk.f32.gmra.mxu2 %vm272_vm1, %v10093_v45 }
 0x530   : > { %9588 = vmatmul.msk.f32.gmra.mxu0 %vm272_vm1, %v13230_v22  ;;  %v5186_v18 = vsel %vm2650_vm2, %v5130_v41, 0.0  ;;  %v5231_v52 = vmul.f32 %v5130_v41, %v5130_v41  ;;  %7874 = vrot.lane.b32.xlu1 %v5130_v41, %s10227_s28 }
 0x531   : > { %9654 = vmatmul.msk.f32.gmra.mxu1 %vm272_vm1, %v13233_v50  ;;  %v5187_v58 = vadd.f32 %v5186_v18, %v5185_v63  ;;  %v4531_v51 = vpop.f32.mrf.mxu3  ;;  %v10094_v63 = vld [vmem:[%s10337_s23 + $0xcb] sm:$0xff] }
 0x532   : > { %v13245_v21 = vpop.f32.mrf.mxu2  ;;  %v5287_v17 = vsel %vm2650_vm2, %v5231_v52, 0.0  ;;  %v4575_v36 = vadd.f32 %v4531_v51, %v12731_v37 }
 0x533   : > { %14778 = vst [vmem:[#allocation57_spill] sm:$0xff] %v13245_v21  ;;  %v5288_v38 = vadd.f32 %v5287_v17, %v5286_v48  ;;  %v13270_v17 = vld [vmem:[%s10337_s23 + $0x96] sm:$0xff]  ;;  %v13317_v21 = vpop.permute.xlu2 %7832 }
 0x534   : > { %v4853_v2 = vadd.f32 %v4809_v13, %v4575_v36  ;;  %v13273_v36 = vld [vmem:[%s10337_s23 + $0xd8] sm:$0xff]  ;;  %14784 = vst [vmem:[#allocation53_spill] sm:$0xff] %v13317_v21 }
 0x535   : > { %v4812_v39 = vpop.f32.mrf.mxu0 }
 0x536   : > { %v5090_v32 = vpop.f32.mrf.mxu1  ;;  %v5131_v35 = vadd.f32 %v5087_v23, %v4853_v2  ;;  %9555 = vmatmul.msk.f32.gmra.mxu3 %vm272_vm1, %v13135_v29 }
 0x537   : > { %9689 = vmatmul.msk.f32.gmra.mxu2 %vm272_vm1, %v10094_v63 }
 0x538   : > { %9589 = vmatmul.msk.f32.gmra.mxu0 %vm272_vm1, %v13250_v9  ;;  %v5188_v37 = vsel %vm2650_vm2, %v5131_v35, 0.0  ;;  %v5232_v48 = vmul.f32 %v5131_v35, %v5131_v35  ;;  %7876 = vrot.lane.b32.xlu2 %v5131_v35, %s10227_s28 }
 0x539   : > { %9655 = vmatmul.msk.f32.gmra.mxu1 %vm272_vm1, %v13253_v0  ;;  %v5189_v11 = vadd.f32 %v5188_v37, %v5187_v58  ;;  %v4534_v13 = vpop.f32.mrf.mxu3  ;;  %v10095_v58 = vld [vmem:[%s10337_s23 + $0xdb] sm:$0xff] }
 0x53a   : > { %v13265_v29 = vpop.f32.mrf.mxu2  ;;  %v5289_v23 = vsel %vm2650_vm2, %v5232_v48, 0.0  ;;  %v4576_v41 = vadd.f32 %v4534_v13, %v12745_v62 }
 0x53b   : > { %14780 = vst [vmem:[#allocation59_spill] sm:$0xff] %v13265_v29  ;;  %v5290_v45 = vadd.f32 %v5289_v23, %v5288_v38 }
 0x53c   : > { %v4854_v18 = vadd.f32 %v4812_v39, %v4576_v41 }
 0x53d   : > { %v4815_v52 = vpop.f32.mrf.mxu0 }
 0x53e   : > { %v5093_v51 = vpop.f32.mrf.mxu1  ;;  %v5132_v2 = vadd.f32 %v5090_v32, %v4854_v18  ;;  %9556 = vmatmul.msk.f32.gmra.mxu3 %vm272_vm1, %v13153_v1  ;;  %v13290_v18 = vld [vmem:[%s10337_s23 + $0x9e] sm:$0xff] }
 0x53f   : > { %9690 = vmatmul.msk.f32.gmra.mxu2 %vm272_vm1, %v10095_v58  ;;  %v13293_v58 = vld [vmem:[%s10337_s23 + $0xe0] sm:$0xff] }
 0x540   : > { %9590 = vmatmul.msk.f32.gmra.mxu0 %vm272_vm1, %v13270_v17  ;;  %v5190_v62 = vsel %vm2650_vm2, %v5132_v2, 0.0  ;;  %v5233_v38 = vmul.f32 %v5132_v2, %v5132_v2  ;;  %7878 = vrot.lane.b32.xlu0 %v5132_v2, %s10227_s28 }
 0x541   : > { %9656 = vmatmul.msk.f32.gmra.mxu1 %vm272_vm1, %v13273_v36  ;;  %v5191_v39 = vadd.f32 %v5190_v62, %v5189_v11  ;;  %v4537_v32 = vpop.f32.mrf.mxu3  ;;  %v10096_v11 = vld [vmem:[%s10337_s23 + $0xe3] sm:$0xff] }
 0x542   : > { %v13285_v35 = vpop.f32.mrf.mxu2  ;;  %v5291_v63 = vsel %vm2650_vm2, %v5233_v38, 0.0  ;;  %v4577_v37 = vadd.f32 %v4537_v32, %v12759_v5  ;;  %v13303_v5 = vpop.permute.xlu0 %7824 }
 0x543   : > { %14781 = vst [vmem:[#allocation68_spill] sm:$0xff] %v13285_v35  ;;  %v5292_v48 = vadd.f32 %v5291_v63, %v5290_v45  ;;  %v13312_v35 = vld [vmem:[%s10337_s23 + $0xae] sm:$0xff] }
 0x544   : > { %v4855_v13 = vadd.f32 %v4815_v52, %v4577_v37  ;;  %14782 = vst [vmem:[#allocation27_spill] sm:$0xff] %v13303_v5  ;;  %v13315_v5 = vld [vmem:[%s10337_s23 + $0xf0] sm:$0xff] }
 0x545   : > { %v4818_v23 = vpop.f32.mrf.mxu0 }
 0x546   : > { %v5096_v41 = vpop.f32.mrf.mxu1  ;;  %v5133_v29 = vadd.f32 %v5093_v51, %v4855_v13  ;;  %9557 = vmatmul.msk.f32.gmra.mxu3 %vm272_vm1, %v13173_v31 }
 0x547   : > { %9691 = vmatmul.msk.f32.gmra.mxu2 %vm272_vm1, %v10096_v11 }
 0x548   : > { %9591 = vmatmul.msk.f32.gmra.mxu0 %vm272_vm1, %v13290_v18  ;;  %v5192_v45 = vsel %vm2650_vm2, %v5133_v29, 0.0  ;;  %v5234_v52 = vmul.f32 %v5133_v29, %v5133_v29  ;;  %7880 = vrot.lane.b32.xlu1 %v5133_v29, %s10227_s28  ;;  %v10097_v29 = vld [vmem:[%s10337_s23 + $0xf3] sm:$0xff] }
 0x549   : > { %9657 = vmatmul.msk.f32.gmra.mxu1 %vm272_vm1, %v13293_v58  ;;  %v5193_v51 = vadd.f32 %v5192_v45, %v5191_v39  ;;  %v4540_v2 = vpop.f32.mrf.mxu3 }
 0x54a   : > { %v13307_v62 = vpop.f32.mrf.mxu2  ;;  %v5293_v38 = vsel %vm2650_vm2, %v5234_v52, 0.0  ;;  %v4578_v32 = vadd.f32 %v4540_v2, %v12773_v28  ;;  %v13327_v28 = vpop.permute.xlu1 %7828 }
 0x54b   : > { %14783 = vst [vmem:[#allocation71_spill] sm:$0xff] %v13307_v62  ;;  %v5294_v63 = vadd.f32 %v5293_v38, %v5292_v48  ;;  %v13333_v52 = vpop.permute.xlu0 %7826  ;;  %v13341_v62 = vld [vmem:[%s10337_s23 + $0xf8] sm:$0xff] }
 0x54c   : > { %v4856_v37 = vadd.f32 %v4818_v23, %v4578_v32  ;;  %14785 = vst [vmem:[#allocation60_spill] sm:$0xff] %v13327_v28  ;;  %v13338_v28 = vld [vmem:[%s10337_s23 + $0xb6] sm:$0xff] }
 0x54d   : > { %v4821_v13 = vpop.f32.mrf.mxu0  ;;  %14787 = vst [vmem:[#allocation67_spill] sm:$0xff] %v13333_v52 }
 0x54e   : > { %v5099_v11 = vpop.f32.mrf.mxu1  ;;  %v5134_v60 = vadd.f32 %v5096_v41, %v4856_v37  ;;  %9558 = vmatmul.msk.f32.gmra.mxu3 %vm272_vm1, %v13193_v20 }
 0x54f   : > { %9692 = vmatmul.msk.f32.gmra.mxu2 %vm272_vm1, %v10097_v29 }
 0x550   : > { %9592 = vmatmul.msk.f32.gmra.mxu0 %vm272_vm1, %v13312_v35  ;;  %v5194_v39 = vsel %vm2650_vm2, %v5134_v60, 0.0  ;;  %v5235_v48 = vmul.f32 %v5134_v60, %v5134_v60  ;;  %7882 = vrot.lane.b32.xlu2 %v5134_v60, %s10227_s28  ;;  %v10098_v60 = vld [vmem:[%s10337_s23 + $0xfb] sm:$0xff] }
 0x551   : > { %9658 = vmatmul.msk.f32.gmra.mxu1 %vm272_vm1, %v13315_v5  ;;  %v5195_v23 = vadd.f32 %v5194_v39, %v5193_v51  ;;  %v4543_v41 = vpop.f32.mrf.mxu3 }
 0x552   : > { %v13331_v45 = vpop.f32.mrf.mxu2  ;;  %v5295_v2 = vsel %vm2650_vm2, %v5235_v48, 0.0  ;;  %v4579_v38 = vadd.f32 %v4543_v41, %v12787_v34  ;;  %v13351_v34 = vpop.permute.xlu2 %7834 }
 0x553   : > { %14786 = vst [vmem:[#allocation19_spill] sm:$0xff] %v13331_v45  ;;  %v5296_v32 = vadd.f32 %v5295_v2, %v5294_v63  ;;  %v13357_v48 = vpop.permute.xlu1 %7830  ;;  %v13359_v41 = vpop.permute.xlu0 %7836  ;;  %v13364_v45 = vld [vmem:[%s10337_s23 + $0xc6] sm:$0xff] }
 0x554   : > { %v4857_v37 = vadd.f32 %v4821_v13, %v4579_v38  ;;  %14788 = vst [vmem:[#allocation62_spill] sm:$0xff] %v13351_v34 }
 0x555   : > { %v4824_v29 = vpop.f32.mrf.mxu0  ;;  %14790 = vst [vmem:[#allocation64_spill] sm:$0xff] %v13357_v48 }
 0x556   : > { %v5102_v21 = vpop.f32.mrf.mxu1  ;;  %v5135_v61 = vadd.f32 %v5099_v11, %v4857_v37  ;;  %9559 = vmatmul.msk.f32.gmra.mxu3 %vm272_vm1, %v13213_v16  ;;  %14791 = vst [vmem:[#allocation72_spill] sm:$0xff] %v13359_v41 }
 0x557   : > { %9693 = vmatmul.msk.f32.gmra.mxu2 %vm272_vm1, %v10098_v60 }
 0x558   : > { %9593 = vmatmul.msk.f32.gmra.mxu0 %vm272_vm1, %v13338_v28  ;;  %v5196_v51 = vsel %vm2650_vm2, %v5135_v61, 0.0  ;;  %v5236_v63 = vmul.f32 %v5135_v61, %v5135_v61  ;;  %7884 = vrot.lane.b32.xlu0 %v5135_v61, %s10227_s28  ;;  %v13367_v61 = vld [vmem:[%s10337_s23 + $0x108] sm:$0xff] }
 0x559   : > { %9659 = vmatmul.msk.f32.gmra.mxu1 %vm272_vm1, %v13341_v62  ;;  %v5197_v13 = vadd.f32 %v5196_v51, %v5195_v23  ;;  %v4546_v11 = vpop.f32.mrf.mxu3  ;;  %v10099_v51 = vld [vmem:[%s10337_s23 + $0x10b] sm:$0xff] }
 0x55a   : > { %v13355_v39 = vpop.f32.mrf.mxu2  ;;  %v5297_v2 = vsel %vm2650_vm2, %v5236_v63, 0.0  ;;  %v4580_v38 = vadd.f32 %v4546_v11, %v12801_v8  ;;  %v13377_v8 = vpop.permute.xlu2 %7840 }
 0x55b   : > { %14789 = vst [vmem:[#allocation69_spill] sm:$0xff] %v13355_v39  ;;  %v5298_v37 = vadd.f32 %v5297_v2, %v5296_v32  ;;  %v13381_v2 = vpop.permute.xlu1 %7838 }
 0x55c   : > { %v4858_v60 = vadd.f32 %v4824_v29, %v4580_v38  ;;  %14792 = vst [vmem:[#allocation70_spill] sm:$0xff] %v13377_v8  ;;  %v13383_v38 = vpop.permute.xlu0 %7842 }
 0x55d   : > { %v5951_v34 = vpop.f32.mrf.mxu0  ;;  %14793 = vst [vmem:[#allocation61_spill] sm:$0xff] %v13381_v2  ;;  %v10100_v2 = vld [vmem:[%s10337_s23 + $0x113] sm:$0xff] }
 0x55e   : > { %v6229_v52 = vpop.f32.mrf.mxu1  ;;  %v5136_v23 = vadd.f32 %v5102_v21, %v4858_v60  ;;  %9560 = vmatmul.msk.f32.gmra.mxu3 %vm272_vm1, %v13233_v50  ;;  %14794 = vst [vmem:[#allocation12_spill] sm:$0xff] %v13383_v38 }
 0x55f   : > { %9694 = vmatmul.msk.f32.gmra.mxu2 %vm272_vm1, %v10099_v51 }
 0x560   : > { %9594 = vmatmul.msk.f32.gmra.mxu0 %vm272_vm1, %v13364_v45  ;;  %v5198_v32 = vsel %vm2650_vm2, %v5136_v23, 0.0  ;;  %v5237_v29 = vmul.f32 %v5136_v23, %v5136_v23  ;;  %7886 = vrot.lane.b32.xlu1 %v5136_v23, %s10227_s28  ;;  %v13391_v23 = vld [vmem:[%s10337_s23 + $0x110] sm:$0xff] }
 0x561   : > { %9660 = vmatmul.msk.f32.gmra.mxu1 %vm272_vm1, %v13367_v61  ;;  %v5199_v21 = vadd.f32 %v5198_v32, %v5197_v13  ;;  %v5705_v63 = vpop.f32.mrf.mxu3  ;;  %14795 = vst [vmem:[#allocation63_spill] sm:$0xff] %v13391_v23 }
 0x562   : > { %v6379_v11 = vpop.f32.mrf.mxu2  ;;  %v5299_v60 = vsel %vm2650_vm2, %v5237_v29, 0.0  ;;  %v5706_v51 = vadd.f32 %v5705_v63, %v12803_v19 }
 0x563   : > { %v5200_v8 = vrot.slane %v5199_v21, 4  ;;  %v5300_v41 = vadd.f32 %v5299_v60, %v5298_v37  ;;  %v13401_v37 = vpop.permute.xlu2 %7846  ;;  %v13405_v63 = vpop.permute.xlu1 %7844 }
 0x564   : > { %v6047_v48 = vadd.f32 %v5951_v34, %v5706_v51  ;;  %14796 = vst [vmem:[#allocation13_spill] sm:$0xff] %v13401_v37  ;;  %v13411_v37 = vld [vmem:[%s10337_s23 + $0xde] sm:$0xff] }
 0x565   : > { %v5954_v39 = vpop.f32.mrf.mxu0  ;;  %v5201_v13 = vadd.f32 %v5200_v8, %v5199_v21  ;;  %v5301_v32 = vrot.slane %v5300_v41, 4  ;;  %14798 = vst [vmem:[#allocation16_spill] sm:$0xff] %v13405_v63 }
 0x566   : > { %v6232_v40 = vpop.f32.mrf.mxu1  ;;  %v6325_v42 = vadd.f32 %v6229_v52, %v6047_v48  ;;  %9561 = vmatmul.msk.f32.gmra.mxu3 %vm272_vm1, %v13253_v0 }
 0x567   : > { %9695 = vmatmul.msk.f32.gmra.mxu2 %vm272_vm1, %v10100_v2  ;;  %v5202_v19 = vrot.slane %v5201_v13, 2  ;;  %v5302_v34 = vadd.f32 %v5301_v32, %v5300_v41  ;;  %v13407_v2 = vpop.permute.xlu0 %7848 }
 0x568   : > { %9595 = vmatmul.msk.f32.gmra.mxu0 %vm272_vm1, %v13388_v24  ;;  %v13403_v8 = vadd.f32 %v6379_v11, %v6325_v42  ;;  %14799 = vst [vmem:[#allocation74_spill] sm:$0xff] %v13407_v2  ;;  %v13484_v2 = vld [vmem:[%s10337_s23 + $0xfe] sm:$0xff] }
 0x569   : > { %9661 = vmatmul.msk.f32.gmra.mxu1 %vm272_vm1, %v13391_v23  ;;  %v5708_v52 = vpop.f32.mrf.mxu3  ;;  %v5203_v29 = vadd.f32 %v5202_v19, %v5201_v13  ;;  %v5303_v21 = vrot.slane %v5302_v34, 2  ;;  %v10101_v19 = vld [vmem:[%s10337_s23 + $0x123] sm:$0xff] }
 0x56a   : > { %14797 = vst [vmem:[#allocation66_spill] sm:$0xff] %v13403_v8  ;;  %v6382_v48 = vpop.f32.mrf.mxu2  ;;  %v5709_v60 = vadd.f32 %v5708_v52, %v12818_v10  ;;  %v13414_v8 = vld [vmem:[%s10337_s23 + $0x120] sm:$0xff] }
 0x56b   : > { %v5204_v51 = vrot.slane %v5203_v29, 1  ;;  %v5304_v38 = vadd.f32 %v5303_v21, %v5302_v34  ;;  %14800 = vst [vmem:[#allocation73_spill] sm:$0xff] %v13414_v8  ;;  %v13430_v52 = vpop.permute.xlu1 %7850 }
 0x56c   : > { %v6048_v0 = vadd.f32 %v5954_v39, %v5709_v60  ;;  %v13423_v39 = vpop.permute.xlu2 %7852  ;;  %14803 = vst [vmem:[#allocation29_spill] sm:$0xff] %v13430_v52  ;;  %v13459_v52 = vld [vmem:[%s10337_s23 + $0xf6] sm:$0xff] }
 0x56d   : > { %v5957_v41 = vpop.f32.mrf.mxu0  ;;  %v5205_v42 = vadd.f32 %v5204_v51, %v5203_v29  ;;  %v5305_v11 = vrot.slane %v5304_v38, 1  ;;  %14801 = vst [vmem:[#allocation38_spill] sm:$0xff] %v13423_v39 }
 0x56e   : > { %v6235_v32 = vpop.f32.mrf.mxu1  ;;  %v6326_v13 = vadd.f32 %v6232_v40, %v6048_v0  ;;  %9562 = vmatmul.msk.f32.gmra.mxu3 %vm272_vm1, %v13273_v36 }
 0x56f   : > { %9696 = vmatmul.msk.f32.gmra.mxu2 %vm272_vm1, %v10101_v19  ;;  %8147 = vrot.lane.b32.xlu1 %v5205_v42, %s10227_s28  ;;  %v5306_v10 = vadd.f32 %v5305_v11, %v5304_v38  ;;  %v13432_v29 = vpop.permute.xlu0 %7854  ;;  %v13436_v42 = vld [vmem:[%s10337_s23 + $0xe6] sm:$0xff] }
 0x570   : > { %9596 = vmatmul.msk.f32.gmra.mxu0 %vm272_vm1, %v13411_v37  ;;  %v13425_v34 = vadd.f32 %v6382_v48, %v6326_v13  ;;  %14804 = vst [vmem:[#allocation22_spill] sm:$0xff] %v13432_v29  ;;  %v13439_v48 = vld [vmem:[%s10337_s23 + $0x128] sm:$0xff]  ;;  %v13462_v29 = vld [vmem:[%s10337_s23 + $0x138] sm:$0xff] }
 0x571   : > { %9662 = vmatmul.msk.f32.gmra.mxu1 %vm272_vm1, %v13414_v8  ;;  %v5711_v40 = vpop.f32.mrf.mxu3  ;;  %8157 = vrot.lane.b32.xlu2 %v5306_v10, %s10227_s28  ;;  %14805 = vst [vmem:[#allocation44_spill] sm:$0xff] %v13439_v48  ;;  %v10102_v13 = vld [vmem:[%s10337_s23 + $0x12b] sm:$0xff] }
 0x572   : > { %14802 = vst [vmem:[#allocation76_spill] sm:$0xff] %v13425_v34  ;;  %v6385_v0 = vpop.f32.mrf.mxu2  ;;  %v5712_v38 = vadd.f32 %v5711_v40, %v12835_v33  ;;  %v13531_v34 = vld [vmem:[%s10337_s23 + $0x158] sm:$0xff] }
 0x573   : > { %v13453_v10 = vpop.permute.xlu1 %7856  ;;  %14810 = vst [vmem:[#allocation79_spill] sm:$0xff] %v13462_v29 }
 0x574   : > { %v6049_v21 = vadd.f32 %v5957_v41, %v5712_v38  ;;  %v13447_v33 = vpop.permute.xlu2 %7858  ;;  %14808 = vst [vmem:[#allocation77_spill] sm:$0xff] %v13453_v10  ;;  %v14814_v10 = vld [vmem:[#allocation46_spill] sm:$0xff] }
 0x575   : > { %v5960_v60 = vpop.f32.mrf.mxu0  ;;  %14806 = vst [vmem:[#allocation25_spill] sm:$0xff] %v13447_v33 }
 0x576   : > { %v6238_v51 = vpop.f32.mrf.mxu1  ;;  %v6327_v11 = vadd.f32 %v6235_v32, %v6049_v21  ;;  %9563 = vmatmul.msk.f32.gmra.mxu3 %vm272_vm1, %v13293_v58 }
 0x577   : > { %9697 = vmatmul.msk.f32.gmra.mxu2 %vm272_vm1, %v10102_v13  ;;  %v13455_v40 = vpop.permute.xlu0 %7860 }
 0x578   : > { %9597 = vmatmul.msk.f32.gmra.mxu0 %vm272_vm1, %v13436_v42  ;;  %v13449_v41 = vadd.f32 %v6385_v0, %v6327_v11  ;;  %14809 = vst [vmem:[#allocation78_spill] sm:$0xff] %v13455_v40  ;;  %v10103_v11 = vld [vmem:[%s10337_s23 + $0x13b] sm:$0xff] }
 0x579   : > { %9663 = vmatmul.msk.f32.gmra.mxu1 %vm272_vm1, %v13439_v48  ;;  %v5714_v32 = vpop.f32.mrf.mxu3 }
 0x57a   : > { %14807 = vst [vmem:[#allocation75_spill] sm:$0xff] %v13449_v41  ;;  %v6388_v19 = vpop.f32.mrf.mxu2  ;;  %v5715_v38 = vadd.f32 %v5714_v32, %v12853_v43  ;;  %v13507_v41 = vld [vmem:[%s10337_s23 + $0x10e] sm:$0xff] }
 0x57c   : > { %v6050_v21 = vadd.f32 %v5960_v60, %v5715_v38  ;;  %v13470_v43 = vpop.permute.xlu2 %7864  ;;  %v13476_v38 = vpop.permute.xlu1 %7862 }
 0x57d   : > { %v5963_v13 = vpop.f32.mrf.mxu0  ;;  %14811 = vst [vmem:[#allocation80_spill] sm:$0xff] %v13470_v43 }
 0x57e   : > { %v6241_v39 = vpop.f32.mrf.mxu1  ;;  %v6328_v0 = vadd.f32 %v6238_v51, %v6050_v21  ;;  %9564 = vmatmul.msk.f32.gmra.mxu3 %vm272_vm1, %v13315_v5  ;;  %14813 = vst [vmem:[#allocation82_spill] sm:$0xff] %v13476_v38  ;;  %v10104_v38 = vld [vmem:[%s10337_s23 + $0x143] sm:$0xff] }
 0x57f   : > { %9698 = vmatmul.msk.f32.gmra.mxu2 %vm272_vm1, %v10103_v11 }
 0x580   : > { %9598 = vmatmul.msk.f32.gmra.mxu0 %vm272_vm1, %v13459_v52  ;;  %v13472_v60 = vadd.f32 %v6388_v19, %v6328_v0  ;;  %v13487_v19 = vld [vmem:[%s10337_s23 + $0x140] sm:$0xff] }
 0x581   : > { %9664 = vmatmul.msk.f32.gmra.mxu1 %vm272_vm1, %v13462_v29  ;;  %v5717_v51 = vpop.f32.mrf.mxu3 }
 0x582   : > { %14812 = vst [vmem:[#allocation81_spill] sm:$0xff] %v13472_v60  ;;  %v6391_v32 = vpop.f32.mrf.mxu2  ;;  %v5718_v21 = vadd.f32 %v5717_v51, %v12870_v56  ;;  %v7867_v33 = vpop.permute.xlu0 %7866  ;;  %v14818_v51 = vld [vmem:[#allocation49_spill] sm:$0xff] }
 0x583   : > { %v13481_v11 = vsel %vm2650_vm2, %v14814_v10, %v7867_v33 }
 0x584   : > { %14815 = vst [vmem:[#allocation46_spill] sm:$0xff] %v13481_v11  ;;  %v6051_v40 = vadd.f32 %v5963_v13, %v5718_v21 }
 0x585   : > { %v5966_v63 = vpop.f32.mrf.mxu0 }
 0x586   : > { %v6244_v43 = vpop.f32.mrf.mxu1  ;;  %v6329_v0 = vadd.f32 %v6241_v39, %v6051_v40  ;;  %9565 = vmatmul.msk.f32.gmra.mxu3 %vm272_vm1, %v13341_v62  ;;  %v13499_v39 = vpop.permute.xlu2 %7870 }
 0x587   : > { %9699 = vmatmul.msk.f32.gmra.mxu2 %vm272_vm1, %v10104_v38  ;;  %14817 = vst [vmem:[#allocation84_spill] sm:$0xff] %v13499_v39  ;;  %v10105_v39 = vld [vmem:[%s10337_s23 + $0x153] sm:$0xff] }
 0x588   : > { %9599 = vmatmul.msk.f32.gmra.mxu0 %vm272_vm1, %v13484_v2  ;;  %v13495_v56 = vadd.f32 %v6391_v32, %v6329_v0  ;;  %v13510_v32 = vld [vmem:[%s10337_s23 + $0x150] sm:$0xff] }
 0x589   : > { %9665 = vmatmul.msk.f32.gmra.mxu1 %vm272_vm1, %v13487_v19  ;;  %v5720_v33 = vpop.f32.mrf.mxu3 }
 0x58a   : > { %14816 = vst [vmem:[#allocation83_spill] sm:$0xff] %v13495_v56  ;;  %v6394_v10 = vpop.f32.mrf.mxu2  ;;  %v5721_v40 = vadd.f32 %v5720_v33, %v12887_v57  ;;  %v7869_v13 = vpop.permute.xlu1 %7868  ;;  %v13528_v56 = vld [vmem:[%s10337_s23 + $0x116] sm:$0xff] }
 0x58b   : > { %v13504_v21 = vsel %vm2650_vm2, %v14818_v51, %v7869_v13  ;;  %v14821_v13 = vld [vmem:[#allocation52_spill] sm:$0xff] }
 0x58c   : > { %14819 = vst [vmem:[#allocation49_spill] sm:$0xff] %v13504_v21  ;;  %v6052_v38 = vadd.f32 %v5966_v63, %v5721_v40 }
 0x58d   : > { %v5969_v11 = vpop.f32.mrf.mxu0 }
 0x58e   : > { %v6247_v60 = vpop.f32.mrf.mxu1  ;;  %v6330_v0 = vadd.f32 %v6244_v43, %v6052_v38  ;;  %9566 = vmatmul.msk.f32.gmra.mxu3 %vm272_vm1, %v13367_v61 }
 0x58f   : > { %9700 = vmatmul.msk.f32.gmra.mxu2 %vm272_vm1, %v10105_v39 }
 0x590   : > { %9600 = vmatmul.msk.f32.gmra.mxu0 %vm272_vm1, %v13507_v41  ;;  %v13518_v57 = vadd.f32 %v6394_v10, %v6330_v0  ;;  %v10106_v0 = vld [vmem:[%s10337_s23 + $0x15b] sm:$0xff] }
 0x591   : > { %9666 = vmatmul.msk.f32.gmra.mxu1 %vm272_vm1, %v13510_v32  ;;  %v5723_v63 = vpop.f32.mrf.mxu3 }
 0x592   : > { %14820 = vst [vmem:[#allocation85_spill] sm:$0xff] %v13518_v57  ;;  %v6397_v33 = vpop.f32.mrf.mxu2  ;;  %v5724_v43 = vadd.f32 %v5723_v63, %v12901_v59  ;;  %v7877_v40 = vpop.permute.xlu2 %7876  ;;  %v13549_v57 = vld [vmem:[%s10337_s23 + $0x126] sm:$0xff] }
 0x593   : > { %v13525_v51 = vsel %vm2650_vm2, %v14821_v13, %v7877_v40  ;;  %v14824_v40 = vld [vmem:[#allocation10_spill] sm:$0xff] }
 0x594   : > { %14822 = vst [vmem:[#allocation52_spill] sm:$0xff] %v13525_v51  ;;  %v6053_v38 = vadd.f32 %v5969_v11, %v5724_v43 }
 0x595   : > { %v5972_v39 = vpop.f32.mrf.mxu0 }
 0x596   : > { %v6250_v21 = vpop.f32.mrf.mxu1  ;;  %v6331_v10 = vadd.f32 %v6247_v60, %v6053_v38  ;;  %9567 = vmatmul.msk.f32.gmra.mxu3 %vm272_vm1, %v13391_v23  ;;  %v13552_v23 = vld [vmem:[%s10337_s23 + $0x168] sm:$0xff] }
 0x597   : > { %9701 = vmatmul.msk.f32.gmra.mxu2 %vm272_vm1, %v10106_v0 }
 0x598   : > { %9601 = vmatmul.msk.f32.gmra.mxu0 %vm272_vm1, %v13528_v56  ;;  %v13539_v59 = vadd.f32 %v6397_v33, %v6331_v10  ;;  %v10107_v10 = vld [vmem:[%s10337_s23 + $0x16b] sm:$0xff] }
 0x599   : > { %9667 = vmatmul.msk.f32.gmra.mxu1 %vm272_vm1, %v13531_v34  ;;  %v5726_v11 = vpop.f32.mrf.mxu3 }
 0x59a   : > { %14823 = vst [vmem:[#allocation86_spill] sm:$0xff] %v13539_v59  ;;  %v6400_v63 = vpop.f32.mrf.mxu2  ;;  %v5727_v60 = vadd.f32 %v5726_v11, %v12915_v4  ;;  %v7873_v43 = vpop.permute.xlu0 %7872  ;;  %v13570_v59 = vld [vmem:[%s10337_s23 + $0x12e] sm:$0xff] }
 0x59b   : > { %v13546_v13 = vsel %vm2650_vm2, %v14824_v40, %v7873_v43  ;;  %v14827_v43 = vld [vmem:[#allocation11_spill] sm:$0xff] }
 0x59c   : > { %14825 = vst [vmem:[#allocation10_spill] sm:$0xff] %v13546_v13  ;;  %v6054_v38 = vadd.f32 %v5972_v39, %v5727_v60 }
 0x59d   : > { %v5975_v0 = vpop.f32.mrf.mxu0 }
 0x59e   : > { %v6253_v51 = vpop.f32.mrf.mxu1  ;;  %v6332_v33 = vadd.f32 %v6250_v21, %v6054_v38  ;;  %9568 = vmatmul.msk.f32.gmra.mxu3 %vm272_vm1, %v13414_v8  ;;  %v13573_v8 = vld [vmem:[%s10337_s23 + $0x170] sm:$0xff] }
 0x59f   : > { %9702 = vmatmul.msk.f32.gmra.mxu2 %vm272_vm1, %v10107_v10 }
 0x5a0   : > { %9602 = vmatmul.msk.f32.gmra.mxu0 %vm272_vm1, %v13549_v57  ;;  %v13560_v4 = vadd.f32 %v6400_v63, %v6332_v33  ;;  %v10108_v33 = vld [vmem:[%s10337_s23 + $0x173] sm:$0xff] }
 0x5a1   : > { %9668 = vmatmul.msk.f32.gmra.mxu1 %vm272_vm1, %v13552_v23  ;;  %v5729_v39 = vpop.f32.mrf.mxu3 }
 0x5a2   : > { %14826 = vst [vmem:[#allocation87_spill] sm:$0xff] %v13560_v4  ;;  %v6403_v11 = vpop.f32.mrf.mxu2  ;;  %v5730_v21 = vadd.f32 %v5729_v39, %v12929_v44  ;;  %v7875_v60 = vpop.permute.xlu1 %7874  ;;  %v13591_v4 = vld [vmem:[%s10337_s23 + $0x13e] sm:$0xff] }
 0x5a3   : > { %v13567_v40 = vsel %vm2650_vm2, %v14827_v43, %v7875_v60  ;;  %v14830_v60 = vld [vmem:[#allocation58_spill] sm:$0xff] }
 0x5a4   : > { %14828 = vst [vmem:[#allocation11_spill] sm:$0xff] %v13567_v40  ;;  %v6055_v38 = vadd.f32 %v5975_v0, %v5730_v21 }
 0x5a5   : > { %v5978_v10 = vpop.f32.mrf.mxu0 }
 0x5a6   : > { %v6256_v13 = vpop.f32.mrf.mxu1  ;;  %v6333_v63 = vadd.f32 %v6253_v51, %v6055_v38  ;;  %9569 = vmatmul.msk.f32.gmra.mxu3 %vm272_vm1, %v13439_v48  ;;  %v13594_v48 = vld [vmem:[%s10337_s23 + $0x180] sm:$0xff] }
 0x5a7   : > { %9703 = vmatmul.msk.f32.gmra.mxu2 %vm272_vm1, %v10108_v33 }
 0x5a8   : > { %9603 = vmatmul.msk.f32.gmra.mxu0 %vm272_vm1, %v13570_v59  ;;  %v13581_v44 = vadd.f32 %v6403_v11, %v6333_v63  ;;  %v10109_v63 = vld [vmem:[%s10337_s23 + $0x183] sm:$0xff] }
 0x5a9   : > { %9669 = vmatmul.msk.f32.gmra.mxu1 %vm272_vm1, %v13573_v8  ;;  %v5732_v0 = vpop.f32.mrf.mxu3 }
 0x5aa   : > { %14829 = vst [vmem:[#allocation88_spill] sm:$0xff] %v13581_v44  ;;  %v6406_v39 = vpop.f32.mrf.mxu2  ;;  %v5733_v51 = vadd.f32 %v5732_v0, %v12943_v27  ;;  %v7883_v21 = vpop.permute.xlu2 %7882  ;;  %v13612_v44 = vld [vmem:[%s10337_s23 + $0x146] sm:$0xff] }
 0x5ab   : > { %v13588_v43 = vsel %vm2650_vm2, %v14830_v60, %v7883_v21  ;;  %v14833_v21 = vld [vmem:[#allocation55_spill] sm:$0xff] }
 0x5ac   : > { %14831 = vst [vmem:[#allocation58_spill] sm:$0xff] %v13588_v43  ;;  %v6056_v38 = vadd.f32 %v5978_v10, %v5733_v51 }
 0x5ad   : > { %v5981_v33 = vpop.f32.mrf.mxu0 }
 0x5ae   : > { %v6259_v40 = vpop.f32.mrf.mxu1  ;;  %v6334_v11 = vadd.f32 %v6256_v13, %v6056_v38  ;;  %9570 = vmatmul.msk.f32.gmra.mxu3 %vm272_vm1, %v13462_v29  ;;  %v13615_v29 = vld [vmem:[%s10337_s23 + $0x188] sm:$0xff] }
 0x5af   : > { %9704 = vmatmul.msk.f32.gmra.mxu2 %vm272_vm1, %v10109_v63  ;;  %14835 = vst [vmem:[#allocation90_spill] sm:$0xff] %v13615_v29 }
 0x5b0   : > { %9604 = vmatmul.msk.f32.gmra.mxu0 %vm272_vm1, %v13591_v4  ;;  %v13602_v27 = vadd.f32 %v6406_v39, %v6334_v11  ;;  %v10110_v11 = vld [vmem:[%s10337_s23 + $0x18b] sm:$0xff] }
 0x5b1   : > { %9670 = vmatmul.msk.f32.gmra.mxu1 %vm272_vm1, %v13594_v48  ;;  %v5735_v10 = vpop.f32.mrf.mxu3 }
 0x5b2   : > { %14832 = vst [vmem:[#allocation89_spill] sm:$0xff] %v13602_v27  ;;  %v6409_v0 = vpop.f32.mrf.mxu2  ;;  %v5736_v13 = vadd.f32 %v5735_v10, %v12957_v14  ;;  %v7879_v51 = vpop.permute.xlu0 %7878  ;;  %v13633_v27 = vld [vmem:[%s10337_s23 + $0x156] sm:$0xff] }
 0x5b3   : > { %v13609_v60 = vsel %vm2650_vm2, %v14833_v21, %v7879_v51  ;;  %v14837_v51 = vld [vmem:[#allocation15_spill] sm:$0xff] }
 0x5b4   : > { %14834 = vst [vmem:[#allocation55_spill] sm:$0xff] %v13609_v60  ;;  %v6057_v38 = vadd.f32 %v5981_v33, %v5736_v13 }
 0x5b5   : > { %v5984_v63 = vpop.f32.mrf.mxu0 }
 0x5b6   : > { %v6262_v43 = vpop.f32.mrf.mxu1  ;;  %v6335_v39 = vadd.f32 %v6259_v40, %v6057_v38  ;;  %9571 = vmatmul.msk.f32.gmra.mxu3 %vm272_vm1, %v13487_v19 }
 0x5b7   : > { %9705 = vmatmul.msk.f32.gmra.mxu2 %vm272_vm1, %v10110_v11 }
 0x5b8   : > { %9605 = vmatmul.msk.f32.gmra.mxu0 %vm272_vm1, %v13612_v44  ;;  %v13623_v14 = vadd.f32 %v6409_v0, %v6335_v39  ;;  %v13636_v0 = vld [vmem:[%s10337_s23 + $0x198] sm:$0xff] }
 0x5b9   : > { %9671 = vmatmul.msk.f32.gmra.mxu1 %vm272_vm1, %v13615_v29  ;;  %v5738_v33 = vpop.f32.mrf.mxu3  ;;  %14839 = vst [vmem:[#allocation92_spill] sm:$0xff] %v13636_v0  ;;  %v13688_v29 = vld [vmem:[%s10337_s23 + $0x176] sm:$0xff] }
 0x5ba   : > { %14836 = vst [vmem:[#allocation91_spill] sm:$0xff] %v13623_v14  ;;  %v6412_v10 = vpop.f32.mrf.mxu2  ;;  %v5739_v40 = vadd.f32 %v5738_v33, %v12971_v54  ;;  %v7881_v13 = vpop.permute.xlu1 %7880  ;;  %v10111_v54 = vld [vmem:[%s10337_s23 + $0x19b] sm:$0xff] }
 0x5bb   : > { %v13630_v21 = vsel %vm2650_vm2, %v14837_v51, %v7881_v13 }
 0x5bc   : > { %14838 = vst [vmem:[#allocation15_spill] sm:$0xff] %v13630_v21  ;;  %v6058_v38 = vadd.f32 %v5984_v63, %v5739_v40  ;;  %v13650_v21 = vld [vmem:[%s10337_s23 + $0x15e] sm:$0xff] }
 0x5bd   : > { %v5987_v11 = vpop.f32.mrf.mxu0 }
 0x5be   : > { %v6265_v60 = vpop.f32.mrf.mxu1  ;;  %v6336_v39 = vadd.f32 %v6262_v43, %v6058_v38  ;;  %9572 = vmatmul.msk.f32.gmra.mxu3 %vm272_vm1, %v13510_v32 }
 0x5bf   : > { %9706 = vmatmul.msk.f32.gmra.mxu2 %vm272_vm1, %v10111_v54  ;;  %v13653_v54 = vld [vmem:[%s10337_s23 + $0x1a0] sm:$0xff] }
 0x5c0   : > { %9606 = vmatmul.msk.f32.gmra.mxu0 %vm272_vm1, %v13633_v27  ;;  %v13644_v63 = vadd.f32 %v6412_v10, %v6336_v39  ;;  %14841 = vst [vmem:[#allocation94_spill] sm:$0xff] %v13653_v54  ;;  %v10112_v10 = vld [vmem:[%s10337_s23 + $0x1a3] sm:$0xff] }
 0x5c1   : > { %9672 = vmatmul.msk.f32.gmra.mxu1 %vm272_vm1, %v13636_v0  ;;  %v5741_v33 = vpop.f32.mrf.mxu3  ;;  %v13670_v0 = vld [vmem:[%s10337_s23 + $0x1b0] sm:$0xff] }
 0x5c2   : > { %14840 = vst [vmem:[#allocation93_spill] sm:$0xff] %v13644_v63  ;;  %v6415_v40 = vpop.f32.mrf.mxu2  ;;  %v5742_v13 = vadd.f32 %v5741_v33, %v12985_v30  ;;  %v13667_v63 = vld [vmem:[%s10337_s23 + $0x16e] sm:$0xff] }
 0x5c4   : > { %v6059_v43 = vadd.f32 %v5987_v11, %v5742_v13 }
 0x5c5   : > { %v5990_v51 = vpop.f32.mrf.mxu0 }
 0x5c6   : > { %v6268_v38 = vpop.f32.mrf.mxu1  ;;  %v6337_v14 = vadd.f32 %v6265_v60, %v6059_v43  ;;  %9573 = vmatmul.msk.f32.gmra.mxu3 %vm272_vm1, %v13531_v34 }
 0x5c7   : > { %9707 = vmatmul.msk.f32.gmra.mxu2 %vm272_vm1, %v10112_v10 }
 0x5c8   : > { %9607 = vmatmul.msk.f32.gmra.mxu0 %vm272_vm1, %v13650_v21  ;;  %v13661_v30 = vadd.f32 %v6415_v40, %v6337_v14  ;;  %v10113_v14 = vld [vmem:[%s10337_s23 + $0x1b3] sm:$0xff] }
 0x5c9   : > { %9673 = vmatmul.msk.f32.gmra.mxu1 %vm272_vm1, %v13653_v54  ;;  %v5744_v11 = vpop.f32.mrf.mxu3 }
 0x5ca   : > { %14842 = vst [vmem:[#allocation95_spill] sm:$0xff] %v13661_v30  ;;  %v6418_v39 = vpop.f32.mrf.mxu2  ;;  %v5745_v33 = vadd.f32 %v5744_v11, %v13007_v7 }
 0x5cc   : > { %v6060_v60 = vadd.f32 %v5990_v51, %v5745_v33  ;;  %v14844_v33 = vld [vmem:[#allocation33_spill] sm:$0xff] }
 0x5cd   : > { %v5993_v13 = vpop.f32.mrf.mxu0 }
 0x5ce   : > { %v6271_v43 = vpop.f32.mrf.mxu1  ;;  %v6338_v10 = vadd.f32 %v6268_v38, %v6060_v60  ;;  %9574 = vmatmul.msk.f32.gmra.mxu3 %vm272_vm1, %v13552_v23 }
 0x5cf   : > { %9708 = vmatmul.msk.f32.gmra.mxu2 %vm272_vm1, %v10113_v14 }
 0x5d0   : > { %9608 = vmatmul.msk.f32.gmra.mxu0 %vm272_vm1, %v13667_v63  ;;  %v13678_v7 = vadd.f32 %v6418_v39, %v6338_v10  ;;  %v13691_v39 = vld [vmem:[%s10337_s23 + $0x1b8] sm:$0xff] }
 0x5d1   : > { %9674 = vmatmul.msk.f32.gmra.mxu1 %vm272_vm1, %v13670_v0  ;;  %v5747_v40 = vpop.f32.mrf.mxu3 }
 0x5d2   : > { %14843 = vst [vmem:[#allocation96_spill] sm:$0xff] %v13678_v7  ;;  %v6421_v51 = vpop.f32.mrf.mxu2  ;;  %v5748_v38 = vadd.f32 %v5747_v40, %v13029_v26  ;;  %v7887_v11 = vpop.permute.xlu1 %7886  ;;  %v10114_v7 = vld [vmem:[%s10337_s23 + $0x1bb] sm:$0xff] }
 0x5d3   : > { %v13685_v60 = vsel %vm2650_vm2, %v14844_v33, %v7887_v11  ;;  %v9842_v33 = vld [vmem:[%s10337_s23 + $0x93] sm:$0xff] }
 0x5d4   : > { %14845 = vst [vmem:[#allocation33_spill] sm:$0xff] %v13685_v60  ;;  %v6061_v30 = vadd.f32 %v5993_v13, %v5748_v38 }
 0x5d5   : > { %v5996_v14 = vpop.f32.mrf.mxu0 }
 0x5d6   : > { %v6274_v54 = vpop.f32.mrf.mxu1  ;;  %v6339_v10 = vadd.f32 %v6271_v43, %v6061_v30  ;;  %9575 = vmatmul.msk.f32.gmra.mxu3 %vm272_vm1, %v13573_v8 }
 0x5d7   : > { %9709 = vmatmul.msk.f32.gmra.mxu2 %vm272_vm1, %v10114_v7 }
 0x5d8   : > { %9609 = vmatmul.msk.f32.gmra.mxu0 %vm272_vm1, %v13688_v29  ;;  %v13699_v26 = vadd.f32 %v6421_v51, %v6339_v10 }
 0x5d9   : > { %9675 = vmatmul.msk.f32.gmra.mxu1 %vm272_vm1, %v13691_v39  ;;  %v5750_v13 = vpop.f32.mrf.mxu3 }
 0x5da   : > { %v6424_v40 = vpop.f32.mrf.mxu2  ;;  %v5751_v38 = vadd.f32 %v5750_v13, %v13043_v49 }
 0x5dc   : > { %v6062_v11 = vadd.f32 %v5996_v14, %v5751_v38  ;;  %v9843_v38 = vld [vmem:[%s10337_s23 + $0x9b] sm:$0xff] }
 0x5dd   : > { %v5999_v30 = vpop.f32.mrf.mxu0 }
 0x5de   : > { %v6277_v43 = vpop.f32.mrf.mxu1  ;;  %v6340_v60 = vadd.f32 %v6274_v54, %v6062_v11  ;;  %9744 = vmatmul.msk.f32.vlgmr.msra.gmra.mxu3 %vm272_vm1, %v13150_v25 }
 0x5df   : > { %9942 = vmatmul.msk.f32.vlgmr.msra.gmra.mxu2 %vm272_vm1, %v13270_v17 }
 0x5e0   : > { %9810 = vmatmul.msk.f32.vlgmr.msra.gmra.mxu0 %vm272_vm1, %v13153_v1  ;;  %v13711_v7 = vadd.f32 %v6424_v40, %v6340_v60 }
 0x5e1   : > { %9876 = vmatmul.msk.f32.vlgmr.msra.gmra.mxu1 %vm272_vm1, %v9842_v33  ;;  %v5753_v49 = vpop.f32.mrf.mxu3  ;;  %v9844_v33 = vld [vmem:[%s10337_s23 + $0xab] sm:$0xff] }
 0x5e2   : > { %v5754_v51 = vadd.f32 %v5753_v49, %v13060_v15  ;;  %v6427_v14 = vpop.f32.mrf.mxu2 }
 0x5e4   : > { %v6063_v10 = vadd.f32 %v5999_v30, %v5754_v51 }
 0x5e5   : > { %v6002_v54 = vpop.f32.mrf.mxu0 }
 0x5e6   : > { %v6280_v13 = vpop.f32.mrf.mxu1  ;;  %v6341_v25 = vadd.f32 %v6277_v43, %v6063_v10  ;;  %9745 = vmatmul.msk.f32.gmra.mxu3 %vm272_vm1, %v13170_v53 }
 0x5e7   : > { %9943 = vmatmul.msk.f32.gmra.mxu2 %vm272_vm1, %v13290_v18 }
 0x5e8   : > { %9811 = vmatmul.msk.f32.gmra.mxu0 %vm272_vm1, %v13173_v31  ;;  %v13722_v1 = vadd.f32 %v6427_v14, %v6341_v25 }
 0x5e9   : > { %9877 = vmatmul.msk.f32.gmra.mxu1 %vm272_vm1, %v9843_v38  ;;  %v5756_v15 = vpop.f32.mrf.mxu3 }
 0x5ea   : > { %v5757_v60 = vadd.f32 %v5756_v15, %v13077_v12  ;;  %v6430_v40 = vpop.f32.mrf.mxu2 }
 0x5ec   : > { %v6064_v11 = vadd.f32 %v6002_v54, %v5757_v60 }
 0x5ed   : > { %v6005_v30 = vpop.f32.mrf.mxu0 }
 0x5ee   : > { %v6283_v43 = vpop.f32.mrf.mxu1  ;;  %v6342_v53 = vadd.f32 %v6280_v13, %v6064_v11  ;;  %9746 = vmatmul.msk.f32.gmra.mxu3 %vm272_vm1, %v13190_v55  ;;  %v9845_v13 = vld [vmem:[%s10337_s23 + $0xb3] sm:$0xff]  ;;  %v9846_v11 = vld [vmem:[%s10337_s23 + $0xc3] sm:$0xff] }
 0x5ef   : > { %9944 = vmatmul.msk.f32.gmra.mxu2 %vm272_vm1, %v13312_v35 }
 0x5f0   : > { %9812 = vmatmul.msk.f32.gmra.mxu0 %vm272_vm1, %v13193_v20  ;;  %v13733_v31 = vadd.f32 %v6430_v40, %v6342_v53 }
 0x5f1   : > { %9878 = vmatmul.msk.f32.gmra.mxu1 %vm272_vm1, %v9844_v33  ;;  %v5759_v12 = vpop.f32.mrf.mxu3 }
 0x5f2   : > { %v5760_v49 = vadd.f32 %v5759_v12, %v13094_v47  ;;  %v6433_v51 = vpop.f32.mrf.mxu2 }
 0x5f4   : > { %v6065_v14 = vadd.f32 %v6005_v30, %v5760_v49  ;;  %v9847_v49 = vld [vmem:[%s10337_s23 + $0xcb] sm:$0xff] }
 0x5f5   : > { %v6008_v10 = vpop.f32.mrf.mxu0 }
 0x5f6   : > { %v6286_v54 = vpop.f32.mrf.mxu1  ;;  %v6343_v55 = vadd.f32 %v6283_v43, %v6065_v14  ;;  %9747 = vmatmul.msk.f32.gmra.mxu3 %vm272_vm1, %v13210_v46  ;;  %v14847_v14 = vld [vmem:[#allocation32_spill] sm:$0xff] }
 0x5f7   : > { %9945 = vmatmul.msk.f32.gmra.mxu2 %vm272_vm1, %v13338_v28 }
 0x5f8   : > { %9813 = vmatmul.msk.f32.gmra.mxu0 %vm272_vm1, %v13213_v16  ;;  %v13744_v20 = vadd.f32 %v6433_v51, %v6343_v55 }
 0x5f9   : > { %9879 = vmatmul.msk.f32.gmra.mxu1 %vm272_vm1, %v9845_v13  ;;  %v5762_v47 = vpop.f32.mrf.mxu3 }
 0x5fa   : > { %v5763_v38 = vadd.f32 %v5762_v47, %v13111_v3  ;;  %v6436_v25 = vpop.f32.mrf.mxu2 }
 0x5fc   : > { %v6066_v15 = vadd.f32 %v6008_v10, %v5763_v38  ;;  %v9848_v38 = vld [vmem:[%s10337_s23 + $0xdb] sm:$0xff] }
 0x5fd   : > { %v6011_v60 = vpop.f32.mrf.mxu0 }
 0x5fe   : > { %v6289_v40 = vpop.f32.mrf.mxu1  ;;  %v6344_v46 = vadd.f32 %v6286_v54, %v6066_v15  ;;  %9748 = vmatmul.msk.f32.gmra.mxu3 %vm272_vm1, %v13230_v22 }
 0x5ff   : > { %9946 = vmatmul.msk.f32.gmra.mxu2 %vm272_vm1, %v13364_v45 }
 0x600   : > { %9814 = vmatmul.msk.f32.gmra.mxu0 %vm272_vm1, %v13233_v50  ;;  %v13755_v16 = vadd.f32 %v6436_v25, %v6344_v46  ;;  %v14846_v50 = vld [vmem:[#allocation65_spill] sm:$0xff] }
 0x601   : > { %9880 = vmatmul.msk.f32.gmra.mxu1 %vm272_vm1, %v9846_v11  ;;  %v5765_v3 = vpop.f32.mrf.mxu3 }
 0x602   : > { %v5766_v30 = vadd.f32 %v5765_v3, %v13128_v6  ;;  %v6439_v43 = vpop.f32.mrf.mxu2 }
 0x604   : > { %v6067_v33 = vadd.f32 %v6011_v60, %v5766_v30  ;;  %v14848_v60 = vld [vmem:[#allocation36_spill] sm:$0xff] }
 0x605   : > { %v6014_v53 = vpop.f32.mrf.mxu0 }
 0x606   : > { %v6292_v12 = vpop.f32.mrf.mxu1  ;;  %v6345_v22 = vadd.f32 %v6289_v40, %v6067_v33  ;;  %9749 = vmatmul.msk.f32.gmra.mxu3 %vm272_vm1, %v13250_v9 }
 0x607   : > { %9947 = vmatmul.msk.f32.gmra.mxu2 %vm272_vm1, %v13388_v24 }
 0x608   : > { %9815 = vmatmul.msk.f32.gmra.mxu0 %vm272_vm1, %v14846_v50  ;;  %v13766_v51 = vadd.f32 %v6439_v43, %v6345_v22  ;;  %v9849_v43 = vld [vmem:[%s10337_s23 + $0xe3] sm:$0xff] }
 0x609   : > { %9881 = vmatmul.msk.f32.gmra.mxu1 %vm272_vm1, %v9847_v49  ;;  %v5768_v6 = vpop.f32.mrf.mxu3 }
 0x60a   : > { %v5769_v10 = vadd.f32 %v5768_v6, %v14847_v14  ;;  %v6442_v54 = vpop.f32.mrf.mxu2  ;;  %v9850_v14 = vld [vmem:[%s10337_s23 + $0xf3] sm:$0xff] }
 0x60c   : > { %v6068_v13 = vadd.f32 %v6014_v53, %v5769_v10  ;;  %v14849_v53 = vld [vmem:[#allocation51_spill] sm:$0xff] }
 0x60d   : > { %v6017_v55 = vpop.f32.mrf.mxu0 }
 0x60e   : > { %v6295_v47 = vpop.f32.mrf.mxu1  ;;  %v6346_v9 = vadd.f32 %v6292_v12, %v6068_v13  ;;  %9750 = vmatmul.msk.f32.gmra.mxu3 %vm272_vm1, %v13270_v17 }
 0x60f   : > { %9948 = vmatmul.msk.f32.gmra.mxu2 %vm272_vm1, %v13411_v37 }
 0x610   : > { %9816 = vmatmul.msk.f32.gmra.mxu0 %vm272_vm1, %v13273_v36  ;;  %v13777_v25 = vadd.f32 %v6442_v54, %v6346_v9  ;;  %v14850_v54 = vld [vmem:[#allocation39_spill] sm:$0xff] }
 0x611   : > { %9882 = vmatmul.msk.f32.gmra.mxu1 %vm272_vm1, %v9848_v38  ;;  %v5771_v15 = vpop.f32.mrf.mxu3 }
 0x612   : > { %v5772_v40 = vadd.f32 %v5771_v15, %v14848_v60  ;;  %v6445_v11 = vpop.f32.mrf.mxu2  ;;  %v9851_v15 = vld [vmem:[%s10337_s23 + $0xfb] sm:$0xff] }
 0x614   : > { %v6069_v46 = vadd.f32 %v6017_v55, %v5772_v40  ;;  %v14851_v40 = vld [vmem:[#allocation56_spill] sm:$0xff] }
 0x615   : > { %v6020_v3 = vpop.f32.mrf.mxu0 }
 0x616   : > { %v6298_v30 = vpop.f32.mrf.mxu1  ;;  %v6347_v17 = vadd.f32 %v6295_v47, %v6069_v46  ;;  %9751 = vmatmul.msk.f32.gmra.mxu3 %vm272_vm1, %v13290_v18 }
 0x617   : > { %9949 = vmatmul.msk.f32.gmra.mxu2 %vm272_vm1, %v13436_v42 }
 0x618   : > { %9817 = vmatmul.msk.f32.gmra.mxu0 %vm272_vm1, %v13293_v58  ;;  %v13788_v36 = vadd.f32 %v6445_v11, %v6347_v17  ;;  %v9852_v17 = vld [vmem:[%s10337_s23 + $0x10b] sm:$0xff] }
 0x619   : > { %9883 = vmatmul.msk.f32.gmra.mxu1 %vm272_vm1, %v9849_v43  ;;  %v5774_v33 = vpop.f32.mrf.mxu3 }
 0x61a   : > { %v5775_v12 = vadd.f32 %v5774_v33, %v14849_v53  ;;  %v6448_v49 = vpop.f32.mrf.mxu2  ;;  %v14852_v53 = vld [vmem:[#allocation57_spill] sm:$0xff] }
 0x61c   : > { %v6070_v22 = vadd.f32 %v6020_v3, %v5775_v12 }
 0x61d   : > { %v6023_v50 = vpop.f32.mrf.mxu0 }
 0x61e   : > { %v6301_v6 = vpop.f32.mrf.mxu1  ;;  %v6348_v18 = vadd.f32 %v6298_v30, %v6070_v22  ;;  %9752 = vmatmul.msk.f32.gmra.mxu3 %vm272_vm1, %v13312_v35 }
 0x61f   : > { %9950 = vmatmul.msk.f32.gmra.mxu2 %vm272_vm1, %v13459_v52 }
 0x620   : > { %9818 = vmatmul.msk.f32.gmra.mxu0 %vm272_vm1, %v13315_v5  ;;  %v13799_v58 = vadd.f32 %v6448_v49, %v6348_v18 }
 0x621   : > { %9884 = vmatmul.msk.f32.gmra.mxu1 %vm272_vm1, %v9850_v14  ;;  %v5777_v10 = vpop.f32.mrf.mxu3  ;;  %v9853_v14 = vld [vmem:[%s10337_s23 + $0x113] sm:$0xff] }
 0x622   : > { %v5778_v13 = vadd.f32 %v5777_v10, %v14850_v54  ;;  %v6451_v55 = vpop.f32.mrf.mxu2  ;;  %v14854_v54 = vld [vmem:[#allocation59_spill] sm:$0xff] }
 0x624   : > { %v6071_v47 = vadd.f32 %v6023_v50, %v5778_v13 }
 0x625   : > { %v6026_v38 = vpop.f32.mrf.mxu0 }
 0x626   : > { %v6304_v9 = vpop.f32.mrf.mxu1  ;;  %v6349_v35 = vadd.f32 %v6301_v6, %v6071_v47  ;;  %9753 = vmatmul.msk.f32.gmra.mxu3 %vm272_vm1, %v13338_v28 }
 0x627   : > { %9951 = vmatmul.msk.f32.gmra.mxu2 %vm272_vm1, %v13484_v2 }
 0x628   : > { %9819 = vmatmul.msk.f32.gmra.mxu0 %vm272_vm1, %v13341_v62  ;;  %v13810_v5 = vadd.f32 %v6451_v55, %v6349_v35  ;;  %v14855_v35 = vld [vmem:[#allocation73_spill] sm:$0xff] }
 0x629   : > { %9885 = vmatmul.msk.f32.gmra.mxu1 %vm272_vm1, %v9851_v15  ;;  %v5780_v60 = vpop.f32.mrf.mxu3  ;;  %v9854_v15 = vld [vmem:[%s10337_s23 + $0x123] sm:$0xff] }
 0x62a   : > { %v5781_v11 = vadd.f32 %v5780_v60, %v14851_v40  ;;  %v6454_v46 = vpop.f32.mrf.mxu2 }
 0x62c   : > { %v6072_v3 = vadd.f32 %v6026_v38, %v5781_v11  ;;  %v14856_v11 = vld [vmem:[#allocation68_spill] sm:$0xff] }
 0x62d   : > { %v6029_v30 = vpop.f32.mrf.mxu0 }
 0x62e   : > { %v6307_v43 = vpop.f32.mrf.mxu1  ;;  %v6350_v28 = vadd.f32 %v6304_v9, %v6072_v3  ;;  %9754 = vmatmul.msk.f32.gmra.mxu3 %vm272_vm1, %v13364_v45 }
 0x62f   : > { %9952 = vmatmul.msk.f32.gmra.mxu2 %vm272_vm1, %v13507_v41 }
 0x630   : > { %9820 = vmatmul.msk.f32.gmra.mxu0 %vm272_vm1, %v13367_v61  ;;  %v13821_v62 = vadd.f32 %v6454_v46, %v6350_v28  ;;  %v14853_v61 = vld [vmem:[#allocation63_spill] sm:$0xff]  ;;  %v9855_v28 = vld [vmem:[%s10337_s23 + $0x12b] sm:$0xff] }
 0x631   : > { %9886 = vmatmul.msk.f32.gmra.mxu1 %vm272_vm1, %v9852_v17  ;;  %v5783_v33 = vpop.f32.mrf.mxu3 }
 0x632   : > { %v5784_v12 = vadd.f32 %v5783_v33, %v14852_v53  ;;  %v6457_v49 = vpop.f32.mrf.mxu2  ;;  %v14857_v33 = vld [vmem:[#allocation44_spill] sm:$0xff] }
 0x634   : > { %v6073_v22 = vadd.f32 %v6029_v30, %v5784_v12 }
 0x635   : > { %v6032_v50 = vpop.f32.mrf.mxu0 }
 0x636   : > { %v6310_v6 = vpop.f32.mrf.mxu1  ;;  %v6351_v45 = vadd.f32 %v6307_v43, %v6073_v22  ;;  %9755 = vmatmul.msk.f32.gmra.mxu3 %vm272_vm1, %v13388_v24 }
 0x637   : > { %9953 = vmatmul.msk.f32.gmra.mxu2 %vm272_vm1, %v13528_v56 }
 0x638   : > { %9821 = vmatmul.msk.f32.gmra.mxu0 %vm272_vm1, %v14853_v61  ;;  %v13832_v18 = vadd.f32 %v6457_v49, %v6351_v45  ;;  %v14858_v49 = vld [vmem:[#allocation71_spill] sm:$0xff] }
 0x639   : > { %9887 = vmatmul.msk.f32.gmra.mxu1 %vm272_vm1, %v9853_v14  ;;  %v5786_v10 = vpop.f32.mrf.mxu3  ;;  %v9856_v61 = vld [vmem:[%s10337_s23 + $0x13b] sm:$0xff] }
 0x63a   : > { %v5787_v13 = vadd.f32 %v5786_v10, %v14854_v54  ;;  %v6460_v55 = vpop.f32.mrf.mxu2  ;;  %v14859_v10 = vld [vmem:[#allocation79_spill] sm:$0xff] }
 0x63c   : > { %v6074_v47 = vadd.f32 %v6032_v50, %v5787_v13 }
 0x63d   : > { %v6035_v38 = vpop.f32.mrf.mxu0 }
 0x63e   : > { %v6313_v9 = vpop.f32.mrf.mxu1  ;;  %v6352_v24 = vadd.f32 %v6310_v6, %v6074_v47  ;;  %9756 = vmatmul.msk.f32.gmra.mxu3 %vm272_vm1, %v13411_v37 }
 0x63f   : > { %9954 = vmatmul.msk.f32.gmra.mxu2 %vm272_vm1, %v13549_v57 }
 0x640   : > { %9822 = vmatmul.msk.f32.gmra.mxu0 %vm272_vm1, %v14855_v35  ;;  %v13843_v60 = vadd.f32 %v6460_v55, %v6352_v24  ;;  %v14860_v55 = vld [vmem:[#allocation19_spill] sm:$0xff] }
 0x641   : > { %9888 = vmatmul.msk.f32.gmra.mxu1 %vm272_vm1, %v9854_v15  ;;  %v5789_v40 = vpop.f32.mrf.mxu3  ;;  %v9857_v35 = vld [vmem:[%s10337_s23 + $0x143] sm:$0xff] }
 0x642   : > { %v5790_v46 = vadd.f32 %v5789_v40, %v14856_v11  ;;  %v6463_v3 = vpop.f32.mrf.mxu2 }
 0x644   : > { %v6075_v30 = vadd.f32 %v6035_v38, %v5790_v46  ;;  %v14861_v46 = vld [vmem:[#allocation69_spill] sm:$0xff] }
 0x645   : > { %v6038_v43 = vpop.f32.mrf.mxu0 }
 0x646   : > { %v6316_v17 = vpop.f32.mrf.mxu1  ;;  %v6353_v37 = vadd.f32 %v6313_v9, %v6075_v30  ;;  %9757 = vmatmul.msk.f32.gmra.mxu3 %vm272_vm1, %v13436_v42 }
 0x647   : > { %9955 = vmatmul.msk.f32.gmra.mxu2 %vm272_vm1, %v13570_v59 }
 0x648   : > { %9823 = vmatmul.msk.f32.gmra.mxu0 %vm272_vm1, %v14857_v33  ;;  %v13854_v53 = vadd.f32 %v6463_v3, %v6353_v37  ;;  %v9858_v37 = vld [vmem:[%s10337_s23 + $0x153] sm:$0xff] }
 0x649   : > { %9889 = vmatmul.msk.f32.gmra.mxu1 %vm272_vm1, %v9855_v28  ;;  %v5792_v12 = vpop.f32.mrf.mxu3 }
 0x64a   : > { %v5793_v22 = vadd.f32 %v5792_v12, %v14858_v49  ;;  %v6466_v50 = vpop.f32.mrf.mxu2  ;;  %v14862_v12 = vld [vmem:[#allocation66_spill] sm:$0xff] }
 0x64c   : > { %v6076_v6 = vadd.f32 %v6038_v43, %v5793_v22 }
 0x64d   : > { %v6041_v14 = vpop.f32.mrf.mxu0 }
 0x64e   : > { %v6319_v45 = vpop.f32.mrf.mxu1  ;;  %v6354_v42 = vadd.f32 %v6316_v17, %v6076_v6  ;;  %9758 = vmatmul.msk.f32.gmra.mxu3 %vm272_vm1, %v13459_v52 }
 0x64f   : > { %9956 = vmatmul.msk.f32.gmra.mxu2 %vm272_vm1, %v13591_v4 }
 0x650   : > { %9824 = vmatmul.msk.f32.gmra.mxu0 %vm272_vm1, %v14859_v10  ;;  %v13865_v54 = vadd.f32 %v6466_v50, %v6354_v42  ;;  %v14863_v42 = vld [vmem:[#allocation76_spill] sm:$0xff] }
 0x651   : > { %9890 = vmatmul.msk.f32.gmra.mxu1 %vm272_vm1, %v9856_v61  ;;  %v5795_v13 = vpop.f32.mrf.mxu3 }
 0x652   : > { %v5796_v47 = vadd.f32 %v5795_v13, %v14860_v55  ;;  %v6469_v38 = vpop.f32.mrf.mxu2 }
 0x654   : > { %v6077_v9 = vadd.f32 %v6041_v14, %v5796_v47 }
 0x655   : > { %v6044_v15 = vpop.f32.mrf.mxu0 }
 0x656   : > { %v6322_v24 = vpop.f32.mrf.mxu1  ;;  %v6355_v52 = vadd.f32 %v6319_v45, %v6077_v9  ;;  %9759 = vmatmul.msk.f32.gmra.mxu3 %vm272_vm1, %v13484_v2  ;;  %v9859_v45 = vld [vmem:[%s10337_s23 + $0x15b] sm:$0xff] }
 0x657   : > { %9957 = vmatmul.msk.f32.gmra.mxu2 %vm272_vm1, %v13612_v44 }
 0x658   : > { %9825 = vmatmul.msk.f32.gmra.mxu0 %vm272_vm1, %v13487_v19  ;;  %v13876_v40 = vadd.f32 %v6469_v38, %v6355_v52 }
 0x659   : > { %9891 = vmatmul.msk.f32.gmra.mxu1 %vm272_vm1, %v9857_v35  ;;  %v5798_v11 = vpop.f32.mrf.mxu3 }
 0x65a   : > { %v5799_v3 = vadd.f32 %v5798_v11, %v14861_v46  ;;  %v6472_v30 = vpop.f32.mrf.mxu2  ;;  %v14864_v46 = vld [vmem:[#allocation75_spill] sm:$0xff] }
 0x65c   : > { %v6078_v43 = vadd.f32 %v6044_v15, %v5799_v3 }
 0x65d   : > { %v6938_v17 = vpop.f32.mrf.mxu0 }
 0x65e   : > { %v7216_v28 = vpop.f32.mrf.mxu1  ;;  %v6356_v2 = vadd.f32 %v6322_v24, %v6078_v43  ;;  %9760 = vmatmul.msk.f32.gmra.mxu3 %vm272_vm1, %v13507_v41 }
 0x65f   : > { %9958 = vmatmul.msk.f32.gmra.mxu2 %vm272_vm1, %v13633_v27 }
 0x660   : > { %9826 = vmatmul.msk.f32.gmra.mxu0 %vm272_vm1, %v13510_v32  ;;  %v13887_v19 = vadd.f32 %v6472_v30, %v6356_v2 }
 0x661   : > { %9892 = vmatmul.msk.f32.gmra.mxu1 %vm272_vm1, %v9858_v37  ;;  %v6657_v33 = vpop.f32.mrf.mxu3 }
 0x662   : > { %v6753_v49 = vadd.f32 %v6657_v33, %v14862_v12  ;;  %v7494_v22 = vpop.f32.mrf.mxu2  ;;  %v9861_v33 = vld [vmem:[%s10337_s23 + $0x173] sm:$0xff] }
 0x664   : > { %v7034_v50 = vadd.f32 %v6938_v17, %v6753_v49 }
 0x665   : > { %v6941_v6 = vpop.f32.mrf.mxu0 }
 0x666   : > { %v7219_v14 = vpop.f32.mrf.mxu1  ;;  %v7312_v41 = vadd.f32 %v7216_v28, %v7034_v50  ;;  %9761 = vmatmul.msk.f32.gmra.mxu3 %vm272_vm1, %v13528_v56  ;;  %v9860_v56 = vld [vmem:[%s10337_s23 + $0x16b] sm:$0xff] }
 0x667   : > { %9959 = vmatmul.msk.f32.gmra.mxu2 %vm272_vm1, %v13650_v21 }
 0x668   : > { %9827 = vmatmul.msk.f32.gmra.mxu0 %vm272_vm1, %v13531_v34  ;;  %v7590_v32 = vadd.f32 %v7494_v22, %v7312_v41 }
 0x669   : > { %9893 = vmatmul.msk.f32.gmra.mxu1 %vm272_vm1, %v9859_v45  ;;  %v6660_v61 = vpop.f32.mrf.mxu3 }
 0x66a   : > { %v6754_v10 = vadd.f32 %v6660_v61, %v14863_v42  ;;  %7952 = vrot.lane.b32.xlu2 %v7590_v32, %s10228_s10  ;;  %v7497_v13 = vpop.f32.mrf.mxu2  ;;  %v7691_v34 = vmul.f32 %v7590_v32, %v7590_v32  ;;  %v7622_v35 = vsel %vm2650_vm2, %v7590_v32, 0.0  ;;  %v13927_v32 = vld [vmem:[%s10337_s23 + $0x186] sm:$0xff] }
 0x66c   : > { %v7035_v55 = vadd.f32 %v6941_v6, %v6754_v10  ;;  %v7723_v43 = vsel %vm2650_vm2, %v7691_v34, 0.0 }
 0x66d   : > { %v6944_v47 = vpop.f32.mrf.mxu0 }
 0x66e   : > { %v7222_v38 = vpop.f32.mrf.mxu1  ;;  %v7313_v9 = vadd.f32 %v7219_v14, %v7035_v55  ;;  %9762 = vmatmul.msk.f32.gmra.mxu3 %vm272_vm1, %v13549_v57  ;;  %v14865_v14 = vld [vmem:[#allocation81_spill] sm:$0xff]  ;;  %v9862_v55 = vld [vmem:[%s10337_s23 + $0x183] sm:$0xff] }
 0x66f   : > { %9960 = vmatmul.msk.f32.gmra.mxu2 %vm272_vm1, %v13667_v63 }
 0x670   : > { %9828 = vmatmul.msk.f32.gmra.mxu0 %vm272_vm1, %v13552_v23  ;;  %v7591_v15 = vadd.f32 %v7497_v13, %v7313_v9 }
 0x671   : > { %9894 = vmatmul.msk.f32.gmra.mxu1 %vm272_vm1, %v9860_v56  ;;  %v6663_v24 = vpop.f32.mrf.mxu3 }
 0x672   : > { %v7623_v52 = vsel %vm2650_vm2, %v7591_v15, 0.0  ;;  %v7692_v11 = vmul.f32 %v7591_v15, %v7591_v15  ;;  %v6755_v3 = vadd.f32 %v6663_v24, %v14864_v46  ;;  %7954 = vrot.lane.b32.xlu0 %v7591_v15, %s10228_s10  ;;  %v7500_v57 = vpop.f32.mrf.mxu2  ;;  %v14866_v15 = vld [vmem:[#allocation83_spill] sm:$0xff] }
 0x673   : > { %v7624_v30 = vadd.f32 %v7623_v52, %v7622_v35  ;;  %v13942_v52 = vld [vmem:[%s10337_s23 + $0x18e] sm:$0xff] }
 0x674   : > { %v7724_v23 = vsel %vm2650_vm2, %v7692_v11, 0.0  ;;  %v7036_v17 = vadd.f32 %v6944_v47, %v6755_v3 }
 0x675   : > { %v6947_v28 = vpop.f32.mrf.mxu0  ;;  %v7725_v37 = vadd.f32 %v7724_v23, %v7723_v43  ;;  %v14867_v23 = vld [vmem:[#allocation90_spill] sm:$0xff] }
 0x676   : > { %v7225_v2 = vpop.f32.mrf.mxu1  ;;  %v7314_v12 = vadd.f32 %v7222_v38, %v7036_v17  ;;  %9763 = vmatmul.msk.f32.gmra.mxu3 %vm272_vm1, %v13570_v59 }
 0x677   : > { %9961 = vmatmul.msk.f32.gmra.mxu2 %vm272_vm1, %v13688_v29 }
 0x678   : > { %9829 = vmatmul.msk.f32.gmra.mxu0 %vm272_vm1, %v13573_v8  ;;  %v7592_v49 = vadd.f32 %v7500_v57, %v7314_v12 }
 0x679   : > { %9895 = vmatmul.msk.f32.gmra.mxu1 %vm272_vm1, %v9861_v33  ;;  %v6666_v22 = vpop.f32.mrf.mxu3  ;;  %v14868_v33 = vld [vmem:[#allocation85_spill] sm:$0xff] }
 0x67a   : > { %v7625_v50 = vsel %vm2650_vm2, %v7592_v49, 0.0  ;;  %v7693_v6 = vmul.f32 %v7592_v49, %v7592_v49  ;;  %v6756_v45 = vadd.f32 %v6666_v22, %v14865_v14  ;;  %7956 = vrot.lane.b32.xlu1 %v7592_v49, %s10228_s10  ;;  %v7503_v41 = vpop.f32.mrf.mxu2  ;;  %v13957_v22 = vld [vmem:[%s10337_s23 + $0x19e] sm:$0xff] }
 0x67b   : > { %v7626_v59 = vadd.f32 %v7625_v50, %v7624_v30  ;;  %v9863_v30 = vld [vmem:[%s10337_s23 + $0x18b] sm:$0xff] }
 0x67c   : > { %v7726_v61 = vsel %vm2650_vm2, %v7693_v6, 0.0  ;;  %v7037_v42 = vadd.f32 %v6947_v28, %v6756_v45 }
 0x67d   : > { %v6950_v8 = vpop.f32.mrf.mxu0  ;;  %v7727_v10 = vadd.f32 %v7726_v61, %v7725_v37 }
 0x67e   : > { %v7228_v13 = vpop.f32.mrf.mxu1  ;;  %v7315_v47 = vadd.f32 %v7225_v2, %v7037_v42  ;;  %9764 = vmatmul.msk.f32.gmra.mxu3 %vm272_vm1, %v13591_v4  ;;  %v14869_v42 = vld [vmem:[#allocation92_spill] sm:$0xff] }
 0x67f   : > { %9962 = vmatmul.msk.f32.gmra.mxu2 %vm272_vm1, %v13927_v32 }
 0x680   : > { %9830 = vmatmul.msk.f32.gmra.mxu0 %vm272_vm1, %v13594_v48  ;;  %v7593_v38 = vadd.f32 %v7503_v41, %v7315_v47  ;;  %v14870_v47 = vld [vmem:[#allocation86_spill] sm:$0xff] }
 0x681   : > { %9896 = vmatmul.msk.f32.gmra.mxu1 %vm272_vm1, %v9862_v55  ;;  %v6669_v56 = vpop.f32.mrf.mxu3 }
 0x682   : > { %v7627_v9 = vsel %vm2650_vm2, %v7593_v38, 0.0  ;;  %v7694_v34 = vmul.f32 %v7593_v38, %v7593_v38  ;;  %v6757_v24 = vadd.f32 %v6669_v56, %v14866_v15  ;;  %7958 = vrot.lane.b32.xlu2 %v7593_v38, %s10228_s10  ;;  %v7506_v35 = vpop.f32.mrf.mxu2 }
 0x683   : > { %v7628_v4 = vadd.f32 %v7627_v9, %v7626_v59  ;;  %v9864_v59 = vld [vmem:[%s10337_s23 + $0x19b] sm:$0xff]  ;;  %v13972_v9 = vld [vmem:[%s10337_s23 + $0x1a6] sm:$0xff] }
 0x684   : > { %v7728_v11 = vsel %vm2650_vm2, %v7694_v34, 0.0  ;;  %v7038_v46 = vadd.f32 %v6950_v8, %v6757_v24 }
 0x685   : > { %v6953_v48 = vpop.f32.mrf.mxu0  ;;  %v7729_v3 = vadd.f32 %v7728_v11, %v7727_v10  ;;  %v9865_v11 = vld [vmem:[%s10337_s23 + $0x1a3] sm:$0xff] }
 0x686   : > { %v7231_v57 = vpop.f32.mrf.mxu1  ;;  %v7316_v43 = vadd.f32 %v7228_v13, %v7038_v46  ;;  %9765 = vmatmul.msk.f32.gmra.mxu3 %vm272_vm1, %v13612_v44 }
 0x687   : > { %9963 = vmatmul.msk.f32.gmra.mxu2 %vm272_vm1, %v13942_v52 }
 0x688   : > { %9831 = vmatmul.msk.f32.gmra.mxu0 %vm272_vm1, %v14867_v23  ;;  %v7594_v17 = vadd.f32 %v7506_v35, %v7316_v43  ;;  %v14872_v23 = vld [vmem:[#allocation87_spill] sm:$0xff] }
 0x689   : > { %9897 = vmatmul.msk.f32.gmra.mxu1 %vm272_vm1, %v9863_v30  ;;  %v6672_v28 = vpop.f32.mrf.mxu3 }
 0x68a   : > { %v7629_v37 = vsel %vm2650_vm2, %v7594_v17, 0.0  ;;  %v7695_v2 = vmul.f32 %v7594_v17, %v7594_v17  ;;  %v6758_v12 = vadd.f32 %v6672_v28, %v14868_v33  ;;  %7960 = vrot.lane.b32.xlu0 %v7594_v17, %s10228_s10  ;;  %v7509_v49 = vpop.f32.mrf.mxu2 }
 0x68b   : > { %v7630_v44 = vadd.f32 %v7629_v37, %v7628_v4  ;;  %v13987_v37 = vld [vmem:[%s10337_s23 + $0x1b6] sm:$0xff] }
 0x68c   : > { %v7730_v50 = vsel %vm2650_vm2, %v7695_v2, 0.0  ;;  %v7039_v6 = vadd.f32 %v6953_v48, %v6758_v12  ;;  %v14871_v48 = vld [vmem:[#allocation94_spill] sm:$0xff] }
 0x68d   : > { %v6956_v14 = vpop.f32.mrf.mxu0  ;;  %v7731_v45 = vadd.f32 %v7730_v50, %v7729_v3  ;;  %v9866_v50 = vld [vmem:[%s10337_s23 + $0x1b3] sm:$0xff] }
 0x68e   : > { %v7234_v41 = vpop.f32.mrf.mxu1  ;;  %v7317_v61 = vadd.f32 %v7231_v57, %v7039_v6  ;;  %9766 = vmatmul.msk.f32.gmra.mxu3 %vm272_vm1, %v13633_v27 }
 0x68f   : > { %9964 = vmatmul.msk.f32.gmra.mxu2 %vm272_vm1, %v13957_v22 }
 0x690   : > { %9832 = vmatmul.msk.f32.gmra.mxu0 %vm272_vm1, %v14869_v42  ;;  %v7595_v8 = vadd.f32 %v7509_v49, %v7317_v61  ;;  %v14873_v61 = vld [vmem:[#allocation88_spill] sm:$0xff] }
 0x691   : > { %9898 = vmatmul.msk.f32.gmra.mxu1 %vm272_vm1, %v9864_v59  ;;  %v6675_v10 = vpop.f32.mrf.mxu3 }
 0x692   : > { %v7631_v13 = vsel %vm2650_vm2, %v7595_v8, 0.0  ;;  %v7696_v55 = vmul.f32 %v7595_v8, %v7595_v8  ;;  %v6759_v38 = vadd.f32 %v6675_v10, %v14870_v47  ;;  %7962 = vrot.lane.b32.xlu1 %v7595_v8, %s10228_s10  ;;  %v7512_v56 = vpop.f32.mrf.mxu2  ;;  %v14002_v10 = vld [vmem:[%s10337_s23 + $0x1be] sm:$0xff] }
 0x693   : > { %v7632_v27 = vadd.f32 %v7631_v13, %v7630_v44 }
 0x694   : > { %v7732_v34 = vsel %vm2650_vm2, %v7696_v55, 0.0  ;;  %v7040_v15 = vadd.f32 %v6956_v14, %v6759_v38 }
 0x695   : > { %v6959_v24 = vpop.f32.mrf.mxu0  ;;  %v7733_v35 = vadd.f32 %v7732_v34, %v7731_v45 }
 0x696   : > { %v7237_v4 = vpop.f32.mrf.mxu1  ;;  %v7318_v46 = vadd.f32 %v7234_v41, %v7040_v15  ;;  %9767 = vmatmul.msk.f32.gmra.mxu3 %vm272_vm1, %v13650_v21 }
 0x697   : > { %9965 = vmatmul.msk.f32.gmra.mxu2 %vm272_vm1, %v13972_v9 }
 0x698   : > { %9833 = vmatmul.msk.f32.gmra.mxu0 %vm272_vm1, %v14871_v48  ;;  %v7596_v3 = vadd.f32 %v7512_v56, %v7318_v46  ;;  %v9867_v56 = vld [vmem:[%s10337_s23 + $0x1bb] sm:$0xff]  ;;  %v9934_v48 = vld [vmem:[%s10337_s23 + $0x1ce] sm:$0xff] }
 0x699   : > { %9899 = vmatmul.msk.f32.gmra.mxu1 %vm272_vm1, %v9865_v11  ;;  %v6678_v57 = vpop.f32.mrf.mxu3 }
 0x69a   : > { %v7633_v30 = vsel %vm2650_vm2, %v7596_v3, 0.0  ;;  %v7697_v43 = vmul.f32 %v7596_v3, %v7596_v3  ;;  %v6760_v17 = vadd.f32 %v6678_v57, %v14872_v23  ;;  %7964 = vrot.lane.b32.xlu2 %v7596_v3, %s10228_s10  ;;  %v7515_v28 = vpop.f32.mrf.mxu2 }
 0x69b   : > { %v7634_v21 = vadd.f32 %v7633_v30, %v7632_v27 }
 0x69c   : > { %v7734_v2 = vsel %vm2650_vm2, %v7697_v43, 0.0  ;;  %v7041_v33 = vadd.f32 %v6959_v24, %v6760_v17  ;;  %v9868_v17 = vld [vmem:[%s10337_s23 + $0x1cb] sm:$0xff] }
 0x69d   : > { %v6962_v12 = vpop.f32.mrf.mxu0  ;;  %v7735_v49 = vadd.f32 %v7734_v2, %v7733_v35 }
 0x69e   : > { %v7240_v44 = vpop.f32.mrf.mxu1  ;;  %v7319_v6 = vadd.f32 %v7237_v4, %v7041_v33  ;;  %9768 = vmatmul.msk.f32.gmra.mxu3 %vm272_vm1, %v13667_v63  ;;  %v14874_v4 = vld [vmem:[#allocation89_spill] sm:$0xff] }
 0x69f   : > { %9966 = vmatmul.msk.f32.gmra.mxu2 %vm272_vm1, %v13987_v37 }
 0x6a0   : > { %9834 = vmatmul.msk.f32.gmra.mxu0 %vm272_vm1, %v13670_v0  ;;  %v7597_v14 = vadd.f32 %v7515_v28, %v7319_v6 }
 0x6a1   : > { %9900 = vmatmul.msk.f32.gmra.mxu1 %vm272_vm1, %v9866_v50  ;;  %v6681_v45 = vpop.f32.mrf.mxu3 }
 0x6a2   : > { %v7635_v41 = vsel %vm2650_vm2, %v7597_v14, 0.0  ;;  %v7698_v59 = vmul.f32 %v7597_v14, %v7597_v14  ;;  %v6761_v42 = vadd.f32 %v6681_v45, %v14873_v61  ;;  %7966 = vrot.lane.b32.xlu0 %v7597_v14, %s10228_s10  ;;  %v7518_v8 = vpop.f32.mrf.mxu2 }
 0x6a3   : > { %v7636_v63 = vadd.f32 %v7635_v41, %v7634_v21 }
 0x6a4   : > { %v7736_v13 = vsel %vm2650_vm2, %v7698_v59, 0.0  ;;  %v7042_v55 = vadd.f32 %v6962_v12, %v6761_v42  ;;  %v9803_v59 = vld [vmem:[%s10337_s23 + $0x1d0] sm:$0xff] }
 0x6a5   : > { %v6965_v0 = vpop.f32.mrf.mxu0  ;;  %v7737_v47 = vadd.f32 %v7736_v13, %v7735_v49  ;;  %v14875_v49 = vld [vmem:[#allocation91_spill] sm:$0xff] }
 0x6a6   : > { %v7243_v38 = vpop.f32.mrf.mxu1  ;;  %v7320_v27 = vadd.f32 %v7240_v44, %v7042_v55  ;;  %9769 = vmatmul.msk.f32.gmra.mxu3 %vm272_vm1, %v13688_v29 }
 0x6a7   : > { %9967 = vmatmul.msk.f32.gmra.mxu2 %vm272_vm1, %v14002_v10 }
 0x6a8   : > { %9835 = vmatmul.msk.f32.gmra.mxu0 %vm272_vm1, %v13691_v39  ;;  %v7598_v34 = vadd.f32 %v7518_v8, %v7320_v27  ;;  %v9802_v39 = vld [vmem:[%s10337_s23 + $0x1c8] sm:$0xff]  ;;  %v9869_v8 = vld [vmem:[%s10337_s23 + $0x1d3] sm:$0xff] }
 0x6a9   : > { %9901 = vmatmul.msk.f32.gmra.mxu1 %vm272_vm1, %v9867_v56  ;;  %v6684_v15 = vpop.f32.mrf.mxu3 }
 0x6aa   : > { %v7637_v24 = vsel %vm2650_vm2, %v7598_v34, 0.0  ;;  %v7699_v35 = vmul.f32 %v7598_v34, %v7598_v34  ;;  %v6762_v11 = vadd.f32 %v6684_v15, %v14874_v4  ;;  %7968 = vrot.lane.b32.xlu1 %v7598_v34, %s10228_s10  ;;  %v7521_v29 = vpop.f32.mrf.mxu2  ;;  %v9936_v34 = vld [vmem:[%s10337_s23 + $0x1e6] sm:$0xff]  ;;  %v14041_v15 = vpop.permute.xlu2 %8157 }
 0x6ab   : > { %v7638_v46 = vadd.f32 %v7637_v24, %v7636_v63 }
 0x6ac   : > { %v7738_v3 = vsel %vm2650_vm2, %v7699_v35, 0.0  ;;  %v7043_v57 = vadd.f32 %v6965_v0, %v6762_v11  ;;  %v9804_v11 = vld [vmem:[%s10337_s23 + $0x1e0] sm:$0xff] }
 0x6ad   : > { %v6968_v30 = vpop.f32.mrf.mxu0  ;;  %v7739_v43 = vadd.f32 %v7738_v3, %v7737_v47 }
 0x6ae   : > { %v7246_v23 = vpop.f32.mrf.mxu1  ;;  %v7321_v28 = vadd.f32 %v7243_v38, %v7043_v57  ;;  %9770 = vmatmul.msk.f32.gmra.mxu3 %vm272_vm1, %v13927_v32  ;;  %v9935_v32 = vld [vmem:[%s10337_s23 + $0x1d6] sm:$0xff]  ;;  %v14876_v38 = vld [vmem:[#allocation93_spill] sm:$0xff] }
 0x6af   : > { %9968 = vmatmul.msk.f32.gmra.mxu2 %vm272_vm1, %v9934_v48  ;;  %v9870_v48 = vld [vmem:[%s10337_s23 + $0x1e3] sm:$0xff] }
 0x6b0   : > { %9836 = vmatmul.msk.f32.gmra.mxu0 %vm272_vm1, %v9802_v39  ;;  %v7599_v21 = vadd.f32 %v7521_v29, %v7321_v28 }
 0x6b1   : > { %9902 = vmatmul.msk.f32.gmra.mxu1 %vm272_vm1, %v9868_v17  ;;  %v6687_v2 = vpop.f32.mrf.mxu3 }
 0x6b2   : > { %v7639_v33 = vsel %vm2650_vm2, %v7599_v21, 0.0  ;;  %v7700_v12 = vmul.f32 %v7599_v21, %v7599_v21  ;;  %v6763_v44 = vadd.f32 %v6687_v2, %v14875_v49  ;;  %7970 = vrot.lane.b32.xlu2 %v7599_v21, %s10228_s10  ;;  %v7524_v50 = vpop.f32.mrf.mxu2  ;;  %v9937_v21 = vld [vmem:[%s10337_s23 + $0x1ee] sm:$0xff]  ;;  %v14878_v2 = vld [vmem:[#allocation27_spill] sm:$0xff] }
 0x6b3   : > { %v7640_v6 = vadd.f32 %v7639_v33, %v7638_v46  ;;  %v14879_v33 = vld [vmem:[#allocation14_spill] sm:$0xff] }
 0x6b4   : > { %v7740_v14 = vsel %vm2650_vm2, %v7700_v12, 0.0  ;;  %v7044_v45 = vadd.f32 %v6968_v30, %v6763_v44  ;;  %v8048_v12 = vsel %vm2650_vm2, %v14879_v33, %v14878_v2  ;;  %v9873_v2 = vld [vmem:[%s10337_s23 + $0x203] sm:$0xff] }
 0x6b5   : > { %v6971_v41 = vpop.f32.mrf.mxu0  ;;  %v7741_v61 = vadd.f32 %v7740_v14, %v7739_v43 }
 0x6b6   : > { %v7249_v42 = vpop.f32.mrf.mxu1  ;;  %v7322_v63 = vadd.f32 %v7246_v23, %v7044_v45  ;;  %9771 = vmatmul.msk.f32.gmra.mxu3 %vm272_vm1, %v13942_v52  ;;  %v14877_v23 = vld [vmem:[#allocation95_spill] sm:$0xff] }
 0x6b7   : > { %9969 = vmatmul.msk.f32.gmra.mxu2 %vm272_vm1, %v9935_v32  ;;  %v9805_v32 = vld [vmem:[%s10337_s23 + $0x1e8] sm:$0xff] }
 0x6b8   : > { %9837 = vmatmul.msk.f32.gmra.mxu0 %vm272_vm1, %v9803_v59  ;;  %v7600_v13 = vadd.f32 %v7524_v50, %v7322_v63  ;;  %v9871_v59 = vld [vmem:[%s10337_s23 + $0x1eb] sm:$0xff] }
 0x6b9   : > { %9903 = vmatmul.msk.f32.gmra.mxu1 %vm272_vm1, %v9869_v8  ;;  %v6690_v55 = vpop.f32.mrf.mxu3 }
 0x6ba   : > { %v7641_v0 = vsel %vm2650_vm2, %v7600_v13, 0.0  ;;  %v7701_v47 = vmul.f32 %v7600_v13, %v7600_v13  ;;  %v6764_v56 = vadd.f32 %v6690_v55, %v14876_v38  ;;  %7972 = vrot.lane.b32.xlu0 %v7600_v13, %s10228_s10  ;;  %v7527_v27 = vpop.f32.mrf.mxu2  ;;  %v14880_v55 = vld [vmem:[#allocation96_spill] sm:$0xff] }
 0x6bb   : > { %v7642_v52 = vadd.f32 %v7641_v0, %v7640_v6 }
 0x6bc   : > { %v7742_v24 = vsel %vm2650_vm2, %v7701_v47, 0.0  ;;  %v7045_v35 = vadd.f32 %v6971_v41, %v6764_v56 }
 0x6bd   : > { %v6974_v4 = vpop.f32.mrf.mxu0  ;;  %v7743_v29 = vadd.f32 %v7742_v24, %v7741_v61 }
 0x6be   : > { %v7252_v46 = vpop.f32.mrf.mxu1  ;;  %v7323_v3 = vadd.f32 %v7249_v42, %v7045_v35  ;;  %9772 = vmatmul.msk.f32.gmra.mxu3 %vm272_vm1, %v13957_v22 }
 0x6bf   : > { %9970 = vmatmul.msk.f32.gmra.mxu2 %vm272_vm1, %v9936_v34  ;;  %v9806_v34 = vld [vmem:[%s10337_s23 + $0x1f8] sm:$0xff] }
 0x6c0   : > { %9838 = vmatmul.msk.f32.gmra.mxu0 %vm272_vm1, %v9804_v11  ;;  %v7601_v57 = vadd.f32 %v7527_v27, %v7323_v3 }
 0x6c1   : > { %9904 = vmatmul.msk.f32.gmra.mxu1 %vm272_vm1, %v9870_v48  ;;  %v6693_v30 = vpop.f32.mrf.mxu3 }
 0x6c2   : > { %v7643_v39 = vsel %vm2650_vm2, %v7601_v57, 0.0  ;;  %v7702_v43 = vmul.f32 %v7601_v57, %v7601_v57  ;;  %v6765_v17 = vadd.f32 %v6693_v30, %v14877_v23  ;;  %7974 = vrot.lane.b32.xlu1 %v7601_v57, %s10228_s10  ;;  %v7530_v22 = vpop.f32.mrf.mxu2 }
 0x6c3   : > { %v7644_v28 = vadd.f32 %v7643_v39, %v7642_v52 }
 0x6c4   : > { %v7744_v49 = vsel %vm2650_vm2, %v7702_v43, 0.0  ;;  %v7046_v44 = vadd.f32 %v6974_v4, %v6765_v17  ;;  %v7953_v50 = vpop.permute.xlu2 %7952  ;;  %v9872_v4 = vld [vmem:[%s10337_s23 + $0x1fb] sm:$0xff] }
 0x6c5   : > { %v6977_v6 = vpop.f32.mrf.mxu0  ;;  %v7745_v14 = vadd.f32 %v7744_v49, %v7743_v29  ;;  %v8081_v45 = vsel %vm8080_vm3, %v8048_v12, %v7953_v50 }
 0x6c6   : > { %v7255_v41 = vpop.f32.mrf.mxu1  ;;  %8114 = vst.msk [vmem:[%s14066_s19] sm:$0xff] %vm8113_vm4, %v8081_v45  ;;  %v7324_v61 = vadd.f32 %v7252_v46, %v7046_v44  ;;  %9773 = vmatmul.msk.f32.gmra.mxu3 %vm272_vm1, %v13972_v9  ;;  %v9938_v9 = vld [vmem:[%s10337_s23 + $0x1fe] sm:$0xff]  ;;  %v14882_v45 = vld [vmem:[#allocation45_spill] sm:$0xff] }
 0x6c7   : > { %9971 = vmatmul.msk.f32.gmra.mxu2 %vm272_vm1, %v9937_v21 }
 0x6c8   : > { %9839 = vmatmul.msk.f32.gmra.mxu0 %vm272_vm1, %v9805_v32  ;;  %v7602_v42 = vadd.f32 %v7530_v22, %v7324_v61  ;;  %v9807_v22 = vld [vmem:[%s10337_s23 + $0x200] sm:$0xff]  ;;  %v14102_v32 = vpop.permute.xlu0 %7884 }
 0x6c9   : > { %9905 = vmatmul.msk.f32.gmra.mxu1 %vm272_vm1, %v9871_v59  ;;  %v6696_v8 = vpop.f32.mrf.mxu3 }
 0x6ca   : > { %v7645_v63 = vsel %vm2650_vm2, %v7602_v42, 0.0  ;;  %v7703_v13 = vmul.f32 %v7602_v42, %v7602_v42  ;;  %v6766_v0 = vadd.f32 %v6696_v8, %v14880_v55  ;;  %7976 = vrot.lane.b32.xlu2 %v7602_v42, %s10228_s10  ;;  %v7533_v47 = vpop.f32.mrf.mxu2 }
 0x6cb   : > { %v7646_v38 = vadd.f32 %v7645_v63, %v7644_v28 }
 0x6cc   : > { %v7746_v56 = vsel %vm2650_vm2, %v7703_v13, 0.0  ;;  %v7047_v27 = vadd.f32 %v6977_v6, %v6766_v0 }
 0x6cd   : > { %v6980_v52 = vpop.f32.mrf.mxu0  ;;  %v7747_v24 = vadd.f32 %v7746_v56, %v7745_v14  ;;  %v14881_v14 = vld [vmem:[#allocation64_spill] sm:$0xff] }
 0x6ce   : > { %v7258_v35 = vpop.f32.mrf.mxu1  ;;  %v7325_v11 = vadd.f32 %v7255_v41, %v7047_v27  ;;  %9774 = vmatmul.msk.f32.gmra.mxu3 %vm272_vm1, %v13987_v37  ;;  %v9939_v37 = vld [vmem:[%s10337_s23 + $0x206] sm:$0xff]  ;;  %v8051_v41 = vsel %vm2650_vm2, %v14882_v45, %v14881_v14  ;;  %s8351_s23 = sshll.u32 %s14046_s11, 1 }
 0x6cf   : > { %9972 = vmatmul.msk.f32.gmra.mxu2 %vm272_vm1, %v9938_v9  ;;  %s14327_s21 = scalar_lea.vmem [#allocation4], %s8351_s23  ;;  %s10129_s23 = sshra.s32 %s8216_s8, 4  ;;  %s10130_s23 = int_to_ptr.hbm [resolvable:$true] %s10129_s23 }
 0x6d0   : > { %9840 = vmatmul.msk.f32.gmra.mxu0 %vm272_vm1, %v9806_v34  ;;  %v7603_v29 = vadd.f32 %v7533_v47, %v7325_v11  ;;  %s8213_s15 = sshll.u32 %s14327_s21, 4  ;;  %s10131_s26 = scalar_lea.hbm %s10130_s23, 2  ;;  %s8214_s15 = int_to_ptr.vmem [resolvable:$true] %s8213_s15 }
 0x6d1   : > { %9906 = vmatmul.msk.f32.gmra.mxu1 %vm272_vm1, %v9872_v4  ;;  %v6699_v46 = vpop.f32.mrf.mxu3  ;;  %p10132_p12 = scmp.ne.s32.totalorder %s10130_s23, %s10131_s26  ;;  %p10136_p1 = scmp.lt.s32.totalorder %s10130_s23, %s14427_s3 }
 0x6d2   : > { %v7647_v48 = vsel %vm2650_vm2, %v7603_v29, 0.0  ;;  %v7704_v3 = vmul.f32 %v7603_v29, %v7603_v29  ;;  %v6767_v57 = vadd.f32 %v6699_v46, %v13699_v26  ;;  %7978 = vrot.lane.b32.xlu0 %v7603_v29, %s10228_s10  ;;  %v7536_v30 = vpop.f32.mrf.mxu2  ;;  %p10137_p2 = scmp.lt.s32.totalorder %s10135_s30, %s10131_s26 }
 0x6d3   : > { %v7648_v39 = vadd.f32 %v7647_v48, %v7646_v38  ;;  %p10133_p13 = pnand %p10132_p12, %p10291_p4 }
 0x6d4   : > { %v7748_v43 = vsel %vm2650_vm2, %v7704_v3, 0.0  ;;  %v7048_v23 = vadd.f32 %v6980_v52, %v6767_v57  ;;  %v14114_v52 = vpop.permute.xlu1 %8147  ;;  %p10138_p3 = por %p10137_p2, %p10136_p1 }
 0x6d5   : > { %v6983_v17 = vpop.f32.mrf.mxu0  ;;  %v7749_v28 = vadd.f32 %v7748_v43, %v7747_v24  ;;  %v14883_v24 = vld [vmem:[#allocation67_spill] sm:$0xff]  ;;  %p10134_p0 = pneg %p10133_p13 }
 0x6d6   : > { %v7261_v21 = vpop.f32.mrf.mxu1  ;;  %v7326_v33 = vadd.f32 %v7258_v35, %v7048_v23  ;;  %9775 = vmatmul.msk.f32.gmra.mxu3 %vm272_vm1, %v14002_v10  ;;  %v14884_v35 = vld [vmem:[#allocation17_spill] sm:$0xff] }
 0x6d7   : > { %9973 = vmatmul.msk.f32.gmra.mxu2 %vm272_vm1, %v9939_v37  ;;  %v8049_v4 = vsel %vm2650_vm2, %v14884_v35, %v14883_v24  ;;  %p10139_p5 = pnand %p10138_p3, %p10134_p0 }
 0x6d8   : > { %9841 = vmatmul.msk.f32.gmra.mxu0 %vm272_vm1, %v9807_v22  ;;  %v7604_v26 = vadd.f32 %v7536_v30, %v7326_v33 }
 0x6d9   : > { %9907 = vmatmul.msk.f32.gmra.mxu1 %vm272_vm1, %v9873_v2  ;;  %v6702_v12 = vpop.f32.mrf.mxu3  ;;  %v14886_v2 = vld [vmem:[#allocation18_spill] sm:$0xff] }
 0x6da   : > { %v7649_v49 = vsel %vm2650_vm2, %v7604_v26, 0.0  ;;  %v7705_v44 = vmul.f32 %v7604_v26, %v7604_v26  ;;  %v6768_v50 = vadd.f32 %v6702_v12, %v13711_v7  ;;  %7980 = vrot.lane.b32.xlu1 %v7604_v26, %s10228_s10  ;;  %v7539_v6 = vpop.f32.mrf.mxu2 }
 0x6db   : > { %v7650_v10 = vadd.f32 %v7649_v49, %v7648_v39 }
 0x6dc   : > { %v7750_v59 = vsel %vm2650_vm2, %v7705_v44, 0.0  ;;  %v7049_v61 = vadd.f32 %v6983_v17, %v6768_v50  ;;  %v7959_v42 = vpop.permute.xlu2 %7958 }
 0x6dd   : > { %v6986_v8 = vpop.f32.mrf.mxu0  ;;  %v7751_v63 = vadd.f32 %v7750_v59, %v7749_v28  ;;  %v8084_v13 = vsel %vm8080_vm3, %v8051_v41, %v7959_v42 }
 0x6de   : > { %v7264_v55 = vpop.f32.mrf.mxu1  ;;  %8117 = vst.msk [vmem:[%s14066_s19 + $0x18] sm:$0xff] %vm8113_vm4, %v8084_v13  ;;  %v7327_v7 = vadd.f32 %v7261_v21, %v7049_v61  ;;  %v14885_v21 = vld [vmem:[#allocation60_spill] sm:$0xff] }
 0x6df   : > { %v8050_v33 = vsel %vm2650_vm2, %v14886_v2, %v14885_v21  ;;  %v14888_v13 = vld [vmem:[#allocation20_spill] sm:$0xff] }
 0x6e0   : > { %v7605_v0 = vadd.f32 %v7539_v6, %v7327_v7 }
 0x6e1   : > { %v6705_v47 = vpop.f32.mrf.mxu3 }
 0x6e2   : > { %v7651_v38 = vsel %vm2650_vm2, %v7605_v0, 0.0  ;;  %v7706_v9 = vmul.f32 %v7605_v0, %v7605_v0  ;;  %v6769_v56 = vadd.f32 %v6705_v47, %v13722_v1  ;;  %7982 = vrot.lane.b32.xlu2 %v7605_v0, %s10228_s10  ;;  %v7542_v27 = vpop.f32.mrf.mxu2 }
 0x6e3   : > { %v7652_v34 = vadd.f32 %v7651_v38, %v7650_v10 }
 0x6e4   : > { %v7752_v11 = vsel %vm2650_vm2, %v7706_v9, 0.0  ;;  %v7050_v29 = vadd.f32 %v6986_v8, %v6769_v56  ;;  %v7955_v46 = vpop.permute.xlu0 %7954 }
 0x6e5   : > { %v6989_v48 = vpop.f32.mrf.mxu0  ;;  %v7753_v3 = vadd.f32 %v7752_v11, %v7751_v63  ;;  %v8082_v57 = vsel %vm8080_vm3, %v8049_v4, %v7955_v46  ;;  %v14887_v63 = vld [vmem:[#allocation72_spill] sm:$0xff] }
 0x6e6   : > { %v7267_v30 = vpop.f32.mrf.mxu1  ;;  %8115 = vst.msk [vmem:[%s14066_s19 + $0x8] sm:$0xff] %vm8113_vm4, %v8082_v57  ;;  %v7328_v1 = vadd.f32 %v7264_v55, %v7050_v29  ;;  %v8054_v55 = vsel %vm2650_vm2, %v14888_v13, %v14887_v63 }
 0x6e8   : > { %v7606_v39 = vadd.f32 %v7542_v27, %v7328_v1 }
 0x6e9   : > { %v6708_v37 = vpop.f32.mrf.mxu3 }
 0x6ea   : > { %v7653_v43 = vsel %vm2650_vm2, %v7606_v39, 0.0  ;;  %v7707_v23 = vmul.f32 %v7606_v39, %v7606_v39  ;;  %v6770_v17 = vadd.f32 %v6708_v37, %v13733_v31  ;;  %7984 = vrot.lane.b32.xlu0 %v7606_v39, %s10228_s10  ;;  %v7545_v22 = vpop.f32.mrf.mxu2 }
 0x6eb   : > { %v7654_v28 = vadd.f32 %v7653_v43, %v7652_v34 }
 0x6ec   : > { %v7754_v26 = vsel %vm2650_vm2, %v7707_v23, 0.0  ;;  %v7051_v12 = vadd.f32 %v6989_v48, %v6770_v17  ;;  %v7957_v49 = vpop.permute.xlu1 %7956  ;;  %v14889_v48 = vld [vmem:[#allocation53_spill] sm:$0xff] }
 0x6ed   : > { %v6992_v44 = vpop.f32.mrf.mxu0  ;;  %v7755_v50 = vadd.f32 %v7754_v26, %v7753_v3  ;;  %v8083_v6 = vsel %vm8080_vm3, %v8050_v33, %v7957_v49  ;;  %v14890_v3 = vld [vmem:[#allocation31_spill] sm:$0xff]  ;;  %v14891_v49 = vld [vmem:[#allocation62_spill] sm:$0xff] }
 0x6ee   : > { %v7270_v10 = vpop.f32.mrf.mxu1  ;;  %8116 = vst.msk [vmem:[%s14066_s19 + $0x10] sm:$0xff] %vm8113_vm4, %v8083_v6  ;;  %v7329_v31 = vadd.f32 %v7267_v30, %v7051_v12  ;;  %v8052_v57 = vsel %vm2650_vm2, %v14890_v3, %v14889_v48 }
 0x6f0   : > { %v7607_v14 = vadd.f32 %v7545_v22, %v7329_v31 }
 0x6f1   : > { %v6711_v45 = vpop.f32.mrf.mxu3 }
 0x6f2   : > { %v7655_v41 = vsel %vm2650_vm2, %v7607_v14, 0.0  ;;  %v7708_v59 = vmul.f32 %v7607_v14, %v7607_v14  ;;  %v6771_v61 = vadd.f32 %v6711_v45, %v13744_v20  ;;  %7986 = vrot.lane.b32.xlu1 %v7607_v14, %s10228_s10  ;;  %v7548_v42 = vpop.f32.mrf.mxu2 }
 0x6f3   : > { %v7656_v8 = vadd.f32 %v7655_v41, %v7654_v28 }
 0x6f4   : > { %v7756_v7 = vsel %vm2650_vm2, %v7708_v59, 0.0  ;;  %v7052_v0 = vadd.f32 %v6992_v44, %v6771_v61  ;;  %v7965_v47 = vpop.permute.xlu2 %7964  ;;  %v14892_v44 = vld [vmem:[#allocation28_spill] sm:$0xff] }
 0x6f5   : > { %v6995_v38 = vpop.f32.mrf.mxu0  ;;  %v7757_v9 = vadd.f32 %v7756_v7, %v7755_v50  ;;  %v8087_v56 = vsel %vm8080_vm3, %v8054_v55, %v7965_v47  ;;  %v8053_v50 = vsel %vm2650_vm2, %v14892_v44, %v14891_v49  ;;  %v14894_v47 = vld [vmem:[#allocation37_spill] sm:$0xff] }
 0x6f6   : > { %v7273_v27 = vpop.f32.mrf.mxu1  ;;  %8120 = vst.msk [vmem:[%s14066_s19 + $0x30] sm:$0xff] %vm8113_vm4, %v8087_v56  ;;  %v7330_v20 = vadd.f32 %v7270_v10, %v7052_v0  ;;  %v14893_v0 = vld [vmem:[#allocation12_spill] sm:$0xff] }
 0x6f8   : > { %v7608_v34 = vadd.f32 %v7548_v42, %v7330_v20 }
 0x6f9   : > { %v6714_v24 = vpop.f32.mrf.mxu3 }
 0x6fa   : > { %v7657_v35 = vsel %vm2650_vm2, %v7608_v34, 0.0  ;;  %v7709_v4 = vmul.f32 %v7608_v34, %v7608_v34  ;;  %v6772_v11 = vadd.f32 %v6714_v24, %v13755_v16  ;;  %7988 = vrot.lane.b32.xlu2 %v7608_v34, %s10228_s10  ;;  %v7551_v29 = vpop.f32.mrf.mxu2 }
 0x6fb   : > { %v7658_v46 = vadd.f32 %v7657_v35, %v7656_v8 }
 0x6fc   : > { %v7758_v30 = vsel %vm2650_vm2, %v7709_v4, 0.0  ;;  %v7053_v1 = vadd.f32 %v6995_v38, %v6772_v11  ;;  %v7961_v39 = vpop.permute.xlu0 %7960  ;;  %v8057_v38 = vsel %vm2650_vm2, %v14894_v47, %v14893_v0  ;;  %v14899_v47 = vld [vmem:[#allocation74_spill] sm:$0xff] }
 0x6fd   : > { %v6998_v37 = vpop.f32.mrf.mxu0  ;;  %v7759_v43 = vadd.f32 %v7758_v30, %v7757_v9  ;;  %v8085_v23 = vsel %vm8080_vm3, %v8052_v57, %v7961_v39  ;;  %v14895_v30 = vld [vmem:[#allocation61_spill] sm:$0xff] }
 0x6fe   : > { %v7276_v17 = vpop.f32.mrf.mxu1  ;;  %8118 = vst.msk [vmem:[%s14066_s19 + $0x20] sm:$0xff] %vm8113_vm4, %v8085_v23  ;;  %v7331_v16 = vadd.f32 %v7273_v27, %v7053_v1  ;;  %v14896_v1 = vld [vmem:[#allocation23_spill] sm:$0xff] }
 0x6ff   : > { %v8055_v39 = vsel %vm2650_vm2, %v14896_v1, %v14895_v30  ;;  %v14901_v30 = vld [vmem:[#allocation16_spill] sm:$0xff]  ;;  %v14902_v1 = vld [vmem:[#allocation34_spill] sm:$0xff] }
 0x700   : > { %v7609_v22 = vadd.f32 %v7551_v29, %v7331_v16 }
 0x701   : > { %v6717_v28 = vpop.f32.mrf.mxu3 }
 0x702   : > { %v7659_v21 = vsel %vm2650_vm2, %v7609_v22, 0.0  ;;  %v7710_v2 = vmul.f32 %v7609_v22, %v7609_v22  ;;  %v6773_v33 = vadd.f32 %v6717_v28, %v13766_v51  ;;  %7990 = vrot.lane.b32.xlu0 %v7609_v22, %s10228_s10  ;;  %v7554_v26 = vpop.f32.mrf.mxu2 }
 0x703   : > { %v7660_v12 = vadd.f32 %v7659_v21, %v7658_v46 }
 0x704   : > { %v7760_v6 = vsel %vm2650_vm2, %v7710_v2, 0.0  ;;  %v7054_v10 = vadd.f32 %v6998_v37, %v6773_v33  ;;  %v7963_v31 = vpop.permute.xlu1 %7962 }
 0x705   : > { %v7001_v14 = vpop.f32.mrf.mxu0  ;;  %v7761_v45 = vadd.f32 %v7760_v6, %v7759_v43  ;;  %v8086_v41 = vsel %vm8080_vm3, %v8053_v50, %v7963_v31  ;;  %v14897_v50 = vld [vmem:[#allocation70_spill] sm:$0xff]  ;;  %v14898_v6 = vld [vmem:[#allocation24_spill] sm:$0xff] }
 0x706   : > { %v7279_v59 = vpop.f32.mrf.mxu1  ;;  %8119 = vst.msk [vmem:[%s14066_s19 + $0x28] sm:$0xff] %vm8113_vm4, %v8086_v41  ;;  %v7332_v51 = vadd.f32 %v7276_v17, %v7054_v10  ;;  %v8056_v10 = vsel %vm2650_vm2, %v14898_v6, %v14897_v50  ;;  %v14904_v50 = vld [vmem:[#allocation26_spill] sm:$0xff] }
 0x708   : > { %v7610_v61 = vadd.f32 %v7554_v26, %v7332_v51 }
 0x709   : > { %v6720_v42 = vpop.f32.mrf.mxu3 }
 0x70a   : > { %v7661_v8 = vsel %vm2650_vm2, %v7610_v61, 0.0  ;;  %v7711_v63 = vmul.f32 %v7610_v61, %v7610_v61  ;;  %v6774_v13 = vadd.f32 %v6720_v42, %v13777_v25  ;;  %7992 = vrot.lane.b32.xlu1 %v7610_v61, %s10228_s10  ;;  %v7557_v55 = vpop.f32.mrf.mxu2 }
 0x70b   : > { %v7662_v7 = vadd.f32 %v7661_v8, %v7660_v12 }
 0x70c   : > { %v7762_v9 = vsel %vm2650_vm2, %v7711_v63, 0.0  ;;  %v7055_v56 = vadd.f32 %v7001_v14, %v6774_v13  ;;  %v7971_v27 = vpop.permute.xlu2 %7970 }
 0x70d   : > { %v7004_v20 = vpop.f32.mrf.mxu0  ;;  %v7763_v34 = vadd.f32 %v7762_v9, %v7761_v45  ;;  %v8090_v24 = vsel %vm8080_vm3, %v8057_v38, %v7971_v27  ;;  %v14900_v38 = vld [vmem:[#allocation30_spill] sm:$0xff] }
 0x70e   : > { %v7282_v35 = vpop.f32.mrf.mxu1  ;;  %8123 = vst.msk [vmem:[%s14066_s19 + $0x48] sm:$0xff] %vm8113_vm4, %v8090_v24  ;;  %v7333_v25 = vadd.f32 %v7279_v59, %v7055_v56  ;;  %v8060_v9 = vsel %vm2650_vm2, %v14900_v38, %v14899_v47 }
 0x710   : > { %v7611_v4 = vadd.f32 %v7557_v55, %v7333_v25 }
 0x711   : > { %v6723_v11 = vpop.f32.mrf.mxu3 }
 0x712   : > { %v7663_v29 = vsel %vm2650_vm2, %v7611_v4, 0.0  ;;  %v7712_v46 = vmul.f32 %v7611_v4, %v7611_v4  ;;  %v6775_v48 = vadd.f32 %v6723_v11, %v13788_v36  ;;  %7994 = vrot.lane.b32.xlu0 %v7611_v4, %s10228_s10  ;;  %v7560_v3 = vpop.f32.mrf.mxu2 }
 0x713   : > { %v7664_v57 = vadd.f32 %v7663_v29, %v7662_v7 }
 0x714   : > { %v7764_v37 = vsel %vm2650_vm2, %v7712_v46, 0.0  ;;  %v7056_v43 = vadd.f32 %v7004_v20, %v6775_v48  ;;  %v7967_v23 = vpop.permute.xlu0 %7966 }
 0x715   : > { %v7007_v17 = vpop.f32.mrf.mxu0  ;;  %v7765_v16 = vadd.f32 %v7764_v37, %v7763_v34  ;;  %v8088_v22 = vsel %vm8080_vm3, %v8055_v39, %v7967_v23  ;;  %v8058_v39 = vsel %vm2650_vm2, %v14902_v1, %v14901_v30 }
 0x716   : > { %v7285_v28 = vpop.f32.mrf.mxu1  ;;  %8121 = vst.msk [vmem:[%s14066_s19 + $0x38] sm:$0xff] %vm8113_vm4, %v8088_v22  ;;  %v7334_v36 = vadd.f32 %v7282_v35, %v7056_v43 }
 0x718   : > { %v7612_v21 = vadd.f32 %v7560_v3, %v7334_v36 }
 0x719   : > { %v6726_v2 = vpop.f32.mrf.mxu3 }
 0x71a   : > { %v7665_v33 = vsel %vm2650_vm2, %v7612_v21, 0.0  ;;  %v7713_v26 = vmul.f32 %v7612_v21, %v7612_v21  ;;  %v6776_v12 = vadd.f32 %v6726_v2, %v13799_v58  ;;  %7996 = vrot.lane.b32.xlu1 %v7612_v21, %s10228_s10  ;;  %v7563_v49 = vpop.f32.mrf.mxu2 }
 0x71b   : > { %v7666_v44 = vadd.f32 %v7665_v33, %v7664_v57 }
 0x71c   : > { %v7766_v31 = vsel %vm2650_vm2, %v7713_v26, 0.0  ;;  %v7057_v14 = vadd.f32 %v7007_v17, %v6776_v12  ;;  %v7969_v45 = vpop.permute.xlu1 %7968 }
 0x71d   : > { %v7010_v41 = vpop.f32.mrf.mxu0  ;;  %v7767_v59 = vadd.f32 %v7766_v31, %v7765_v16  ;;  %v8089_v51 = vsel %vm8080_vm3, %v8056_v10, %v7969_v45 }
 0x71e   : > { %v7288_v61 = vpop.f32.mrf.mxu1  ;;  %8122 = vst.msk [vmem:[%s14066_s19 + $0x40] sm:$0xff] %vm8113_vm4, %v8089_v51  ;;  %v7335_v58 = vadd.f32 %v7285_v28, %v7057_v14 }
 0x720   : > { %v7613_v42 = vadd.f32 %v7563_v49, %v7335_v58 }
 0x721   : > { %v6729_v8 = vpop.f32.mrf.mxu3 }
 0x722   : > { %v7667_v63 = vsel %vm2650_vm2, %v7613_v42, 0.0  ;;  %v7714_v13 = vmul.f32 %v7613_v42, %v7613_v42  ;;  %v6777_v55 = vadd.f32 %v6729_v8, %v13810_v5  ;;  %7998 = vrot.lane.b32.xlu2 %v7613_v42, %s10228_s10  ;;  %v7566_v7 = vpop.f32.mrf.mxu2 }
 0x723   : > { %v7668_v0 = vadd.f32 %v7667_v63, %v7666_v44  ;;  %v14903_v44 = vld [vmem:[#allocation13_spill] sm:$0xff] }
 0x724   : > { %v7768_v56 = vsel %vm2650_vm2, %v7714_v13, 0.0  ;;  %v7058_v27 = vadd.f32 %v7010_v41, %v6777_v55  ;;  %v7977_v20 = vpop.permute.xlu2 %7976  ;;  %v8059_v6 = vsel %vm2650_vm2, %v14904_v50, %v14903_v44 }
 0x725   : > { %v7013_v34 = vpop.f32.mrf.mxu0  ;;  %v7769_v24 = vadd.f32 %v7768_v56, %v7767_v59  ;;  %v8093_v35 = vsel %vm8080_vm3, %v8060_v9, %v7977_v20 }
 0x726   : > { %v7291_v25 = vpop.f32.mrf.mxu1  ;;  %8126 = vst.msk [vmem:[%s14066_s19 + $0x60] sm:$0xff] %vm8113_vm4, %v8093_v35  ;;  %v7336_v5 = vadd.f32 %v7288_v61, %v7058_v27 }
 0x728   : > { %v7614_v4 = vadd.f32 %v7566_v7, %v7336_v5  ;;  %v14905_v7 = vld [vmem:[#allocation22_spill] sm:$0xff] }
 0x729   : > { %v6732_v11 = vpop.f32.mrf.mxu3 }
 0x72a   : > { %v7669_v29 = vsel %vm2650_vm2, %v7614_v4, 0.0  ;;  %v7715_v46 = vmul.f32 %v7614_v4, %v7614_v4  ;;  %v6778_v48 = vadd.f32 %v6732_v11, %v13821_v62  ;;  %8000 = vrot.lane.b32.xlu0 %v7614_v4, %s10228_s10  ;;  %v7569_v3 = vpop.f32.mrf.mxu2 }
 0x72b   : > { %v7670_v57 = vadd.f32 %v7669_v29, %v7668_v0  ;;  %v14906_v0 = vld [vmem:[#allocation8_spill] sm:$0xff] }
 0x72c   : > { %v7770_v37 = vsel %vm2650_vm2, %v7715_v46, 0.0  ;;  %v7059_v43 = vadd.f32 %v7013_v34, %v6778_v48  ;;  %v7973_v23 = vpop.permute.xlu0 %7972  ;;  %v8063_v47 = vsel %vm2650_vm2, %v14906_v0, %v14905_v7  ;;  %v14907_v48 = vld [vmem:[#allocation29_spill] sm:$0xff] }
 0x72d   : > { %v7016_v17 = vpop.f32.mrf.mxu0  ;;  %v7771_v16 = vadd.f32 %v7770_v37, %v7769_v24  ;;  %v8091_v22 = vsel %vm8080_vm3, %v8058_v39, %v7973_v23 }
 0x72e   : > { %v7294_v28 = vpop.f32.mrf.mxu1  ;;  %8124 = vst.msk [vmem:[%s14066_s19 + $0x50] sm:$0xff] %vm8113_vm4, %v8091_v22  ;;  %v7337_v62 = vadd.f32 %v7291_v25, %v7059_v43 }
 0x730   : > { %v7615_v36 = vadd.f32 %v7569_v3, %v7337_v62  ;;  %v14908_v3 = vld [vmem:[#allocation41_spill] sm:$0xff] }
 0x731   : > { %v6735_v21 = vpop.f32.mrf.mxu3 }
 0x732   : > { %v7671_v2 = vsel %vm2650_vm2, %v7615_v36, 0.0  ;;  %v7716_v33 = vmul.f32 %v7615_v36, %v7615_v36  ;;  %v6779_v26 = vadd.f32 %v6735_v21, %v13832_v18  ;;  %8002 = vrot.lane.b32.xlu1 %v7615_v36, %s10228_s10  ;;  %v7572_v12 = vpop.f32.mrf.mxu2 }
 0x733   : > { %v7672_v49 = vadd.f32 %v7671_v2, %v7670_v57  ;;  %v8061_v57 = vsel %vm2650_vm2, %v14908_v3, %v14907_v48 }
 0x734   : > { %v7772_v10 = vsel %vm2650_vm2, %v7716_v33, 0.0  ;;  %v7060_v31 = vadd.f32 %v7016_v17, %v6779_v26  ;;  %v7975_v14 = vpop.permute.xlu1 %7974  ;;  %v14909_v33 = vld [vmem:[#allocation38_spill] sm:$0xff]  ;;  %v14910_v26 = vld [vmem:[#allocation35_spill] sm:$0xff] }
 0x735   : > { %v7019_v45 = vpop.f32.mrf.mxu0  ;;  %v7773_v41 = vadd.f32 %v7772_v10, %v7771_v16  ;;  %v8092_v59 = vsel %vm8080_vm3, %v8059_v6, %v7975_v14 }
 0x736   : > { %v7297_v51 = vpop.f32.mrf.mxu1  ;;  %8125 = vst.msk [vmem:[%s14066_s19 + $0x58] sm:$0xff] %vm8113_vm4, %v8092_v59  ;;  %v7338_v18 = vadd.f32 %v7294_v28, %v7060_v31 }
 0x738   : > { %v7616_v61 = vadd.f32 %v7572_v12, %v7338_v18  ;;  %v8062_v12 = vsel %vm2650_vm2, %v14910_v26, %v14909_v33 }
 0x739   : > { %v6738_v58 = vpop.f32.mrf.mxu3 }
 0x73a   : > { %v7673_v42 = vsel %vm2650_vm2, %v7616_v61, 0.0  ;;  %v7717_v8 = vmul.f32 %v7616_v61, %v7616_v61  ;;  %v6780_v63 = vadd.f32 %v6738_v58, %v13843_v60  ;;  %8004 = vrot.lane.b32.xlu2 %v7616_v61, %s10228_s10  ;;  %v7575_v13 = vpop.f32.mrf.mxu2 }
 0x73b   : > { %v7674_v55 = vadd.f32 %v7673_v42, %v7672_v49  ;;  %v14911_v42 = vld [vmem:[#allocation78_spill] sm:$0xff] }
 0x73c   : > { %v7774_v38 = vsel %vm2650_vm2, %v7717_v8, 0.0  ;;  %v7061_v9 = vadd.f32 %v7019_v45, %v6780_v63  ;;  %v7983_v56 = vpop.permute.xlu2 %7982  ;;  %v14912_v8 = vld [vmem:[#allocation43_spill] sm:$0xff] }
 0x73d   : > { %v7022_v27 = vpop.f32.mrf.mxu0  ;;  %v7775_v20 = vadd.f32 %v7774_v38, %v7773_v41  ;;  %v8096_v34 = vsel %vm8080_vm3, %v8063_v47, %v7983_v56  ;;  %v8066_v63 = vsel %vm2650_vm2, %v14912_v8, %v14911_v42 }
 0x73e   : > { %v7300_v24 = vpop.f32.mrf.mxu1  ;;  %8129 = vst.msk [vmem:[%s14066_s19 + $0x78] sm:$0xff] %vm8113_vm4, %v8096_v34  ;;  %v7339_v60 = vadd.f32 %v7297_v51, %v7061_v9 }
 0x740   : > { %v7617_v35 = vadd.f32 %v7575_v13, %v7339_v60 }
 0x741   : > { %v6741_v25 = vpop.f32.mrf.mxu3 }
 0x742   : > { %v7675_v5 = vsel %vm2650_vm2, %v7617_v35, 0.0  ;;  %v7718_v4 = vmul.f32 %v7617_v35, %v7617_v35  ;;  %v6781_v11 = vadd.f32 %v6741_v25, %v13854_v53  ;;  %8006 = vrot.lane.b32.xlu0 %v7617_v35, %s10228_s10  ;;  %v7578_v29 = vpop.f32.mrf.mxu2  ;;  %v14913_v35 = vld [vmem:[#allocation77_spill] sm:$0xff]  ;;  %v14914_v25 = vld [vmem:[#allocation48_spill] sm:$0xff] }
 0x743   : > { %v7676_v46 = vadd.f32 %v7675_v5, %v7674_v55  ;;  %v8064_v5 = vsel %vm2650_vm2, %v14914_v25, %v14913_v35  ;;  %v14927_v35 = vld [vmem:[#allocation11_spill] sm:$0xff] }
 0x744   : > { %v7776_v30 = vsel %vm2650_vm2, %v7718_v4, 0.0  ;;  %v7062_v1 = vadd.f32 %v7022_v27, %v6781_v11  ;;  %v7979_v39 = vpop.permute.xlu0 %7978 }
 0x745   : > { %v7777_v37 = vadd.f32 %v7776_v30, %v7775_v20  ;;  %v8094_v43 = vsel %vm8080_vm3, %v8061_v57, %v7979_v39  ;;  %v7025_v23 = vpop.f32.mrf.mxu0 }
 0x746   : > { %8127 = vst.msk [vmem:[%s14066_s19 + $0x68] sm:$0xff] %vm8113_vm4, %v8094_v43  ;;  %v7340_v17 = vadd.f32 %v7300_v24, %v7062_v1  ;;  %v7303_v53 = vpop.f32.mrf.mxu1  ;;  %v14916_v43 = vld [vmem:[#allocation42_spill] sm:$0xff] }
 0x748   : > { %v7618_v16 = vadd.f32 %v7578_v29, %v7340_v17 }
 0x749   : > { %v6744_v22 = vpop.f32.mrf.mxu3 }
 0x74a   : > { %v7677_v28 = vsel %vm2650_vm2, %v7618_v16, 0.0  ;;  %v7719_v62 = vmul.f32 %v7618_v16, %v7618_v16  ;;  %v6782_v36 = vadd.f32 %v6744_v22, %v13865_v54  ;;  %8008 = vrot.lane.b32.xlu1 %v7618_v16, %s10228_s10  ;;  %v7581_v21 = vpop.f32.mrf.mxu2 }
 0x74b   : > { %v7678_v2 = vadd.f32 %v7677_v28, %v7676_v46 }
 0x74c   : > { %v7778_v49 = vsel %vm2650_vm2, %v7719_v62, 0.0  ;;  %v7063_v44 = vadd.f32 %v7025_v23, %v6782_v36  ;;  %v7981_v50 = vpop.permute.xlu1 %7980 }
 0x74d   : > { %v7779_v6 = vadd.f32 %v7778_v49, %v7777_v37  ;;  %v8095_v10 = vsel %vm8080_vm3, %v8062_v12, %v7981_v50  ;;  %v7028_v54 = vpop.f32.mrf.mxu0  ;;  %v14915_v37 = vld [vmem:[#allocation25_spill] sm:$0xff] }
 0x74e   : > { %8128 = vst.msk [vmem:[%s14066_s19 + $0x70] sm:$0xff] %vm8113_vm4, %v8095_v10  ;;  %v7341_v31 = vadd.f32 %v7303_v53, %v7063_v44  ;;  %v7306_v41 = vpop.f32.mrf.mxu1  ;;  %v8065_v23 = vsel %vm2650_vm2, %v14916_v43, %v14915_v37  ;;  %v14917_v10 = vld [vmem:[#allocation82_spill] sm:$0xff] }
 0x750   : > { %v7619_v14 = vadd.f32 %v7581_v21, %v7341_v31  ;;  %v14918_v31 = vld [vmem:[#allocation9_spill] sm:$0xff] }
 0x751   : > { %v6747_v45 = vpop.f32.mrf.mxu3 }
 0x752   : > { %v7679_v59 = vsel %vm2650_vm2, %v7619_v14, 0.0  ;;  %v7720_v51 = vmul.f32 %v7619_v14, %v7619_v14  ;;  %v6783_v18 = vadd.f32 %v6747_v45, %v13876_v40  ;;  %v7584_v58 = vpop.f32.mrf.mxu2 }
 0x753   : > { %v7680_v61 = vadd.f32 %v7679_v59, %v7678_v2  ;;  %v14919_v59 = vld [vmem:[#allocation80_spill] sm:$0xff] }
 0x754   : > { %v7780_v13 = vsel %vm2650_vm2, %v7720_v51, 0.0  ;;  %v7064_v55 = vadd.f32 %v7028_v54, %v6783_v18  ;;  %v7989_v7 = vpop.permute.xlu2 %7988  ;;  %v8067_v54 = vsel %vm2650_vm2, %v14918_v31, %v14917_v10  ;;  %v14920_v51 = vld [vmem:[#allocation54_spill] sm:$0xff] }
 0x755   : > { %v7781_v0 = vadd.f32 %v7780_v13, %v7779_v6  ;;  %v8099_v47 = vsel %vm8080_vm3, %v8066_v63, %v7989_v7  ;;  %v7031_v40 = vpop.f32.mrf.mxu0  ;;  %v8068_v18 = vsel %vm2650_vm2, %v14920_v51, %v14919_v59  ;;  %v14923_v7 = vld [vmem:[#allocation46_spill] sm:$0xff] }
 0x756   : > { %8132 = vst.msk [vmem:[%s14066_s19 + $0x90] sm:$0xff] %vm8113_vm4, %v8099_v47  ;;  %v7342_v38 = vadd.f32 %v7306_v41, %v7064_v55  ;;  %v7309_v60 = vpop.f32.mrf.mxu1 }
 0x758   : > { %v7620_v9 = vadd.f32 %v7584_v58, %v7342_v38  ;;  %v14922_v58 = vld [vmem:[#allocation50_spill] sm:$0xff]  ;;  %v14924_v38 = vld [vmem:[#allocation49_spill] sm:$0xff] }
 0x759   : > { %v6750_v56 = vpop.f32.mrf.mxu3 }
 0x75a   : > { %v7681_v27 = vsel %vm2650_vm2, %v7620_v9, 0.0  ;;  %v7721_v20 = vmul.f32 %v7620_v9, %v7620_v9  ;;  %v6784_v34 = vadd.f32 %v6750_v56, %v13887_v19  ;;  %v7587_v3 = vpop.f32.mrf.mxu2 }
 0x75b   : > { %v7682_v24 = vadd.f32 %v7681_v27, %v7680_v61  ;;  %v14921_v61 = vld [vmem:[#allocation84_spill] sm:$0xff] }
 0x75c   : > { %v7782_v4 = vsel %vm2650_vm2, %v7721_v20, 0.0  ;;  %v7065_v11 = vadd.f32 %v7031_v40, %v6784_v34  ;;  %v7985_v29 = vpop.permute.xlu0 %7984  ;;  %v8071_v42 = vsel %vm2650_vm2, %v14922_v58, %v14921_v61  ;;  %v14925_v40 = vld [vmem:[#allocation52_spill] sm:$0xff]  ;;  %v14926_v34 = vld [vmem:[#allocation10_spill] sm:$0xff] }
 0x75d   : > { %v7783_v46 = vadd.f32 %v7782_v4, %v7781_v0  ;;  %v8097_v48 = vsel %vm8080_vm3, %v8064_v5, %v7985_v29  ;;  %v14928_v4 = vld [vmem:[#allocation55_spill] sm:$0xff]  ;;  %v10229_v29 = vmov 0.0  }
 0x75e   : > { %8130 = vst.msk [vmem:[%s14066_s19 + $0x80] sm:$0xff] %vm8113_vm4, %v8097_v48  ;;  %v7343_v57 = vadd.f32 %v7309_v60, %v7065_v11  ;;  %v14929_v48 = vld [vmem:[#allocation15_spill] sm:$0xff] }
 0x75f   : > { %200 = vst.msk [vmem:[%s14327_s21] sm:$0x3] %vm199_vm5, %v10229_v29 }
 0x760   : > { %v7621_v30 = vadd.f32 %v7587_v3, %v7343_v57 }
 0x762   : > { %v7683_v19 = vsel %vm2650_vm2, %v7621_v30, 0.0  ;;  %v7722_v1 = vmul.f32 %v7621_v30, %v7621_v30  ;;  %8014 = vrot.lane.b32.xlu1 %v7621_v30, %s10228_s10  ;;  %v14930_v30 = vld [vmem:[#allocation47_spill] sm:$0xff] }
 0x763   : > { %v7684_v39 = vadd.f32 %v7683_v19, %v7682_v24  ;;  %v2815_v19 = vrot.slane %v14930_v30, 4 }
 0x764   : > { %v7784_v17 = vsel %vm2650_vm2, %v7722_v1, 0.0  ;;  %v7987_v53 = vpop.permute.xlu1 %7986  ;;  %v14931_v1 = vld [vmem:[#allocation40_spill] sm:$0xff] }
 0x765   : > { %v7685_v16 = vrot.slane %v7684_v39, 4  ;;  %v7785_v22 = vadd.f32 %v7784_v17, %v7783_v46  ;;  %v8098_v28 = vsel %vm8080_vm3, %v8065_v23, %v7987_v53  ;;  %v2816_v37 = vadd.f32 %v2815_v19, %v14930_v30  ;;  %v14932_v23 = vld [vmem:[#allocation58_spill] sm:$0xff] }
 0x766   : > { %8131 = vst.msk [vmem:[%s14066_s19 + $0x88] sm:$0xff] %vm8113_vm4, %v8098_v28 }
 0x767   : > { %v7686_v62 = vadd.f32 %v7685_v16, %v7684_v39  ;;  %v7786_v36 = vrot.slane %v7785_v22, 4  ;;  %v2714_v39 = vrot.slane %v14931_v1, 4 }
 0x769   : > { %v7687_v21 = vrot.slane %v7686_v62, 2  ;;  %v7787_v2 = vadd.f32 %v7786_v36, %v7785_v22  ;;  %v2715_v16 = vadd.f32 %v2714_v39, %v14931_v1  ;;  %v14933_v22 = vld [vmem:[#allocation33_spill] sm:$0xff] }
 0x76b   : > { %v7688_v33 = vadd.f32 %v7687_v21, %v7686_v62  ;;  %v7788_v26 = vrot.slane %v7787_v2, 2  ;;  %v2817_v62 = vrot.slane %v2816_v37, 2  ;;  %v2716_v36 = vrot.slane %v2715_v16, 2 }
 0x76d   : > { %v7689_v12 = vrot.slane %v7688_v33, 1  ;;  %v7789_v49 = vadd.f32 %v7788_v26, %v7787_v2  ;;  %v2818_v21 = vadd.f32 %v2817_v62, %v2816_v37  ;;  %v2717_v2 = vadd.f32 %v2716_v36, %v2715_v16 }
 0x76f   : > { %v7690_v44 = vadd.f32 %v7689_v12, %v7688_v33  ;;  %v7790_v50 = vrot.slane %v7789_v49, 1  ;;  %v2819_v33 = vrot.slane %v2818_v21, 1  ;;  %v2718_v26 = vrot.slane %v2717_v2, 1 }
 0x771   : > { %8151 = vrot.lane.b32.xlu2 %v7690_v44, %s10228_s10  ;;  %v7791_v6 = vadd.f32 %v7790_v50, %v7789_v49  ;;  %v2820_v12 = vadd.f32 %v2819_v33, %v2818_v21  ;;  %v2719_v44 = vadd.f32 %v2718_v26, %v2717_v2 }
 0x773   : > { %8161 = vrot.lane.b32.xlu0 %v7791_v6, %s10228_s10  ;;  %v8164_v49 = vsel %vm2650_vm2, %v2820_v12, %v14041_v15  ;;  %v8154_v10 = vsel %vm2650_vm2, %v2719_v44, %v14114_v52  ;;  %v14934_v52 = vld [vmem:[#allocation21_spill] sm:$0xff] }
 0x774   : > { %v7991_v45 = vpop.permute.xlu0 %7990  ;;  %v8078_v59 = vsel %vm2650_vm2, %v14934_v52, %v14102_v32 }
 0x775   : > { %v8100_v41 = vsel %vm8080_vm3, %v8067_v54, %v7991_v45  ;;  %v8171_v54 = vld [vmem:[%s14327_s21] sm:$0x3] }
 0x776   : > { %8133 = vst.msk [vmem:[%s14066_s19 + $0x98] sm:$0xff] %vm8113_vm4, %v8100_v41 }
 0x779   : > { %8010 = vrot.lane.b32.xlu2 %v7619_v14, %s10228_s10 }
 0x77b   : > { %8012 = vrot.lane.b32.xlu0 %v7620_v9, %s10228_s10  ;;  %s8198_s10 = sshll.u32 %s8195_s7, 4  ;;  %s14368_s10 = int_to_ptr.hbm [resolvable:$true] %s8198_s10 }
 0x77c   : > { %v7999_v8 = vpop.permute.xlu2 %7998  ;;  %v7993_v63 = vpop.permute.xlu1 %7992 }
 0x77d   : > { %v8104_v13 = vsel %vm8080_vm3, %v8071_v42, %v7999_v8  ;;  %v8101_v55 = vsel %vm8080_vm3, %v8068_v18, %v7993_v63 }
 0x77e   : > { %8137 = vst.msk [vmem:[%s14066_s19 + $0xb8] sm:$0xff] %vm8113_vm4, %v8104_v13 }
 0x77f   : > { %8134 = vst.msk [vmem:[%s14066_s19 + $0xa0] sm:$0xff] %vm8113_vm4, %v8101_v55 }
 0x784   : > { %v7995_v14 = vpop.permute.xlu0 %7994 }
 0x785   : > { %v8102_v0 = vsel %vm8080_vm3, %v14923_v7, %v7995_v14 }
 0x786   : > { %8135 = vst.msk [vmem:[%s14066_s19 + $0xa8] sm:$0xff] %vm8113_vm4, %v8102_v0 }
 0x78c   : > { %v7997_v47 = vpop.permute.xlu1 %7996 }
 0x78d   : > { %v8103_v9 = vsel %vm8080_vm3, %v14924_v38, %v7997_v47 }
 0x78e   : > { %8136 = vst.msk [vmem:[%s14066_s19 + $0xb0] sm:$0xff] %vm8113_vm4, %v8103_v9 }
 0x794   : > { %v8005_v56 = vpop.permute.xlu2 %8004 }
 0x795   : > { %v8107_v27 = vsel %vm8080_vm3, %v14925_v40, %v8005_v56 }
 0x796   : > { %8140 = vst.msk [vmem:[%s14066_s19 + $0xd0] sm:$0xff] %vm8113_vm4, %v8107_v27 }
 0x79c   : > { %v8001_v20 = vpop.permute.xlu0 %8000 }
 0x79d   : > { %v8105_v24 = vsel %vm8080_vm3, %v14926_v34, %v8001_v20 }
 0x79e   : > { %8138 = vst.msk [vmem:[%s14066_s19 + $0xc0] sm:$0xff] %vm8113_vm4, %v8105_v24 }
 0x7a4   : > { %v8003_v60 = vpop.permute.xlu1 %8002 }
 0x7a5   : > { %v8106_v25 = vsel %vm8080_vm3, %v14927_v35, %v8003_v60 }
 0x7a6   : > { %8139 = vst.msk [vmem:[%s14066_s19 + $0xc8] sm:$0xff] %vm8113_vm4, %v8106_v25 }
 0x7b4   : > { %v8007_v5 = vpop.permute.xlu0 %8006 }
 0x7b5   : > { %v8108_v11 = vsel %vm8080_vm3, %v14928_v4, %v8007_v5 }
 0x7b6   : > { %8141 = vst.msk [vmem:[%s14066_s19 + $0xd8] sm:$0xff] %vm8113_vm4, %v8108_v11 }
 0x7bc   : > { %v8009_v46 = vpop.permute.xlu1 %8008 }
 0x7bd   : > { %v8109_v3 = vsel %vm8080_vm3, %v14929_v48, %v8009_v46 }
 0x7be   : > { %8142 = vst.msk [vmem:[%s14066_s19 + $0xe0] sm:$0xff] %vm8113_vm4, %v8109_v3 }
 0x7cb   : > { %v8152_v57 = vpop.permute.xlu2 %8151 }
 0x7cc   : > { %v8155_v15 = vsel %vm8080_vm3, %v8154_v10, %v8152_v57 }
 0x7d3   : > { %v8011_v43 = vpop.permute.xlu2 %8010 }
 0x7d4   : > { %v8110_v17 = vsel %vm8080_vm3, %v14932_v23, %v8011_v43  ;;  %v8015_v53 = vpop.permute.xlu1 %8014 }
 0x7d5   : > { %8143 = vst.msk [vmem:[%s14066_s19 + $0xe8] sm:$0xff] %vm8113_vm4, %v8110_v17  ;;  %v8112_v28 = vsel %vm8080_vm3, %v14933_v22, %v8015_v53 }
 0x7d6   : > { %8145 = vst.msk [vmem:[%s14066_s19 + $0xf8] sm:$0xff] %vm8113_vm4, %v8112_v28 }
 0x7e5   : > { %v8162_v50 = vpop.permute.xlu0 %8161 }
 0x7e6   : > { %v8165_v6 = vsel %vm8080_vm3, %v8164_v49, %v8162_v50 }
 0x7e7   : > { %v8167_v31 = vrot.slane %v8165_v6, 7 }
 0x7e9   : > { %v8170_v45 = vsel %vm8169_vm6, %v8155_v15, %v8167_v31 }
 0x7ea   : > { %v8172_v41 = vadd.f32 %v8171_v54, %v8170_v45 }
 0x7ec   : > { %8174 = vst.msk [vmem:[%s14327_s21] sm:$0x3] %vm199_vm5, %v8172_v41 }
 0x7ed   : > { %v8013_v51 = vpop.permute.xlu0 %8012 }
 0x7ee   : > { %10142 = shalt.err (!%p10139_p5)
}
 0x7ef   : > { %9987 = dma.vmem_to_hbm [thread:$0]  (%p10291_p4), %s8214_s15, 32, %s8216_s8, %s8181_s18   ;;  %v8111_v32 = vsel %vm8080_vm3, %v8078_v59, %v8013_v51 }
 0x7f0   : > { %8144 = vst.msk [vmem:[%s14066_s19 + $0xf0] sm:$0xff] %vm8113_vm4, %v8111_v32  ;;  %s8176_s5 = scalar_lea.sflag [#allocation3], %s14046_s11  ;;  %s10157_s6 = sshra.s32 %s14368_s10, 4  ;;  %s10158_s6 = int_to_ptr.hbm [resolvable:$true] %s10157_s6 }
 0x7f1   : > { %s10159_s7 = scalar_lea.hbm %s10158_s6, 256  ;;  %s10163_s27 = scalar_lea.hbm %s14426_s2, 512 }
 0x7f2   : > { %p10160_p6 = scmp.ne.s32.totalorder %s10158_s6, %s10159_s7  ;;  %p10164_p10 = scmp.lt.s32.totalorder %s10158_s6, %s14426_s2 }
 0x7f3   : > { %p10165_p11 = scmp.lt.s32.totalorder %s10163_s27, %s10159_s7 }
 0x7f4   : > { %p10161_p7 = pnand %p10160_p6, %p10291_p4 }
 0x7f5   : > { %p10166_p12 = por %p10165_p11, %p10164_p10 }
 0x7f6   : > { %p10162_p9 = pneg %p10161_p7 }
 0x7f8   : > { %p10167_p13 = pnand %p10166_p12, %p10162_p9 }
 0x7fa   : > { %10170 = shalt.err (!%p10167_p13)
}
 0x7fb   : > { %s10230_s11 = smov 128  }
 0x7fc   : > { %9986 = dma.vmem_to_hbm [thread:$0]  (%p10291_p4), %s14364_s9, 4096, %s14368_s10, %s8176_s5, %s10230_s11, %s10230_s11, %s10227_s28  }
 0x7fd PF: > { %p9997_p0 = scmp.ge.s32.totalorder %s10225_s17, 2  ;;  %s8227_s19 = sand.u32 1, %s10205_s12  }
 0x7fe   : > { %s8228_s15 = scalar_lea.sflag [#allocation3], %s8227_s19 }
 0x7ff   : > { %p9991_p1 = pnand %p9997_p0, %p10298_p8 }
 0x801   : > { %p9992_p2 = pneg %p9991_p1 }
 0x803   : > { %10196 = dma.done.wait (%p9992_p2), %s8228_s15, 4096  }
 0x804   : > { %10198 = vsyncadd (%p9992_p2), %s8228_s15, 4294963200  ;;  %s8238_s8 = scalar_lea.sflag [#allocation5], %s8227_s19 }
 0x805   : > { %10200 = dma.done.wait (%p9992_p2), %s8238_s8, 32  }
 0x806   : > { %10202 = vsyncadd (%p9992_p2), %s8238_s8, 4294967264  ;;  %s20_s17 = sadd.s32 1, %s10225_s17   ;;  %s14935_s12 = smov %s10209_s13 }
 0x807   : > { %p17_p3 = scmp.ge.s32.totalorder %s20_s17, 4   ;;  %s14936_s13 = smov %s10213_s14 }
 0x808   : > { %s14937_s14 = smov %s10304_s25  ;;  %s14938_s15 = smov %s10221_s16 }
 0x809   : > { %s14939_s16 = smov %s14941_s20  ;;  %19 = sbr.rel (!%p17_p3) target bundleno = 6 (0x6), region = 117 }
 0x80e   :  { %8244 = vsyncpa [#allocation3], 1 }
 0x80f   :  { %8246 = vsyncpa [#allocation3 + $0x1], 1 }
 0x810   :  { %8247 = vsyncpa [#allocation5], 1 }
 0x811   :  { %8249 = vsyncpa [#allocation5 + $0x1], 1 }

</bundles_post_ra>
